<compile_context>
chip_gen: v7x
topology: tpu7x:2x2x1
jax: 0.10.0
libtpu: 0.0.40
codegen_flags: <defaults>
</compile_context>

<pallas_src>
import functools

import jax
import jax.numpy as jnp
import numpy as np
from jax.experimental import pallas as pl
from jax.experimental.pallas import tpu as pltpu  # noqa: F401  (TPU backend assumed)


def _layer_norm(y, gamma, beta, eps):
    mu = jnp.mean(y, axis=-1, keepdims=True)
    var = jnp.mean((y - mu) ** 2, axis=-1, keepdims=True)
    return (y - mu) * jax.lax.rsqrt(var + eps) * gamma + beta


# -----------------------------------------------------------------------------
# Fused STMHA kernel (single grid step, everything resident in VMEM).
# x_ref rows are in the original '(bs no) sl' = (b, n, s) order, flattened to 2D.
# out_ref rows are in '(bs sl) no' = (b, s, n) order (un-permuted by the wrapper).
# -----------------------------------------------------------------------------
def _stmha_kernel(x_ref, wqkv_ref, bqkv_ref, wout_ref, vecs_ref,
                  fw1_ref, fb1_ref, fw2_ref,
                  out_ref, tattn_ref, sattn_ref,
                  *, bs, no, sl, n_heads):
    D = x_ref.shape[-1]
    H = n_heads
    dk = D // H
    scale = 1.0 / np.sqrt(dk)          # folded into q once (not per-head on (L,L))

    x = x_ref[...]                      # (bs*no*sl, D), row order (b, n, s)
    bqkv = bqkv_ref[...]                # (2, 3D)  [time | social] fused QKV biases
    vecs = vecs_ref[...]                # (9, D)
    tbo, tg, tb = vecs[0:1], vecs[1:2], vecs[2:3]
    sbo, sg, sb = vecs[3:4], vecs[4:5], vecs[5:6]
    fb2, fg, fb = vecs[6:7], vecs[7:8], vecs[8:9]

    # ---------------- time attention: sequences over s, batch (b, n) ----------------
    B_t = bs * no
    qkv = jnp.dot(x, wqkv_ref[0], preferred_element_type=jnp.float32) + bqkv[0:1]
    q3 = (qkv[:, 0:D] * scale).reshape(B_t, sl, D)
    k3 = qkv[:, D:2 * D].reshape(B_t, sl, D)
    v3 = qkv[:, 2 * D:3 * D].reshape(B_t, sl, D)

    t_heads = []
    for h in range(H):                  # static unroll over heads, batched over B_t
        lo = h * dk
        qh, kh, vh = q3[:, :, lo:lo + dk], k3[:, :, lo:lo + dk], v3[:, :, lo:lo + dk]
        s = jnp.einsum('bld,btd->blt', qh, kh, preferred_element_type=jnp.float32)
        s = s - jnp.max(s, axis=-1, keepdims=True)
        p = jnp.exp(s)
        p = p / jnp.sum(p, axis=-1, keepdims=True)       # exact softmax (correctness)
        tattn_ref[h] = p                                  # (B_t, sl, sl)
        t_heads.append(jnp.einsum('blt,btd->bld', p, vh,
                                  preferred_element_type=jnp.float32))
    o = jnp.concatenate(t_heads, axis=-1).reshape(B_t * sl, D)   # 'h b l v -> b l (h v)'
    o = jnp.dot(o, wout_ref[0], preferred_element_type=jnp.float32) + tbo
    y1 = _layer_norm(o + x, tg, tb, 1e-5)                 # (bs*no*sl, D), (b, n, s)

    # -------- single row permutation (b, n, s) -> (b, s, n), sublane slices + concat --
    y4 = y1.reshape(bs, no, sl, D)
    pieces = [y4[:, :, s, :][:, None, :, :] for s in range(sl)]   # each (bs, 1, no, D)
    y1p = jnp.concatenate(pieces, axis=1).reshape(bs * sl * no, D)

    # ---------------- social attention: sequences over n, batch (b, s) ----------------
    R = bs * sl
    qkv2 = jnp.dot(y1p, wqkv_ref[1], preferred_element_type=jnp.float32) + bqkv[1:2]
    q2 = (qkv2[:, 0:D] * scale).reshape(R, no, D)
    k2 = qkv2[:, D:2 * D].reshape(R, no, D)
    v2 = qkv2[:, 2 * D:3 * D].reshape(R, no, D)

    s_heads = []
    for h in range(H):                  # batched dot_generals replace 64 lane-reduces
        lo = h * dk
        qh, kh, vh = q2[:, :, lo:lo + dk], k2[:, :, lo:lo + dk], v2[:, :, lo:lo + dk]
        s = jnp.einsum('rnd,rmd->rnm', qh, kh, preferred_element_type=jnp.float32)
        s = s - jnp.max(s, axis=-1, keepdims=True)
        p = jnp.exp(s)
        p = p / jnp.sum(p, axis=-1, keepdims=True)        # exact softmax
        sattn_ref[h] = p                                   # (R, no, no)
        s_heads.append(jnp.einsum('rnm,rmd->rnd', p, vh,
                                  preferred_element_type=jnp.float32))
    o2 = jnp.concatenate(s_heads, axis=-1).reshape(R * no, D)
    o2 = jnp.dot(o2, wout_ref[1], preferred_element_type=jnp.float32) + sbo
    y2 = _layer_norm(o2 + y1p, sg, sb, 1e-5)               # rows still (b, s, n)

    # ---------------- FFN (row-wise; stays in (b, s, n) order) ------------------------
    h1 = jnp.maximum(
        jnp.dot(y2, fw1_ref[...], preferred_element_type=jnp.float32) + fb1_ref[...], 0.0)
    y3 = jnp.dot(h1, fw2_ref[...], preferred_element_type=jnp.float32) + fb2
    out_ref[...] = _layer_norm(y3 + y2, fg, fb, 1e-6)


# -----------------------------------------------------------------------------
# Wrapper
# -----------------------------------------------------------------------------
def _fold_double_projection(w, b):
    """lin(lin(x)) == x @ (W @ W) + (b @ W + b) for pre-transposed W of shape (in, out)."""
    return jnp.dot(w, w), jnp.dot(b, w) + b


def stmha_forward(x, batch_size, time_params, soc_params, ffn_params, n_heads):
    B, L, D = x.shape            # B = bs*no, L = sl, D = hs
    bs = batch_size
    no = B // bs
    sl = L
    H = n_heads

    twq, tbq, twk, tbk, twv, tbv, two, tbo, tg, tb = time_params
    swq, sbq, swk, sbk, swv, sbv, swo, sbo, sg, sb = soc_params
    fw1, fb1, fw2, fb2, fg, fb = ffn_params
    d_ffn = fw1.shape[1]

    # Fold the double Wq/Wk/Wv application and fuse Q|K|V along the output dim.
    def fold_and_fuse(wq, bq, wk, bk, wv, bv):
        wq, bq = _fold_double_projection(wq, bq)
        wk, bk = _fold_double_projection(wk, bk)
        wv, bv = _fold_double_projection(wv, bv)
        return (jnp.concatenate([wq, wk, wv], axis=1),     # (D, 3D)
                jnp.concatenate([bq, bk, bv], axis=1))     # (1, 3D)

    wqkv_t, bqkv_t = fold_and_fuse(twq, tbq, twk, tbk, twv, tbv)
    wqkv_s, bqkv_s = fold_and_fuse(swq, sbq, swk, sbk, swv, sbv)

    # Pack the many small parameters into a few slabs -> few input DMAs.
    w_qkv = jnp.stack([wqkv_t, wqkv_s], axis=0)            # (2, D, 3D)
    b_qkv = jnp.concatenate([bqkv_t, bqkv_s], axis=0)      # (2, 3D)
    w_out = jnp.stack([two, swo], axis=0)                  # (2, D, D)
    vecs = jnp.concatenate([tbo, tg, tb, sbo, sg, sb, fb2, fg, fb], axis=0)  # (9, D)

    xf = x.reshape(B * L, D)

    full = lambda shp: pl.BlockSpec(shp, lambda: (0,) * len(shp))
    kernel = functools.partial(_stmha_kernel, bs=bs, no=no, sl=sl, n_heads=H)

    out_flat, time_attn, soc_attn = pl.pallas_call(
        kernel,
        out_shape=(
            jax.ShapeDtypeStruct((bs * sl * no, D), jnp.float32),
            jax.ShapeDtypeStruct((H, B, L, L), jnp.float32),
            jax.ShapeDtypeStruct((H, bs * sl, no, no), jnp.float32),
        ),
        in_specs=[
            full((B * L, D)),
            full((2, D, 3 * D)), full((2, 3 * D)),
            full((2, D, D)), full((9, D)),
            full((D, d_ffn)), full((1, d_ffn)), full((d_ffn, D)),
        ],
        out_specs=(
            full((bs * sl * no, D)),
            full((H, B, L, L)),
            full((H, bs * sl, no, no)),
        ),
    )(xf, w_qkv, b_qkv, w_out, vecs, fw1, fb1, fw2)

    # Kernel output rows are in (b, s, n) order; invert the rearrange outside the kernel.
    out = (out_flat.reshape(bs, sl, no, D)
           .transpose(0, 2, 1, 3)
           .reshape(bs * no, sl, D))
    return out, time_attn, soc_attn


# -----------------------------------------------------------------------------
# Pure-JAX reference (mirrors PyTorch exactly, incl. the double projection).
# -----------------------------------------------------------------------------
def _mha_ref(x, params, n_heads, eps=1e-5):
    wq, bq, wk, bk, wv, bv, wo, bo, g, b = params
    B, L, D = x.shape
    H = n_heads
    dk = D // H
    lin = lambda a, w, bias: jnp.dot(a, w) + bias
    q = lin(lin(x, wq, bq), wq, bq)
    k = lin(lin(x, wk, bk), wk, bk)
    v = lin(lin(x, wv, bv), wv, bv)
    split = lambda t: jnp.transpose(t.reshape(B, L, H, dk), (2, 0, 1, 3))
    qh, kh, vh = split(q), split(k), split(v)
    attn = jnp.einsum('hblk,hbtk->hblt', qh, kh) / np.sqrt(dk)
    attn = jax.nn.softmax(attn, axis=3)
    o = jnp.einsum('hblt,hbtv->hblv', attn, vh)
    o = jnp.transpose(o, (1, 2, 0, 3)).reshape(B, L, D)
    o = jnp.dot(o, wo) + bo + x
    mu = o.mean(-1, keepdims=True)
    var = ((o - mu) ** 2).mean(-1, keepdims=True)
    return (o - mu) * jax.lax.rsqrt(var + eps) * g + b, attn


def _ffn_ref(x, params, eps=1e-6):
    w1, b1, w2, b2, g, b = params
    h = jax.nn.relu(jnp.dot(x, w1) + b1)
    y = jnp.dot(h, w2) + b2 + x
    mu = y.mean(-1, keepdims=True)
    var = ((y - mu) ** 2).mean(-1, keepdims=True)
    return (y - mu) * jax.lax.rsqrt(var + eps) * g + b


def stmha_ref(x, batch_size, time_params, soc_params, ffn_params, n_heads):
    B, L, D = x.shape
    bs, no, sl = batch_size, B // batch_size, L
    out, t_attn = _mha_ref(x, time_params, n_heads)
    out = out.reshape(bs, no, sl, D).transpose(0, 2, 1, 3).reshape(bs * sl, no, D)
    out, s_attn = _mha_ref(out, soc_params, n_heads)
    out = out.reshape(bs, sl, no, D).transpose(0, 2, 1, 3).reshape(bs * no, sl, D)
    return _ffn_ref(out, ffn_params), t_attn, s_attn


# -----------------------------------------------------------------------------
# Deterministic parameter init (mirrors the PyTorch __init__ distributions).
# Linear weights are stored pre-transposed: (in_features, out_features).
# -----------------------------------------------------------------------------
def init_mha_params(key, d_model, n_heads):
    ks = jax.random.split(key, 8)
    dq = d_model / n_heads
    std_qkv = np.sqrt(2.0 / (d_model + dq))
    std_xav = np.sqrt(2.0 / (d_model + d_model))
    bound = 1.0 / np.sqrt(d_model)

    def w_normal(k, std):
        return (std * jax.random.normal(k, (d_model, d_model))).T.astype(jnp.float32)

    def bias(k):
        return jax.random.uniform(k, (1, d_model), minval=-bound, maxval=bound).astype(jnp.float32)

    wq, wk, wv = w_normal(ks[0], std_qkv), w_normal(ks[1], std_qkv), w_normal(ks[2], std_qkv)
    wo = w_normal(ks[3], std_xav)
    bq, bk, bv, bo = bias(ks[4]), bias(ks[5]), bias(ks[6]), bias(ks[7])
    gamma = jnp.ones((1, d_model), jnp.float32)
    beta = jnp.zeros((1, d_model), jnp.float32)
    return (wq, bq, wk, bk, wv, bv, wo, bo, gamma, beta)


def init_ffn_params(key, d_model, d_ffn):
    ks = jax.random.split(key, 4)
    b1 = 1.0 / np.sqrt(d_model)
    b2 = 1.0 / np.sqrt(d_ffn)
    w1 = jax.random.uniform(ks[0], (d_ffn, d_model), minval=-b1, maxval=b1).T.astype(jnp.float32)
    bb1 = jax.random.uniform(ks[1], (1, d_ffn), minval=-b1, maxval=b1).astype(jnp.float32)
    w2 = jax.random.uniform(ks[2], (d_model, d_ffn), minval=-b2, maxval=b2).T.astype(jnp.float32)
    bb2 = jax.random.uniform(ks[3], (1, d_model), minval=-b2, maxval=b2).astype(jnp.float32)
    gamma = jnp.ones((1, d_model), jnp.float32)
    beta = jnp.zeros((1, d_model), jnp.float32)
    return (w1, bb1, w2, bb2, gamma, beta)


if __name__ == "__main__":
    d_model, d_ffn, n_heads = 32, 64, 4
    bs, no, sl = 2, 4, 8          # input is (bs*no, sl, d_model) = (8, 8, 32)

    key = jax.random.PRNGKey(0)
    k_in, k_t, k_s, k_f = jax.random.split(key, 4)

    x = jax.random.normal(k_in, (bs * no, sl, d_model), dtype=jnp.float32)
    time_params = init_mha_params(k_t, d_model, n_heads)
    soc_params = init_mha_params(k_s, d_model, n_heads)
    ffn_params = init_ffn_params(k_f, d_model, d_ffn)

    fwd = jax.jit(functools.partial(stmha_forward, n_heads=n_heads),
                  static_argnames=("batch_size",))
    out, time_attn, soc_attn = fwd(x, batch_size=bs,
                                   time_params=time_params,
                                   soc_params=soc_params,
                                   ffn_params=ffn_params)
    jax.block_until_ready((out, time_attn, soc_attn))

    assert out.shape == (bs * no, sl, d_model)
    assert time_attn.shape == (n_heads, bs * no, sl, sl)
    assert soc_attn.shape == (n_heads, bs * sl, no, no)
    assert bool(jnp.all(jnp.isfinite(out)))

    # correctness vs. pure-JAX reference (folded weights + fused QKV -> tiny FP deltas)
    ref_out, ref_t, ref_s = stmha_ref(x, bs, time_params, soc_params, ffn_params, n_heads)
    np.testing.assert_allclose(np.asarray(out), np.asarray(ref_out), rtol=2e-3, atol=2e-3)
    np.testing.assert_allclose(np.asarray(time_attn), np.asarray(ref_t), rtol=2e-3, atol=2e-3)
    np.testing.assert_allclose(np.asarray(soc_attn), np.asarray(ref_s), rtol=2e-3, atol=2e-3)

    print("KERNEL_OK")
</pallas_src>

<mosaic_0001>
module attributes {stable_mosaic.version = 11 : i64} {
  func.func @_stmha_kernel(%arg0: memref<64x32xf32, #tpu.memory_space<vmem>>, %arg1: memref<2x32x96xf32, #tpu.memory_space<vmem>>, %arg2: memref<2x96xf32, #tpu.memory_space<vmem>>, %arg3: memref<2x32x32xf32, #tpu.memory_space<vmem>>, %arg4: memref<9x32xf32, #tpu.memory_space<vmem>>, %arg5: memref<32x64xf32, #tpu.memory_space<vmem>>, %arg6: memref<1x64xf32, #tpu.memory_space<vmem>>, %arg7: memref<64x32xf32, #tpu.memory_space<vmem>>, %arg8: memref<64x32xf32, #tpu.memory_space<vmem>>, %arg9: memref<4x8x8x8xf32, #tpu.memory_space<vmem>>, %arg10: memref<4x16x4x4xf32, #tpu.memory_space<vmem>>) attributes {dimension_semantics = [], scalar_prefetch = 0 : i64, scratch_operands = 0 : i64, tpu.core_type = #tpu.core_type<tc>} {
    %c0 = arith.constant 0 : index
    %c0_0 = arith.constant 0 : index
    %0 = vector.load %arg0[%c0, %c0_0] : memref<64x32xf32, #tpu.memory_space<vmem>>, vector<64x32xf32>
    %c0_1 = arith.constant 0 : index
    %c0_2 = arith.constant 0 : index
    %1 = vector.load %arg2[%c0_1, %c0_2] : memref<2x96xf32, #tpu.memory_space<vmem>>, vector<2x96xf32>
    %c0_3 = arith.constant 0 : index
    %c0_4 = arith.constant 0 : index
    %2 = vector.load %arg4[%c0_3, %c0_4] : memref<9x32xf32, #tpu.memory_space<vmem>>, vector<9x32xf32>
    %3 = vector.extract_strided_slice %2 {offsets = [0, 0], sizes = [1, 32], strides = [1, 1]} : vector<9x32xf32> to vector<1x32xf32>
    %4 = vector.extract_strided_slice %2 {offsets = [1, 0], sizes = [1, 32], strides = [1, 1]} : vector<9x32xf32> to vector<1x32xf32>
    %5 = vector.extract_strided_slice %2 {offsets = [2, 0], sizes = [1, 32], strides = [1, 1]} : vector<9x32xf32> to vector<1x32xf32>
    %6 = vector.extract_strided_slice %2 {offsets = [3, 0], sizes = [1, 32], strides = [1, 1]} : vector<9x32xf32> to vector<1x32xf32>
    %7 = vector.extract_strided_slice %2 {offsets = [4, 0], sizes = [1, 32], strides = [1, 1]} : vector<9x32xf32> to vector<1x32xf32>
    %8 = vector.extract_strided_slice %2 {offsets = [5, 0], sizes = [1, 32], strides = [1, 1]} : vector<9x32xf32> to vector<1x32xf32>
    %9 = vector.extract_strided_slice %2 {offsets = [6, 0], sizes = [1, 32], strides = [1, 1]} : vector<9x32xf32> to vector<1x32xf32>
    %10 = vector.extract_strided_slice %2 {offsets = [7, 0], sizes = [1, 32], strides = [1, 1]} : vector<9x32xf32> to vector<1x32xf32>
    %11 = vector.extract_strided_slice %2 {offsets = [8, 0], sizes = [1, 32], strides = [1, 1]} : vector<9x32xf32> to vector<1x32xf32>
    %c0_5 = arith.constant 0 : index
    %c0_6 = arith.constant 0 : index
    %c0_7 = arith.constant 0 : index
    %12 = vector.load %arg1[%c0_5, %c0_6, %c0_7] : memref<2x32x96xf32, #tpu.memory_space<vmem>>, vector<1x32x96xf32>
    %13 = vector.shape_cast %12 : vector<1x32x96xf32> to vector<32x96xf32>
    %cst = arith.constant dense<0.000000e+00> : vector<64x96xf32>
    %14 = tpu.matmul %0, %13, %cst {dimension_numbers = #tpu.dot_dimension_numbers<[1], [0], [0], [1], [0, 0, 1, 1], [], []>} : vector<64x32xf32>, vector<32x96xf32>, vector<64x96xf32> -> vector<64x96xf32>
    %15 = vector.extract_strided_slice %1 {offsets = [0, 0], sizes = [1, 96], strides = [1, 1]} : vector<2x96xf32> to vector<1x96xf32>
    %16 = vector.broadcast %15 : vector<1x96xf32> to vector<64x96xf32>
    %17 = arith.addf %14, %16 : vector<64x96xf32>
    %18 = vector.extract_strided_slice %17 {offsets = [0, 0], sizes = [64, 32], strides = [1, 1]} : vector<64x96xf32> to vector<64x32xf32>
    %cst_8 = arith.constant 0.353553385 : f32
    %19 = vector.broadcast %cst_8 : f32 to vector<64x32xf32>
    %20 = arith.mulf %18, %19 : vector<64x32xf32>
    %21 = vector.shape_cast %20 : vector<64x32xf32> to vector<8x8x32xf32>
    %22 = vector.extract_strided_slice %17 {offsets = [0, 32], sizes = [64, 32], strides = [1, 1]} : vector<64x96xf32> to vector<64x32xf32>
    %23 = vector.shape_cast %22 : vector<64x32xf32> to vector<8x8x32xf32>
    %24 = vector.extract_strided_slice %17 {offsets = [0, 64], sizes = [64, 32], strides = [1, 1]} : vector<64x96xf32> to vector<64x32xf32>
    %25 = vector.shape_cast %24 : vector<64x32xf32> to vector<8x8x32xf32>
    %26 = vector.extract_strided_slice %21 {offsets = [0, 0, 0], sizes = [8, 8, 8], strides = [1, 1, 1]} : vector<8x8x32xf32> to vector<8x8x8xf32>
    %27 = vector.extract_strided_slice %23 {offsets = [0, 0, 0], sizes = [8, 8, 8], strides = [1, 1, 1]} : vector<8x8x32xf32> to vector<8x8x8xf32>
    %28 = vector.extract_strided_slice %25 {offsets = [0, 0, 0], sizes = [8, 8, 8], strides = [1, 1, 1]} : vector<8x8x32xf32> to vector<8x8x8xf32>
    "tpu.trace_start"() <{level = 10 : i32, message = "bld,btd->blt"}> : () -> ()
    %cst_9 = arith.constant dense<0.000000e+00> : vector<8x8x8xf32>
    %29 = tpu.matmul %26, %27, %cst_9 {dimension_numbers = #tpu.dot_dimension_numbers<[2], [2], [1], [1], [0, 0, 0, 1, 1, 1], [0], [0]>} : vector<8x8x8xf32>, vector<8x8x8xf32>, vector<8x8x8xf32> -> vector<8x8x8xf32>
    "tpu.trace_stop"() : () -> ()
    %cst_10 = arith.constant dense<0xFF800000> : vector<8x8xf32>
    %30 = vector.multi_reduction <maximumf>, %29, %cst_10 [2] : vector<8x8x8xf32> to vector<8x8xf32>
    %31 = vector.shape_cast %30 : vector<8x8xf32> to vector<8x8x1xf32>
    %32 = vector.broadcast %31 : vector<8x8x1xf32> to vector<8x8x8xf32>
    %33 = arith.subf %29, %32 : vector<8x8x8xf32>
    %34 = math.exp %33 : vector<8x8x8xf32>
    %cst_11 = arith.constant dense<0.000000e+00> : vector<8x8xf32>
    %35 = vector.multi_reduction <add>, %34, %cst_11 [2] : vector<8x8x8xf32> to vector<8x8xf32>
    %36 = vector.shape_cast %35 : vector<8x8xf32> to vector<8x8x1xf32>
    %37 = vector.broadcast %36 : vector<8x8x1xf32> to vector<8x8x8xf32>
    %38 = arith.divf %34, %37 : vector<8x8x8xf32>
    %c0_12 = arith.constant 0 : index
    %c0_13 = arith.constant 0 : index
    %c0_14 = arith.constant 0 : index
    %c0_15 = arith.constant 0 : index
    %39 = vector.load %arg9[%c0_12, %c0_13, %c0_14, %c0_15] : memref<4x8x8x8xf32, #tpu.memory_space<vmem>>, vector<1x8x8x8xf32>
    %40 = vector.shape_cast %39 : vector<1x8x8x8xf32> to vector<8x8x8xf32>
    %41 = vector.shape_cast %38 : vector<8x8x8xf32> to vector<1x8x8x8xf32>
    tpu.vector_store %arg9[%c0_12, %c0_13, %c0_14, %c0_15], %41 {strides = array<i32>} : memref<4x8x8x8xf32, #tpu.memory_space<vmem>>, vector<1x8x8x8xf32>,
    "tpu.trace_start"() <{level = 10 : i32, message = "blt,btd->bld"}> : () -> ()
    %cst_16 = arith.constant dense<0.000000e+00> : vector<8x8x8xf32>
    %42 = tpu.matmul %38, %28, %cst_16 {dimension_numbers = #tpu.dot_dimension_numbers<[2], [1], [1], [2], [0, 0, 0, 1, 1, 2], [0], [0]>} : vector<8x8x8xf32>, vector<8x8x8xf32>, vector<8x8x8xf32> -> vector<8x8x8xf32>
    "tpu.trace_stop"() : () -> ()
    %43 = vector.extract_strided_slice %21 {offsets = [0, 0, 8], sizes = [8, 8, 8], strides = [1, 1, 1]} : vector<8x8x32xf32> to vector<8x8x8xf32>
    %44 = vector.extract_strided_slice %23 {offsets = [0, 0, 8], sizes = [8, 8, 8], strides = [1, 1, 1]} : vector<8x8x32xf32> to vector<8x8x8xf32>
    %45 = vector.extract_strided_slice %25 {offsets = [0, 0, 8], sizes = [8, 8, 8], strides = [1, 1, 1]} : vector<8x8x32xf32> to vector<8x8x8xf32>
    "tpu.trace_start"() <{level = 10 : i32, message = "bld,btd->blt"}> : () -> ()
    %cst_17 = arith.constant dense<0.000000e+00> : vector<8x8x8xf32>
    %46 = tpu.matmul %43, %44, %cst_17 {dimension_numbers = #tpu.dot_dimension_numbers<[2], [2], [1], [1], [0, 0, 0, 1, 1, 1], [0], [0]>} : vector<8x8x8xf32>, vector<8x8x8xf32>, vector<8x8x8xf32> -> vector<8x8x8xf32>
    "tpu.trace_stop"() : () -> ()
    %cst_18 = arith.constant dense<0xFF800000> : vector<8x8xf32>
    %47 = vector.multi_reduction <maximumf>, %46, %cst_18 [2] : vector<8x8x8xf32> to vector<8x8xf32>
    %48 = vector.shape_cast %47 : vector<8x8xf32> to vector<8x8x1xf32>
    %49 = vector.broadcast %48 : vector<8x8x1xf32> to vector<8x8x8xf32>
    %50 = arith.subf %46, %49 : vector<8x8x8xf32>
    %51 = math.exp %50 : vector<8x8x8xf32>
    %cst_19 = arith.constant dense<0.000000e+00> : vector<8x8xf32>
    %52 = vector.multi_reduction <add>, %51, %cst_19 [2] : vector<8x8x8xf32> to vector<8x8xf32>
    %53 = vector.shape_cast %52 : vector<8x8xf32> to vector<8x8x1xf32>
    %54 = vector.broadcast %53 : vector<8x8x1xf32> to vector<8x8x8xf32>
    %55 = arith.divf %51, %54 : vector<8x8x8xf32>
    %c1 = arith.constant 1 : index
    %c0_20 = arith.constant 0 : index
    %c0_21 = arith.constant 0 : index
    %c0_22 = arith.constant 0 : index
    %56 = vector.load %arg9[%c1, %c0_20, %c0_21, %c0_22] : memref<4x8x8x8xf32, #tpu.memory_space<vmem>>, vector<1x8x8x8xf32>
    %57 = vector.shape_cast %56 : vector<1x8x8x8xf32> to vector<8x8x8xf32>
    %58 = vector.shape_cast %55 : vector<8x8x8xf32> to vector<1x8x8x8xf32>
    tpu.vector_store %arg9[%c1, %c0_20, %c0_21, %c0_22], %58 {strides = array<i32>} : memref<4x8x8x8xf32, #tpu.memory_space<vmem>>, vector<1x8x8x8xf32>,
    "tpu.trace_start"() <{level = 10 : i32, message = "blt,btd->bld"}> : () -> ()
    %cst_23 = arith.constant dense<0.000000e+00> : vector<8x8x8xf32>
    %59 = tpu.matmul %55, %45, %cst_23 {dimension_numbers = #tpu.dot_dimension_numbers<[2], [1], [1], [2], [0, 0, 0, 1, 1, 2], [0], [0]>} : vector<8x8x8xf32>, vector<8x8x8xf32>, vector<8x8x8xf32> -> vector<8x8x8xf32>
    "tpu.trace_stop"() : () -> ()
    %60 = vector.extract_strided_slice %21 {offsets = [0, 0, 16], sizes = [8, 8, 8], strides = [1, 1, 1]} : vector<8x8x32xf32> to vector<8x8x8xf32>
    %61 = vector.extract_strided_slice %23 {offsets = [0, 0, 16], sizes = [8, 8, 8], strides = [1, 1, 1]} : vector<8x8x32xf32> to vector<8x8x8xf32>
    %62 = vector.extract_strided_slice %25 {offsets = [0, 0, 16], sizes = [8, 8, 8], strides = [1, 1, 1]} : vector<8x8x32xf32> to vector<8x8x8xf32>
    "tpu.trace_start"() <{level = 10 : i32, message = "bld,btd->blt"}> : () -> ()
    %cst_24 = arith.constant dense<0.000000e+00> : vector<8x8x8xf32>
    %63 = tpu.matmul %60, %61, %cst_24 {dimension_numbers = #tpu.dot_dimension_numbers<[2], [2], [1], [1], [0, 0, 0, 1, 1, 1], [0], [0]>} : vector<8x8x8xf32>, vector<8x8x8xf32>, vector<8x8x8xf32> -> vector<8x8x8xf32>
    "tpu.trace_stop"() : () -> ()
    %cst_25 = arith.constant dense<0xFF800000> : vector<8x8xf32>
    %64 = vector.multi_reduction <maximumf>, %63, %cst_25 [2] : vector<8x8x8xf32> to vector<8x8xf32>
    %65 = vector.shape_cast %64 : vector<8x8xf32> to vector<8x8x1xf32>
    %66 = vector.broadcast %65 : vector<8x8x1xf32> to vector<8x8x8xf32>
    %67 = arith.subf %63, %66 : vector<8x8x8xf32>
    %68 = math.exp %67 : vector<8x8x8xf32>
    %cst_26 = arith.constant dense<0.000000e+00> : vector<8x8xf32>
    %69 = vector.multi_reduction <add>, %68, %cst_26 [2] : vector<8x8x8xf32> to vector<8x8xf32>
    %70 = vector.shape_cast %69 : vector<8x8xf32> to vector<8x8x1xf32>
    %71 = vector.broadcast %70 : vector<8x8x1xf32> to vector<8x8x8xf32>
    %72 = arith.divf %68, %71 : vector<8x8x8xf32>
    %c2 = arith.constant 2 : index
    %c0_27 = arith.constant 0 : index
    %c0_28 = arith.constant 0 : index
    %c0_29 = arith.constant 0 : index
    %73 = vector.load %arg9[%c2, %c0_27, %c0_28, %c0_29] : memref<4x8x8x8xf32, #tpu.memory_space<vmem>>, vector<1x8x8x8xf32>
    %74 = vector.shape_cast %73 : vector<1x8x8x8xf32> to vector<8x8x8xf32>
    %75 = vector.shape_cast %72 : vector<8x8x8xf32> to vector<1x8x8x8xf32>
    tpu.vector_store %arg9[%c2, %c0_27, %c0_28, %c0_29], %75 {strides = array<i32>} : memref<4x8x8x8xf32, #tpu.memory_space<vmem>>, vector<1x8x8x8xf32>,
    "tpu.trace_start"() <{level = 10 : i32, message = "blt,btd->bld"}> : () -> ()
    %cst_30 = arith.constant dense<0.000000e+00> : vector<8x8x8xf32>
    %76 = tpu.matmul %72, %62, %cst_30 {dimension_numbers = #tpu.dot_dimension_numbers<[2], [1], [1], [2], [0, 0, 0, 1, 1, 2], [0], [0]>} : vector<8x8x8xf32>, vector<8x8x8xf32>, vector<8x8x8xf32> -> vector<8x8x8xf32>
    "tpu.trace_stop"() : () -> ()
    %77 = vector.extract_strided_slice %21 {offsets = [0, 0, 24], sizes = [8, 8, 8], strides = [1, 1, 1]} : vector<8x8x32xf32> to vector<8x8x8xf32>
    %78 = vector.extract_strided_slice %23 {offsets = [0, 0, 24], sizes = [8, 8, 8], strides = [1, 1, 1]} : vector<8x8x32xf32> to vector<8x8x8xf32>
    %79 = vector.extract_strided_slice %25 {offsets = [0, 0, 24], sizes = [8, 8, 8], strides = [1, 1, 1]} : vector<8x8x32xf32> to vector<8x8x8xf32>
    "tpu.trace_start"() <{level = 10 : i32, message = "bld,btd->blt"}> : () -> ()
    %cst_31 = arith.constant dense<0.000000e+00> : vector<8x8x8xf32>
    %80 = tpu.matmul %77, %78, %cst_31 {dimension_numbers = #tpu.dot_dimension_numbers<[2], [2], [1], [1], [0, 0, 0, 1, 1, 1], [0], [0]>} : vector<8x8x8xf32>, vector<8x8x8xf32>, vector<8x8x8xf32> -> vector<8x8x8xf32>
    "tpu.trace_stop"() : () -> ()
    %cst_32 = arith.constant dense<0xFF800000> : vector<8x8xf32>
    %81 = vector.multi_reduction <maximumf>, %80, %cst_32 [2] : vector<8x8x8xf32> to vector<8x8xf32>
    %82 = vector.shape_cast %81 : vector<8x8xf32> to vector<8x8x1xf32>
    %83 = vector.broadcast %82 : vector<8x8x1xf32> to vector<8x8x8xf32>
    %84 = arith.subf %80, %83 : vector<8x8x8xf32>
    %85 = math.exp %84 : vector<8x8x8xf32>
    %cst_33 = arith.constant dense<0.000000e+00> : vector<8x8xf32>
    %86 = vector.multi_reduction <add>, %85, %cst_33 [2] : vector<8x8x8xf32> to vector<8x8xf32>
    %87 = vector.shape_cast %86 : vector<8x8xf32> to vector<8x8x1xf32>
    %88 = vector.broadcast %87 : vector<8x8x1xf32> to vector<8x8x8xf32>
    %89 = arith.divf %85, %88 : vector<8x8x8xf32>
    %c3 = arith.constant 3 : index
    %c0_34 = arith.constant 0 : index
    %c0_35 = arith.constant 0 : index
    %c0_36 = arith.constant 0 : index
    %90 = vector.load %arg9[%c3, %c0_34, %c0_35, %c0_36] : memref<4x8x8x8xf32, #tpu.memory_space<vmem>>, vector<1x8x8x8xf32>
    %91 = vector.shape_cast %90 : vector<1x8x8x8xf32> to vector<8x8x8xf32>
    %92 = vector.shape_cast %89 : vector<8x8x8xf32> to vector<1x8x8x8xf32>
    tpu.vector_store %arg9[%c3, %c0_34, %c0_35, %c0_36], %92 {strides = array<i32>} : memref<4x8x8x8xf32, #tpu.memory_space<vmem>>, vector<1x8x8x8xf32>,
    "tpu.trace_start"() <{level = 10 : i32, message = "blt,btd->bld"}> : () -> ()
    %cst_37 = arith.constant dense<0.000000e+00> : vector<8x8x8xf32>
    %93 = tpu.matmul %89, %79, %cst_37 {dimension_numbers = #tpu.dot_dimension_numbers<[2], [1], [1], [2], [0, 0, 0, 1, 1, 2], [0], [0]>} : vector<8x8x8xf32>, vector<8x8x8xf32>, vector<8x8x8xf32> -> vector<8x8x8xf32>
    "tpu.trace_stop"() : () -> ()
    %94 = tpu.concatenate %42, %59, %76, %93 in 2 : vector<8x8x8xf32>, vector<8x8x8xf32>, vector<8x8x8xf32>, vector<8x8x8xf32> -> vector<8x8x32xf32>
    %95 = vector.shape_cast %94 : vector<8x8x32xf32> to vector<64x32xf32>
    %c0_38 = arith.constant 0 : index
    %c0_39 = arith.constant 0 : index
    %c0_40 = arith.constant 0 : index
    %96 = vector.load %arg3[%c0_38, %c0_39, %c0_40] : memref<2x32x32xf32, #tpu.memory_space<vmem>>, vector<1x32x32xf32>
    %97 = vector.shape_cast %96 : vector<1x32x32xf32> to vector<32x32xf32>
    %cst_41 = arith.constant dense<0.000000e+00> : vector<64x32xf32>
    %98 = tpu.matmul %95, %97, %cst_41 {dimension_numbers = #tpu.dot_dimension_numbers<[1], [0], [0], [1], [0, 0, 1, 1], [], []>} : vector<64x32xf32>, vector<32x32xf32>, vector<64x32xf32> -> vector<64x32xf32>
    %99 = vector.broadcast %3 : vector<1x32xf32> to vector<64x32xf32>
    %100 = arith.addf %98, %99 : vector<64x32xf32>
    %101 = arith.addf %100, %0 : vector<64x32xf32>
    %cst_42 = arith.constant dense<0.000000e+00> : vector<64xf32>
    %102 = vector.multi_reduction <add>, %101, %cst_42 [1] : vector<64x32xf32> to vector<64xf32>
    %103 = vector.shape_cast %102 : vector<64xf32> to vector<64x1xf32>
    %cst_43 = arith.constant 3.200000e+01 : f32
    %104 = vector.broadcast %cst_43 : f32 to vector<64x1xf32>
    %105 = arith.divf %103, %104 : vector<64x1xf32>
    %106 = vector.broadcast %105 : vector<64x1xf32> to vector<64x32xf32>
    %107 = arith.subf %101, %106 : vector<64x32xf32>
    %108 = arith.mulf %107, %107 : vector<64x32xf32>
    %cst_44 = arith.constant dense<0.000000e+00> : vector<64xf32>
    %109 = vector.multi_reduction <add>, %108, %cst_44 [1] : vector<64x32xf32> to vector<64xf32>
    %110 = vector.shape_cast %109 : vector<64xf32> to vector<64x1xf32>
    %cst_45 = arith.constant 3.200000e+01 : f32
    %111 = vector.broadcast %cst_45 : f32 to vector<64x1xf32>
    %112 = arith.divf %110, %111 : vector<64x1xf32>
    %113 = vector.broadcast %105 : vector<64x1xf32> to vector<64x32xf32>
    %114 = arith.subf %101, %113 : vector<64x32xf32>
    %cst_46 = arith.constant 9.99999974E-6 : f32
    %115 = vector.broadcast %cst_46 : f32 to vector<64x1xf32>
    %116 = arith.addf %112, %115 : vector<64x1xf32>
    %117 = math.rsqrt %116 : vector<64x1xf32>
    %118 = vector.broadcast %117 : vector<64x1xf32> to vector<64x32xf32>
    %119 = arith.mulf %114, %118 : vector<64x32xf32>
    %120 = vector.broadcast %4 : vector<1x32xf32> to vector<64x32xf32>
    %121 = arith.mulf %119, %120 : vector<64x32xf32>
    %122 = vector.broadcast %5 : vector<1x32xf32> to vector<64x32xf32>
    %123 = arith.addf %121, %122 : vector<64x32xf32>
    %124 = vector.shape_cast %123 : vector<64x32xf32> to vector<2x4x8x32xf32>
    %125 = vector.extract_strided_slice %124 {offsets = [0, 0, 0, 0], sizes = [2, 4, 1, 32], strides = [1, 1, 1, 1]} : vector<2x4x8x32xf32> to vector<2x4x1x32xf32>
    %126 = vector.shape_cast %125 : vector<2x4x1x32xf32> to vector<2x4x32xf32>
    %127 = vector.shape_cast %126 : vector<2x4x32xf32> to vector<2x1x4x32xf32>
    %128 = vector.extract_strided_slice %124 {offsets = [0, 0, 1, 0], sizes = [2, 4, 1, 32], strides = [1, 1, 1, 1]} : vector<2x4x8x32xf32> to vector<2x4x1x32xf32>
    %129 = vector.shape_cast %128 : vector<2x4x1x32xf32> to vector<2x4x32xf32>
    %130 = vector.shape_cast %129 : vector<2x4x32xf32> to vector<2x1x4x32xf32>
    %131 = vector.extract_strided_slice %124 {offsets = [0, 0, 2, 0], sizes = [2, 4, 1, 32], strides = [1, 1, 1, 1]} : vector<2x4x8x32xf32> to vector<2x4x1x32xf32>
    %132 = vector.shape_cast %131 : vector<2x4x1x32xf32> to vector<2x4x32xf32>
    %133 = vector.shape_cast %132 : vector<2x4x32xf32> to vector<2x1x4x32xf32>
    %134 = vector.extract_strided_slice %124 {offsets = [0, 0, 3, 0], sizes = [2, 4, 1, 32], strides = [1, 1, 1, 1]} : vector<2x4x8x32xf32> to vector<2x4x1x32xf32>
    %135 = vector.shape_cast %134 : vector<2x4x1x32xf32> to vector<2x4x32xf32>
    %136 = vector.shape_cast %135 : vector<2x4x32xf32> to vector<2x1x4x32xf32>
    %137 = vector.extract_strided_slice %124 {offsets = [0, 0, 4, 0], sizes = [2, 4, 1, 32], strides = [1, 1, 1, 1]} : vector<2x4x8x32xf32> to vector<2x4x1x32xf32>
    %138 = vector.shape_cast %137 : vector<2x4x1x32xf32> to vector<2x4x32xf32>
    %139 = vector.shape_cast %138 : vector<2x4x32xf32> to vector<2x1x4x32xf32>
    %140 = vector.extract_strided_slice %124 {offsets = [0, 0, 5, 0], sizes = [2, 4, 1, 32], strides = [1, 1, 1, 1]} : vector<2x4x8x32xf32> to vector<2x4x1x32xf32>
    %141 = vector.shape_cast %140 : vector<2x4x1x32xf32> to vector<2x4x32xf32>
    %142 = vector.shape_cast %141 : vector<2x4x32xf32> to vector<2x1x4x32xf32>
    %143 = vector.extract_strided_slice %124 {offsets = [0, 0, 6, 0], sizes = [2, 4, 1, 32], strides = [1, 1, 1, 1]} : vector<2x4x8x32xf32> to vector<2x4x1x32xf32>
    %144 = vector.shape_cast %143 : vector<2x4x1x32xf32> to vector<2x4x32xf32>
    %145 = vector.shape_cast %144 : vector<2x4x32xf32> to vector<2x1x4x32xf32>
    %146 = vector.extract_strided_slice %124 {offsets = [0, 0, 7, 0], sizes = [2, 4, 1, 32], strides = [1, 1, 1, 1]} : vector<2x4x8x32xf32> to vector<2x4x1x32xf32>
    %147 = vector.shape_cast %146 : vector<2x4x1x32xf32> to vector<2x4x32xf32>
    %148 = vector.shape_cast %147 : vector<2x4x32xf32> to vector<2x1x4x32xf32>
    %149 = tpu.concatenate %127, %130, %133, %136, %139, %142, %145, %148 in 1 : vector<2x1x4x32xf32>, vector<2x1x4x32xf32>, vector<2x1x4x32xf32>, vector<2x1x4x32xf32>, vector<2x1x4x32xf32>, vector<2x1x4x32xf32>, vector<2x1x4x32xf32>, vector<2x1x4x32xf32> -> vector<2x8x4x32xf32>
    %150 = vector.shape_cast %149 : vector<2x8x4x32xf32> to vector<64x32xf32>
    %c1_47 = arith.constant 1 : index
    %c0_48 = arith.constant 0 : index
    %c0_49 = arith.constant 0 : index
    %151 = vector.load %arg1[%c1_47, %c0_48, %c0_49] : memref<2x32x96xf32, #tpu.memory_space<vmem>>, vector<1x32x96xf32>
    %152 = vector.shape_cast %151 : vector<1x32x96xf32> to vector<32x96xf32>
    %cst_50 = arith.constant dense<0.000000e+00> : vector<64x96xf32>
    %153 = tpu.matmul %150, %152, %cst_50 {dimension_numbers = #tpu.dot_dimension_numbers<[1], [0], [0], [1], [0, 0, 1, 1], [], []>} : vector<64x32xf32>, vector<32x96xf32>, vector<64x96xf32> -> vector<64x96xf32>
    %154 = vector.extract_strided_slice %1 {offsets = [1, 0], sizes = [1, 96], strides = [1, 1]} : vector<2x96xf32> to vector<1x96xf32>
    %155 = vector.broadcast %154 : vector<1x96xf32> to vector<64x96xf32>
    %156 = arith.addf %153, %155 : vector<64x96xf32>
    %157 = vector.extract_strided_slice %156 {offsets = [0, 0], sizes = [64, 32], strides = [1, 1]} : vector<64x96xf32> to vector<64x32xf32>
    %cst_51 = arith.constant 0.353553385 : f32
    %158 = vector.broadcast %cst_51 : f32 to vector<64x32xf32>
    %159 = arith.mulf %157, %158 : vector<64x32xf32>
    %160 = vector.shape_cast %159 : vector<64x32xf32> to vector<16x4x32xf32>
    %161 = vector.extract_strided_slice %156 {offsets = [0, 32], sizes = [64, 32], strides = [1, 1]} : vector<64x96xf32> to vector<64x32xf32>
    %162 = vector.shape_cast %161 : vector<64x32xf32> to vector<16x4x32xf32>
    %163 = vector.extract_strided_slice %156 {offsets = [0, 64], sizes = [64, 32], strides = [1, 1]} : vector<64x96xf32> to vector<64x32xf32>
    %164 = vector.shape_cast %163 : vector<64x32xf32> to vector<16x4x32xf32>
    %165 = vector.extract_strided_slice %160 {offsets = [0, 0, 0], sizes = [16, 4, 8], strides = [1, 1, 1]} : vector<16x4x32xf32> to vector<16x4x8xf32>
    %166 = vector.extract_strided_slice %162 {offsets = [0, 0, 0], sizes = [16, 4, 8], strides = [1, 1, 1]} : vector<16x4x32xf32> to vector<16x4x8xf32>
    %167 = vector.extract_strided_slice %164 {offsets = [0, 0, 0], sizes = [16, 4, 8], strides = [1, 1, 1]} : vector<16x4x32xf32> to vector<16x4x8xf32>
    "tpu.trace_start"() <{level = 10 : i32, message = "rnd,rmd->rnm"}> : () -> ()
    %cst_52 = arith.constant dense<0.000000e+00> : vector<16x4x4xf32>
    %168 = tpu.matmul %165, %166, %cst_52 {dimension_numbers = #tpu.dot_dimension_numbers<[2], [2], [1], [1], [0, 0, 0, 1, 1, 1], [0], [0]>} : vector<16x4x8xf32>, vector<16x4x8xf32>, vector<16x4x4xf32> -> vector<16x4x4xf32>
    "tpu.trace_stop"() : () -> ()
    %cst_53 = arith.constant dense<0xFF800000> : vector<16x4xf32>
    %169 = vector.multi_reduction <maximumf>, %168, %cst_53 [2] : vector<16x4x4xf32> to vector<16x4xf32>
    %170 = vector.shape_cast %169 : vector<16x4xf32> to vector<16x4x1xf32>
    %171 = vector.broadcast %170 : vector<16x4x1xf32> to vector<16x4x4xf32>
    %172 = arith.subf %168, %171 : vector<16x4x4xf32>
    %173 = math.exp %172 : vector<16x4x4xf32>
    %cst_54 = arith.constant dense<0.000000e+00> : vector<16x4xf32>
    %174 = vector.multi_reduction <add>, %173, %cst_54 [2] : vector<16x4x4xf32> to vector<16x4xf32>
    %175 = vector.shape_cast %174 : vector<16x4xf32> to vector<16x4x1xf32>
    %176 = vector.broadcast %175 : vector<16x4x1xf32> to vector<16x4x4xf32>
    %177 = arith.divf %173, %176 : vector<16x4x4xf32>
    %c0_55 = arith.constant 0 : index
    %c0_56 = arith.constant 0 : index
    %c0_57 = arith.constant 0 : index
    %c0_58 = arith.constant 0 : index
    %178 = vector.load %arg10[%c0_55, %c0_56, %c0_57, %c0_58] : memref<4x16x4x4xf32, #tpu.memory_space<vmem>>, vector<1x16x4x4xf32>
    %179 = vector.shape_cast %178 : vector<1x16x4x4xf32> to vector<16x4x4xf32>
    %180 = vector.shape_cast %177 : vector<16x4x4xf32> to vector<1x16x4x4xf32>
    tpu.vector_store %arg10[%c0_55, %c0_56, %c0_57, %c0_58], %180 {strides = array<i32>} : memref<4x16x4x4xf32, #tpu.memory_space<vmem>>, vector<1x16x4x4xf32>,
    "tpu.trace_start"() <{level = 10 : i32, message = "rnm,rmd->rnd"}> : () -> ()
    %cst_59 = arith.constant dense<0.000000e+00> : vector<16x4x8xf32>
    %181 = tpu.matmul %177, %167, %cst_59 {dimension_numbers = #tpu.dot_dimension_numbers<[2], [1], [1], [2], [0, 0, 0, 1, 1, 2], [0], [0]>} : vector<16x4x4xf32>, vector<16x4x8xf32>, vector<16x4x8xf32> -> vector<16x4x8xf32>
    "tpu.trace_stop"() : () -> ()
    %182 = vector.extract_strided_slice %160 {offsets = [0, 0, 8], sizes = [16, 4, 8], strides = [1, 1, 1]} : vector<16x4x32xf32> to vector<16x4x8xf32>
    %183 = vector.extract_strided_slice %162 {offsets = [0, 0, 8], sizes = [16, 4, 8], strides = [1, 1, 1]} : vector<16x4x32xf32> to vector<16x4x8xf32>
    %184 = vector.extract_strided_slice %164 {offsets = [0, 0, 8], sizes = [16, 4, 8], strides = [1, 1, 1]} : vector<16x4x32xf32> to vector<16x4x8xf32>
    "tpu.trace_start"() <{level = 10 : i32, message = "rnd,rmd->rnm"}> : () -> ()
    %cst_60 = arith.constant dense<0.000000e+00> : vector<16x4x4xf32>
    %185 = tpu.matmul %182, %183, %cst_60 {dimension_numbers = #tpu.dot_dimension_numbers<[2], [2], [1], [1], [0, 0, 0, 1, 1, 1], [0], [0]>} : vector<16x4x8xf32>, vector<16x4x8xf32>, vector<16x4x4xf32> -> vector<16x4x4xf32>
    "tpu.trace_stop"() : () -> ()
    %cst_61 = arith.constant dense<0xFF800000> : vector<16x4xf32>
    %186 = vector.multi_reduction <maximumf>, %185, %cst_61 [2] : vector<16x4x4xf32> to vector<16x4xf32>
    %187 = vector.shape_cast %186 : vector<16x4xf32> to vector<16x4x1xf32>
    %188 = vector.broadcast %187 : vector<16x4x1xf32> to vector<16x4x4xf32>
    %189 = arith.subf %185, %188 : vector<16x4x4xf32>
    %190 = math.exp %189 : vector<16x4x4xf32>
    %cst_62 = arith.constant dense<0.000000e+00> : vector<16x4xf32>
    %191 = vector.multi_reduction <add>, %190, %cst_62 [2] : vector<16x4x4xf32> to vector<16x4xf32>
    %192 = vector.shape_cast %191 : vector<16x4xf32> to vector<16x4x1xf32>
    %193 = vector.broadcast %192 : vector<16x4x1xf32> to vector<16x4x4xf32>
    %194 = arith.divf %190, %193 : vector<16x4x4xf32>
    %c1_63 = arith.constant 1 : index
    %c0_64 = arith.constant 0 : index
    %c0_65 = arith.constant 0 : index
    %c0_66 = arith.constant 0 : index
    %195 = vector.load %arg10[%c1_63, %c0_64, %c0_65, %c0_66] : memref<4x16x4x4xf32, #tpu.memory_space<vmem>>, vector<1x16x4x4xf32>
    %196 = vector.shape_cast %195 : vector<1x16x4x4xf32> to vector<16x4x4xf32>
    %197 = vector.shape_cast %194 : vector<16x4x4xf32> to vector<1x16x4x4xf32>
    tpu.vector_store %arg10[%c1_63, %c0_64, %c0_65, %c0_66], %197 {strides = array<i32>} : memref<4x16x4x4xf32, #tpu.memory_space<vmem>>, vector<1x16x4x4xf32>,
    "tpu.trace_start"() <{level = 10 : i32, message = "rnm,rmd->rnd"}> : () -> ()
    %cst_67 = arith.constant dense<0.000000e+00> : vector<16x4x8xf32>
    %198 = tpu.matmul %194, %184, %cst_67 {dimension_numbers = #tpu.dot_dimension_numbers<[2], [1], [1], [2], [0, 0, 0, 1, 1, 2], [0], [0]>} : vector<16x4x4xf32>, vector<16x4x8xf32>, vector<16x4x8xf32> -> vector<16x4x8xf32>
    "tpu.trace_stop"() : () -> ()
    %199 = vector.extract_strided_slice %160 {offsets = [0, 0, 16], sizes = [16, 4, 8], strides = [1, 1, 1]} : vector<16x4x32xf32> to vector<16x4x8xf32>
    %200 = vector.extract_strided_slice %162 {offsets = [0, 0, 16], sizes = [16, 4, 8], strides = [1, 1, 1]} : vector<16x4x32xf32> to vector<16x4x8xf32>
    %201 = vector.extract_strided_slice %164 {offsets = [0, 0, 16], sizes = [16, 4, 8], strides = [1, 1, 1]} : vector<16x4x32xf32> to vector<16x4x8xf32>
    "tpu.trace_start"() <{level = 10 : i32, message = "rnd,rmd->rnm"}> : () -> ()
    %cst_68 = arith.constant dense<0.000000e+00> : vector<16x4x4xf32>
    %202 = tpu.matmul %199, %200, %cst_68 {dimension_numbers = #tpu.dot_dimension_numbers<[2], [2], [1], [1], [0, 0, 0, 1, 1, 1], [0], [0]>} : vector<16x4x8xf32>, vector<16x4x8xf32>, vector<16x4x4xf32> -> vector<16x4x4xf32>
    "tpu.trace_stop"() : () -> ()
    %cst_69 = arith.constant dense<0xFF800000> : vector<16x4xf32>
    %203 = vector.multi_reduction <maximumf>, %202, %cst_69 [2] : vector<16x4x4xf32> to vector<16x4xf32>
    %204 = vector.shape_cast %203 : vector<16x4xf32> to vector<16x4x1xf32>
    %205 = vector.broadcast %204 : vector<16x4x1xf32> to vector<16x4x4xf32>
    %206 = arith.subf %202, %205 : vector<16x4x4xf32>
    %207 = math.exp %206 : vector<16x4x4xf32>
    %cst_70 = arith.constant dense<0.000000e+00> : vector<16x4xf32>
    %208 = vector.multi_reduction <add>, %207, %cst_70 [2] : vector<16x4x4xf32> to vector<16x4xf32>
    %209 = vector.shape_cast %208 : vector<16x4xf32> to vector<16x4x1xf32>
    %210 = vector.broadcast %209 : vector<16x4x1xf32> to vector<16x4x4xf32>
    %211 = arith.divf %207, %210 : vector<16x4x4xf32>
    %c2_71 = arith.constant 2 : index
    %c0_72 = arith.constant 0 : index
    %c0_73 = arith.constant 0 : index
    %c0_74 = arith.constant 0 : index
    %212 = vector.load %arg10[%c2_71, %c0_72, %c0_73, %c0_74] : memref<4x16x4x4xf32, #tpu.memory_space<vmem>>, vector<1x16x4x4xf32>
    %213 = vector.shape_cast %212 : vector<1x16x4x4xf32> to vector<16x4x4xf32>
    %214 = vector.shape_cast %211 : vector<16x4x4xf32> to vector<1x16x4x4xf32>
    tpu.vector_store %arg10[%c2_71, %c0_72, %c0_73, %c0_74], %214 {strides = array<i32>} : memref<4x16x4x4xf32, #tpu.memory_space<vmem>>, vector<1x16x4x4xf32>,
    "tpu.trace_start"() <{level = 10 : i32, message = "rnm,rmd->rnd"}> : () -> ()
    %cst_75 = arith.constant dense<0.000000e+00> : vector<16x4x8xf32>
    %215 = tpu.matmul %211, %201, %cst_75 {dimension_numbers = #tpu.dot_dimension_numbers<[2], [1], [1], [2], [0, 0, 0, 1, 1, 2], [0], [0]>} : vector<16x4x4xf32>, vector<16x4x8xf32>, vector<16x4x8xf32> -> vector<16x4x8xf32>
    "tpu.trace_stop"() : () -> ()
    %216 = vector.extract_strided_slice %160 {offsets = [0, 0, 24], sizes = [16, 4, 8], strides = [1, 1, 1]} : vector<16x4x32xf32> to vector<16x4x8xf32>
    %217 = vector.extract_strided_slice %162 {offsets = [0, 0, 24], sizes = [16, 4, 8], strides = [1, 1, 1]} : vector<16x4x32xf32> to vector<16x4x8xf32>
    %218 = vector.extract_strided_slice %164 {offsets = [0, 0, 24], sizes = [16, 4, 8], strides = [1, 1, 1]} : vector<16x4x32xf32> to vector<16x4x8xf32>
    "tpu.trace_start"() <{level = 10 : i32, message = "rnd,rmd->rnm"}> : () -> ()
    %cst_76 = arith.constant dense<0.000000e+00> : vector<16x4x4xf32>
    %219 = tpu.matmul %216, %217, %cst_76 {dimension_numbers = #tpu.dot_dimension_numbers<[2], [2], [1], [1], [0, 0, 0, 1, 1, 1], [0], [0]>} : vector<16x4x8xf32>, vector<16x4x8xf32>, vector<16x4x4xf32> -> vector<16x4x4xf32>
    "tpu.trace_stop"() : () -> ()
    %cst_77 = arith.constant dense<0xFF800000> : vector<16x4xf32>
    %220 = vector.multi_reduction <maximumf>, %219, %cst_77 [2] : vector<16x4x4xf32> to vector<16x4xf32>
    %221 = vector.shape_cast %220 : vector<16x4xf32> to vector<16x4x1xf32>
    %222 = vector.broadcast %221 : vector<16x4x1xf32> to vector<16x4x4xf32>
    %223 = arith.subf %219, %222 : vector<16x4x4xf32>
    %224 = math.exp %223 : vector<16x4x4xf32>
    %cst_78 = arith.constant dense<0.000000e+00> : vector<16x4xf32>
    %225 = vector.multi_reduction <add>, %224, %cst_78 [2] : vector<16x4x4xf32> to vector<16x4xf32>
    %226 = vector.shape_cast %225 : vector<16x4xf32> to vector<16x4x1xf32>
    %227 = vector.broadcast %226 : vector<16x4x1xf32> to vector<16x4x4xf32>
    %228 = arith.divf %224, %227 : vector<16x4x4xf32>
    %c3_79 = arith.constant 3 : index
    %c0_80 = arith.constant 0 : index
    %c0_81 = arith.constant 0 : index
    %c0_82 = arith.constant 0 : index
    %229 = vector.load %arg10[%c3_79, %c0_80, %c0_81, %c0_82] : memref<4x16x4x4xf32, #tpu.memory_space<vmem>>, vector<1x16x4x4xf32>
    %230 = vector.shape_cast %229 : vector<1x16x4x4xf32> to vector<16x4x4xf32>
    %231 = vector.shape_cast %228 : vector<16x4x4xf32> to vector<1x16x4x4xf32>
    tpu.vector_store %arg10[%c3_79, %c0_80, %c0_81, %c0_82], %231 {strides = array<i32>} : memref<4x16x4x4xf32, #tpu.memory_space<vmem>>, vector<1x16x4x4xf32>,
    "tpu.trace_start"() <{level = 10 : i32, message = "rnm,rmd->rnd"}> : () -> ()
    %cst_83 = arith.constant dense<0.000000e+00> : vector<16x4x8xf32>
    %232 = tpu.matmul %228, %218, %cst_83 {dimension_numbers = #tpu.dot_dimension_numbers<[2], [1], [1], [2], [0, 0, 0, 1, 1, 2], [0], [0]>} : vector<16x4x4xf32>, vector<16x4x8xf32>, vector<16x4x8xf32> -> vector<16x4x8xf32>
    "tpu.trace_stop"() : () -> ()
    %233 = tpu.concatenate %181, %198, %215, %232 in 2 : vector<16x4x8xf32>, vector<16x4x8xf32>, vector<16x4x8xf32>, vector<16x4x8xf32> -> vector<16x4x32xf32>
    %234 = vector.shape_cast %233 : vector<16x4x32xf32> to vector<64x32xf32>
    %c1_84 = arith.constant 1 : index
    %c0_85 = arith.constant 0 : index
    %c0_86 = arith.constant 0 : index
    %235 = vector.load %arg3[%c1_84, %c0_85, %c0_86] : memref<2x32x32xf32, #tpu.memory_space<vmem>>, vector<1x32x32xf32>
    %236 = vector.shape_cast %235 : vector<1x32x32xf32> to vector<32x32xf32>
    %cst_87 = arith.constant dense<0.000000e+00> : vector<64x32xf32>
    %237 = tpu.matmul %234, %236, %cst_87 {dimension_numbers = #tpu.dot_dimension_numbers<[1], [0], [0], [1], [0, 0, 1, 1], [], []>} : vector<64x32xf32>, vector<32x32xf32>, vector<64x32xf32> -> vector<64x32xf32>
    %238 = vector.broadcast %6 : vector<1x32xf32> to vector<64x32xf32>
    %239 = arith.addf %237, %238 : vector<64x32xf32>
    %240 = arith.addf %239, %150 : vector<64x32xf32>
    %cst_88 = arith.constant dense<0.000000e+00> : vector<64xf32>
    %241 = vector.multi_reduction <add>, %240, %cst_88 [1] : vector<64x32xf32> to vector<64xf32>
    %242 = vector.shape_cast %241 : vector<64xf32> to vector<64x1xf32>
    %cst_89 = arith.constant 3.200000e+01 : f32
    %243 = vector.broadcast %cst_89 : f32 to vector<64x1xf32>
    %244 = arith.divf %242, %243 : vector<64x1xf32>
    %245 = vector.broadcast %244 : vector<64x1xf32> to vector<64x32xf32>
    %246 = arith.subf %240, %245 : vector<64x32xf32>
    %247 = arith.mulf %246, %246 : vector<64x32xf32>
    %cst_90 = arith.constant dense<0.000000e+00> : vector<64xf32>
    %248 = vector.multi_reduction <add>, %247, %cst_90 [1] : vector<64x32xf32> to vector<64xf32>
    %249 = vector.shape_cast %248 : vector<64xf32> to vector<64x1xf32>
    %cst_91 = arith.constant 3.200000e+01 : f32
    %250 = vector.broadcast %cst_91 : f32 to vector<64x1xf32>
    %251 = arith.divf %249, %250 : vector<64x1xf32>
    %252 = vector.broadcast %244 : vector<64x1xf32> to vector<64x32xf32>
    %253 = arith.subf %240, %252 : vector<64x32xf32>
    %cst_92 = arith.constant 9.99999974E-6 : f32
    %254 = vector.broadcast %cst_92 : f32 to vector<64x1xf32>
    %255 = arith.addf %251, %254 : vector<64x1xf32>
    %256 = math.rsqrt %255 : vector<64x1xf32>
    %257 = vector.broadcast %256 : vector<64x1xf32> to vector<64x32xf32>
    %258 = arith.mulf %253, %257 : vector<64x32xf32>
    %259 = vector.broadcast %7 : vector<1x32xf32> to vector<64x32xf32>
    %260 = arith.mulf %258, %259 : vector<64x32xf32>
    %261 = vector.broadcast %8 : vector<1x32xf32> to vector<64x32xf32>
    %262 = arith.addf %260, %261 : vector<64x32xf32>
    %c0_93 = arith.constant 0 : index
    %c0_94 = arith.constant 0 : index
    %263 = vector.load %arg5[%c0_93, %c0_94] : memref<32x64xf32, #tpu.memory_space<vmem>>, vector<32x64xf32>
    %cst_95 = arith.constant dense<0.000000e+00> : vector<64x64xf32>
    %264 = tpu.matmul %262, %263, %cst_95 {dimension_numbers = #tpu.dot_dimension_numbers<[1], [0], [0], [1], [0, 0, 1, 1], [], []>} : vector<64x32xf32>, vector<32x64xf32>, vector<64x64xf32> -> vector<64x64xf32>
    %c0_96 = arith.constant 0 : index
    %c0_97 = arith.constant 0 : index
    %265 = vector.load %arg6[%c0_96, %c0_97] : memref<1x64xf32, #tpu.memory_space<vmem>>, vector<1x64xf32>
    %266 = vector.broadcast %265 : vector<1x64xf32> to vector<64x64xf32>
    %267 = arith.addf %264, %266 : vector<64x64xf32>
    %cst_98 = arith.constant 0.000000e+00 : f32
    %268 = vector.broadcast %cst_98 : f32 to vector<64x64xf32>
    %269 = arith.maximumf %267, %268 : vector<64x64xf32>
    %c0_99 = arith.constant 0 : index
    %c0_100 = arith.constant 0 : index
    %270 = vector.load %arg7[%c0_99, %c0_100] : memref<64x32xf32, #tpu.memory_space<vmem>>, vector<64x32xf32>
    %cst_101 = arith.constant dense<0.000000e+00> : vector<64x32xf32>
    %271 = tpu.matmul %269, %270, %cst_101 {dimension_numbers = #tpu.dot_dimension_numbers<[1], [0], [0], [1], [0, 0, 1, 1], [], []>} : vector<64x64xf32>, vector<64x32xf32>, vector<64x32xf32> -> vector<64x32xf32>
    %272 = vector.broadcast %9 : vector<1x32xf32> to vector<64x32xf32>
    %273 = arith.addf %271, %272 : vector<64x32xf32>
    %274 = arith.addf %273, %262 : vector<64x32xf32>
    %cst_102 = arith.constant dense<0.000000e+00> : vector<64xf32>
    %275 = vector.multi_reduction <add>, %274, %cst_102 [1] : vector<64x32xf32> to vector<64xf32>
    %276 = vector.shape_cast %275 : vector<64xf32> to vector<64x1xf32>
    %cst_103 = arith.constant 3.200000e+01 : f32
    %277 = vector.broadcast %cst_103 : f32 to vector<64x1xf32>
    %278 = arith.divf %276, %277 : vector<64x1xf32>
    %279 = vector.broadcast %278 : vector<64x1xf32> to vector<64x32xf32>
    %280 = arith.subf %274, %279 : vector<64x32xf32>
    %281 = arith.mulf %280, %280 : vector<64x32xf32>
    %cst_104 = arith.constant dense<0.000000e+00> : vector<64xf32>
    %282 = vector.multi_reduction <add>, %281, %cst_104 [1] : vector<64x32xf32> to vector<64xf32>
    %283 = vector.shape_cast %282 : vector<64xf32> to vector<64x1xf32>
    %cst_105 = arith.constant 3.200000e+01 : f32
    %284 = vector.broadcast %cst_105 : f32 to vector<64x1xf32>
    %285 = arith.divf %283, %284 : vector<64x1xf32>
    %286 = vector.broadcast %278 : vector<64x1xf32> to vector<64x32xf32>
    %287 = arith.subf %274, %286 : vector<64x32xf32>
    %cst_106 = arith.constant 9.99999997E-7 : f32
    %288 = vector.broadcast %cst_106 : f32 to vector<64x1xf32>
    %289 = arith.addf %285, %288 : vector<64x1xf32>
    %290 = math.rsqrt %289 : vector<64x1xf32>
    %291 = vector.broadcast %290 : vector<64x1xf32> to vector<64x32xf32>
    %292 = arith.mulf %287, %291 : vector<64x32xf32>
    %293 = vector.broadcast %10 : vector<1x32xf32> to vector<64x32xf32>
    %294 = arith.mulf %292, %293 : vector<64x32xf32>
    %295 = vector.broadcast %11 : vector<1x32xf32> to vector<64x32xf32>
    %296 = arith.addf %294, %295 : vector<64x32xf32>
    %c0_107 = arith.constant 0 : index
    %c0_108 = arith.constant 0 : index
    %297 = vector.load %arg8[%c0_107, %c0_108] : memref<64x32xf32, #tpu.memory_space<vmem>>, vector<64x32xf32>
    tpu.vector_store %arg8[%c0_107, %c0_108], %296 {strides = array<i32>} : memref<64x32xf32, #tpu.memory_space<vmem>>, vector<64x32xf32>,
    return
  }
}

</mosaic_0001>

<bundles_post_ra>
// kernel: stmha_forward.1
= control target key start
LH: loop header
LB: loop body
LE: loop exit
PB: predicated region body
PF: predicated region fallthrough
CT: control target
= control target key end

     0   :  { %vm52_vm0 = vcmask 261120   ;;  %s24719_s0 = inlined_call_operand.vmem [shape: f32[64,32], index: 0, kind: input, shape index: {}]   ;;  %s24720_s1 = inlined_call_operand.vmem [shape: f32[2,32,96], index: 1, kind: input, shape index: {}]   ;;  %s24721_s2 = inlined_call_operand.vmem [shape: f32[2,96], index: 2, kind: input, shape index: {}]   ;;  %s24722_s3 = inlined_call_operand.vmem [shape: f32[2,32,32], index: 3, kind: input, shape index: {}]   ;;  %s24723_s4 = inlined_call_operand.vmem [shape: f32[9,32], index: 4, kind: input, shape index: {}]   ;;  %s24724_s5 = inlined_call_operand.vmem [shape: f32[32,64], index: 5, kind: input, shape index: {}]   ;;  %s24725_s6 = inlined_call_operand.vmem [shape: f32[1,64], index: 6, kind: input, shape index: {}]   ;;  %s24726_s7 = inlined_call_operand.vmem [shape: f32[64,32], index: 7, kind: input, shape index: {}]   ;;  %s24727_s8 = inlined_call_operand.vmem [shape: f32[64,32], index: 8, kind: output, shape index: {0}]   ;;  %s24728_s9 = inlined_call_operand.hbm [shape: f32[4,8,8,8], index: 9, kind: output, shape index: {1}]   ;;  %s24729_s10 = inlined_call_operand.vmem [shape: f32[4,16,4,4], index: 10, kind: output, shape index: {2}]  }
   0x1   :  { %v44_v0 = vld [vmem:[%s24720_s1] sm:$0xff]  ;;  %v45_v1 = vld [vmem:[%s24720_s1 + $0x8] sm:$0xff]  ;;  %v46_v2 = vld [vmem:[%s24720_s1 + $0x10] sm:$0xff] }
   0x2   :  { %v19957_v3 = vpack.c.bf16 %v45_v1, %v44_v0  ;;  %v47_v4 = vld [vmem:[%s24720_s1 + $0x18] sm:$0xff]  ;;  %v33_v5 = vld [vmem:[%s24719_s0] sm:$0xff] }
   0x3   :  { %v19961_v6 = vpack.c.bf16 %v47_v4, %v46_v2  ;;  %18877 = vmatprep.mubr.msk.f32.mxu0 %vm52_vm0, %v33_v5 }
   0x4   :  { %19958 = vmatprep.subr.bf16.mxu0 %v19957_v3 }
   0x5   :  { %19960 = vmatpush3.bf16.msra.mxu0 %v19957_v3 }
   0x6   :  { %16 = vsyncpa [#allocation3], 0  ;;  %19962 = vmatprep.subr.bf16.mxu0 %v19961_v6  ;;  %v34_v7 = vld [vmem:[%s24719_s0 + $0x8] sm:$0xff]  ;;  %v35_v8 = vld [vmem:[%s24719_s0 + $0x10] sm:$0xff]  ;;  %v24732_v14 = vmov 0.0   ;;  %v48_v15 = vlaneseq  ;;  %vm20498_vm1 = vmmov 0  }
   0x7   :  { %v36_v9 = vld [vmem:[%s24719_s0 + $0x18] sm:$0xff]  ;;  %v37_v10 = vld [vmem:[%s24719_s0 + $0x20] sm:$0xff]  ;;  %v38_v11 = vld [vmem:[%s24719_s0 + $0x28] sm:$0xff]  ;;  %18894 = vmatprep.subr.mxu1 %v24732_v14  ;;  %18896 = vmatprep.mubr.msk.f32.mxu1 %vm20498_vm1, %v24732_v14  ;;  %s20499_s19 = smov 96   ;;  %s20500_s20 = smov 64   ;;  %vm193_vm2 = vcmask 64512  }
   0x8   :  { %v39_v12 = vld [vmem:[%s24719_s0 + $0x30] sm:$0xff]  ;;  %v40_v13 = vld [vmem:[%s24719_s0 + $0x38] sm:$0xff]  ;;  %v20616_v16 = vshrl.u32 %v48_v15, 7  ;;  %v41_v18 = vld [vmem:[%s24721_s2] sm:$0x3]  ;;  %s20501_s21 = smov 88  }
   0x9   :  { %19964 = vmatpush3.bf16.msra.mxu0 %v19961_v6  ;;  %s20502_s22 = smov 120   ;;  %s20503_s23 = smov 56   ;;  %vm5619_vm3 = vcmask 195584   ;;  %vm5610_vm4 = vcmask 130048   ;;  %vm5975_vm5 = vcmask 1041409   ;;  %vm5977_vm6 = vcmask 1042434  }
   0xa   :  { %18889 = vmatprep.subr.mxu0 %v24732_v14  ;;  %24750 = vst [vmem:[#allocation5_spill] sm:$0xff] %v20616_v16  ;;  %v50_v17 = vsub.s32 0, %v20616_v16  ;;  %s20504_s24 = smov 80   ;;  %s20505_s25 = smov 112   ;;  %vm5979_vm7 = vcmask 1043459   ;;  %vm5982_vm8 = vcmask 1044484  }
   0xb   :  { %s20506_s26 = smov 48   ;;  %s20507_s27 = smov 72   ;;  %vm5985_vm9 = vcmask 1045509   ;;  %vm5988_vm10 = vcmask 1046534   ;;  %vm5991_vm11 = vcmask 1047559   ;;  %vm7664_vm12 = vcmask 1043456  }
   0xc   :  { %18878 = vmatmul.mubr.msk.f32.vlgmr.msra.gmra.mrb[0].mxu0 %vm52_vm0, %v34_v7  ;;  %v51_v19 = vrot.slane %v41_v18, %v50_v17  ;;  %s20508_s28 = smov 104   ;;  %s24730_s29 = smov 40   ;;  %vm7465_vm13 = vcmask 27648   ;;  %vm7660_vm14 = vcmask 31744   ;;  %vm17609_vm15 = vcmask 523264  }
   0xd   :  { %18880 = vmatprep.mubr.msk.f32.mxu0 %vm52_vm0, %v35_v8  ;;  %s20510_s30 = smov 8   ;;  %s20511_s11 = smov 16  }
   0xe   :  { %s20512_s12 = smov 24  }
  0x10   :  { %18881 = vmatmul.mubr.msk.f32.gmra.mrb[2].mxu0 %vm52_vm0, %v36_v9 }
  0x11   :  { %18883 = vmatprep.mubr.msk.f32.mxu0 %vm52_vm0, %v37_v10 }
  0x14   :  { %18884 = vmatmul.mubr.msk.f32.gmra.mrb[4].mxu0 %vm52_vm0, %v38_v11 }
  0x15   :  { %18886 = vmatprep.mubr.msk.f32.mxu0 %vm52_vm0, %v39_v12 }
  0x18   :  { %18887 = vmatmul.mubr.msk.f32.gmra.mrb[6].mxu0 %vm52_vm0, %v40_v13 }
  0x19   :  { %18891 = vmatprep.mubr.msk.f32.mxu0 %vm20498_vm1, %v24732_v14 }
  0xdf   :  { %v18879_v20 = vpop.f32.mrb[0].mxu0 }
  0xe0   :  { %v20628_v21 = vadd.f32 %v18879_v20, %v51_v19  ;;  %v143_v22 = vpop.f32.mrb[1].mxu0 }
  0xe1   :  { %v20632_v24 = vadd.f32 %v143_v22, %v51_v19 }
  0xe2   :  { %270 = vrot.lane.b32.xlu0 %v20628_v21, %s20499_s19  ;;  %v20682_v37 = vmul.f32 0.35355338, %v20628_v21 }
  0xe3   :  { %v18882_v23 = vpop.f32.mrb[2].mxu0  ;;  %v20692_v40 = vmul.f32 0.35355338, %v20632_v24 }
  0xe4   :  { %v153_v25 = vpop.f32.mrb[3].mxu0  ;;  %v20640_v29 = vadd.f32 %v18882_v23, %v51_v19 }
  0xe5   :  { %v20634_v26 = vadd.f32 %v153_v25, %v51_v19 }
  0xe6   :  { %191 = vrot.lane.b32.xlu0 %v20632_v24, %s20499_s19  ;;  %v20709_v44 = vmul.f32 0.35355338, %v20640_v29 }
  0xe7   :  { %v18885_v27 = vpop.f32.mrb[4].mxu0  ;;  %348 = vrot.lane.b32.xlu1 %v20634_v26, %s20499_s19  ;;  %v20697_v41 = vmul.f32 0.35355338, %v20634_v26 }
  0xe8   :  { %v163_v28 = vpop.f32.mrb[5].mxu0  ;;  %v20644_v31 = vadd.f32 %v18885_v27, %v51_v19 }
  0xe9   :  { %v20642_v30 = vadd.f32 %v163_v28, %v51_v19 }
  0xea   :  { %v20723_v48 = vmul.f32 0.35355338, %v20644_v31 }
  0xeb   :  { %v18888_v32 = vpop.f32.mrb[6].mxu0  ;;  %426 = vrot.lane.b32.xlu1 %v20640_v29, %s20499_s19  ;;  %504 = vrot.lane.b32.xlu0 %v20642_v30, %s20499_s19  ;;  %v20719_v47 = vmul.f32 0.35355338, %v20642_v30 }
  0xec   :  { %v173_v33 = vpop.f32.mrb[7].mxu0  ;;  %v20652_v35 = vadd.f32 %v18888_v32, %v51_v19 }
  0xed   :  { %v20650_v34 = vadd.f32 %v173_v33, %v51_v19 }
  0xee   :  { %v20740_v51 = vmul.f32 0.35355338, %v20652_v35 }
  0xef   :  { %582 = vrot.lane.b32.xlu1 %v20644_v31, %s20499_s19  ;;  %660 = vrot.lane.b32.xlu0 %v20650_v34, %s20499_s19  ;;  %v20737_v50 = vmul.f32 0.35355338, %v20650_v34 }
  0xf3   :  { %738 = vrot.lane.b32.xlu1 %v20652_v35, %s20499_s19  ;;  %987 = vrot.lane.b32.xlu0 %v20628_v21, %s20500_s20 }
  0xf7   :  { %911 = vrot.lane.b32.xlu1 %v20632_v24, %s20500_s20  ;;  %1215 = vrot.lane.b32.xlu0 %v20642_v30, %s20500_s20 }
  0xfb   :  { %1063 = vrot.lane.b32.xlu1 %v20634_v26, %s20500_s20  ;;  %1521 = vrot.lane.b32.xlu0 %v20632_v24, %s20501_s21 }
  0xff   :  { %1139 = vrot.lane.b32.xlu1 %v20640_v29, %s20500_s20  ;;  %1367 = vrot.lane.b32.xlu0 %v20650_v34, %s20500_s20 }
 0x103   :  { %1291 = vrot.lane.b32.xlu1 %v20644_v31, %s20500_s20 }
 0x107   :  { %1443 = vrot.lane.b32.xlu1 %v20652_v35, %s20500_s20 }
 0x10b   :  { %1599 = vrot.lane.b32.xlu1 %v20628_v21, %s20501_s21 }
 0x154   :  { %v271_v36 = vpop.permute.xlu0 %270 }
 0x155   :  { %18895 = vmatpush3.xpose.msk.msra.mxu1 %vm193_vm2, %v271_v36 }
 0x156   :  { %18899 = vmatprep.subr.mxu1 %v24732_v14 }
 0x158   :  { %18897 = vmatmul.mubr.msk.f32.vlgmr.msra.gmra.mrb[0].mxu1 %vm193_vm2, %v20682_v37  ;;  %v192_v38 = vpop.permute.xlu0 %191 }
 0x159   :  { %v349_v39 = vpop.permute.xlu1 %348  ;;  %18890 = vmatpush3.xpose.msk.msra.mxu0 %vm193_vm2, %v192_v38  ;;  %18901 = vmatprep.mubr.msk.f32.mxu1 %vm20498_vm1, %v24732_v14 }
 0x15a   :  { %18900 = vmatpush3.xpose.msk.msra.mxu1 %vm193_vm2, %v349_v39  ;;  %18914 = vmatprep.subr.mxu0 %v24732_v14 }
 0x15b   :  { %18904 = vmatprep.subr.mxu1 %v24732_v14 }
 0x15c   :  { %18892 = vmatmul.mubr.msk.f32.vlgmr.msra.gmra.mrb[8].mxu0 %vm193_vm2, %v20692_v40 }
 0x15d   :  { %v427_v42 = vpop.permute.xlu1 %426  ;;  %18902 = vmatmul.mubr.msk.f32.vlgmr.msra.gmra.mrb[2].mxu1 %vm193_vm2, %v20697_v41  ;;  %v505_v43 = vpop.permute.xlu0 %504  ;;  %18916 = vmatprep.mubr.msk.f32.mxu0 %vm20498_vm1, %v24732_v14 }
 0x15e   :  { %18905 = vmatpush3.xpose.msk.msra.mxu1 %vm193_vm2, %v427_v42  ;;  %18906 = vmatprep.mubr.msk.f32.mxu1 %vm20498_vm1, %v24732_v14 }
 0x15f   :  { %18909 = vmatprep.subr.mxu1 %v24732_v14 }
 0x161   :  { %v583_v45 = vpop.permute.xlu1 %582  ;;  %18907 = vmatmul.mubr.msk.f32.vlgmr.msra.gmra.mrb[4].mxu1 %vm193_vm2, %v20709_v44  ;;  %v661_v46 = vpop.permute.xlu0 %660 }
 0x162   :  { %18910 = vmatpush3.xpose.msk.msra.mxu1 %vm193_vm2, %v505_v43  ;;  %18915 = vmatpush3.xpose.msk.msra.mxu0 %vm193_vm2, %v583_v45 }
 0x163   :  { %18911 = vmatprep.mubr.msk.f32.mxu1 %vm20498_vm1, %v24732_v14  ;;  %18919 = vmatprep.subr.mxu1 %v24732_v14 }
 0x164   :  { %18924 = vmatprep.subr.mxu0 %v24732_v14 }
 0x165   :  { %v739_v49 = vpop.permute.xlu1 %738  ;;  %18912 = vmatmul.mubr.msk.f32.vlgmr.msra.gmra.mrb[6].mxu1 %vm193_vm2, %v20719_v47  ;;  %18917 = vmatmul.mubr.msk.f32.vlgmr.msra.gmra.mrb[10].mxu0 %vm193_vm2, %v20723_v48  ;;  %v988_v52 = vpop.permute.xlu0 %987 }
 0x166   :  { %18920 = vmatpush3.xpose.msk.msra.mxu1 %vm193_vm2, %v661_v46  ;;  %18925 = vmatpush3.xpose.msk.msra.mxu0 %vm193_vm2, %v739_v49 }
 0x167   :  { %18921 = vmatprep.mubr.msk.f32.mxu1 %vm20498_vm1, %v24732_v14  ;;  %18926 = vmatprep.mubr.msk.f32.mxu0 %vm20498_vm1, %v24732_v14 }
 0x168   :  { %18929 = vmatprep.subr.mxu1 %v24732_v14  ;;  %18934 = vmatprep.subr.mxu0 %v24732_v14 }
 0x169   :  { %v912_v53 = vpop.permute.xlu1 %911  ;;  %18922 = vmatmul.mubr.msk.f32.vlgmr.msra.gmra.mrb[8].mxu1 %vm193_vm2, %v20737_v50  ;;  %18927 = vmatmul.mubr.msk.f32.vlgmr.msra.gmra.mrb[12].mxu0 %vm193_vm2, %v20740_v51  ;;  %v20781_v20 = vpop.permute.xlu0 %1215 }
 0x16a   :  { %18930 = vmatpush3.msra.mxu1 %v912_v53  ;;  %18935 = vmatpush3.msra.mxu0 %v988_v52 }
 0x16b   :  { %18936 = vmatprep.mubr.msk.f32.mxu0 %vm20498_vm1, %v24732_v14  ;;  %18944 = vmatprep.subr.mxu0 %v24732_v14 }
 0x16c   :  { %18931 = vmatprep.mubr.msk.f32.mxu1 %vm20498_vm1, %v24732_v14  ;;  %18939 = vmatprep.subr.mxu1 %v24732_v14 }
 0x16d   :  { %v20775_v15 = vpop.permute.xlu1 %1063  ;;  %v20785_v23 = vpop.permute.xlu0 %1521 }
 0x171   :  { %v20777_v18 = vpop.permute.xlu1 %1139  ;;  %v20789_v27 = vpop.permute.xlu0 %1367 }
 0x175   :  { %v20779_v19 = vpop.permute.xlu1 %1291 }
 0x179   :  { %v20783_v22 = vpop.permute.xlu1 %1443 }
 0x17d   :  { %v20787_v25 = vpop.permute.xlu1 %1599 }
 0x22b   :  { %v343_v54 = vpop.f32.mrb[0].mxu1 }
 0x22c   :  { %v18898_v55 = vpop.f32.mrb[1].mxu1  ;;  %v818_v56 = vsel %vm193_vm2, %v343_v54, -inf }
 0x22d   :  { %819 = vmax.xlane.f32.xlu1 %v818_v56 }
 0x22f   :  { %v265_v57 = vpop.f32.mrb[8].mxu0 }
 0x230   :  { %v18893_v58 = vpop.f32.mrb[9].mxu0  ;;  %v421_v59 = vpop.f32.mrb[2].mxu1  ;;  %v815_v60 = vsel %vm193_vm2, %v265_v57, -inf }
 0x231   :  { %v18903_v61 = vpop.f32.mrb[3].mxu1  ;;  %816 = vmax.xlane.f32.xlu0 %v815_v60  ;;  %v821_v63 = vsel %vm193_vm2, %v421_v59, -inf }
 0x234   :  { %v499_v62 = vpop.f32.mrb[4].mxu1 }
 0x235   :  { %v18908_v0 = vpop.f32.mrb[5].mxu1  ;;  %822 = vmax.xlane.f32.xlu0 %v821_v63  ;;  %v824_v12 = vsel %vm193_vm2, %v499_v62, -inf }
 0x238   :  { %v20757_v1 = vpop.f32.mrb[6].mxu1  ;;  %v655_v2 = vpop.f32.mrb[10].mxu0 }
 0x239   :  { %v18913_v3 = vpop.f32.mrb[7].mxu1  ;;  %v18918_v4 = vpop.f32.mrb[11].mxu0  ;;  %v827_v5 = vsel %vm193_vm2, %v20757_v1, -inf  ;;  %v830_v6 = vsel %vm193_vm2, %v655_v2, -inf }
 0x23a   :  { %828 = vmax.xlane.f32.xlu1 %v827_v5  ;;  %831 = vmax.xlane.f32.xlu0 %v830_v6 }
 0x23c   :  { %v20762_v7 = vpop.f32.mrb[8].mxu1  ;;  %v20764_v8 = vpop.f32.mrb[12].mxu0 }
 0x23d   :  { %v18923_v9 = vpop.f32.mrb[9].mxu1  ;;  %v18928_v10 = vpop.f32.mrb[13].mxu0  ;;  %v833_v11 = vsel %vm193_vm2, %v20762_v7, -inf  ;;  %v836_v13 = vsel %vm193_vm2, %v20764_v8, -inf }
 0x23e   :  { %834 = vmax.xlane.f32.xlu1 %v833_v11  ;;  %825 = vmax.xlane.f32.xlu0 %v824_v12 }
 0x242   :  { %837 = vmax.xlane.f32.xlu0 %v836_v13 }
 0x24f   :  { %1597 = vrot.lane.b32.xlu1 %v20682_v37, %s20502_s22 }
 0x258   :  { %1519 = vrot.lane.b32.xlu0 %v20692_v40, %s20502_s22 }
 0x2ba   :  { %v820_v28 = vpop.xlane.xlu1 %819 }
 0x2bb   :  { %v840_v32 = vsub.f32 %v343_v54, %v820_v28 }
 0x2bd   :  { %v849_v33 = vmul.f32 1.442695, %v840_v32 }
 0x2be   :  { %v817_v36 = vpop.xlane.xlu0 %816 }
 0x2bf   :  { %20031 = vpow2.f32 %v849_v33  ;;  %v839_v38 = vsub.f32 %v265_v57, %v817_v36 }
 0x2c1   :  { %v847_v39 = vmul.f32 1.442695, %v839_v38 }
 0x2c2   :  { %v823_v42 = vpop.xlane.xlu0 %822 }
 0x2c3   :  { %20033 = vpow2.f32 %v847_v39  ;;  %v841_v43 = vsub.f32 %v421_v59, %v823_v42 }
 0x2c5   :  { %v851_v45 = vmul.f32 1.442695, %v841_v43 }
 0x2c7   :  { %20035 = vpow2.f32 %v851_v45  ;;  %v832_v46 = vpop.xlane.xlu0 %831  ;;  %v829_v3 = vpop.xlane.xlu1 %828 }
 0x2c8   :  { %v844_v49 = vsub.f32 %v655_v2, %v832_v46  ;;  %v843_v4 = vsub.f32 %v20757_v1, %v829_v3 }
 0x2c9   :  { %v20791_v52 = vpop.eup %20031 }
 0x2ca   :  { %v857_v53 = vmul.f32 1.442695, %v844_v49  ;;  %v866_v55 = vsel %vm193_vm2, %v20791_v52, 0.0  ;;  %v855_v9 = vmul.f32 1.442695, %v843_v4 }
 0x2cb   :  { %v826_v56 = vpop.xlane.xlu0 %825  ;;  %867 = vadd.xlane.f32.xlu0 %v866_v55  ;;  %v835_v5 = vpop.xlane.xlu1 %834 }
 0x2cc   :  { %v842_v54 = vsub.f32 %v499_v62, %v826_v56  ;;  %20037 = vpow2.f32 %v857_v53  ;;  %v845_v10 = vsub.f32 %v20762_v7, %v835_v5 }
 0x2cd   :  { %v20795_v58 = vpop.eup %20033 }
 0x2ce   :  { %v853_v57 = vmul.f32 1.442695, %v842_v54  ;;  %v863_v59 = vsel %vm193_vm2, %v20795_v58, 0.0  ;;  %v859_v12 = vmul.f32 1.442695, %v845_v10 }
 0x2cf   :  { %864 = vadd.xlane.f32.xlu1 %v863_v59  ;;  %v838_v6 = vpop.xlane.xlu0 %837  ;;  %v20852_v38 = vpop.permute.xlu1 %1597 }
 0x2d0   :  { %20039 = vpow2.f32 %v853_v57  ;;  %v846_v11 = vsub.f32 %v20764_v8, %v838_v6 }
 0x2d1   :  { %v20799_v60 = vpop.eup %20035  ;;  %20041 = vpow2.f32 %v855_v9 }
 0x2d2   :  { %v869_v61 = vsel %vm193_vm2, %v20799_v60, 0.0  ;;  %v861_v13 = vmul.f32 1.442695, %v846_v11  ;;  %20043 = vpow2.f32 %v859_v12 }
 0x2d3   :  { %870 = vadd.xlane.f32.xlu1 %v869_v61  ;;  %v20850_v36 = vpop.permute.xlu0 %1519 }
 0x2d4   :  { %20045 = vpow2.f32 %v861_v13 }
 0x2d6   :  { %v20803_v63 = vpop.eup %20037 }
 0x2d7   :  { %v878_v62 = vsel %vm193_vm2, %v20803_v63, 0.0 }
 0x2d8   :  { %879 = vadd.xlane.f32.xlu0 %v878_v62 }
 0x2da   :  { %v20807_v0 = vpop.eup %20039 }
 0x2db   :  { %v872_v2 = vsel %vm193_vm2, %v20807_v0, 0.0  ;;  %v20820_v28 = vpop.eup %20041 }
 0x2dc   :  { %873 = vadd.xlane.f32.xlu0 %v872_v2  ;;  %v875_v32 = vsel %vm193_vm2, %v20820_v28, 0.0  ;;  %v20824_v33 = vpop.eup %20043 }
 0x2dd   :  { %v881_v7 = vsel %vm193_vm2, %v20824_v33, 0.0 }
 0x2de   :  { %v20826_v1 = vpop.eup %20045 }
 0x2df   :  { %v884_v8 = vsel %vm193_vm2, %v20826_v1, 0.0 }
 0x2e4   :  { %1755 = vrot.lane.b32.xlu1 %v20640_v29, %s20501_s21 }
 0x2e8   :  { %1753 = vrot.lane.b32.xlu1 %v20709_v44, %s20502_s22 }
 0x2f2   :  { %1677 = vrot.lane.b32.xlu0 %v20634_v26, %s20501_s21 }
 0x30c   :  { %876 = vadd.xlane.f32.xlu1 %v875_v32 }
 0x310   :  { %882 = vadd.xlane.f32.xlu1 %v881_v7 }
 0x311   :  { %885 = vadd.xlane.f32.xlu0 %v884_v8 }
 0x321   :  { %1911 = vrot.lane.b32.xlu1 %v20644_v31, %s20501_s21 }
 0x325   :  { %1909 = vrot.lane.b32.xlu1 %v20723_v48, %s20502_s22 }
 0x327   :  { %1675 = vrot.lane.b32.xlu0 %v20697_v41, %s20502_s22 }
 0x329   :  { %2067 = vrot.lane.b32.xlu1 %v20652_v35, %s20501_s21 }
 0x32b   :  { %1833 = vrot.lane.b32.xlu0 %v20642_v30, %s20501_s21 }
 0x32d   :  { %2065 = vrot.lane.b32.xlu1 %v20740_v51, %s20502_s22 }
 0x32f   :  { %1831 = vrot.lane.b32.xlu0 %v20719_v47, %s20502_s22 }
 0x333   :  { %1989 = vrot.lane.b32.xlu0 %v20650_v34, %s20501_s21 }
 0x337   :  { %1987 = vrot.lane.b32.xlu0 %v20737_v50, %s20502_s22 }
 0x358   :  { %v868_v39 = vpop.xlane.xlu0 %867 }
 0x359   :  { %20047 = vrcp.f32 %v868_v39 }
 0x35c   :  { %v865_v42 = vpop.xlane.xlu1 %864 }
 0x35d   :  { %20049 = vrcp.f32 %v865_v42 }
 0x360   :  { %v871_v43 = vpop.xlane.xlu1 %870 }
 0x361   :  { %20051 = vrcp.f32 %v871_v43 }
 0x363   :  { %v20048_v45 = vpop.eup %20047 }
 0x364   :  { %v890_v46 = vmul.f32 %v20048_v45, %v20791_v52 }
 0x365   :  { %v880_v49 = vpop.xlane.xlu0 %879 }
 0x366   :  { %904 = vst.msk [vmem:[#allocation2 + $0x8] sm:$0xff] %vm193_vm2, %v890_v46  ;;  %18937 = vmatmul.mubr.msk.f32.vlgmr.msra.gmra.mrb[14].mxu0 %vm193_vm2, %v890_v46  ;;  %20053 = vrcp.f32 %v880_v49 }
 0x367   :  { %v20050_v53 = vpop.eup %20049  ;;  %18945 = vmatpush3.msra.mxu0 %v20777_v18  ;;  %18946 = vmatprep.mubr.msk.f32.mxu0 %vm20498_vm1, %v24732_v14 }
 0x368   :  { %v888_v55 = vmul.f32 %v20050_v53, %v20795_v58  ;;  %18954 = vmatprep.subr.mxu0 %v24732_v14 }
 0x369   :  { %v874_v56 = vpop.xlane.xlu0 %873 }
 0x36a   :  { %903 = vst.msk [vmem:[#allocation2] sm:$0xff] %vm193_vm2, %v888_v55  ;;  %18932 = vmatmul.mubr.msk.f32.vlgmr.msra.gmra.mrb[10].mxu1 %vm193_vm2, %v888_v55  ;;  %20055 = vrcp.f32 %v874_v56 }
 0x36b   :  { %v20052_v52 = vpop.eup %20051  ;;  %18940 = vmatpush3.msra.mxu1 %v20775_v15  ;;  %18941 = vmatprep.mubr.msk.f32.mxu1 %vm20498_vm1, %v24732_v14 }
 0x36c   :  { %18949 = vmatprep.subr.mxu1 %v24732_v14  ;;  %v892_v18 = vmul.f32 %v20052_v52, %v20799_v60 }
 0x36d   :  { %v1678_v61 = vpop.permute.xlu0 %1677 }
 0x36e   :  { %905 = vst.msk [vmem:[#allocation2 + $0x10] sm:$0xff] %vm193_vm2, %v892_v18  ;;  %18942 = vmatmul.mubr.msk.f32.vlgmr.msra.gmra.mrb[12].mxu1 %vm193_vm2, %v892_v18 }
 0x36f   :  { %18950 = vmatpush3.msra.mxu1 %v20781_v20  ;;  %18951 = vmatprep.mubr.msk.f32.mxu1 %vm20498_vm1, %v24732_v14  ;;  %v1756_v20 = vpop.permute.xlu1 %1755 }
 0x370   :  { %18959 = vmatprep.subr.mxu1 %v24732_v14  ;;  %v20054_v54 = vpop.eup %20053 }
 0x371   :  { %v898_v15 = vmul.f32 %v20054_v54, %v20803_v63 }
 0x373   :  { %908 = vst.msk [vmem:[#allocation2 + $0x28] sm:$0xff] %vm193_vm2, %v898_v15  ;;  %v1754_v59 = vpop.permute.xlu1 %1753 }
 0x374   :  { %v20056_v58 = vpop.eup %20055 }
 0x375   :  { %v894_v57 = vmul.f32 %v20056_v58, %v20807_v0 }
 0x377   :  { %906 = vst.msk [vmem:[#allocation2 + $0x18] sm:$0xff] %vm193_vm2, %v894_v57  ;;  %18947 = vmatmul.mubr.msk.f32.vlgmr.msra.gmra.mrb[16].mxu0 %vm193_vm2, %v894_v57 }
 0x378   :  { %18955 = vmatpush3.msra.mxu0 %v20779_v19  ;;  %18956 = vmatprep.mubr.msk.f32.mxu0 %vm20498_vm1, %v24732_v14 }
 0x379   :  { %18964 = vmatprep.subr.mxu0 %v24732_v14 }
 0x37b   :  { %18957 = vmatmul.mubr.msk.f32.vlgmr.msra.gmra.mrb[18].mxu0 %vm193_vm2, %v898_v15 }
 0x37c   :  { %18965 = vmatpush3.msra.mxu0 %v20783_v22  ;;  %18966 = vmatprep.mubr.msk.f32.mxu0 %vm20498_vm1, %v24732_v14 }
 0x37d   :  { %18974 = vmatprep.subr.mxu0 %v24732_v14 }
 0x399   :  { %v877_v60 = vpop.xlane.xlu1 %876 }
 0x39a   :  { %20057 = vrcp.f32 %v877_v60 }
 0x39d   :  { %v883_v19 = vpop.xlane.xlu1 %882 }
 0x39e   :  { %20059 = vrcp.f32 %v883_v19  ;;  %v886_v63 = vpop.xlane.xlu0 %885 }
 0x39f   :  { %20061 = vrcp.f32 %v886_v63 }
 0x3a1   :  { %v1912_v5 = vpop.permute.xlu1 %1911 }
 0x3a2   :  { %v1676_v0 = vpop.permute.xlu0 %1675 }
 0x3a4   :  { %v20058_v62 = vpop.eup %20057 }
 0x3a5   :  { %v896_v2 = vmul.f32 %v20058_v62, %v20820_v28 }
 0x3a6   :  { %v1834_v6 = vpop.permute.xlu0 %1833 }
 0x3a7   :  { %907 = vst.msk [vmem:[#allocation2 + $0x20] sm:$0xff] %vm193_vm2, %v896_v2  ;;  %18952 = vmatmul.mubr.msk.f32.vlgmr.msra.gmra.mrb[14].mxu1 %vm193_vm2, %v896_v2 }
 0x3a8   :  { %v20060_v22 = vpop.eup %20059  ;;  %18960 = vmatpush3.msra.mxu1 %v20789_v27  ;;  %18961 = vmatprep.mubr.msk.f32.mxu1 %vm20498_vm1, %v24732_v14  ;;  %v1910_v27 = vpop.permute.xlu1 %1909 }
 0x3a9   :  { %v900_v3 = vmul.f32 %v20060_v22, %v20824_v33  ;;  %18969 = vmatprep.subr.mxu1 %v24732_v14  ;;  %v20062_v4 = vpop.eup %20061 }
 0x3aa   :  { %v902_v9 = vmul.f32 %v20062_v4, %v20826_v1  ;;  %v1832_v10 = vpop.permute.xlu0 %1831 }
 0x3ab   :  { %909 = vst.msk [vmem:[#allocation2 + $0x30] sm:$0xff] %vm193_vm2, %v900_v3  ;;  %18962 = vmatmul.mubr.msk.f32.vlgmr.msra.gmra.mrb[16].mxu1 %vm193_vm2, %v900_v3 }
 0x3ac   :  { %18971 = vmatprep.mubr.msk.f32.mxu1 %vm20498_vm1, %v24732_v14  ;;  %910 = vst.msk [vmem:[#allocation2 + $0x38] sm:$0xff] %vm193_vm2, %v902_v9  ;;  %18967 = vmatmul.mubr.msk.f32.vlgmr.msra.gmra.mrb[20].mxu0 %vm193_vm2, %v902_v9 }
 0x3ad   :  { %18975 = vmatpush3.xpose.msk.msra.mxu0 %vm193_vm2, %v20787_v25  ;;  %18976 = vmatprep.mubr.msk.f32.mxu0 %vm20498_vm1, %v24732_v14 }
 0x3ae   :  { %18984 = vmatprep.subr.mxu0 %v24732_v14  ;;  %v1990_v25 = vpop.permute.xlu0 %1989 }
 0x3af   :  { %18970 = vmatpush3.xpose.msk.msra.mxu1 %vm193_vm2, %v20785_v23  ;;  %v2068_v23 = vpop.permute.xlu1 %2067 }
 0x3b0   :  { %18979 = vmatprep.subr.mxu1 %v24732_v14  ;;  %18977 = vmatmul.mubr.msk.f32.vlgmr.msra.gmra.mrb[22].mxu0 %vm193_vm2, %v20852_v38 }
 0x3b1   :  { %18985 = vmatpush3.xpose.msk.msra.mxu0 %vm193_vm2, %v1756_v20  ;;  %18986 = vmatprep.mubr.msk.f32.mxu0 %vm20498_vm1, %v24732_v14 }
 0x3b2   :  { %18972 = vmatmul.mubr.msk.f32.vlgmr.msra.gmra.mrb[18].mxu1 %vm193_vm2, %v20850_v36  ;;  %18994 = vmatprep.subr.mxu0 %v24732_v14  ;;  %v1988_v12 = vpop.permute.xlu0 %1987 }
 0x3b3   :  { %18980 = vmatpush3.xpose.msk.msra.mxu1 %vm193_vm2, %v1678_v61  ;;  %18981 = vmatprep.mubr.msk.f32.mxu1 %vm20498_vm1, %v24732_v14  ;;  %v2066_v11 = vpop.permute.xlu1 %2065 }
 0x3b4   :  { %18987 = vmatmul.mubr.msk.f32.vlgmr.msra.gmra.mrb[24].mxu0 %vm193_vm2, %v1754_v59  ;;  %18989 = vmatprep.subr.mxu1 %v24732_v14 }
 0x3b5   :  { %18995 = vmatpush3.xpose.msk.msra.mxu0 %vm193_vm2, %v1912_v5  ;;  %18996 = vmatprep.mubr.msk.f32.mxu0 %vm20498_vm1, %v24732_v14 }
 0x3b6   :  { %18982 = vmatmul.mubr.msk.f32.vlgmr.msra.gmra.mrb[20].mxu1 %vm193_vm2, %v1676_v0  ;;  %19004 = vmatprep.subr.mxu0 %v24732_v14 }
 0x3b7   :  { %18990 = vmatpush3.xpose.msk.msra.mxu1 %vm193_vm2, %v1834_v6  ;;  %18991 = vmatprep.mubr.msk.f32.mxu1 %vm20498_vm1, %v24732_v14 }
 0x3b8   :  { %18997 = vmatmul.mubr.msk.f32.vlgmr.msra.gmra.mrb[26].mxu0 %vm193_vm2, %v1910_v27  ;;  %18999 = vmatprep.subr.mxu1 %v24732_v14 }
 0x3b9   :  { %19005 = vmatpush3.xpose.msk.msra.mxu0 %vm193_vm2, %v2068_v23  ;;  %19006 = vmatprep.mubr.msk.f32.mxu0 %vm20498_vm1, %v24732_v14 }
 0x3ba   :  { %18992 = vmatmul.mubr.msk.f32.vlgmr.msra.gmra.mrb[22].mxu1 %vm193_vm2, %v1832_v10  ;;  %19014 = vmatprep.subr.mxu0 %v24732_v14 }
 0x3bb   :  { %19000 = vmatpush3.xpose.msk.msra.mxu1 %vm193_vm2, %v1990_v25  ;;  %19001 = vmatprep.mubr.msk.f32.mxu1 %vm20498_vm1, %v24732_v14 }
 0x3bc   :  { %19009 = vmatprep.subr.mxu1 %v24732_v14  ;;  %19007 = vmatmul.mubr.msk.f32.vlgmr.msra.gmra.mrb[28].mxu0 %vm193_vm2, %v2066_v11 }
 0x3bd   :  { %19016 = vmatprep.mubr.msk.f32.mxu0 %vm20498_vm1, %v24732_v14 }
 0x3be   :  { %19002 = vmatmul.mubr.msk.f32.vlgmr.msra.gmra.mrb[24].mxu1 %vm193_vm2, %v1988_v12 }
 0x3bf   :  { %19011 = vmatprep.mubr.msk.f32.mxu1 %vm20498_vm1, %v24732_v14 }
 0x439   :  { %v20950_v13 = vpop.f32.mrb[14].mxu0 }
 0x43a   :  { %v18938_v28 = vpop.f32.mrb[15].mxu0 }
 0x43d   :  { %v20952_v32 = vpop.f32.mrb[10].mxu1 }
 0x43e   :  { %v18933_v33 = vpop.f32.mrb[11].mxu1 }
 0x441   :  { %v20954_v1 = vpop.f32.mrb[12].mxu1 }
 0x442   :  { %v18943_v7 = vpop.f32.mrb[13].mxu1 }
 0x44a   :  { %v20956_v8 = vpop.f32.mrb[16].mxu0 }
 0x44b   :  { %v18948_v36 = vpop.f32.mrb[17].mxu0 }
 0x44e   :  { %v20958_v38 = vpop.f32.mrb[18].mxu0 }
 0x44f   :  { %v18958_v39 = vpop.f32.mrb[19].mxu0 }
 0x47a   :  { %v20960_v42 = vpop.f32.mrb[14].mxu1 }
 0x47b   :  { %v18953_v43 = vpop.f32.mrb[15].mxu1 }
 0x47e   :  { %v20962_v45 = vpop.f32.mrb[16].mxu1 }
 0x47f   :  { %v18963_v46 = vpop.f32.mrb[17].mxu1  ;;  %v20964_v49 = vpop.f32.mrb[20].mxu0 }
 0x480   :  { %v18968_v53 = vpop.f32.mrb[21].mxu0 }
 0x483   :  { %v1671_v55 = vpop.f32.mrb[22].mxu0 }
 0x484   :  { %v18978_v52 = vpop.f32.mrb[23].mxu0  ;;  %v2146_v18 = vsel %vm193_vm2, %v1671_v55, -inf }
 0x485   :  { %v1593_v56 = vpop.f32.mrb[18].mxu1  ;;  %2147 = vmax.xlane.f32.xlu1 %v2146_v18 }
 0x486   :  { %v18973_v54 = vpop.f32.mrb[19].mxu1  ;;  %v2143_v15 = vsel %vm193_vm2, %v1593_v56, -inf }
 0x487   :  { %2144 = vmax.xlane.f32.xlu0 %v2143_v15  ;;  %v1827_v58 = vpop.f32.mrb[24].mxu0 }
 0x488   :  { %v18988_v20 = vpop.f32.mrb[25].mxu0  ;;  %v2152_v2 = vsel %vm193_vm2, %v1827_v58, -inf }
 0x489   :  { %v1749_v57 = vpop.f32.mrb[20].mxu1 }
 0x48a   :  { %v18983_v59 = vpop.f32.mrb[21].mxu1  ;;  %v2149_v60 = vsel %vm193_vm2, %v1749_v57, -inf }
 0x48b   :  { %2150 = vmax.xlane.f32.xlu0 %v2149_v60  ;;  %v1983_v61 = vpop.f32.mrb[26].mxu0 }
 0x48c   :  { %v18998_v63 = vpop.f32.mrb[27].mxu0  ;;  %v2158_v6 = vsel %vm193_vm2, %v1983_v61, -inf }
 0x48d   :  { %v1905_v19 = vpop.f32.mrb[22].mxu1 }
 0x48e   :  { %v18993_v62 = vpop.f32.mrb[23].mxu1  ;;  %v2155_v0 = vsel %vm193_vm2, %v1905_v19, -inf }
 0x48f   :  { %2156 = vmax.xlane.f32.xlu1 %v2155_v0  ;;  %2153 = vmax.xlane.f32.xlu0 %v2152_v2  ;;  %v20971_v22 = vpop.f32.mrb[28].mxu0 }
 0x490   :  { %v19008_v4 = vpop.f32.mrb[29].mxu0  ;;  %v2164_v9 = vsel %vm193_vm2, %v20971_v22, -inf }
 0x491   :  { %v20973_v3 = vpop.f32.mrb[24].mxu1 }
 0x492   :  { %v19003_v5 = vpop.f32.mrb[25].mxu1  ;;  %v2161_v27 = vsel %vm193_vm2, %v20973_v3, -inf }
 0x493   :  { %2159 = vmax.xlane.f32.xlu0 %v2158_v6 }
 0x497   :  { %2165 = vmax.xlane.f32.xlu0 %v2164_v9 }
 0x4a0   :  { %2240 = vrot.lane.b32.xlu1 %v20632_v24, %s20503_s23 }
 0x4ad   :  { %2316 = vrot.lane.b32.xlu0 %v20628_v21, %s20503_s23 }
 0x4b1   :  { %2544 = vrot.lane.b32.xlu0 %v20642_v30, %s20503_s23 }
 0x4b5   :  { %2696 = vrot.lane.b32.xlu0 %v20650_v34, %s20503_s23 }
 0x4b9   :  { %2850 = vrot.lane.b32.xlu0 %v20632_v24, %s20504_s24 }
 0x4bd   :  { %2848 = vrot.lane.b32.xlu0 %v20692_v40, %s20505_s25 }
 0x4c1   :  { %3006 = vrot.lane.b32.xlu0 %v20634_v26, %s20504_s24 }
 0x4c4   :  { %2162 = vmax.xlane.f32.xlu1 %v2161_v27 }
 0x4d5   :  { %2392 = vrot.lane.b32.xlu1 %v20634_v26, %s20503_s23 }
 0x4d9   :  { %2468 = vrot.lane.b32.xlu1 %v20640_v29, %s20503_s23 }
 0x4dd   :  { %2620 = vrot.lane.b32.xlu1 %v20644_v31, %s20503_s23 }
 0x4e1   :  { %2772 = vrot.lane.b32.xlu1 %v20652_v35, %s20503_s23 }
 0x4e5   :  { %2928 = vrot.lane.b32.xlu1 %v20628_v21, %s20504_s24 }
 0x4e9   :  { %2926 = vrot.lane.b32.xlu1 %v20682_v37, %s20505_s25 }
 0x4ed   :  { %3084 = vrot.lane.b32.xlu1 %v20640_v29, %s20504_s24 }
 0x512   :  { %v2148_v10 = vpop.xlane.xlu1 %2147 }
 0x513   :  { %v2168_v23 = vsub.f32 %v1671_v55, %v2148_v10 }
 0x514   :  { %v2145_v25 = vpop.xlane.xlu0 %2144 }
 0x515   :  { %v2167_v11 = vsub.f32 %v1593_v56, %v2145_v25  ;;  %v2177_v12 = vmul.f32 1.442695, %v2168_v23 }
 0x517   :  { %v2175_v28 = vmul.f32 1.442695, %v2167_v11  ;;  %20063 = vpow2.f32 %v2177_v12 }
 0x518   :  { %v2151_v33 = vpop.xlane.xlu0 %2150 }
 0x519   :  { %20065 = vpow2.f32 %v2175_v28  ;;  %v2169_v7 = vsub.f32 %v1749_v57, %v2151_v33 }
 0x51b   :  { %v2179_v36 = vmul.f32 1.442695, %v2169_v7 }
 0x51c   :  { %v2157_v39 = vpop.xlane.xlu1 %2156  ;;  %v2154_v43 = vpop.xlane.xlu0 %2153 }
 0x51d   :  { %20067 = vpow2.f32 %v2179_v36  ;;  %v2171_v46 = vsub.f32 %v1905_v19, %v2157_v39  ;;  %v2170_v53 = vsub.f32 %v1827_v58, %v2154_v43 }
 0x51f   :  { %v2183_v52 = vmul.f32 1.442695, %v2171_v46  ;;  %v2181_v18 = vmul.f32 1.442695, %v2170_v53 }
 0x520   :  { %v2241_v54 = vpop.permute.xlu1 %2240  ;;  %v2160_v15 = vpop.xlane.xlu0 %2159 }
 0x521   :  { %20069 = vpow2.f32 %v2183_v52  ;;  %v2172_v55 = vsub.f32 %v1983_v61, %v2160_v15  ;;  %19010 = vmatpush3.msra.mxu1 %v2241_v54  ;;  %v21008_v56 = vpop.eup %20063 }
 0x522   :  { %20071 = vpow2.f32 %v2181_v18  ;;  %19019 = vmatprep.subr.mxu1 %v24732_v14  ;;  %v2194_v59 = vsel %vm193_vm2, %v21008_v56, 0.0 }
 0x523   :  { %v21011_v20 = vpop.eup %20065  ;;  %v2185_v57 = vmul.f32 1.442695, %v2172_v55  ;;  %2195 = vadd.xlane.f32.xlu0 %v2194_v59 }
 0x524   :  { %v2166_v58 = vpop.xlane.xlu0 %2165  ;;  %v2191_v60 = vsel %vm193_vm2, %v21011_v20, 0.0 }
 0x525   :  { %20073 = vpow2.f32 %v2185_v57  ;;  %v2174_v61 = vsub.f32 %v20971_v22, %v2166_v58  ;;  %2192 = vadd.xlane.f32.xlu1 %v2191_v60 }
 0x527   :  { %v21018_v19 = vpop.eup %20067  ;;  %v2189_v63 = vmul.f32 1.442695, %v2174_v61 }
 0x528   :  { %v2317_v62 = vpop.permute.xlu0 %2316  ;;  %v2197_v0 = vsel %vm193_vm2, %v21018_v19, 0.0 }
 0x529   :  { %20075 = vpow2.f32 %v2189_v63  ;;  %2198 = vadd.xlane.f32.xlu1 %v2197_v0  ;;  %19015 = vmatpush3.msra.mxu0 %v2317_v62 }
 0x52a   :  { %19024 = vmatprep.subr.mxu0 %v24732_v14 }
 0x52b   :  { %v21023_v2 = vpop.eup %20069 }
 0x52c   :  { %v21025_v4 = vpop.eup %20071  ;;  %v2203_v22 = vsel %vm193_vm2, %v21023_v2, 0.0  ;;  %v2545_v7 = vpop.permute.xlu0 %2544 }
 0x52d   :  { %2204 = vadd.xlane.f32.xlu1 %v2203_v22  ;;  %v2200_v5 = vsel %vm193_vm2, %v21025_v4, 0.0 }
 0x52e   :  { %2201 = vadd.xlane.f32.xlu0 %v2200_v5 }
 0x52f   :  { %v21031_v6 = vpop.eup %20073 }
 0x530   :  { %v2206_v9 = vsel %vm193_vm2, %v21031_v6, 0.0  ;;  %v2697_v39 = vpop.permute.xlu0 %2696 }
 0x532   :  { %2207 = vadd.xlane.f32.xlu0 %v2206_v9 }
 0x533   :  { %v21035_v27 = vpop.eup %20075 }
 0x534   :  { %v2212_v10 = vsel %vm193_vm2, %v21035_v27, 0.0  ;;  %v21080_v46 = vpop.permute.xlu0 %2850 }
 0x536   :  { %2213 = vadd.xlane.f32.xlu0 %v2212_v10 }
 0x538   :  { %v21084_v52 = vpop.permute.xlu0 %2848 }
 0x53c   :  { %v21088_v54 = vpop.permute.xlu0 %3006 }
 0x54c   :  { %3004 = vrot.lane.b32.xlu0 %v20697_v41, %s20505_s25 }
 0x550   :  { %3162 = vrot.lane.b32.xlu0 %v20642_v30, %s20504_s24 }
 0x551   :  { %v2163_v23 = vpop.xlane.xlu1 %2162 }
 0x552   :  { %v2173_v25 = vsub.f32 %v20973_v3, %v2163_v23 }
 0x554   :  { %v2187_v11 = vmul.f32 1.442695, %v2173_v25  ;;  %3160 = vrot.lane.b32.xlu0 %v20719_v47, %s20505_s25 }
 0x555   :  { %v2393_v28 = vpop.permute.xlu1 %2392 }
 0x556   :  { %20077 = vpow2.f32 %v2187_v11 }
 0x558   :  { %3318 = vrot.lane.b32.xlu0 %v20650_v34, %s20504_s24 }
 0x559   :  { %v2469_v33 = vpop.permute.xlu1 %2468 }
 0x55c   :  { %3316 = vrot.lane.b32.xlu0 %v20737_v50, %s20505_s25 }
 0x55d   :  { %v2621_v36 = vpop.permute.xlu1 %2620 }
 0x560   :  { %v21050_v12 = vpop.eup %20077  ;;  %3645 = vrot.lane.b32.xlu0 %v20628_v21, %s20506_s26 }
 0x561   :  { %v2209_v3 = vsel %vm193_vm2, %v21050_v12, 0.0  ;;  %v2773_v43 = vpop.permute.xlu1 %2772 }
 0x562   :  { %2210 = vadd.xlane.f32.xlu1 %v2209_v3 }
 0x564   :  { %3873 = vrot.lane.b32.xlu0 %v20642_v30, %s20506_s26 }
 0x565   :  { %v21082_v53 = vpop.permute.xlu1 %2928 }
 0x568   :  { %4025 = vrot.lane.b32.xlu0 %v20650_v34, %s20506_s26 }
 0x569   :  { %v21086_v18 = vpop.permute.xlu1 %2926 }
 0x56d   :  { %v21090_v15 = vpop.permute.xlu1 %3084 }
 0x573   :  { %3082 = vrot.lane.b32.xlu1 %v20709_v44, %s20505_s25 }
 0x577   :  { %3240 = vrot.lane.b32.xlu1 %v20644_v31, %s20504_s24 }
 0x57b   :  { %3238 = vrot.lane.b32.xlu1 %v20723_v48, %s20505_s25 }
 0x57f   :  { %3396 = vrot.lane.b32.xlu1 %v20652_v35, %s20504_s24 }
 0x583   :  { %3394 = vrot.lane.b32.xlu1 %v20740_v51, %s20505_s25 }
 0x587   :  { %3569 = vrot.lane.b32.xlu1 %v20632_v24, %s20506_s26 }
 0x58b   :  { %3721 = vrot.lane.b32.xlu1 %v20634_v26, %s20506_s26 }
 0x58f   :  { %3797 = vrot.lane.b32.xlu1 %v20640_v29, %s20506_s26 }
 0x593   :  { %3949 = vrot.lane.b32.xlu1 %v20644_v31, %s20506_s26 }
 0x597   :  { %4101 = vrot.lane.b32.xlu1 %v20652_v35, %s20506_s26 }
 0x5b0   :  { %v2196_v55 = vpop.xlane.xlu0 %2195 }
 0x5b1   :  { %20079 = vrcp.f32 %v2196_v55 }
 0x5b2   :  { %v2193_v57 = vpop.xlane.xlu1 %2192 }
 0x5b3   :  { %20081 = vrcp.f32 %v2193_v57 }
 0x5b6   :  { %v2199_v59 = vpop.xlane.xlu1 %2198 }
 0x5b7   :  { %20083 = vrcp.f32 %v2199_v59 }
 0x5ba   :  { %v2205_v58 = vpop.xlane.xlu1 %2204 }
 0x5bb   :  { %20085 = vrcp.f32 %v2205_v58  ;;  %v2202_v60 = vpop.xlane.xlu0 %2201  ;;  %v20080_v61 = vpop.eup %20079 }
 0x5bc   :  { %20087 = vrcp.f32 %v2202_v60  ;;  %v2218_v62 = vmul.f32 %v20080_v61, %v21008_v56 }
 0x5bd   :  { %v20082_v63 = vpop.eup %20081 }
 0x5be   :  { %v2216_v0 = vmul.f32 %v20082_v63, %v21011_v20  ;;  %2233 = vst.msk [vmem:[#allocation2 + $0x48] sm:$0xff] %vm193_vm2, %v2218_v62  ;;  %19017 = vmatmul.mubr.msk.f32.vlgmr.msra.gmra.mrb[30].mxu0 %vm193_vm2, %v2218_v62 }
 0x5bf   :  { %v2208_v22 = vpop.xlane.xlu0 %2207  ;;  %19025 = vmatpush3.msra.mxu0 %v2469_v33  ;;  %19026 = vmatprep.mubr.msk.f32.mxu0 %vm20498_vm1, %v24732_v14 }
 0x5c0   :  { %20089 = vrcp.f32 %v2208_v22  ;;  %2232 = vst.msk [vmem:[#allocation2 + $0x40] sm:$0xff] %vm193_vm2, %v2216_v0  ;;  %19012 = vmatmul.mubr.msk.f32.vlgmr.msra.gmra.mrb[26].mxu1 %vm193_vm2, %v2216_v0  ;;  %19034 = vmatprep.subr.mxu0 %v24732_v14 }
 0x5c1   :  { %v20084_v5 = vpop.eup %20083  ;;  %19020 = vmatpush3.msra.mxu1 %v2393_v28  ;;  %19021 = vmatprep.mubr.msk.f32.mxu1 %vm20498_vm1, %v24732_v14 }
 0x5c2   :  { %19029 = vmatprep.subr.mxu1 %v24732_v14  ;;  %v2220_v56 = vmul.f32 %v20084_v5, %v21018_v19 }
 0x5c3   :  { %v2214_v20 = vpop.xlane.xlu0 %2213 }
 0x5c4   :  { %20091 = vrcp.f32 %v2214_v20  ;;  %2234 = vst.msk [vmem:[#allocation2 + $0x50] sm:$0xff] %vm193_vm2, %v2220_v56  ;;  %19022 = vmatmul.mubr.msk.f32.vlgmr.msra.gmra.mrb[28].mxu1 %vm193_vm2, %v2220_v56 }
 0x5c5   :  { %v20086_v9 = vpop.eup %20085  ;;  %19030 = vmatpush3.msra.mxu1 %v2545_v7  ;;  %19031 = vmatprep.mubr.msk.f32.mxu1 %vm20498_vm1, %v24732_v14 }
 0x5c6   :  { %v20088_v10 = vpop.eup %20087  ;;  %19039 = vmatprep.subr.mxu1 %v24732_v14  ;;  %v2224_v19 = vmul.f32 %v20086_v9, %v21023_v2 }
 0x5c7   :  { %v2222_v23 = vmul.f32 %v20088_v10, %v21025_v4 }
 0x5c8   :  { %2236 = vst.msk [vmem:[#allocation2 + $0x60] sm:$0xff] %vm193_vm2, %v2224_v19  ;;  %19032 = vmatmul.mubr.msk.f32.vlgmr.msra.gmra.mrb[30].mxu1 %vm193_vm2, %v2224_v19 }
 0x5c9   :  { %2235 = vst.msk [vmem:[#allocation2 + $0x58] sm:$0xff] %vm193_vm2, %v2222_v23  ;;  %19027 = vmatmul.mubr.msk.f32.vlgmr.msra.gmra.mrb[32].mxu0 %vm193_vm2, %v2222_v23  ;;  %19040 = vmatpush3.msra.mxu1 %v2697_v39 }
 0x5ca   :  { %v20090_v25 = vpop.eup %20089  ;;  %19035 = vmatpush3.msra.mxu0 %v2621_v36  ;;  %19036 = vmatprep.mubr.msk.f32.mxu0 %vm20498_vm1, %v24732_v14 }
 0x5cb   :  { %19044 = vmatprep.subr.mxu0 %v24732_v14  ;;  %v2226_v2 = vmul.f32 %v20090_v25, %v21031_v6  ;;  %19041 = vmatprep.mubr.msk.f32.mxu1 %vm20498_vm1, %v24732_v14  ;;  %v3005_v6 = vpop.permute.xlu0 %3004 }
 0x5cc   :  { %19049 = vmatprep.subr.mxu1 %v24732_v14 }
 0x5cd   :  { %2237 = vst.msk [vmem:[#allocation2 + $0x68] sm:$0xff] %vm193_vm2, %v2226_v2  ;;  %19037 = vmatmul.mubr.msk.f32.vlgmr.msra.gmra.mrb[34].mxu0 %vm193_vm2, %v2226_v2 }
 0x5ce   :  { %v20092_v4 = vpop.eup %20091  ;;  %19045 = vmatpush3.msra.mxu0 %v2773_v43  ;;  %19046 = vmatprep.mubr.msk.f32.mxu0 %vm20498_vm1, %v24732_v14 }
 0x5cf   :  { %v2230_v11 = vmul.f32 %v20092_v4, %v21035_v27  ;;  %19054 = vmatprep.subr.mxu0 %v24732_v14  ;;  %v3163_v27 = vpop.permute.xlu0 %3162 }
 0x5d1   :  { %2239 = vst.msk [vmem:[#allocation2 + $0x78] sm:$0xff] %vm193_vm2, %v2230_v11  ;;  %19047 = vmatmul.mubr.msk.f32.vlgmr.msra.gmra.mrb[36].mxu0 %vm193_vm2, %v2230_v11 }
 0x5d2   :  { %19056 = vmatprep.mubr.msk.f32.mxu0 %vm20498_vm1, %v24732_v14 }
 0x5d3   :  { %v3161_v28 = vpop.permute.xlu0 %3160 }
 0x5d5   :  { %19055 = vmatpush3.xpose.msk.msra.mxu0 %vm193_vm2, %v21082_v53 }
 0x5d6   :  { %19064 = vmatprep.subr.mxu0 %v24732_v14 }
 0x5d7   :  { %v3319_v36 = vpop.permute.xlu0 %3318 }
 0x5d8   :  { %19057 = vmatmul.mubr.msk.f32.vlgmr.msra.gmra.mrb[38].mxu0 %vm193_vm2, %v21086_v18 }
 0x5d9   :  { %19065 = vmatpush3.xpose.msk.msra.mxu0 %vm193_vm2, %v21090_v15  ;;  %19066 = vmatprep.mubr.msk.f32.mxu0 %vm20498_vm1, %v24732_v14 }
 0x5da   :  { %19074 = vmatprep.subr.mxu0 %v24732_v14 }
 0x5db   :  { %v3317_v18 = vpop.permute.xlu0 %3316 }
 0x5ef   :  { %v2211_v3 = vpop.xlane.xlu1 %2210 }
 0x5f0   :  { %20093 = vrcp.f32 %v2211_v3 }
 0x5f3   :  { %v3083_v33 = vpop.permute.xlu1 %3082 }
 0x5f4   :  { %19067 = vmatmul.mubr.msk.f32.vlgmr.msra.gmra.mrb[40].mxu0 %vm193_vm2, %v3083_v33 }
 0x5f5   :  { %19076 = vmatprep.mubr.msk.f32.mxu0 %vm20498_vm1, %v24732_v14 }
 0x5f7   :  { %v3241_v7 = vpop.permute.xlu1 %3240 }
 0x5f8   :  { %19075 = vmatpush3.xpose.msk.msra.mxu0 %vm193_vm2, %v3241_v7 }
 0x5f9   :  { %19084 = vmatprep.subr.mxu0 %v24732_v14 }
 0x5fa   :  { %v20094_v39 = vpop.eup %20093 }
 0x5fb   :  { %v3239_v43 = vpop.permute.xlu1 %3238  ;;  %v2228_v53 = vmul.f32 %v20094_v39, %v21050_v12 }
 0x5fc   :  { %19077 = vmatmul.mubr.msk.f32.vlgmr.msra.gmra.mrb[42].mxu0 %vm193_vm2, %v3239_v43 }
 0x5fd   :  { %2238 = vst.msk [vmem:[#allocation2 + $0x70] sm:$0xff] %vm193_vm2, %v2228_v53  ;;  %19042 = vmatmul.mubr.msk.f32.vlgmr.msra.gmra.mrb[32].mxu1 %vm193_vm2, %v2228_v53  ;;  %19086 = vmatprep.mubr.msk.f32.mxu0 %vm20498_vm1, %v24732_v14 }
 0x5fe   :  { %19050 = vmatpush3.xpose.msk.msra.mxu1 %vm193_vm2, %v21080_v46  ;;  %19051 = vmatprep.mubr.msk.f32.mxu1 %vm20498_vm1, %v24732_v14  ;;  %v3646_v46 = vpop.permute.xlu0 %3645 }
 0x5ff   :  { %v3397_v15 = vpop.permute.xlu1 %3396  ;;  %19059 = vmatprep.subr.mxu1 %v24732_v14 }
 0x600   :  { %19085 = vmatpush3.xpose.msk.msra.mxu0 %vm193_vm2, %v3397_v15 }
 0x601   :  { %19052 = vmatmul.mubr.msk.f32.vlgmr.msra.gmra.mrb[34].mxu1 %vm193_vm2, %v21084_v52  ;;  %19094 = vmatprep.subr.mxu0 %v24732_v14 }
 0x602   :  { %19060 = vmatpush3.xpose.msk.msra.mxu1 %vm193_vm2, %v21088_v54  ;;  %19061 = vmatprep.mubr.msk.f32.mxu1 %vm20498_vm1, %v24732_v14 }
 0x603   :  { %v3395_v12 = vpop.permute.xlu1 %3394  ;;  %19069 = vmatprep.subr.mxu1 %v24732_v14 }
 0x604   :  { %19087 = vmatmul.mubr.msk.f32.vlgmr.msra.gmra.mrb[44].mxu0 %vm193_vm2, %v3395_v12 }
 0x605   :  { %19095 = vmatpush3.msra.mxu0 %v3646_v46  ;;  %19062 = vmatmul.mubr.msk.f32.vlgmr.msra.gmra.mrb[36].mxu1 %vm193_vm2, %v3005_v6 }
 0x606   :  { %19070 = vmatpush3.xpose.msk.msra.mxu1 %vm193_vm2, %v3163_v27  ;;  %19071 = vmatprep.mubr.msk.f32.mxu1 %vm20498_vm1, %v24732_v14 }
 0x607   :  { %19079 = vmatprep.subr.mxu1 %v24732_v14  ;;  %19096 = vmatprep.mubr.msk.f32.mxu0 %vm20498_vm1, %v24732_v14  ;;  %v3570_v52 = vpop.permute.xlu1 %3569 }
 0x608   :  { %19104 = vmatprep.subr.mxu0 %v24732_v14 }
 0x609   :  { %19072 = vmatmul.mubr.msk.f32.vlgmr.msra.gmra.mrb[38].mxu1 %vm193_vm2, %v3161_v28 }
 0x60a   :  { %19080 = vmatpush3.xpose.msk.msra.mxu1 %vm193_vm2, %v3319_v36  ;;  %19081 = vmatprep.mubr.msk.f32.mxu1 %vm20498_vm1, %v24732_v14 }
 0x60b   :  { %19089 = vmatprep.subr.mxu1 %v24732_v14 }
 0x60d   :  { %19082 = vmatmul.mubr.msk.f32.vlgmr.msra.gmra.mrb[40].mxu1 %vm193_vm2, %v3317_v18 }
 0x60e   :  { %19090 = vmatpush3.msra.mxu1 %v3570_v52  ;;  %19091 = vmatprep.mubr.msk.f32.mxu1 %vm20498_vm1, %v24732_v14 }
 0x60f   :  { %19099 = vmatprep.subr.mxu1 %v24732_v14 }
 0x691   :  { %v21186_v54 = vpop.f32.mrb[30].mxu0 }
 0x692   :  { %v19018_v57 = vpop.f32.mrb[31].mxu0 }
 0x693   :  { %v21188_v55 = vpop.f32.mrb[26].mxu1 }
 0x694   :  { %v19013_v59 = vpop.f32.mrb[27].mxu1 }
 0x697   :  { %v21190_v58 = vpop.f32.mrb[28].mxu1 }
 0x698   :  { %v19023_v60 = vpop.f32.mrb[29].mxu1 }
 0x69b   :  { %v21192_v61 = vpop.f32.mrb[30].mxu1 }
 0x69c   :  { %v21194_v63 = vpop.f32.mrb[32].mxu0  ;;  %v19033_v62 = vpop.f32.mrb[31].mxu1 }
 0x69d   :  { %v19028_v0 = vpop.f32.mrb[33].mxu0  ;;  %v21223_v62 = vpop.permute.xlu1 %3721 }
 0x6a0   :  { %v21196_v22 = vpop.f32.mrb[34].mxu0 }
 0x6a1   :  { %v19038_v5 = vpop.f32.mrb[35].mxu0  ;;  %v21225_v0 = vpop.permute.xlu1 %3797 }
 0x6a4   :  { %v21198_v56 = vpop.f32.mrb[36].mxu0 }
 0x6a5   :  { %v19048_v20 = vpop.f32.mrb[37].mxu0  ;;  %v21227_v5 = vpop.permute.xlu1 %3949 }
 0x6a9   :  { %v21229_v20 = vpop.permute.xlu1 %4101 }
 0x6ab   :  { %v3000_v9 = vpop.f32.mrb[38].mxu0 }
 0x6ac   :  { %v19058_v10 = vpop.f32.mrb[39].mxu0  ;;  %v3475_v19 = vsel %vm193_vm2, %v3000_v9, -inf }
 0x6ad   :  { %3476 = vmax.xlane.f32.xlu1 %v3475_v19 }
 0x6c7   :  { %v3156_v23 = vpop.f32.mrb[40].mxu0 }
 0x6c8   :  { %v19068_v25 = vpop.f32.mrb[41].mxu0  ;;  %v3481_v12 = vsel %vm193_vm2, %v3156_v23, -inf }
 0x6cf   :  { %v21201_v2 = vpop.f32.mrb[42].mxu0 }
 0x6d0   :  { %v21203_v4 = vpop.f32.mrb[32].mxu1  ;;  %v19078_v11 = vpop.f32.mrb[43].mxu0  ;;  %v3487_v59 = vsel %vm193_vm2, %v21201_v2, -inf }
 0x6d1   :  { %v19043_v6 = vpop.f32.mrb[33].mxu1 }
 0x6d4   :  { %v2922_v27 = vpop.f32.mrb[34].mxu1 }
 0x6d5   :  { %v19053_v3 = vpop.f32.mrb[35].mxu1  ;;  %v3472_v28 = vsel %vm193_vm2, %v2922_v27, -inf }
 0x6d6   :  { %3473 = vmax.xlane.f32.xlu0 %v3472_v28  ;;  %v21235_v3 = vpop.permute.xlu0 %3873 }
 0x6d7   :  { %v21206_v33 = vpop.f32.mrb[44].mxu0 }
 0x6d8   :  { %v3078_v7 = vpop.f32.mrb[36].mxu1  ;;  %v19088_v36 = vpop.f32.mrb[45].mxu0  ;;  %v3493_v60 = vsel %vm193_vm2, %v21206_v33, -inf }
 0x6d9   :  { %v19063_v39 = vpop.f32.mrb[37].mxu1  ;;  %v3478_v43 = vsel %vm193_vm2, %v3078_v7, -inf }
 0x6da   :  { %3479 = vmax.xlane.f32.xlu0 %v3478_v43  ;;  %v21237_v28 = vpop.permute.xlu0 %4025 }
 0x6dc   :  { %v3234_v53 = vpop.f32.mrb[38].mxu1 }
 0x6dd   :  { %v19073_v18 = vpop.f32.mrb[39].mxu1  ;;  %v3484_v15 = vsel %vm193_vm2, %v3234_v53, -inf }
 0x6de   :  { %3485 = vmax.xlane.f32.xlu1 %v3484_v15  ;;  %3482 = vmax.xlane.f32.xlu0 %v3481_v12 }
 0x6e0   :  { %v21211_v46 = vpop.f32.mrb[40].mxu1 }
 0x6e1   :  { %v19083_v52 = vpop.f32.mrb[41].mxu1  ;;  %v3490_v57 = vsel %vm193_vm2, %v21211_v46, -inf }
 0x6e2   :  { %3491 = vmax.xlane.f32.xlu1 %v3490_v57  ;;  %3488 = vmax.xlane.f32.xlu0 %v3487_v59 }
 0x6e6   :  { %3494 = vmax.xlane.f32.xlu0 %v3493_v60 }
 0x6f3   :  { %4257 = vrot.lane.b32.xlu1 %v20628_v21, %s20507_s27 }
 0x6fc   :  { %4179 = vrot.lane.b32.xlu0 %v20632_v24, %s20507_s27 }
 0x73a   :  { %v3477_v10 = vpop.xlane.xlu1 %3476 }
 0x73b   :  { %v3497_v19 = vsub.f32 %v3000_v9, %v3477_v10 }
 0x73d   :  { %v3506_v25 = vmul.f32 1.442695, %v3497_v19 }
 0x73f   :  { %20095 = vpow2.f32 %v3506_v25 }
 0x749   :  { %v21231_v11 = vpop.eup %20095 }
 0x74a   :  { %v3523_v6 = vsel %vm193_vm2, %v21231_v11, 0.0 }
 0x74b   :  { %3524 = vadd.xlane.f32.xlu0 %v3523_v6 }
 0x763   :  { %v3474_v36 = vpop.xlane.xlu0 %3473 }
 0x764   :  { %v3496_v39 = vsub.f32 %v2922_v27, %v3474_v36 }
 0x766   :  { %v3504_v43 = vmul.f32 1.442695, %v3496_v39 }
 0x767   :  { %v3480_v18 = vpop.xlane.xlu0 %3479 }
 0x768   :  { %20097 = vpow2.f32 %v3504_v43  ;;  %v3498_v15 = vsub.f32 %v3078_v7, %v3480_v18 }
 0x76a   :  { %v3508_v12 = vmul.f32 1.442695, %v3498_v15 }
 0x76b   :  { %v3486_v9 = vpop.xlane.xlu1 %3485  ;;  %v3483_v52 = vpop.xlane.xlu0 %3482 }
 0x76c   :  { %20099 = vpow2.f32 %v3508_v12  ;;  %v3500_v57 = vsub.f32 %v3234_v53, %v3486_v9  ;;  %v3499_v59 = vsub.f32 %v3156_v23, %v3483_v52 }
 0x76e   :  { %v3512_v60 = vmul.f32 1.442695, %v3500_v57  ;;  %v3510_v10 = vmul.f32 1.442695, %v3499_v59 }
 0x76f   :  { %v3489_v19 = vpop.xlane.xlu0 %3488  ;;  %v3492_v12 = vpop.xlane.xlu1 %3491 }
 0x770   :  { %20101 = vpow2.f32 %v3512_v60  ;;  %v3501_v25 = vsub.f32 %v21201_v2, %v3489_v19  ;;  %v3502_v9 = vsub.f32 %v21211_v46, %v3492_v12 }
 0x771   :  { %20103 = vpow2.f32 %v3510_v10 }
 0x772   :  { %v21240_v6 = vpop.eup %20097  ;;  %v3514_v27 = vmul.f32 1.442695, %v3501_v25  ;;  %v3516_v57 = vmul.f32 1.442695, %v3502_v9 }
 0x773   :  { %v3520_v36 = vsel %vm193_vm2, %v21240_v6, 0.0  ;;  %v3495_v52 = vpop.xlane.xlu0 %3494 }
 0x774   :  { %3521 = vadd.xlane.f32.xlu1 %v3520_v36  ;;  %20105 = vpow2.f32 %v3514_v27  ;;  %v3503_v59 = vsub.f32 %v21206_v33, %v3495_v52 }
 0x775   :  { %20107 = vpow2.f32 %v3516_v57 }
 0x776   :  { %v21244_v7 = vpop.eup %20099  ;;  %v3518_v60 = vmul.f32 1.442695, %v3503_v59 }
 0x777   :  { %v3526_v23 = vsel %vm193_vm2, %v21244_v7, 0.0  ;;  %v21288_v33 = vpop.permute.xlu0 %4179 }
 0x778   :  { %3527 = vadd.xlane.f32.xlu1 %v3526_v23  ;;  %20109 = vpow2.f32 %v3518_v60 }
 0x77a   :  { %v21248_v53 = vpop.eup %20101 }
 0x77b   :  { %v21250_v39 = vpop.eup %20103  ;;  %v3532_v2 = vsel %vm193_vm2, %v21248_v53, 0.0 }
 0x77c   :  { %3533 = vadd.xlane.f32.xlu1 %v3532_v2  ;;  %v3529_v43 = vsel %vm193_vm2, %v21250_v39, 0.0 }
 0x77d   :  { %3530 = vadd.xlane.f32.xlu0 %v3529_v43 }
 0x77e   :  { %v21256_v18 = vpop.eup %20105 }
 0x77f   :  { %v3535_v15 = vsel %vm193_vm2, %v21256_v18, 0.0  ;;  %v21266_v10 = vpop.eup %20107 }
 0x780   :  { %v3538_v19 = vsel %vm193_vm2, %v21266_v10, 0.0 }
 0x781   :  { %3536 = vadd.xlane.f32.xlu0 %v3535_v15 }
 0x78d   :  { %4255 = vrot.lane.b32.xlu1 %v20682_v37, %s20508_s28  ;;  %v21270_v37 = vpop.eup %20109 }
 0x797   :  { %4177 = vrot.lane.b32.xlu0 %v20692_v40, %s20508_s28  ;;  %v3541_v40 = vsel %vm193_vm2, %v21270_v37, 0.0 }
 0x7b1   :  { %3539 = vadd.xlane.f32.xlu1 %v3538_v19 }
 0x7b6   :  { %3542 = vadd.xlane.f32.xlu0 %v3541_v40 }
 0x7c2   :  { %4413 = vrot.lane.b32.xlu1 %v20640_v29, %s20507_s27 }
 0x7c6   :  { %4411 = vrot.lane.b32.xlu1 %v20709_v44, %s20508_s28 }
 0x7ca   :  { %4569 = vrot.lane.b32.xlu1 %v20644_v31, %s20507_s27 }
 0x7cc   :  { %4335 = vrot.lane.b32.xlu0 %v20634_v26, %s20507_s27 }
 0x7ce   :  { %4567 = vrot.lane.b32.xlu1 %v20723_v48, %s20508_s28 }
 0x7d0   :  { %4333 = vrot.lane.b32.xlu0 %v20697_v41, %s20508_s28 }
 0x7d2   :  { %4725 = vrot.lane.b32.xlu1 %v20652_v35, %s20507_s27 }
 0x7d4   :  { %4491 = vrot.lane.b32.xlu0 %v20642_v30, %s20507_s27 }
 0x7d6   :  { %4723 = vrot.lane.b32.xlu1 %v20740_v51, %s20508_s28 }
 0x7d8   :  { %v3525_v44 = vpop.xlane.xlu0 %3524  ;;  %4489 = vrot.lane.b32.xlu0 %v20719_v47, %s20508_s28 }
 0x7d9   :  { %20111 = vrcp.f32 %v3525_v44 }
 0x7da   :  { %4898 = vrot.lane.b32.xlu1 %v20632_v24, %s24730_s29  ;;  %v21309_v24 = vpop.permute.xlu1 %4257 }
 0x7dc   :  { %4647 = vrot.lane.b32.xlu0 %v20650_v34, %s20507_s27 }
 0x7e0   :  { %4645 = vrot.lane.b32.xlu0 %v20737_v50, %s20508_s28 }
 0x7e3   :  { %v20112_v41 = vpop.eup %20111 }
 0x7e4   :  { %v3547_v48 = vmul.f32 %v20112_v41, %v21231_v11 }
 0x7e6   :  { %3562 = vst.msk [vmem:[#allocation2 + $0x88] sm:$0xff] %vm193_vm2, %v3547_v48  ;;  %19097 = vmatmul.mubr.msk.f32.vlgmr.msra.gmra.mrb[46].mxu0 %vm193_vm2, %v3547_v48 }
 0x7e7   :  { %19105 = vmatpush3.msra.mxu0 %v21225_v0  ;;  %19106 = vmatprep.mubr.msk.f32.mxu0 %vm20498_vm1, %v24732_v14 }
 0x7e8   :  { %19114 = vmatprep.subr.mxu0 %v24732_v14 }
 0x801   :  { %v3522_v47 = vpop.xlane.xlu1 %3521 }
 0x802   :  { %20113 = vrcp.f32 %v3522_v47 }
 0x805   :  { %v3528_v51 = vpop.xlane.xlu1 %3527 }
 0x806   :  { %20115 = vrcp.f32 %v3528_v51 }
 0x809   :  { %v3534_v50 = vpop.xlane.xlu1 %3533 }
 0x80a   :  { %20117 = vrcp.f32 %v3534_v50  ;;  %v3531_v46 = vpop.xlane.xlu0 %3530 }
 0x80b   :  { %20119 = vrcp.f32 %v3531_v46 }
 0x80c   :  { %v20114_v11 = vpop.eup %20113 }
 0x80d   :  { %v3545_v25 = vmul.f32 %v20114_v11, %v21240_v6 }
 0x80e   :  { %v3537_v27 = vpop.xlane.xlu0 %3536 }
 0x80f   :  { %20121 = vrcp.f32 %v3537_v27  ;;  %3561 = vst.msk [vmem:[#allocation2 + $0x80] sm:$0xff] %vm193_vm2, %v3545_v25  ;;  %19092 = vmatmul.mubr.msk.f32.vlgmr.msra.gmra.mrb[42].mxu1 %vm193_vm2, %v3545_v25 }
 0x810   :  { %v20116_v0 = vpop.eup %20115  ;;  %19100 = vmatpush3.msra.mxu1 %v21223_v62  ;;  %19101 = vmatprep.mubr.msk.f32.mxu1 %vm20498_vm1, %v24732_v14 }
 0x811   :  { %19109 = vmatprep.subr.mxu1 %v24732_v14  ;;  %v3549_v36 = vmul.f32 %v20116_v0, %v21244_v7 }
 0x813   :  { %3563 = vst.msk [vmem:[#allocation2 + $0x90] sm:$0xff] %vm193_vm2, %v3549_v36  ;;  %19102 = vmatmul.mubr.msk.f32.vlgmr.msra.gmra.mrb[44].mxu1 %vm193_vm2, %v3549_v36 }
 0x814   :  { %v20118_v6 = vpop.eup %20117  ;;  %19110 = vmatpush3.msra.mxu1 %v21235_v3  ;;  %19111 = vmatprep.mubr.msk.f32.mxu1 %vm20498_vm1, %v24732_v14 }
 0x815   :  { %v20120_v23 = vpop.eup %20119  ;;  %19119 = vmatprep.subr.mxu1 %v24732_v14  ;;  %v3553_v62 = vmul.f32 %v20118_v6, %v21248_v53  ;;  %v4178_v53 = vpop.permute.xlu0 %4177 }
 0x816   :  { %v3551_v2 = vmul.f32 %v20120_v23, %v21250_v39 }
 0x817   :  { %3565 = vst.msk [vmem:[#allocation2 + $0xa0] sm:$0xff] %vm193_vm2, %v3553_v62  ;;  %19112 = vmatmul.mubr.msk.f32.vlgmr.msra.gmra.mrb[46].mxu1 %vm193_vm2, %v3553_v62 }
 0x818   :  { %3564 = vst.msk [vmem:[#allocation2 + $0x98] sm:$0xff] %vm193_vm2, %v3551_v2  ;;  %19107 = vmatmul.mubr.msk.f32.vlgmr.msra.gmra.mrb[48].mxu0 %vm193_vm2, %v3551_v2  ;;  %19120 = vmatpush3.msra.mxu1 %v21237_v28 }
 0x819   :  { %v20122_v3 = vpop.eup %20121  ;;  %19115 = vmatpush3.msra.mxu0 %v21227_v5  ;;  %19116 = vmatprep.mubr.msk.f32.mxu0 %vm20498_vm1, %v24732_v14  ;;  %v4256_v5 = vpop.permute.xlu1 %4255 }
 0x81a   :  { %19124 = vmatprep.subr.mxu0 %v24732_v14  ;;  %v3555_v7 = vmul.f32 %v20122_v3, %v21256_v18  ;;  %19121 = vmatprep.mubr.msk.f32.mxu1 %vm20498_vm1, %v24732_v14 }
 0x81b   :  { %19129 = vmatprep.subr.mxu1 %v24732_v14 }
 0x81c   :  { %3566 = vst.msk [vmem:[#allocation2 + $0xa8] sm:$0xff] %vm193_vm2, %v3555_v7  ;;  %19117 = vmatmul.mubr.msk.f32.vlgmr.msra.gmra.mrb[50].mxu0 %vm193_vm2, %v3555_v7 }
 0x81d   :  { %19125 = vmatpush3.msra.mxu0 %v21229_v20  ;;  %19126 = vmatprep.mubr.msk.f32.mxu0 %vm20498_vm1, %v24732_v14 }
 0x81e   :  { %19134 = vmatprep.subr.mxu0 %v24732_v14 }
 0x83e   :  { %v3540_v28 = vpop.xlane.xlu1 %3539 }
 0x83f   :  { %20123 = vrcp.f32 %v3540_v28 }
 0x842   :  { %v4414_v39 = vpop.permute.xlu1 %4413 }
 0x843   :  { %v3543_v43 = vpop.xlane.xlu0 %3542 }
 0x844   :  { %20125 = vrcp.f32 %v3543_v43 }
 0x846   :  { %v4412_v18 = vpop.permute.xlu1 %4411 }
 0x847   :  { %v4336_v15 = vpop.permute.xlu0 %4335 }
 0x849   :  { %v20124_v12 = vpop.eup %20123 }
 0x84a   :  { %v4570_v9 = vpop.permute.xlu1 %4569  ;;  %v3557_v52 = vmul.f32 %v20124_v12, %v21266_v10 }
 0x84b   :  { %v4334_v57 = vpop.permute.xlu0 %4333 }
 0x84c   :  { %3567 = vst.msk [vmem:[#allocation2 + $0xb0] sm:$0xff] %vm193_vm2, %v3557_v52  ;;  %19122 = vmatmul.mubr.msk.f32.vlgmr.msra.gmra.mrb[48].mxu1 %vm193_vm2, %v3557_v52 }
 0x84d   :  { %19130 = vmatpush3.xpose.msk.msra.mxu1 %vm193_vm2, %v21288_v33  ;;  %19131 = vmatprep.mubr.msk.f32.mxu1 %vm20498_vm1, %v24732_v14 }
 0x84e   :  { %v20126_v20 = vpop.eup %20125  ;;  %v4568_v59 = vpop.permute.xlu1 %4567  ;;  %19139 = vmatprep.subr.mxu1 %v24732_v14 }
 0x84f   :  { %v4492_v60 = vpop.permute.xlu0 %4491  ;;  %v3559_v19 = vmul.f32 %v20126_v20, %v21270_v37 }
 0x850   :  { %19132 = vmatmul.mubr.msk.f32.vlgmr.msra.gmra.mrb[50].mxu1 %vm193_vm2, %v4178_v53 }
 0x851   :  { %3568 = vst.msk [vmem:[#allocation2 + $0xb8] sm:$0xff] %vm193_vm2, %v3559_v19  ;;  %19127 = vmatmul.mubr.msk.f32.vlgmr.msra.gmra.mrb[52].mxu0 %vm193_vm2, %v3559_v19  ;;  %19140 = vmatpush3.xpose.msk.msra.mxu1 %vm193_vm2, %v4336_v15 }
 0x852   :  { %19135 = vmatpush3.xpose.msk.msra.mxu0 %vm193_vm2, %v21309_v24  ;;  %v4726_v10 = vpop.permute.xlu1 %4725  ;;  %19136 = vmatprep.mubr.msk.f32.mxu0 %vm20498_vm1, %v24732_v14 }
 0x853   :  { %v4490_v40 = vpop.permute.xlu0 %4489  ;;  %19141 = vmatprep.mubr.msk.f32.mxu1 %vm20498_vm1, %v24732_v14  ;;  %19144 = vmatprep.subr.mxu0 %v24732_v14 }
 0x854   :  { %19149 = vmatprep.subr.mxu1 %v24732_v14  ;;  %19142 = vmatmul.mubr.msk.f32.vlgmr.msra.gmra.mrb[52].mxu1 %vm193_vm2, %v4334_v57 }
 0x855   :  { %19137 = vmatmul.mubr.msk.f32.vlgmr.msra.gmra.mrb[54].mxu0 %vm193_vm2, %v4256_v5  ;;  %19150 = vmatpush3.xpose.msk.msra.mxu1 %vm193_vm2, %v4492_v60 }
 0x856   :  { %19145 = vmatpush3.xpose.msk.msra.mxu0 %vm193_vm2, %v4414_v39  ;;  %v4724_v37 = vpop.permute.xlu1 %4723  ;;  %19146 = vmatprep.mubr.msk.f32.mxu0 %vm20498_vm1, %v24732_v14 }
 0x857   :  { %v4648_v33 = vpop.permute.xlu0 %4647  ;;  %19151 = vmatprep.mubr.msk.f32.mxu1 %vm20498_vm1, %v24732_v14  ;;  %19154 = vmatprep.subr.mxu0 %v24732_v14 }
 0x858   :  { %19159 = vmatprep.subr.mxu1 %v24732_v14  ;;  %19152 = vmatmul.mubr.msk.f32.vlgmr.msra.gmra.mrb[54].mxu1 %vm193_vm2, %v4490_v40 }
 0x859   :  { %19147 = vmatmul.mubr.msk.f32.vlgmr.msra.gmra.mrb[56].mxu0 %vm193_vm2, %v4412_v18  ;;  %19160 = vmatpush3.xpose.msk.msra.mxu1 %vm193_vm2, %v4648_v33 }
 0x85a   :  { %19155 = vmatpush3.xpose.msk.msra.mxu0 %vm193_vm2, %v4570_v9  ;;  %v4899_v44 = vpop.permute.xlu1 %4898  ;;  %19156 = vmatprep.mubr.msk.f32.mxu0 %vm20498_vm1, %v24732_v14 }
 0x85b   :  { %v4646_v41 = vpop.permute.xlu0 %4645  ;;  %19161 = vmatprep.mubr.msk.f32.mxu1 %vm20498_vm1, %v24732_v14  ;;  %19164 = vmatprep.subr.mxu0 %v24732_v14 }
 0x85c   :  { %19169 = vmatprep.subr.mxu1 %v24732_v14  ;;  %19162 = vmatmul.mubr.msk.f32.vlgmr.msra.gmra.mrb[56].mxu1 %vm193_vm2, %v4646_v41 }
 0x85d   :  { %19157 = vmatmul.mubr.msk.f32.vlgmr.msra.gmra.mrb[58].mxu0 %vm193_vm2, %v4568_v59  ;;  %19170 = vmatpush3.msra.mxu1 %v4899_v44 }
 0x85e   :  { %19165 = vmatpush3.xpose.msk.msra.mxu0 %vm193_vm2, %v4726_v10  ;;  %19166 = vmatprep.mubr.msk.f32.mxu0 %vm20498_vm1, %v24732_v14 }
 0x85f   :  { %19174 = vmatprep.subr.mxu0 %v24732_v14  ;;  %19171 = vmatprep.mubr.msk.f32.mxu1 %vm20498_vm1, %v24732_v14 }
 0x860   :  { %19179 = vmatprep.subr.mxu1 %v24732_v14 }
 0x861   :  { %19167 = vmatmul.mubr.msk.f32.vlgmr.msra.gmra.mrb[60].mxu0 %vm193_vm2, %v4724_v37 }
 0x862   :  { %19176 = vmatprep.mubr.msk.f32.mxu0 %vm20498_vm1, %v24732_v14 }
 0x8b9   :  { %v21399_v48 = vpop.f32.mrb[46].mxu0 }
 0x8ba   :  { %v19098_v24 = vpop.f32.mrb[47].mxu0 }
 0x8e2   :  { %v21401_v47 = vpop.f32.mrb[42].mxu1 }
 0x8e3   :  { %v19093_v51 = vpop.f32.mrb[43].mxu1 }
 0x8e6   :  { %v21403_v50 = vpop.f32.mrb[44].mxu1 }
 0x8e7   :  { %v19103_v46 = vpop.f32.mrb[45].mxu1 }
 0x8ea   :  { %v21405_v11 = vpop.f32.mrb[46].mxu1 }
 0x8eb   :  { %v21407_v25 = vpop.f32.mrb[48].mxu0  ;;  %v19113_v27 = vpop.f32.mrb[47].mxu1 }
 0x8ec   :  { %v19108_v0 = vpop.f32.mrb[49].mxu0 }
 0x8ef   :  { %v21409_v36 = vpop.f32.mrb[50].mxu0 }
 0x8f0   :  { %v19118_v6 = vpop.f32.mrb[51].mxu0 }
 0x91f   :  { %v21411_v23 = vpop.f32.mrb[48].mxu1 }
 0x920   :  { %v19123_v62 = vpop.f32.mrb[49].mxu1 }
 0x923   :  { %v4251_v2 = vpop.f32.mrb[50].mxu1 }
 0x924   :  { %v21413_v3 = vpop.f32.mrb[52].mxu0  ;;  %v19133_v7 = vpop.f32.mrb[51].mxu1  ;;  %v4801_v5 = vsel %vm193_vm2, %v4251_v2, -inf }
 0x925   :  { %v19128_v28 = vpop.f32.mrb[53].mxu0  ;;  %4802 = vmax.xlane.f32.xlu0 %v4801_v5 }
 0x927   :  { %v4407_v53 = vpop.f32.mrb[52].mxu1 }
 0x928   :  { %v4329_v39 = vpop.f32.mrb[54].mxu0  ;;  %v19143_v43 = vpop.f32.mrb[53].mxu1  ;;  %v4807_v18 = vsel %vm193_vm2, %v4407_v53, -inf }
 0x929   :  { %v19138_v15 = vpop.f32.mrb[55].mxu0  ;;  %4808 = vmax.xlane.f32.xlu0 %v4807_v18  ;;  %v4804_v12 = vsel %vm193_vm2, %v4329_v39, -inf }
 0x92a   :  { %4805 = vmax.xlane.f32.xlu1 %v4804_v12 }
 0x92b   :  { %v4563_v9 = vpop.f32.mrb[54].mxu1 }
 0x92c   :  { %v4485_v52 = vpop.f32.mrb[56].mxu0  ;;  %v19153_v57 = vpop.f32.mrb[55].mxu1  ;;  %v4813_v20 = vsel %vm193_vm2, %v4563_v9, -inf }
 0x92d   :  { %v19148_v59 = vpop.f32.mrb[57].mxu0  ;;  %v4810_v60 = vsel %vm193_vm2, %v4485_v52, -inf }
 0x92e   :  { %4814 = vmax.xlane.f32.xlu1 %v4813_v20  ;;  %4811 = vmax.xlane.f32.xlu0 %v4810_v60 }
 0x92f   :  { %v4719_v19 = vpop.f32.mrb[56].mxu1 }
 0x930   :  { %v4641_v10 = vpop.f32.mrb[58].mxu0  ;;  %v19163_v40 = vpop.f32.mrb[57].mxu1  ;;  %v4819_v37 = vsel %vm193_vm2, %v4719_v19, -inf }
 0x931   :  { %v19158_v33 = vpop.f32.mrb[59].mxu0  ;;  %v4816_v44 = vsel %vm193_vm2, %v4641_v10, -inf }
 0x932   :  { %4820 = vmax.xlane.f32.xlu1 %v4819_v37  ;;  %4817 = vmax.xlane.f32.xlu0 %v4816_v44 }
 0x934   :  { %v4797_v41 = vpop.f32.mrb[60].mxu0 }
 0x935   :  { %v19168_v24 = vpop.f32.mrb[61].mxu0  ;;  %v4822_v51 = vsel %vm193_vm2, %v4797_v41, -inf }
 0x936   :  { %4823 = vmax.xlane.f32.xlu0 %v4822_v51 }
 0x943   :  { %5050 = vrot.lane.b32.xlu1 %v20634_v26, %s24730_s29 }
 0x947   :  { %5126 = vrot.lane.b32.xlu1 %v20640_v29, %s24730_s29 }
 0x94c   :  { %4974 = vrot.lane.b32.xlu0 %v20628_v21, %s24730_s29 }
 0x9b2   :  { %v4803_v46 = vpop.xlane.xlu0 %4802 }
 0x9b3   :  { %v4825_v27 = vsub.f32 %v4251_v2, %v4803_v46 }
 0x9b5   :  { %v4833_v0 = vmul.f32 1.442695, %v4825_v27 }
 0x9b6   :  { %v4809_v6 = vpop.xlane.xlu0 %4808 }
 0x9b7   :  { %20127 = vpow2.f32 %v4833_v0  ;;  %v4827_v62 = vsub.f32 %v4407_v53, %v4809_v6  ;;  %v4806_v7 = vpop.xlane.xlu1 %4805 }
 0x9b8   :  { %v4826_v5 = vsub.f32 %v4329_v39, %v4806_v7 }
 0x9b9   :  { %v4837_v28 = vmul.f32 1.442695, %v4827_v62 }
 0x9ba   :  { %v4835_v43 = vmul.f32 1.442695, %v4826_v5 }
 0x9bb   :  { %20129 = vpow2.f32 %v4837_v28  ;;  %v4812_v18 = vpop.xlane.xlu0 %4811  ;;  %v4815_v40 = vpop.xlane.xlu1 %4814 }
 0x9bc   :  { %20131 = vpow2.f32 %v4835_v43  ;;  %v4828_v26 = vsub.f32 %v4485_v52, %v4812_v18  ;;  %v4829_v37 = vsub.f32 %v4563_v9, %v4815_v40  ;;  %v5629_v40 = vld [vmem:[%s24722_s3 + $0x8] sm:$0xff] }
 0x9be   :  { %v4839_v15 = vmul.f32 1.442695, %v4828_v26  ;;  %v4841_v44 = vmul.f32 1.442695, %v4829_v37 }
 0x9bf   :  { %v4818_v12 = vpop.xlane.xlu0 %4817  ;;  %v4821_v33 = vpop.xlane.xlu1 %4820 }
 0x9c0   :  { %20133 = vpow2.f32 %v4839_v15  ;;  %v4831_v24 = vsub.f32 %v4719_v19, %v4821_v33  ;;  %v4830_v51 = vsub.f32 %v4641_v10, %v4818_v12  ;;  %v5630_v33 = vld [vmem:[%s24722_s3 + $0x10] sm:$0xff] }
 0x9c1   :  { %v21429_v29 = vpop.eup %20127  ;;  %20135 = vpow2.f32 %v4841_v44  ;;  %v5631_v44 = vld [vmem:[%s24722_s3 + $0x18] sm:$0xff] }
 0x9c2   :  { %v4849_v21 = vsel %vm193_vm2, %v21429_v29, 0.0  ;;  %v4845_v46 = vmul.f32 1.442695, %v4831_v24  ;;  %v4843_v27 = vmul.f32 1.442695, %v4830_v51  ;;  %v19969_v24 = vpack.c.bf16 %v5631_v44, %v5630_v33 }
 0x9c3   :  { %v4824_v2 = vpop.xlane.xlu0 %4823  ;;  %4850 = vadd.xlane.f32.xlu1 %v4849_v21 }
 0x9c4   :  { %v4832_v0 = vsub.f32 %v4797_v41, %v4824_v2  ;;  %20137 = vpow2.f32 %v4845_v46 }
 0x9c5   :  { %v21433_v57 = vpop.eup %20129  ;;  %20139 = vpow2.f32 %v4843_v27 }
 0x9c6   :  { %v21435_v53 = vpop.eup %20131  ;;  %v4855_v39 = vsel %vm193_vm2, %v21433_v57, 0.0  ;;  %v4847_v6 = vmul.f32 1.442695, %v4832_v0 }
 0x9c7   :  { %v4975_v20 = vpop.permute.xlu0 %4974  ;;  %4856 = vadd.xlane.f32.xlu1 %v4855_v39  ;;  %v4852_v52 = vsel %vm193_vm2, %v21435_v53, 0.0 }
 0x9c8   :  { %4853 = vadd.xlane.f32.xlu0 %v4852_v52  ;;  %19175 = vmatpush3.msra.mxu0 %v4975_v20  ;;  %20141 = vpow2.f32 %v4847_v6 }
 0x9c9   :  { %19184 = vmatprep.subr.mxu0 %v24732_v14 }
 0x9ca   :  { %v21442_v59 = vpop.eup %20133 }
 0x9cb   :  { %v4858_v60 = vsel %vm193_vm2, %v21442_v59, 0.0  ;;  %v21450_v62 = vpop.eup %20135 }
 0x9cc   :  { %4859 = vadd.xlane.f32.xlu0 %v4858_v60  ;;  %v5628_v60 = vld [vmem:[%s24722_s3] sm:$0xff] }
 0x9cd   :  { %v19965_v37 = vpack.c.bf16 %v5629_v40, %v5628_v60 }
 0x9ce   :  { %v21454_v7 = vpop.eup %20137 }
 0x9cf   :  { %v4867_v9 = vsel %vm193_vm2, %v21454_v7, 0.0 }
 0x9d8   :  { %5278 = vrot.lane.b32.xlu1 %v20644_v31, %s24730_s29  ;;  %v4861_v31 = vsel %vm193_vm2, %v21450_v62, 0.0 }
 0x9e2   :  { %5202 = vrot.lane.b32.xlu0 %v20642_v30, %s24730_s29  ;;  %v21456_v30 = vpop.eup %20139 }
 0x9e3   :  { %v4864_v19 = vsel %vm193_vm2, %v21456_v30, 0.0  ;;  %v21462_v10 = vpop.eup %20141 }
 0x9e4   :  { %v4870_v41 = vsel %vm193_vm2, %v21462_v10, 0.0 }
 0x9fc   :  { %4862 = vadd.xlane.f32.xlu1 %v4861_v31 }
 0xa00   :  { %4868 = vadd.xlane.f32.xlu1 %v4867_v9 }
 0xa01   :  { %4865 = vadd.xlane.f32.xlu0 %v4864_v19 }
 0xa05   :  { %4871 = vadd.xlane.f32.xlu0 %v4870_v41 }
 0xa11   :  { %5430 = vrot.lane.b32.xlu1 %v20652_v35, %s24730_s29 }
 0xa15   :  { %5516 = vrot.lane.b32.xlu1 %v21186_v54, %s20510_s30 }
 0xa19   :  { %5548 = vrot.lane.b32.xlu1 %v21399_v48, %s20511_s11 }
 0xa1b   :  { %5354 = vrot.lane.b32.xlu0 %v20650_v34, %s24730_s29  ;;  %v5051_v34 = vpop.permute.xlu1 %5050 }
 0xa1d   :  { %5520 = vrot.lane.b32.xlu1 %v21194_v63, %s20510_s30 }
 0xa1f   :  { %5514 = vrot.lane.b32.xlu0 %v21188_v55, %s20510_s30  ;;  %v5127_v35 = vpop.permute.xlu1 %5126 }
 0xa21   :  { %5552 = vrot.lane.b32.xlu1 %v21407_v25, %s20511_s11 }
 0xa23   :  { %5546 = vrot.lane.b32.xlu0 %v21401_v47, %s20511_s11 }
 0xa25   :  { %5524 = vrot.lane.b32.xlu1 %v21196_v22, %s20510_s30 }
 0xa27   :  { %5518 = vrot.lane.b32.xlu0 %v21190_v58, %s20510_s30 }
 0xa29   :  { %5556 = vrot.lane.b32.xlu1 %v21409_v36, %s20511_s11 }
 0xa2b   :  { %5550 = vrot.lane.b32.xlu0 %v21403_v50, %s20511_s11 }
 0xa2f   :  { %5522 = vrot.lane.b32.xlu0 %v21192_v61, %s20510_s30 }
 0xa33   :  { %5554 = vrot.lane.b32.xlu0 %v21405_v11, %s20511_s11 }
 0xa50   :  { %v4851_v54 = vpop.xlane.xlu1 %4850 }
 0xa51   :  { %20143 = vrcp.f32 %v4851_v54 }
 0xa54   :  { %v4857_v55 = vpop.xlane.xlu1 %4856 }
 0xa55   :  { %20145 = vrcp.f32 %v4857_v55  ;;  %v4854_v63 = vpop.xlane.xlu0 %4853 }
 0xa56   :  { %20147 = vrcp.f32 %v4854_v63 }
 0xa58   :  { %v5279_v28 = vpop.permute.xlu1 %5278 }
 0xa59   :  { %v4860_v58 = vpop.xlane.xlu0 %4859 }
 0xa5a   :  { %20149 = vrcp.f32 %v4860_v58 }
 0xa5b   :  { %v20144_v22 = vpop.eup %20143 }
 0xa5c   :  { %v4874_v48 = vmul.f32 %v20144_v22, %v21429_v29 }
 0xa5d   :  { %v5203_v25 = vpop.permute.xlu0 %5202 }
 0xa5e   :  { %4890 = vst.msk [vmem:[#allocation2 + $0xc0] sm:$0xff] %vm193_vm2, %v4874_v48  ;;  %19172 = vmatmul.mubr.msk.f32.vlgmr.msra.gmra.mrb[58].mxu1 %vm193_vm2, %v4874_v48 }
 0xa5f   :  { %v20146_v61 = vpop.eup %20145  ;;  %19180 = vmatpush3.msra.mxu1 %v5051_v34  ;;  %19181 = vmatprep.mubr.msk.f32.mxu1 %vm20498_vm1, %v24732_v14 }
 0xa60   :  { %v20148_v47 = vpop.eup %20147  ;;  %19189 = vmatprep.subr.mxu1 %v24732_v14  ;;  %v4878_v50 = vmul.f32 %v20146_v61, %v21433_v57 }
 0xa61   :  { %v4876_v11 = vmul.f32 %v20148_v47, %v21435_v53 }
 0xa62   :  { %4892 = vst.msk [vmem:[#allocation2 + $0xd0] sm:$0xff] %vm193_vm2, %v4878_v50  ;;  %19182 = vmatmul.mubr.msk.f32.vlgmr.msra.gmra.mrb[60].mxu1 %vm193_vm2, %v4878_v50 }
 0xa63   :  { %4891 = vst.msk [vmem:[#allocation2 + $0xc8] sm:$0xff] %vm193_vm2, %v4876_v11  ;;  %19177 = vmatmul.mubr.msk.f32.vlgmr.msra.gmra.mrb[62].mxu0 %vm193_vm2, %v4876_v11  ;;  %19190 = vmatpush3.msra.mxu1 %v5203_v25 }
 0xa64   :  { %19185 = vmatpush3.msra.mxu0 %v5127_v35  ;;  %19186 = vmatprep.mubr.msk.f32.mxu0 %vm20498_vm1, %v24732_v14  ;;  %v20150_v36 = vpop.eup %20149 }
 0xa65   :  { %19194 = vmatprep.subr.mxu0 %v24732_v14  ;;  %19191 = vmatprep.mubr.msk.f32.mxu1 %vm20498_vm1, %v24732_v14  ;;  %v4880_v5 = vmul.f32 %v20150_v36, %v21442_v59 }
 0xa66   :  { %19199 = vmatprep.subr.mxu1 %v24732_v14 }
 0xa67   :  { %4893 = vst.msk [vmem:[#allocation2 + $0xd8] sm:$0xff] %vm193_vm2, %v4880_v5  ;;  %19187 = vmatmul.mubr.msk.f32.vlgmr.msra.gmra.mrb[64].mxu0 %vm193_vm2, %v4880_v5 }
 0xa68   :  { %19195 = vmatpush3.msra.mxu0 %v5279_v28  ;;  %19196 = vmatprep.mubr.msk.f32.mxu0 %vm20498_vm1, %v24732_v14 }
 0xa69   :  { %19204 = vmatprep.subr.mxu0 %v24732_v14 }
 0xa89   :  { %v4863_v43 = vpop.xlane.xlu1 %4862 }
 0xa8a   :  { %20151 = vrcp.f32 %v4863_v43 }
 0xa8d   :  { %v4869_v18 = vpop.xlane.xlu1 %4868 }
 0xa8e   :  { %20153 = vrcp.f32 %v4869_v18  ;;  %v4866_v26 = vpop.xlane.xlu0 %4865 }
 0xa8f   :  { %20155 = vrcp.f32 %v4866_v26 }
 0xa91   :  { %v5431_v20 = vpop.permute.xlu1 %5430 }
 0xa92   :  { %v4872_v15 = vpop.xlane.xlu0 %4871 }
 0xa93   :  { %20157 = vrcp.f32 %v4872_v15 }
 0xa94   :  { %v20152_v12 = vpop.eup %20151 }
 0xa95   :  { %v4882_v29 = vmul.f32 %v20152_v12, %v21450_v62  ;;  %v5517_v35 = vpop.permute.xlu1 %5516 }
 0xa96   :  { %v5355_v21 = vpop.permute.xlu0 %5354  ;;  %v5603_v43 = vsel %vm193_vm2, %v20950_v13, %v5517_v35 }
 0xa97   :  { %4894 = vst.msk [vmem:[#allocation2 + $0xe0] sm:$0xff] %vm193_vm2, %v4882_v29  ;;  %19192 = vmatmul.mubr.msk.f32.vlgmr.msra.gmra.mrb[62].mxu1 %vm193_vm2, %v4882_v29 }
 0xa98   :  { %v20154_v2 = vpop.eup %20153  ;;  %19200 = vmatpush3.msra.mxu1 %v5355_v21  ;;  %19201 = vmatprep.mubr.msk.f32.mxu1 %vm20498_vm1, %v24732_v14 }
 0xa99   :  { %v4886_v57 = vmul.f32 %v20154_v2, %v21454_v7  ;;  %v20156_v53 = vpop.eup %20155  ;;  %19966 = vmatprep.subr.bf16.mxu1 %v19965_v37 }
 0xa9a   :  { %v4884_v39 = vmul.f32 %v20156_v53, %v21456_v30 }
 0xa9b   :  { %4896 = vst.msk [vmem:[#allocation2 + $0xf0] sm:$0xff] %vm193_vm2, %v4886_v57  ;;  %19202 = vmatmul.mubr.msk.f32.vlgmr.msra.gmra.mrb[64].mxu1 %vm193_vm2, %v4886_v57 }
 0xa9c   :  { %4895 = vst.msk [vmem:[#allocation2 + $0xe8] sm:$0xff] %vm193_vm2, %v4884_v39  ;;  %19197 = vmatmul.mubr.msk.f32.vlgmr.msra.gmra.mrb[66].mxu0 %vm193_vm2, %v4884_v39  ;;  %19968 = vmatpush3.bf16.msra.mxu1 %v19965_v37 }
 0xa9d   :  { %v20158_v52 = vpop.eup %20157  ;;  %19205 = vmatpush3.msra.mxu0 %v5431_v20  ;;  %19206 = vmatprep.mubr.msk.f32.mxu0 %vm20498_vm1, %v24732_v14 }
 0xa9e   :  { %v4888_v59 = vmul.f32 %v20158_v52, %v21462_v10  ;;  %19970 = vmatprep.subr.bf16.mxu1 %v19969_v24 }
 0xaa0   :  { %4897 = vst.msk [vmem:[#allocation2 + $0xf8] sm:$0xff] %vm193_vm2, %v4888_v59  ;;  %19207 = vmatmul.mubr.msk.f32.vlgmr.msra.gmra.mrb[68].mxu0 %vm193_vm2, %v4888_v59  ;;  %19972 = vmatpush3.bf16.msra.mxu1 %v19969_v24 }
 0xaa1   :  { %19249 = vmatprep.subr.mxu1 %v24732_v14 }
 0xb31   :  { %v4970_v51 = vpop.f32.mrb[58].mxu1 }
 0xb32   :  { %v19173_v46 = vpop.f32.mrb[59].mxu1  ;;  %5578 = vrot.lane.b32.xlu0 %v4970_v51, %s20512_s12 }
 0xb35   :  { %v5122_v27 = vpop.f32.mrb[60].mxu1 }
 0xb36   :  { %v5046_v0 = vpop.f32.mrb[62].mxu0  ;;  %v19183_v6 = vpop.f32.mrb[61].mxu1  ;;  %5582 = vrot.lane.b32.xlu0 %v5122_v27, %s20512_s12 }
 0xb37   :  { %5580 = vrot.lane.b32.xlu1 %v5046_v0, %s20512_s12  ;;  %v19178_v62 = vpop.f32.mrb[63].mxu0  ;;  %v21608_v6 = vld [vmem:[%s24723_s4] sm:$0xff] }
 0xb3a   :  { %5526 = vrot.lane.b32.xlu0 %v21203_v4, %s20510_s30  ;;  %v5198_v31 = vpop.f32.mrb[64].mxu0 }
 0xb3b   :  { %5584 = vrot.lane.b32.xlu1 %v5198_v31, %s20512_s12  ;;  %v19188_v7 = vpop.f32.mrb[65].mxu0 }
 0xb3e   :  { %5558 = vrot.lane.b32.xlu0 %v21411_v23, %s20511_s11 }
 0xb3f   :  { %5528 = vrot.lane.b32.xlu1 %v21198_v56, %s20510_s30  ;;  %v5515_v56 = vpop.permute.xlu0 %5514 }
 0xb40   :  { %v5602_v50 = vsel %vm193_vm2, %v20952_v32, %v5515_v56 }
 0xb43   :  { %5560 = vrot.lane.b32.xlu1 %v21413_v3, %s20511_s11  ;;  %v5547_v54 = vpop.permute.xlu0 %5546  ;;  %v5549_v3 = vpop.permute.xlu1 %5548 }
 0xb44   :  { %v5611_v11 = vsel %vm5610_vm4, %v5602_v50, %v5547_v54  ;;  %v5612_v15 = vsel %vm5610_vm4, %v5603_v43, %v5549_v3  ;;  %v20465_v54 = vld [vmem:[%s24719_s0 + $0x10] sm:$0xff] }
 0xb47   :  { %v5519_v55 = vpop.permute.xlu0 %5518  ;;  %v5521_v63 = vpop.permute.xlu1 %5520 }
 0xb48   :  { %v5604_v28 = vsel %vm193_vm2, %v20954_v1, %v5519_v55  ;;  %v5605_v1 = vsel %vm193_vm2, %v20956_v8, %v5521_v63  ;;  %v20466_v55 = vld [vmem:[%s24719_s0 + $0x18] sm:$0xff] }
 0xb4b   :  { %v5551_v58 = vpop.permute.xlu0 %5550  ;;  %v5553_v22 = vpop.permute.xlu1 %5552 }
 0xb4c   :  { %v5613_v18 = vsel %vm5610_vm4, %v5604_v28, %v5551_v58  ;;  %v5614_v21 = vsel %vm5610_vm4, %v5605_v1, %v5553_v22  ;;  %v20470_v1 = vld [vmem:[%s24719_s0 + $0x30] sm:$0xff] }
 0xb4f   :  { %v5523_v48 = vpop.permute.xlu0 %5522  ;;  %v5525_v61 = vpop.permute.xlu1 %5524 }
 0xb50   :  { %v5606_v20 = vsel %vm193_vm2, %v20960_v42, %v5523_v48  ;;  %v5607_v33 = vsel %vm193_vm2, %v20958_v38, %v5525_v61 }
 0xb53   :  { %v5555_v47 = vpop.permute.xlu0 %5554  ;;  %v5557_v36 = vpop.permute.xlu1 %5556 }
 0xb54   :  { %v5615_v52 = vsel %vm5610_vm4, %v5606_v20, %v5555_v47  ;;  %v5616_v24 = vsel %vm5610_vm4, %v5607_v33, %v5557_v36  ;;  %v20468_v36 = vld [vmem:[%s24719_s0 + $0x20] sm:$0xff] }
 0xb6a   :  { %v5274_v30 = vpop.f32.mrb[62].mxu1 }
 0xb6b   :  { %5586 = vrot.lane.b32.xlu0 %v5274_v30, %s20512_s12  ;;  %v19193_v9 = vpop.f32.mrb[63].mxu1 }
 0xb6c   :  { %v20463_v9 = vld [vmem:[%s24719_s0 + $0x8] sm:$0xff] }
 0xb6e   :  { %v5426_v19 = vpop.f32.mrb[64].mxu1 }
 0xb6f   :  { %5590 = vrot.lane.b32.xlu0 %v5426_v19, %s20512_s12  ;;  %v19203_v4 = vpop.f32.mrb[65].mxu1  ;;  %v5350_v10 = vpop.f32.mrb[66].mxu0 }
 0xb70   :  { %5588 = vrot.lane.b32.xlu1 %v5350_v10, %s20512_s12  ;;  %v19198_v41 = vpop.f32.mrb[67].mxu0  ;;  %v20464_v4 = vld [vmem:[%s24719_s0] sm:$0xff] }
 0xb73   :  { %v5502_v34 = vpop.f32.mrb[68].mxu0 }
 0xb74   :  { %5592 = vrot.lane.b32.xlu1 %v5502_v34, %s20512_s12  ;;  %v19208_v23 = vpop.f32.mrb[69].mxu0 }
 0xba4   :  { %v5579_v25 = vpop.permute.xlu0 %5578 }
 0xba5   :  { %v5620_v5 = vsel %vm5619_vm3, %v5611_v11, %v5579_v25  ;;  %v20467_v11 = vld [vmem:[%s24719_s0 + $0x28] sm:$0xff] }
 0xba6   :  { %19217 = vmatprep.mubr.msk.f32.mxu1 %vm52_vm0, %v5620_v5 }
 0xba8   :  { %v5583_v26 = vpop.permute.xlu0 %5582 }
 0xba9   :  { %v5622_v32 = vsel %vm5619_vm3, %v5613_v18, %v5583_v26  ;;  %v5581_v12 = vpop.permute.xlu1 %5580 }
 0xbaa   :  { %v5621_v29 = vsel %vm5619_vm3, %v5612_v15, %v5581_v12  ;;  %v20469_v12 = vld [vmem:[%s24719_s0 + $0x38] sm:$0xff] }
 0xbab   :  { %19218 = vmatmul.mubr.msk.f32.vlgmr.msra.gmra.mrb[66].mxu1 %vm52_vm0, %v5621_v29 }
 0xbac   :  { %19220 = vmatprep.mubr.msk.f32.mxu1 %vm52_vm0, %v5622_v32  ;;  %v5527_v57 = vpop.permute.xlu0 %5526 }
 0xbad   :  { %v5585_v13 = vpop.permute.xlu1 %5584  ;;  %v5608_v8 = vsel %vm193_vm2, %v20962_v45, %v5527_v57 }
 0xbae   :  { %v5623_v2 = vsel %vm5619_vm3, %v5614_v21, %v5585_v13 }
 0xbaf   :  { %19221 = vmatmul.mubr.msk.f32.gmra.mrb[68].mxu1 %vm52_vm0, %v5623_v2 }
 0xbb0   :  { %v5559_v53 = vpop.permute.xlu0 %5558 }
 0xbb1   :  { %v5529_v39 = vpop.permute.xlu1 %5528  ;;  %v5617_v44 = vsel %vm5610_vm4, %v5608_v8, %v5559_v53 }
 0xbb2   :  { %v5609_v27 = vsel %vm193_vm2, %v20964_v49, %v5529_v39  ;;  %v5635_v49 = vrot.slane %v21608_v6, %v50_v17 }
 0xbb5   :  { %v5561_v40 = vpop.permute.xlu1 %5560 }
 0xbb6   :  { %v5618_v45 = vsel %vm5610_vm4, %v5609_v27, %v5561_v40 }
 0xbdd   :  { %v5587_v59 = vpop.permute.xlu0 %5586 }
 0xbde   :  { %v5624_v60 = vsel %vm5619_vm3, %v5615_v52, %v5587_v59 }
 0xbdf   :  { %19223 = vmatprep.mubr.msk.f32.mxu1 %vm52_vm0, %v5624_v60 }
 0xbe1   :  { %v5591_v37 = vpop.permute.xlu0 %5590 }
 0xbe2   :  { %v5626_v42 = vsel %vm5619_vm3, %v5617_v44, %v5591_v37  ;;  %v5589_v51 = vpop.permute.xlu1 %5588 }
 0xbe3   :  { %v5625_v46 = vsel %vm5619_vm3, %v5616_v24, %v5589_v51 }
 0xbe4   :  { %19224 = vmatmul.mubr.msk.f32.gmra.mrb[70].mxu1 %vm52_vm0, %v5625_v46 }
 0xbe5   :  { %19226 = vmatprep.mubr.msk.f32.mxu1 %vm52_vm0, %v5626_v42 }
 0xbe6   :  { %v5593_v0 = vpop.permute.xlu1 %5592 }
 0xbe7   :  { %v5627_v38 = vsel %vm5619_vm3, %v5618_v45, %v5593_v0 }
 0xbe8   :  { %19227 = vmatmul.mubr.msk.f32.gmra.mrb[72].mxu1 %vm52_vm0, %v5627_v38 }
 0xbe9   :  { %19251 = vmatprep.mubr.msk.f32.mxu1 %vm20498_vm1, %v24732_v14 }
 0xc7e   :  { %v19219_v62 = vpop.f32.mrb[66].mxu1 }
 0xc7f   :  { %v5732_v31 = vadd.f32 %v19219_v62, %v5635_v49  ;;  %v5726_v7 = vpop.f32.mrb[67].mxu1  ;;  %v18020_v62 = vld [vmem:[%s24720_s1 + $0x28] sm:$0xff] }
 0xc80   :  { %v5727_v30 = vadd.f32 %v5726_v7, %v5635_v49 }
 0xc81   :  { %v5766_v19 = vadd.f32 %v20463_v9, %v5732_v31  ;;  %v18021_v31 = vld [vmem:[%s24720_s1 + $0x30] sm:$0xff] }
 0xc82   :  { %v5765_v10 = vadd.f32 %v20464_v4, %v5727_v30  ;;  %v19222_v41 = vpop.f32.mrb[68].mxu1  ;;  %v18022_v30 = vld [vmem:[%s24720_s1 + $0x38] sm:$0xff] }
 0xc83   :  { %v5776_v34 = vsel %vm52_vm0, %v5766_v19, 0.0  ;;  %v5736_v23 = vpop.f32.mrb[69].mxu1  ;;  %v5742_v56 = vadd.f32 %v19222_v41, %v5635_v49  ;;  %v19977_v9 = vpack.c.bf16 %v18022_v30, %v18021_v31 }
 0xc84   :  { %5777 = vadd.xlane.f32.xlu0 %v5776_v34  ;;  %v5773_v17 = vsel %vm52_vm0, %v5765_v10, 0.0  ;;  %v5737_v35 = vadd.f32 %v5736_v23, %v5635_v49 }
 0xc85   :  { %5774 = vadd.xlane.f32.xlu1 %v5773_v17  ;;  %v5768_v63 = vadd.f32 %v20466_v55, %v5742_v56 }
 0xc86   :  { %v5767_v3 = vadd.f32 %v20465_v54, %v5737_v35 }
 0xc87   :  { %v5782_v22 = vsel %vm52_vm0, %v5768_v63, 0.0 }
 0xc88   :  { %v5779_v58 = vsel %vm52_vm0, %v5767_v3, 0.0 }
 0xc89   :  { %5780 = vadd.xlane.f32.xlu0 %v5779_v58 }
 0xc8d   :  { %5783 = vadd.xlane.f32.xlu0 %v5782_v22 }
 0xcb7   :  { %v19225_v48 = vpop.f32.mrb[70].mxu1 }
 0xcb8   :  { %v5752_v61 = vadd.f32 %v19225_v48, %v5635_v49  ;;  %v5746_v47 = vpop.f32.mrb[71].mxu1 }
 0xcb9   :  { %v5747_v50 = vadd.f32 %v5746_v47, %v5635_v49 }
 0xcba   :  { %v5770_v25 = vadd.f32 %v20467_v11, %v5752_v61 }
 0xcbb   :  { %v5769_v5 = vadd.f32 %v20468_v36, %v5747_v50  ;;  %v19228_v28 = vpop.f32.mrb[72].mxu1 }
 0xcbc   :  { %v5762_v43 = vadd.f32 %v19228_v28, %v5635_v49  ;;  %v5756_v18 = vpop.f32.mrb[73].mxu1  ;;  %v5788_v26 = vsel %vm52_vm0, %v5770_v25, 0.0 }
 0xcbd   :  { %v5757_v15 = vadd.f32 %v5756_v18, %v5635_v49  ;;  %5789 = vadd.xlane.f32.xlu1 %v5788_v26  ;;  %v5785_v32 = vsel %vm52_vm0, %v5769_v5, 0.0  ;;  %v18019_v49 = vld [vmem:[%s24720_s1 + $0x20] sm:$0xff]  ;;  %s24893_s1 = smov 40  }
 0xcbe   :  { %v5772_v29 = vadd.f32 %v20469_v12, %v5762_v43  ;;  %5786 = vadd.xlane.f32.xlu0 %v5785_v32  ;;  %v19973_v7 = vpack.c.bf16 %v18020_v62, %v18019_v49  ;;  %v5880_v12 = vsub.s32 1, %v20616_v16 }
 0xcbf   :  { %v5771_v21 = vadd.f32 %v20470_v1, %v5757_v15 }
 0xcc0   :  { %v5794_v13 = vsel %vm52_vm0, %v5772_v29, 0.0  ;;  %19974 = vmatprep.subr.bf16.mxu0 %v19973_v7 }
 0xcc1   :  { %v5791_v2 = vsel %vm52_vm0, %v5771_v21, 0.0  ;;  %19976 = vmatpush3.bf16.msra.mxu0 %v19973_v7 }
 0xcc2   :  { %5795 = vadd.xlane.f32.xlu0 %v5794_v13  ;;  %5792 = vadd.xlane.f32.xlu1 %v5791_v2  ;;  %v21703_v2 = vrot.slane %v21608_v6, %v5880_v12 }
 0xcc3   :  { %19978 = vmatprep.subr.bf16.mxu0 %v19977_v9 }
 0xcc5   :  { %19980 = vmatpush3.bf16.msra.mxu0 %v19977_v9 }
 0xcc6   :  { %19254 = vmatprep.subr.mxu0 %v24732_v14 }
 0xd11   :  { %v5778_v57 = vpop.xlane.xlu0 %5777 }
 0xd12   :  { %v5799_v53 = vmul.f32 0.03125, %v5778_v57  ;;  %v5775_v39 = vpop.xlane.xlu1 %5774 }
 0xd13   :  { %v5798_v20 = vmul.f32 0.03125, %v5775_v39 }
 0xd14   :  { %v21645_v52 = vsub.f32 %v5766_v19, %v5799_v53 }
 0xd15   :  { %v21647_v59 = vsub.f32 %v5765_v10, %v5798_v20 }
 0xd16   :  { %v5815_v60 = vmul.f32 %v21645_v52, %v21645_v52  ;;  %v5781_v40 = vpop.xlane.xlu0 %5780 }
 0xd17   :  { %v5814_v8 = vmul.f32 %v21647_v59, %v21647_v59  ;;  %v5800_v37 = vmul.f32 0.03125, %v5781_v40 }
 0xd18   :  { %v5825_v33 = vsel %vm52_vm0, %v5815_v60, 0.0 }
 0xd19   :  { %5826 = vadd.xlane.f32.xlu1 %v5825_v33  ;;  %v5822_v44 = vsel %vm52_vm0, %v5814_v8, 0.0  ;;  %v21655_v24 = vsub.f32 %v5767_v3, %v5800_v37 }
 0xd1a   :  { %5823 = vadd.xlane.f32.xlu0 %v5822_v44  ;;  %v5784_v42 = vpop.xlane.xlu0 %5783 }
 0xd1b   :  { %v5801_v51 = vmul.f32 0.03125, %v5784_v42  ;;  %v5816_v46 = vmul.f32 %v21655_v24, %v21655_v24 }
 0xd1d   :  { %v21659_v27 = vsub.f32 %v5768_v63, %v5801_v51  ;;  %v5828_v45 = vsel %vm52_vm0, %v5816_v46, 0.0 }
 0xd1e   :  { %5829 = vadd.xlane.f32.xlu1 %v5828_v45 }
 0xd1f   :  { %v5817_v0 = vmul.f32 %v21659_v27, %v21659_v27 }
 0xd21   :  { %v5831_v38 = vsel %vm52_vm0, %v5817_v0, 0.0 }
 0xd22   :  { %5832 = vadd.xlane.f32.xlu0 %v5831_v38 }
 0xd4a   :  { %v5790_v19 = vpop.xlane.xlu1 %5789 }
 0xd4b   :  { %v5803_v4 = vmul.f32 0.03125, %v5790_v19  ;;  %v5787_v10 = vpop.xlane.xlu0 %5786 }
 0xd4c   :  { %v5802_v41 = vmul.f32 0.03125, %v5787_v10 }
 0xd4d   :  { %v21678_v34 = vsub.f32 %v5770_v25, %v5803_v4 }
 0xd4e   :  { %v21680_v23 = vsub.f32 %v5769_v5, %v5802_v41 }
 0xd4f   :  { %v5796_v17 = vpop.xlane.xlu0 %5795  ;;  %v5793_v56 = vpop.xlane.xlu1 %5792  ;;  %v5819_v35 = vmul.f32 %v21678_v34, %v21678_v34 }
 0xd50   :  { %v5805_v54 = vmul.f32 0.03125, %v5796_v17  ;;  %v5804_v3 = vmul.f32 0.03125, %v5793_v56  ;;  %v5818_v55 = vmul.f32 %v21680_v23, %v21680_v23 }
 0xd51   :  { %v5837_v63 = vsel %vm52_vm0, %v5819_v35, 0.0 }
 0xd52   :  { %v21687_v58 = vsub.f32 %v5772_v29, %v5805_v54  ;;  %v21689_v22 = vsub.f32 %v5771_v21, %v5804_v3  ;;  %5838 = vadd.xlane.f32.xlu1 %v5837_v63  ;;  %v5834_v48 = vsel %vm52_vm0, %v5818_v55, 0.0  ;;  %v5892_v21 = vsub.s32 2, %v20616_v16 }
 0xd53   :  { %5835 = vadd.xlane.f32.xlu0 %v5834_v48 }
 0xd54   :  { %v5821_v61 = vmul.f32 %v21687_v58, %v21687_v58  ;;  %v5820_v47 = vmul.f32 %v21689_v22, %v21689_v22  ;;  %v21706_v39 = vrot.slane %v21608_v6, %v5892_v21 }
 0xd56   :  { %v5843_v50 = vsel %vm52_vm0, %v5821_v61, 0.0  ;;  %v5840_v11 = vsel %vm52_vm0, %v5820_v47, 0.0 }
 0xd57   :  { %5844 = vadd.xlane.f32.xlu0 %v5843_v50  ;;  %5841 = vadd.xlane.f32.xlu1 %v5840_v11 }
 0xda6   :  { %v5827_v25 = vpop.xlane.xlu1 %5826 }
 0xda7   :  { %v5847_v36 = vmul.f32 0.03125, %v5827_v25  ;;  %v5824_v5 = vpop.xlane.xlu0 %5823 }
 0xda8   :  { %v5846_v28 = vmul.f32 0.03125, %v5824_v5 }
 0xda9   :  { %v5855_v43 = vadd.f32 1e-05, %v5847_v36 }
 0xdaa   :  { %v5854_v18 = vadd.f32 1e-05, %v5846_v28 }
 0xdab   :  { %20159 = vrsqrt.f32 %v5855_v43  ;;  %v5830_v26 = vpop.xlane.xlu1 %5829 }
 0xdac   :  { %20161 = vrsqrt.f32 %v5854_v18  ;;  %v5848_v15 = vmul.f32 0.03125, %v5830_v26 }
 0xdae   :  { %v5856_v32 = vadd.f32 1e-05, %v5848_v15 }
 0xdaf   :  { %v5833_v29 = vpop.xlane.xlu0 %5832 }
 0xdb0   :  { %20163 = vrsqrt.f32 %v5856_v32  ;;  %v5849_v1 = vmul.f32 0.03125, %v5833_v29 }
 0xdb2   :  { %v5857_v13 = vadd.f32 1e-05, %v5849_v1 }
 0xdb4   :  { %20165 = vrsqrt.f32 %v5857_v13 }
 0xdb5   :  { %v20160_v57 = vpop.eup %20159 }
 0xdb6   :  { %v20162_v53 = vpop.eup %20161  ;;  %v5871_v20 = vmul.f32 %v20160_v57, %v21645_v52 }
 0xdb7   :  { %v5870_v60 = vmul.f32 %v20162_v53, %v21647_v59 }
 0xdb8   :  { %v5883_v40 = vmul.f32 %v21703_v2, %v5871_v20 }
 0xdb9   :  { %v5882_v8 = vmul.f32 %v21703_v2, %v5870_v60 }
 0xdba   :  { %v21713_v37 = vadd.f32 %v21706_v39, %v5883_v40  ;;  %v20164_v33 = vpop.eup %20163 }
 0xdbb   :  { %v5894_v44 = vadd.f32 %v21706_v39, %v5882_v8  ;;  %v5872_v42 = vmul.f32 %v20164_v33, %v21655_v24 }
 0xdbc   :  { %v5959_v52 = vrot.slane %v21713_v37, 7  ;;  %v18027_v51 = vrot.slane %v21713_v37, 9  ;;  %v18034_v0 = vrot.slane %v21713_v37, 11  ;;  %v18040_v62 = vrot.slane %v21713_v37, 13 }
 0xdbd   :  { %v5884_v6 = vmul.f32 %v21703_v2, %v5872_v42  ;;  %v5918_v59 = vrot.slane %v5894_v44, 2  ;;  %v5934_v45 = vrot.slane %v5894_v44, 4  ;;  %v5950_v49 = vrot.slane %v5894_v44, 6 }
 0xdbe   :  { %v20166_v46 = vpop.eup %20165  ;;  %v18023_v31 = vrot.slane %v5894_v44, 5  ;;  %v18024_v7 = vrot.slane %v21713_v37, 4  ;;  %v18030_v30 = vrot.slane %v5894_v44, 7  ;;  %v18031_v9 = vrot.slane %v21713_v37, 6 }
 0xdbf   :  { %v5896_v38 = vadd.f32 %v21706_v39, %v5884_v6  ;;  %v5873_v24 = vmul.f32 %v20166_v46, %v21659_v27  ;;  %v5976_v10 = vsel %vm5975_vm5, %v5959_v52, %v5894_v44  ;;  %v5994_v41 = vsel %vm5975_vm5, %v18027_v51, %v5918_v59 }
 0xdc0   :  { %v6008_v27 = vsel %vm5975_vm5, %v18034_v0, %v5934_v45  ;;  %v18037_v56 = vrot.slane %v5894_v44, 9  ;;  %v18042_v35 = vrot.slane %v5894_v44, 11  ;;  %v6022_v3 = vsel %vm5975_vm5, %v18040_v62, %v5950_v49 }
 0xdc1   :  { %v5885_v19 = vmul.f32 %v21703_v2, %v5873_v24  ;;  %v5952_v4 = vrot.slane %v5896_v38, 6  ;;  %v18035_v17 = vrot.slane %v5896_v38, 10  ;;  %v6029_v63 = vrot.slane %v5959_v52, 3 }
 0xdc2   :  { %v18025_v48 = vrot.slane %v5896_v38, 3  ;;  %v5996_v61 = vsel %vm5977_vm6, %v5896_v38, %v5994_v41  ;;  %v18032_v47 = vrot.slane %v5896_v38, 5  ;;  %v18039_v50 = vrot.slane %v5896_v38, 7 }
 0xdc3   :  { %v5897_v54 = vadd.f32 %v21706_v39, %v5885_v19  ;;  %v6023_v55 = vrot.slane %v5952_v4, 6  ;;  %v5978_v25 = vsel %vm5977_vm6, %v5952_v4, %v5976_v10  ;;  %v18043_v5 = vrot.slane %v5896_v38, 9 }
 0xdc4   :  { %v6010_v28 = vsel %vm5977_vm6, %v18035_v17, %v6008_v27 }
 0xdc5   :  { %v5945_v11 = vrot.slane %v5897_v54, 5  ;;  %v18029_v36 = vrot.slane %v5897_v54, 7  ;;  %v18036_v43 = vrot.slane %v5897_v54, 9  ;;  %v6024_v18 = vsel %vm5977_vm6, %v6023_v55, %v6022_v3 }
 0xdc6   :  { %v18041_v26 = vrot.slane %v5897_v54, 11  ;;  %v18026_v32 = vrot.slane %v5897_v54, 2  ;;  %v18033_v1 = vrot.slane %v5897_v54, 4 }
 0xdc7   :  { %v5980_v15 = vsel %vm5979_vm7, %v5945_v11, %v5978_v25  ;;  %v5998_v29 = vsel %vm5979_vm7, %v18029_v36, %v5996_v61  ;;  %v6012_v57 = vsel %vm5979_vm7, %v18036_v43, %v6010_v28  ;;  %v6019_v46 = vrot.slane %v5945_v11, 1 }
 0xdc8   :  { %v5983_v21 = vsel %vm5982_vm8, %v18023_v31, %v5980_v15  ;;  %v6000_v13 = vsel %vm5982_vm8, %v18030_v30, %v5998_v29  ;;  %v6026_v53 = vsel %vm5979_vm7, %v18041_v26, %v6024_v18  ;;  %v6014_v40 = vsel %vm5982_vm8, %v18037_v56, %v6012_v57 }
 0xdc9   :  { %v5986_v20 = vsel %vm5985_vm9, %v18024_v7, %v5983_v21  ;;  %v6002_v60 = vsel %vm5985_vm9, %v18031_v9, %v6000_v13  ;;  %v6028_v8 = vsel %vm5982_vm8, %v18042_v35, %v6026_v53  ;;  %v6016_v42 = vsel %vm5985_vm9, %v21713_v37, %v6014_v40 }
 0xdca   :  { %v5989_v33 = vsel %vm5988_vm10, %v18025_v48, %v5986_v20  ;;  %v6004_v44 = vsel %vm5988_vm10, %v18032_v47, %v6002_v60  ;;  %v6030_v6 = vsel %vm5985_vm9, %v6029_v63, %v6028_v8  ;;  %v6018_v51 = vsel %vm5988_vm10, %v18039_v50, %v6016_v42 }
 0xdcb   :  { %v21752_v52 = vsel %vm5991_vm11, %v18026_v32, %v5989_v33  ;;  %v21755_v59 = vsel %vm5991_vm11, %v18033_v1, %v6004_v44  ;;  %v21763_v45 = vsel %vm5991_vm11, %v6019_v46, %v6018_v51  ;;  %v6032_v37 = vsel %vm5988_vm10, %v18043_v5, %v6030_v6 }
 0xdcc   :  { %24751 = vst [vmem:[#allocation6_spill] sm:$0xff] %v21752_v52  ;;  %24752 = vst [vmem:[#allocation7_spill] sm:$0xff] %v21755_v59  ;;  %19237 = vmatprep.mubr.msk.f32.mxu0 %vm52_vm0, %v21752_v52  ;;  %v21769_v0 = vsel %vm5991_vm11, %v5897_v54, %v6032_v37 }
 0xdcd   :  { %19238 = vmatmul.mubr.msk.f32.vlgmr.msra.gmra.mrb[70].mxu0 %vm52_vm0, %v21755_v59  ;;  %24753 = vst [vmem:[#allocation8_spill] sm:$0xff] %v21763_v45  ;;  %24754 = vst [vmem:[#allocation9_spill] sm:$0xff] %v21769_v0 }
 0xdce   :  { %19240 = vmatprep.mubr.msk.f32.mxu0 %vm52_vm0, %v21763_v45 }
 0xdd1   :  { %19241 = vmatmul.mubr.msk.f32.gmra.mrb[72].mxu0 %vm52_vm0, %v21769_v0 }
 0xddf   :  { %v5839_v38 = vpop.xlane.xlu1 %5838 }
 0xde0   :  { %v5851_v24 = vmul.f32 0.03125, %v5839_v38  ;;  %v5836_v49 = vpop.xlane.xlu0 %5835 }
 0xde1   :  { %v5850_v62 = vmul.f32 0.03125, %v5836_v49 }
 0xde2   :  { %v5859_v31 = vadd.f32 1e-05, %v5851_v24 }
 0xde3   :  { %v5858_v7 = vadd.f32 1e-05, %v5850_v62 }
 0xde4   :  { %20167 = vrsqrt.f32 %v5859_v31  ;;  %v5845_v30 = vpop.xlane.xlu0 %5844  ;;  %v5842_v9 = vpop.xlane.xlu1 %5841 }
 0xde5   :  { %20169 = vrsqrt.f32 %v5858_v7  ;;  %v5853_v19 = vmul.f32 0.03125, %v5845_v30  ;;  %v5852_v4 = vmul.f32 0.03125, %v5842_v9 }
 0xde7   :  { %v5861_v10 = vadd.f32 1e-05, %v5853_v19  ;;  %v5860_v41 = vadd.f32 1e-05, %v5852_v4 }
 0xde9   :  { %20171 = vrsqrt.f32 %v5861_v10 }
 0xdea   :  { %20173 = vrsqrt.f32 %v5860_v41 }
 0xdee   :  { %v20168_v27 = vpop.eup %20167 }
 0xdef   :  { %v20170_v17 = vpop.eup %20169  ;;  %v5875_v56 = vmul.f32 %v20168_v27, %v21678_v34 }
 0xdf0   :  { %v5874_v35 = vmul.f32 %v20170_v17, %v21680_v23 }
 0xdf1   :  { %v5887_v54 = vmul.f32 %v21703_v2, %v5875_v56 }
 0xdf2   :  { %v5886_v3 = vmul.f32 %v21703_v2, %v5874_v35 }
 0xdf3   :  { %v20172_v55 = vpop.eup %20171  ;;  %v5899_v63 = vadd.f32 %v21706_v39, %v5887_v54 }
 0xdf4   :  { %v20174_v48 = vpop.eup %20173  ;;  %v5898_v61 = vadd.f32 %v21706_v39, %v5886_v3  ;;  %v5877_v47 = vmul.f32 %v20172_v55, %v21687_v58 }
 0xdf5   :  { %v5876_v50 = vmul.f32 %v20174_v48, %v21689_v22  ;;  %v5963_v11 = vrot.slane %v5899_v63, 7  ;;  %v18049_v25 = vrot.slane %v5899_v63, 9  ;;  %v18046_v36 = vrot.slane %v5899_v63, 4 }
 0xdf6   :  { %v5889_v34 = vmul.f32 %v21703_v2, %v5877_v47  ;;  %v5922_v23 = vrot.slane %v5898_v61, 2  ;;  %v18045_v43 = vrot.slane %v5898_v61, 5  ;;  %v18052_v18 = vrot.slane %v5898_v61, 7 }
 0xdf7   :  { %v5888_v5 = vmul.f32 %v21703_v2, %v5876_v50  ;;  %v6035_v28 = vsel %vm5975_vm5, %v5963_v11, %v5898_v61  ;;  %v18053_v32 = vrot.slane %v5899_v63, 6  ;;  %v5938_v58 = vrot.slane %v5898_v61, 4 }
 0xdf8   :  { %v5901_v26 = vadd.f32 %v21706_v39, %v5889_v34  ;;  %v6047_v15 = vsel %vm5975_vm5, %v18049_v25, %v5922_v23  ;;  %v18056_v29 = vrot.slane %v5899_v63, 11  ;;  %v18059_v1 = vrot.slane %v5898_v61, 9 }
 0xdf9   :  { %v5900_v22 = vadd.f32 %v21706_v39, %v5888_v5  ;;  %v5954_v21 = vrot.slane %v5898_v61, 6  ;;  %v18062_v53 = vrot.slane %v5899_v63, 13  ;;  %v18064_v20 = vrot.slane %v5898_v61, 11 }
 0xdfa   :  { %v5949_v13 = vrot.slane %v5901_v26, 5  ;;  %v18051_v57 = vrot.slane %v5901_v26, 7  ;;  %v18048_v60 = vrot.slane %v5901_v26, 2  ;;  %v18055_v8 = vrot.slane %v5901_v26, 4 }
 0xdfb   :  { %v5956_v2 = vrot.slane %v5900_v22, 6  ;;  %v6049_v40 = vsel %vm5977_vm6, %v5900_v22, %v6047_v15  ;;  %v18047_v33 = vrot.slane %v5900_v22, 3  ;;  %v18057_v42 = vrot.slane %v5900_v22, 10 }
 0xdfc   :  { %v6051_v44 = vsel %vm5979_vm7, %v18051_v57, %v6049_v40  ;;  %v18058_v6 = vrot.slane %v5901_v26, 9  ;;  %v18054_v46 = vrot.slane %v5900_v22, 5  ;;  %v6061_v37 = vsel %vm5975_vm5, %v18056_v29, %v5938_v58 }
 0xdfd   :  { %v6036_v51 = vsel %vm5977_vm6, %v5956_v2, %v6035_v28  ;;  %v6053_v39 = vsel %vm5982_vm8, %v18052_v18, %v6051_v44  ;;  %v6063_v49 = vsel %vm5977_vm6, %v18057_v42, %v6061_v37  ;;  %v18061_v62 = vrot.slane %v5900_v22, 7 }
 0xdfe   :  { %v6037_v38 = vsel %vm5979_vm7, %v5949_v13, %v6036_v51  ;;  %v6055_v24 = vsel %vm5985_vm9, %v18053_v32, %v6053_v39  ;;  %v6065_v7 = vsel %vm5979_vm7, %v18058_v6, %v6063_v49  ;;  %v6075_v30 = vsel %vm5975_vm5, %v18062_v53, %v5954_v21 }
 0xdff   :  { %v6039_v31 = vsel %vm5982_vm8, %v18045_v43, %v6037_v38  ;;  %v6076_v9 = vrot.slane %v5956_v2, 6  ;;  %v6057_v4 = vsel %vm5988_vm10, %v18054_v46, %v6055_v24  ;;  %v6067_v10 = vsel %vm5982_vm8, %v18059_v1, %v6065_v7 }
 0xe00   :  { %v6041_v19 = vsel %vm5985_vm9, %v18046_v36, %v6039_v31  ;;  %v18063_v41 = vrot.slane %v5901_v26, 11  ;;  %v6069_v17 = vsel %vm5985_vm9, %v5899_v63, %v6067_v10  ;;  %v6072_v56 = vrot.slane %v5949_v13, 1  ;;  %v20471_v36 = vld [vmem:[%s24721_s2] sm:$0x3] }
 0xe01   :  { %v6043_v27 = vsel %vm5988_vm10, %v18047_v33, %v6041_v19  ;;  %v6077_v35 = vsel %vm5977_vm6, %v6076_v9, %v6075_v30  ;;  %v6071_v3 = vsel %vm5988_vm10, %v18061_v62, %v6069_v17  ;;  %v6082_v48 = vrot.slane %v5963_v11, 3 }
 0xe02   :  { %v21805_v54 = vsel %vm5991_vm11, %v18048_v60, %v6043_v27  ;;  %v6079_v55 = vsel %vm5979_vm7, %v18063_v41, %v6077_v35  ;;  %v21812_v61 = vsel %vm5991_vm11, %v18055_v8, %v6057_v4  ;;  %v18065_v63 = vrot.slane %v5900_v22, 9 }
 0xe03   :  { %24755 = vst [vmem:[#allocation10_spill] sm:$0xff] %v21805_v54  ;;  %19243 = vmatprep.mubr.msk.f32.mxu0 %vm52_vm0, %v21805_v54  ;;  %24756 = vst [vmem:[#allocation11_spill] sm:$0xff] %v21812_v61  ;;  %v6081_v47 = vsel %vm5982_vm8, %v18064_v20, %v6079_v55  ;;  %v21818_v50 = vsel %vm5991_vm11, %v6072_v56, %v6071_v3  ;;  %v5974_v23 = vrot.slane %v20471_v36, %v5880_v12 }
 0xe04   :  { %19244 = vmatmul.mubr.msk.f32.gmra.mrb[74].mxu0 %vm52_vm0, %v21812_v61  ;;  %24757 = vst [vmem:[#allocation12_spill] sm:$0xff] %v21818_v50  ;;  %v6083_v25 = vsel %vm5985_vm9, %v6082_v48, %v6081_v47 }
 0xe05   :  { %19246 = vmatprep.mubr.msk.f32.mxu0 %vm52_vm0, %v21818_v50  ;;  %v6085_v11 = vsel %vm5988_vm10, %v18065_v63, %v6083_v25 }
 0xe06   :  { %v21825_v34 = vsel %vm5991_vm11, %v5901_v26, %v6085_v11 }
 0xe07   :  { %24758 = vst [vmem:[#allocation13_spill] sm:$0xff] %v21825_v34 }
 0xe08   :  { %19247 = vmatmul.mubr.msk.f32.gmra.mrb[76].mxu0 %vm52_vm0, %v21825_v34 }
 0xe09   :  { %19256 = vmatprep.mubr.msk.f32.mxu0 %vm20498_vm1, %v24732_v14 }
 0xea0   :  { %v19239_v5 = vpop.f32.mrb[70].mxu0 }
 0xea1   :  { %v6170_v28 = vpop.f32.mrb[71].mxu0  ;;  %v21844_v32 = vadd.f32 %v19239_v5, %v5974_v23 }
 0xea2   :  { %v21836_v43 = vadd.f32 %v6170_v28, %v5974_v23 }
 0xea3   :  { %v21856_v12 = vcombine.high %v21844_v32, %v21844_v32  ;;  %v21964_v39 = vmul.f32 0.35355338, %v21844_v32 }
 0xea4   :  { %v19242_v18 = vpop.f32.mrb[72].mxu0  ;;  %6249 = vrot.lane.b32.xlu1 %v21836_v43, %s20499_s19  ;;  %v21842_v26 = vcombine.high %v21836_v43, %v21836_v43  ;;  %v21949_v6 = vmul.f32 0.35355338, %v21836_v43 }
 0xea5   :  { %v6180_v15 = vpop.f32.mrb[73].mxu0  ;;  %v21858_v22 = vadd.f32 %v19242_v18, %v5974_v23  ;;  %v21973_v37 = vcombine.high %v21964_v39, %v21964_v39 }
 0xea6   :  { %6325 = vrot.lane.b32.xlu0 %v21842_v26, %s20499_s19  ;;  %v21848_v58 = vadd.f32 %v6180_v15, %v5974_v23  ;;  %v21959_v51 = vcombine.high %v21949_v6, %v21949_v6 }
 0xea7   :  { %v21872_v1 = vcombine.high %v21858_v22, %v21858_v22  ;;  %24759 = vst [vmem:[#allocation14_spill] sm:$0xff] %v21973_v37  ;;  %v22018_v19 = vmul.f32 0.35355338, %v21858_v22 }
 0xea8   :  { %6401 = vrot.lane.b32.xlu1 %v21844_v32, %s20499_s19  ;;  %v21866_v29 = vcombine.high %v21848_v58, %v21848_v58  ;;  %v21999_v31 = vmul.f32 0.35355338, %v21848_v58 }
 0xea9   :  { %v22031_v10 = vcombine.high %v22018_v19, %v22018_v19 }
 0xeaa   :  { %6553 = vrot.lane.b32.xlu0 %v21848_v58, %s20499_s19  ;;  %24760 = vst [vmem:[#allocation15_spill] sm:$0xff] %v21999_v31  ;;  %v22015_v9 = vcombine.high %v21999_v31, %v21999_v31 }
 0xeac   :  { %6477 = vrot.lane.b32.xlu1 %v21856_v12, %s20499_s19  ;;  %24761 = vst [vmem:[#allocation16_spill] sm:$0xff] %v22015_v9 }
 0xeae   :  { %6705 = vrot.lane.b32.xlu0 %v21858_v22, %s20499_s19 }
 0xeb0   :  { %6629 = vrot.lane.b32.xlu1 %v21866_v29, %s20499_s19 }
 0xeb4   :  { %6781 = vrot.lane.b32.xlu1 %v21872_v1, %s20499_s19 }
 0xed7   :  { %v19245_v21 = vpop.f32.mrb[74].mxu0 }
 0xed8   :  { %v6190_v13 = vpop.f32.mrb[75].mxu0  ;;  %v21878_v53 = vadd.f32 %v19245_v21, %v5974_v23 }
 0xed9   :  { %v21876_v57 = vadd.f32 %v6190_v13, %v5974_v23 }
 0xeda   :  { %v21896_v33 = vcombine.high %v21878_v53, %v21878_v53  ;;  %v22054_v3 = vmul.f32 0.35355338, %v21878_v53 }
 0xedb   :  { %v19248_v20 = vpop.f32.mrb[76].mxu0  ;;  %6857 = vrot.lane.b32.xlu0 %v21876_v57, %s20499_s19  ;;  %v21884_v2 = vcombine.high %v21876_v57, %v21876_v57  ;;  %v22041_v27 = vmul.f32 0.35355338, %v21876_v57 }
 0xedc   :  { %v21886_v60 = vadd.f32 %v19248_v20, %v5974_v23  ;;  %v6200_v40 = vpop.f32.mrb[77].mxu0  ;;  %v22069_v47 = vcombine.high %v22054_v3, %v22054_v3 }
 0xedd   :  { %v21888_v8 = vadd.f32 %v6200_v40, %v5974_v23  ;;  %6933 = vrot.lane.b32.xlu1 %v21884_v2, %s20499_s19  ;;  %v22050_v35 = vcombine.high %v22041_v27, %v22041_v27 }
 0xede   :  { %v21912_v42 = vcombine.high %v21886_v60, %v21886_v60  ;;  %v22092_v23 = vmul.f32 0.35355338, %v21886_v60 }
 0xedf   :  { %7009 = vrot.lane.b32.xlu0 %v21878_v53, %s20499_s19  ;;  %v21904_v44 = vcombine.high %v21888_v8, %v21888_v8  ;;  %v22073_v63 = vmul.f32 0.35355338, %v21888_v8 }
 0xee0   :  { %v22107_v28 = vcombine.high %v22092_v23, %v22092_v23 }
 0xee1   :  { %7085 = vrot.lane.b32.xlu1 %v21896_v33, %s20499_s19  ;;  %v22088_v36 = vcombine.high %v22073_v63, %v22073_v63 }
 0xee3   :  { %7161 = vrot.lane.b32.xlu0 %v21888_v8, %s20499_s19 }
 0xee5   :  { %7237 = vrot.lane.b32.xlu1 %v21904_v44, %s20499_s19 }
 0xee7   :  { %7313 = vrot.lane.b32.xlu0 %v21886_v60, %s20499_s19 }
 0xee9   :  { %7389 = vrot.lane.b32.xlu1 %v21912_v42, %s20499_s19 }
 0xeeb   :  { %7737 = vrot.lane.b32.xlu0 %v21842_v26, %s20500_s20 }
 0xeed   :  { %7658 = vrot.lane.b32.xlu1 %v21836_v43, %s20500_s20 }
 0xeef   :  { %7891 = vrot.lane.b32.xlu0 %v21856_v12, %s20500_s20 }
 0xef1   :  { %7814 = vrot.lane.b32.xlu1 %v21844_v32, %s20500_s20 }
 0xef3   :  { %8122 = vrot.lane.b32.xlu0 %v21858_v22, %s20500_s20 }
 0xef5   :  { %7968 = vrot.lane.b32.xlu1 %v21848_v58, %s20500_s20 }
 0xef7   :  { %8276 = vrot.lane.b32.xlu0 %v21876_v57, %s20500_s20 }
 0xef9   :  { %8045 = vrot.lane.b32.xlu1 %v21866_v29, %s20500_s20 }
 0xefb   :  { %8430 = vrot.lane.b32.xlu0 %v21878_v53, %s20500_s20 }
 0xefd   :  { %8199 = vrot.lane.b32.xlu1 %v21872_v1, %s20500_s20 }
 0xeff   :  { %8584 = vrot.lane.b32.xlu0 %v21888_v8, %s20500_s20 }
 0xf01   :  { %8353 = vrot.lane.b32.xlu1 %v21884_v2, %s20500_s20 }
 0xf03   :  { %8738 = vrot.lane.b32.xlu0 %v21886_v60, %s20500_s20 }
 0xf05   :  { %8507 = vrot.lane.b32.xlu1 %v21896_v33, %s20500_s20 }
 0xf07   :  { %8894 = vrot.lane.b32.xlu0 %v21836_v43, %s20501_s21 }
 0xf09   :  { %8815 = vrot.lane.b32.xlu1 %v21912_v42, %s20500_s20 }
 0xf0b   :  { %8892 = vrot.lane.b32.xlu0 %v21949_v6, %s20502_s22 }
 0xf0d   :  { %8972 = vrot.lane.b32.xlu1 %v21842_v26, %s20501_s21 }
 0xf0f   :  { %9050 = vrot.lane.b32.xlu0 %v21844_v32, %s20501_s21 }
 0xf11   :  { %8970 = vrot.lane.b32.xlu1 %v21959_v51, %s20502_s22 }
 0xf13   :  { %9048 = vrot.lane.b32.xlu0 %v21964_v39, %s20502_s22 }
 0xf15   :  { %9128 = vrot.lane.b32.xlu1 %v21856_v12, %s20501_s21 }
 0xf16   :  { %v6250_v46 = vpop.permute.xlu1 %6249 }
 0xf17   :  { %19250 = vmatpush3.xpose.msk.msra.mxu1 %vm193_vm2, %v6250_v46 }
 0xf18   :  { %v6326_v38 = vpop.permute.xlu0 %6325  ;;  %19259 = vmatprep.subr.mxu1 %v24732_v14 }
 0xf19   :  { %9126 = vrot.lane.b32.xlu1 %v21973_v37, %s20502_s22  ;;  %19255 = vmatpush3.xpose.msk.msra.mxu0 %vm193_vm2, %v6326_v38 }
 0xf1a   :  { %v6402_v24 = vpop.permute.xlu1 %6401  ;;  %19252 = vmatmul.mubr.msk.f32.vlgmr.msra.gmra.mrb[74].mxu1 %vm193_vm2, %v21949_v6  ;;  %19264 = vmatprep.subr.mxu0 %v24732_v14 }
 0xf1b   :  { %19260 = vmatpush3.xpose.msk.msra.mxu1 %vm193_vm2, %v6402_v24  ;;  %19261 = vmatprep.mubr.msk.f32.mxu1 %vm20498_vm1, %v24732_v14 }
 0xf1c   :  { %v6554_v49 = vpop.permute.xlu0 %6553  ;;  %19257 = vmatmul.mubr.msk.f32.vlgmr.msra.gmra.mrb[78].mxu0 %vm193_vm2, %v21959_v51  ;;  %19269 = vmatprep.subr.mxu1 %v24732_v14 }
 0xf1d   :  { %8661 = vrot.lane.b32.xlu1 %v21904_v44, %s20500_s20  ;;  %19266 = vmatprep.mubr.msk.f32.mxu0 %vm20498_vm1, %v24732_v14 }
 0xf1e   :  { %v6478_v62 = vpop.permute.xlu1 %6477  ;;  %19262 = vmatmul.mubr.msk.f32.vlgmr.msra.gmra.mrb[76].mxu1 %vm193_vm2, %v21964_v39 }
 0xf1f   :  { %19265 = vmatpush3.xpose.msk.msra.mxu0 %vm193_vm2, %v6478_v62  ;;  %19270 = vmatpush3.xpose.msk.msra.mxu1 %vm193_vm2, %v6554_v49 }
 0xf20   :  { %19271 = vmatprep.mubr.msk.f32.mxu1 %vm20498_vm1, %v24732_v14  ;;  %19274 = vmatprep.subr.mxu0 %v24732_v14  ;;  %v6706_v7 = vpop.permute.xlu0 %6705 }
 0xf21   :  { %19279 = vmatprep.subr.mxu1 %v24732_v14 }
 0xf22   :  { %v6630_v30 = vpop.permute.xlu1 %6629  ;;  %19267 = vmatmul.mubr.msk.f32.vlgmr.msra.gmra.mrb[80].mxu0 %vm193_vm2, %v21973_v37  ;;  %19272 = vmatmul.mubr.msk.f32.vlgmr.msra.gmra.mrb[78].mxu1 %vm193_vm2, %v21999_v31 }
 0xf23   :  { %19275 = vmatpush3.xpose.msk.msra.mxu0 %vm193_vm2, %v6630_v30  ;;  %19280 = vmatpush3.xpose.msk.msra.mxu1 %vm193_vm2, %v6706_v7 }
 0xf24   :  { %19276 = vmatprep.mubr.msk.f32.mxu0 %vm20498_vm1, %v24732_v14  ;;  %19281 = vmatprep.mubr.msk.f32.mxu1 %vm20498_vm1, %v24732_v14 }
 0xf25   :  { %19284 = vmatprep.subr.mxu0 %v24732_v14  ;;  %19289 = vmatprep.subr.mxu1 %v24732_v14 }
 0xf26   :  { %v6782_v4 = vpop.permute.xlu1 %6781  ;;  %19277 = vmatmul.mubr.msk.f32.vlgmr.msra.gmra.mrb[82].mxu0 %vm193_vm2, %v22015_v9  ;;  %19282 = vmatmul.mubr.msk.f32.vlgmr.msra.gmra.mrb[80].mxu1 %vm193_vm2, %v22018_v19 }
 0xf27   :  { %19285 = vmatpush3.xpose.msk.msra.mxu0 %vm193_vm2, %v6782_v4  ;;  %19286 = vmatprep.mubr.msk.f32.mxu0 %vm20498_vm1, %v24732_v14 }
 0xf28   :  { %19294 = vmatprep.subr.mxu0 %v24732_v14  ;;  %19291 = vmatprep.mubr.msk.f32.mxu1 %vm20498_vm1, %v24732_v14 }
 0xf2a   :  { %19287 = vmatmul.mubr.msk.f32.vlgmr.msra.gmra.mrb[84].mxu0 %vm193_vm2, %v22031_v10 }
 0xf2b   :  { %19296 = vmatprep.mubr.msk.f32.mxu0 %vm20498_vm1, %v24732_v14 }
 0xf4d   :  { %v6858_v41 = vpop.permute.xlu0 %6857 }
 0xf4e   :  { %19290 = vmatpush3.xpose.msk.msra.mxu1 %vm193_vm2, %v6858_v41 }
 0xf4f   :  { %v6934_v17 = vpop.permute.xlu1 %6933  ;;  %19299 = vmatprep.subr.mxu1 %v24732_v14 }
 0xf50   :  { %19295 = vmatpush3.xpose.msk.msra.mxu0 %vm193_vm2, %v6934_v17 }
 0xf51   :  { %v7010_v56 = vpop.permute.xlu0 %7009  ;;  %19292 = vmatmul.mubr.msk.f32.vlgmr.msra.gmra.mrb[82].mxu1 %vm193_vm2, %v22041_v27  ;;  %19304 = vmatprep.subr.mxu0 %v24732_v14 }
 0xf52   :  { %19300 = vmatpush3.xpose.msk.msra.mxu1 %vm193_vm2, %v7010_v56  ;;  %19301 = vmatprep.mubr.msk.f32.mxu1 %vm20498_vm1, %v24732_v14 }
 0xf53   :  { %v7086_v55 = vpop.permute.xlu1 %7085  ;;  %19297 = vmatmul.mubr.msk.f32.vlgmr.msra.gmra.mrb[86].mxu0 %vm193_vm2, %v22050_v35  ;;  %19309 = vmatprep.subr.mxu1 %v24732_v14 }
 0xf54   :  { %19305 = vmatpush3.xpose.msk.msra.mxu0 %vm193_vm2, %v7086_v55  ;;  %19306 = vmatprep.mubr.msk.f32.mxu0 %vm20498_vm1, %v24732_v14 }
 0xf55   :  { %v7162_v48 = vpop.permute.xlu0 %7161  ;;  %19302 = vmatmul.mubr.msk.f32.vlgmr.msra.gmra.mrb[84].mxu1 %vm193_vm2, %v22054_v3  ;;  %19314 = vmatprep.subr.mxu0 %v24732_v14 }
 0xf56   :  { %19310 = vmatpush3.xpose.msk.msra.mxu1 %vm193_vm2, %v7162_v48  ;;  %19311 = vmatprep.mubr.msk.f32.mxu1 %vm20498_vm1, %v24732_v14 }
 0xf57   :  { %v7238_v25 = vpop.permute.xlu1 %7237  ;;  %19307 = vmatmul.mubr.msk.f32.vlgmr.msra.gmra.mrb[88].mxu0 %vm193_vm2, %v22069_v47  ;;  %19319 = vmatprep.subr.mxu1 %v24732_v14 }
 0xf58   :  { %19315 = vmatpush3.xpose.msk.msra.mxu0 %vm193_vm2, %v7238_v25  ;;  %19316 = vmatprep.mubr.msk.f32.mxu0 %vm20498_vm1, %v24732_v14 }
 0xf59   :  { %v7314_v11 = vpop.permute.xlu0 %7313  ;;  %19312 = vmatmul.mubr.msk.f32.vlgmr.msra.gmra.mrb[86].mxu1 %vm193_vm2, %v22073_v63  ;;  %19324 = vmatprep.subr.mxu0 %v24732_v14 }
 0xf5a   :  { %19320 = vmatpush3.xpose.msk.msra.mxu1 %vm193_vm2, %v7314_v11  ;;  %19321 = vmatprep.mubr.msk.f32.mxu1 %vm20498_vm1, %v24732_v14 }
 0xf5b   :  { %v7390_v5 = vpop.permute.xlu1 %7389  ;;  %19317 = vmatmul.mubr.msk.f32.vlgmr.msra.gmra.mrb[90].mxu0 %vm193_vm2, %v22088_v36  ;;  %19329 = vmatprep.subr.mxu1 %v24732_v14 }
 0xf5c   :  { %19325 = vmatpush3.xpose.msk.msra.mxu0 %vm193_vm2, %v7390_v5  ;;  %19326 = vmatprep.mubr.msk.f32.mxu0 %vm20498_vm1, %v24732_v14 }
 0xf5d   :  { %19322 = vmatmul.mubr.msk.f32.vlgmr.msra.gmra.mrb[88].mxu1 %vm193_vm2, %v22092_v23  ;;  %19334 = vmatprep.subr.mxu0 %v24732_v14  ;;  %v7738_v18 = vpop.permute.xlu0 %7737 }
 0xf5e   :  { %19331 = vmatprep.mubr.msk.f32.mxu1 %vm20498_vm1, %v24732_v14 }
 0xf5f   :  { %v7659_v15 = vpop.permute.xlu1 %7658  ;;  %19327 = vmatmul.mubr.msk.f32.vlgmr.msra.gmra.mrb[92].mxu0 %vm193_vm2, %v22107_v28 }
 0xf60   :  { %19330 = vmatpush3.msk.msra.mxu1 %vm7664_vm12, %v7659_v15  ;;  %19335 = vmatpush3.msk.msra.mxu0 %vm7664_vm12, %v7738_v18 }
 0xf61   :  { %19339 = vmatprep.subr.mxu1 %v24732_v14  ;;  %19336 = vmatprep.mubr.msk.f32.mxu0 %vm20498_vm1, %v24732_v14  ;;  %v22188_v50 = vpop.permute.xlu0 %7891 }
 0xf62   :  { %19344 = vmatprep.subr.mxu0 %v24732_v14 }
 0xf63   :  { %v22184_v14 = vpop.permute.xlu1 %7814 }
 0xfed   :  { %v22120_v21 = vpop.f32.mrb[74].mxu1 }
 0xfee   :  { %v19253_v13 = vpop.f32.mrb[75].mxu1  ;;  %v7466_v20 = vsel %vm7465_vm13, %v22120_v21, -inf }
 0xfef   :  { %7467 = vmax.xlane.f32.xlu0 %v7466_v20  ;;  %v22124_v40 = vpop.f32.mrb[78].mxu0 }
 0xff0   :  { %v19258_v46 = vpop.f32.mrb[79].mxu0  ;;  %v7469_v38 = vsel %vm7465_vm13, %v22124_v40, -inf }
 0xff1   :  { %v22128_v24 = vpop.f32.mrb[76].mxu1  ;;  %7470 = vmax.xlane.f32.xlu1 %v7469_v38 }
 0xff2   :  { %v19263_v49 = vpop.f32.mrb[77].mxu1  ;;  %v7472_v62 = vsel %vm7465_vm13, %v22128_v24, -inf }
 0xff3   :  { %7473 = vmax.xlane.f32.xlu0 %v7472_v62 }
 0xff5   :  { %v22132_v7 = vpop.f32.mrb[80].mxu0  ;;  %v22134_v30 = vpop.f32.mrb[78].mxu1 }
 0xff6   :  { %v19268_v4 = vpop.f32.mrb[81].mxu0  ;;  %v19273_v41 = vpop.f32.mrb[79].mxu1  ;;  %v7478_v17 = vsel %vm7465_vm13, %v22134_v30, -inf  ;;  %v7475_v56 = vsel %vm7465_vm13, %v22132_v7, -inf }
 0xff7   :  { %7479 = vmax.xlane.f32.xlu1 %v7478_v17  ;;  %7476 = vmax.xlane.f32.xlu0 %v7475_v56 }
 0xff9   :  { %v22140_v55 = vpop.f32.mrb[82].mxu0  ;;  %v22142_v48 = vpop.f32.mrb[80].mxu1 }
 0xffa   :  { %v19278_v25 = vpop.f32.mrb[83].mxu0  ;;  %v19283_v11 = vpop.f32.mrb[81].mxu1  ;;  %v7484_v5 = vsel %vm7465_vm13, %v22142_v48, -inf  ;;  %v7481_v18 = vsel %vm7465_vm13, %v22140_v55, -inf }
 0xffb   :  { %7485 = vmax.xlane.f32.xlu1 %v7484_v5  ;;  %7482 = vmax.xlane.f32.xlu0 %v7481_v18 }
 0xffd   :  { %v22148_v15 = vpop.f32.mrb[84].mxu0 }
 0xffe   :  { %v19288_v13 = vpop.f32.mrb[85].mxu0  ;;  %v7487_v20 = vsel %vm7465_vm13, %v22148_v15, -inf }
 0xfff   :  { %7488 = vmax.xlane.f32.xlu0 %v7487_v20 }
0x1024   :  { %v22152_v46 = vpop.f32.mrb[82].mxu1 }
0x1025   :  { %v19293_v38 = vpop.f32.mrb[83].mxu1  ;;  %v7490_v49 = vsel %vm7465_vm13, %v22152_v46, -inf }
0x1026   :  { %7491 = vmax.xlane.f32.xlu1 %v7490_v49  ;;  %v22156_v62 = vpop.f32.mrb[86].mxu0 }
0x1027   :  { %v19298_v4 = vpop.f32.mrb[87].mxu0  ;;  %v7493_v41 = vsel %vm7465_vm13, %v22156_v62, -inf }
0x1028   :  { %v22160_v17 = vpop.f32.mrb[84].mxu1  ;;  %7494 = vmax.xlane.f32.xlu0 %v7493_v41 }
0x1029   :  { %v19303_v56 = vpop.f32.mrb[85].mxu1  ;;  %v7496_v25 = vsel %vm7465_vm13, %v22160_v17, -inf }
0x102a   :  { %7497 = vmax.xlane.f32.xlu1 %v7496_v25  ;;  %v22164_v11 = vpop.f32.mrb[88].mxu0 }
0x102b   :  { %v19308_v5 = vpop.f32.mrb[89].mxu0  ;;  %v7499_v18 = vsel %vm7465_vm13, %v22164_v11, -inf }
0x102c   :  { %v22168_v13 = vpop.f32.mrb[86].mxu1  ;;  %7500 = vmax.xlane.f32.xlu0 %v7499_v18 }
0x102d   :  { %v19313_v20 = vpop.f32.mrb[87].mxu1  ;;  %v7502_v38 = vsel %vm7465_vm13, %v22168_v13, -inf }
0x102e   :  { %7503 = vmax.xlane.f32.xlu1 %v7502_v38  ;;  %v22172_v49 = vpop.f32.mrb[90].mxu0 }
0x102f   :  { %v19318_v4 = vpop.f32.mrb[91].mxu0  ;;  %v7505_v41 = vsel %vm7465_vm13, %v22172_v49, -inf }
0x1030   :  { %v22176_v56 = vpop.f32.mrb[88].mxu1  ;;  %7506 = vmax.xlane.f32.xlu0 %v7505_v41  ;;  %v22186_v4 = vpop.permute.xlu1 %7968 }
0x1031   :  { %v19323_v25 = vpop.f32.mrb[89].mxu1  ;;  %v7508_v5 = vsel %vm7465_vm13, %v22176_v56, -inf }
0x1032   :  { %7509 = vmax.xlane.f32.xlu1 %v7508_v5  ;;  %v22180_v18 = vpop.f32.mrb[92].mxu0  ;;  %v22196_v25 = vpop.permute.xlu0 %8122 }
0x1033   :  { %v19328_v20 = vpop.f32.mrb[93].mxu0  ;;  %v7511_v38 = vsel %vm7465_vm13, %v22180_v18, -inf }
0x1034   :  { %7512 = vmax.xlane.f32.xlu0 %v7511_v38  ;;  %v22192_v41 = vpop.permute.xlu1 %8045 }
0x1036   :  { %v22204_v20 = vpop.permute.xlu0 %8276 }
0x1037   :  { %24763 = vst [vmem:[#allocation18_spill] sm:$0xff] %v22204_v20 }
0x1038   :  { %v22198_v5 = vpop.permute.xlu1 %8199 }
0x1039   :  { %24762 = vst [vmem:[#allocation17_spill] sm:$0xff] %v22198_v5 }
0x103a   :  { %v22212_v34 = vpop.permute.xlu0 %8430 }
0x103b   :  { %24765 = vst [vmem:[#allocation20_spill] sm:$0xff] %v22212_v34 }
0x103c   :  { %v22208_v38 = vpop.permute.xlu1 %8353 }
0x103d   :  { %24764 = vst [vmem:[#allocation19_spill] sm:$0xff] %v22208_v38 }
0x103e   :  { %v22216_v61 = vpop.permute.xlu0 %8584 }
0x103f   :  { %24767 = vst [vmem:[#allocation22_spill] sm:$0xff] %v22216_v61 }
0x1040   :  { %v22214_v54 = vpop.permute.xlu1 %8507 }
0x1041   :  { %24766 = vst [vmem:[#allocation21_spill] sm:$0xff] %v22214_v54 }
0x1042   :  { %v22220_v45 = vpop.permute.xlu0 %8738 }
0x1043   :  { %9284 = vrot.lane.b32.xlu1 %v21866_v29, %s20501_s21  ;;  %24769 = vst [vmem:[#allocation24_spill] sm:$0xff] %v22220_v45 }
0x1044   :  { %v22218_v0 = vpop.permute.xlu1 %8815 }
0x1045   :  { %24768 = vst [vmem:[#allocation23_spill] sm:$0xff] %v22218_v0 }
0x1046   :  { %v22224_v59 = vpop.permute.xlu0 %8894 }
0x1047   :  { %9282 = vrot.lane.b32.xlu1 %v22015_v9, %s20502_s22  ;;  %24771 = vst [vmem:[#allocation26_spill] sm:$0xff] %v22224_v59 }
0x1048   :  { %v22222_v52 = vpop.permute.xlu1 %8972 }
0x1049   :  { %24770 = vst [vmem:[#allocation25_spill] sm:$0xff] %v22222_v52 }
0x104a   :  { %9206 = vrot.lane.b32.xlu0 %v21848_v58, %s20501_s21 }
0x104b   :  { %9440 = vrot.lane.b32.xlu1 %v21872_v1, %s20501_s21 }
0x104c   :  { %v22226_v16 = vpop.permute.xlu1 %8970 }
0x104d   :  { %24772 = vst [vmem:[#allocation27_spill] sm:$0xff] %v22226_v16 }
0x104e   :  { %9204 = vrot.lane.b32.xlu0 %v21999_v31, %s20502_s22  ;;  %v22228_v31 = vpop.permute.xlu0 %8892 }
0x104f   :  { %24773 = vst [vmem:[#allocation28_spill] sm:$0xff] %v22228_v31 }
0x1050   :  { %v22230_v9 = vpop.permute.xlu1 %9128 }
0x1051   :  { %24774 = vst [vmem:[#allocation29_spill] sm:$0xff] %v22230_v9 }
0x1052   :  { %9362 = vrot.lane.b32.xlu0 %v21858_v22, %s20501_s21  ;;  %v22232_v38 = vpop.permute.xlu0 %9050 }
0x1053   :  { %24775 = vst [vmem:[#allocation30_spill] sm:$0xff] %v22232_v38 }
0x1054   :  { %v22234_v34 = vpop.permute.xlu1 %9126 }
0x1055   :  { %24776 = vst [vmem:[#allocation31_spill] sm:$0xff] %v22234_v34 }
0x1056   :  { %v22236_v54 = vpop.permute.xlu0 %9048 }
0x1057   :  { %24777 = vst [vmem:[#allocation32_spill] sm:$0xff] %v22236_v54 }
0x1058   :  { %v22238_v61 = vpop.permute.xlu1 %8661 }
0x1059   :  { %24778 = vst [vmem:[#allocation33_spill] sm:$0xff] %v22238_v61 }
0x107c   :  { %v7468_v0 = vpop.xlane.xlu0 %7467 }
0x107d   :  { %v7514_v45 = vsub.f32 %v22120_v21, %v7468_v0 }
0x107e   :  { %v7471_v52 = vpop.xlane.xlu1 %7470 }
0x107f   :  { %v7530_v20 = vmul.f32 1.442695, %v7514_v45  ;;  %v7515_v59 = vsub.f32 %v22124_v40, %v7471_v52 }
0x1080   :  { %v7474_v16 = vpop.xlane.xlu0 %7473 }
0x1081   :  { %20175 = vpow2.f32 %v7530_v20  ;;  %v7532_v31 = vmul.f32 1.442695, %v7515_v59  ;;  %v7516_v9 = vsub.f32 %v22128_v24, %v7474_v16 }
0x1083   :  { %20177 = vpow2.f32 %v7532_v31  ;;  %v7534_v38 = vmul.f32 1.442695, %v7516_v9 }
0x1084   :  { %v7480_v5 = vpop.xlane.xlu1 %7479  ;;  %v7477_v34 = vpop.xlane.xlu0 %7476 }
0x1085   :  { %20179 = vpow2.f32 %v7534_v38  ;;  %v7518_v54 = vsub.f32 %v22134_v30, %v7480_v5  ;;  %v7517_v61 = vsub.f32 %v22132_v7, %v7477_v34 }
0x1087   :  { %v7538_v37 = vmul.f32 1.442695, %v7518_v54  ;;  %v7536_v0 = vmul.f32 1.442695, %v7517_v61 }
0x1088   :  { %v7486_v21 = vpop.xlane.xlu1 %7485  ;;  %v7483_v45 = vpop.xlane.xlu0 %7482 }
0x1089   :  { %20181 = vpow2.f32 %v7538_v37  ;;  %v7520_v52 = vsub.f32 %v22142_v48, %v7486_v21  ;;  %v7519_v59 = vsub.f32 %v22140_v55, %v7483_v45 }
0x108a   :  { %20183 = vpow2.f32 %v7536_v0 }
0x108b   :  { %v22247_v16 = vpop.eup %20175  ;;  %v7542_v31 = vmul.f32 1.442695, %v7520_v52  ;;  %v7540_v9 = vmul.f32 1.442695, %v7519_v59 }
0x108c   :  { %v7489_v40 = vpop.xlane.xlu0 %7488  ;;  %v7562_v24 = vsel %vm7465_vm13, %v22247_v16, 0.0 }
0x108d   :  { %v22251_v30 = vpop.eup %20177  ;;  %20185 = vpow2.f32 %v7542_v31  ;;  %v7521_v54 = vsub.f32 %v22148_v15, %v7489_v40  ;;  %7563 = vadd.xlane.f32.xlu1 %v7562_v24 }
0x108e   :  { %20187 = vpow2.f32 %v7540_v9  ;;  %v7565_v61 = vsel %vm7465_vm13, %v22251_v30, 0.0 }
0x108f   :  { %v22256_v34 = vpop.eup %20179  ;;  %v7544_v37 = vmul.f32 1.442695, %v7521_v54  ;;  %7566 = vadd.xlane.f32.xlu0 %v7565_v61 }
0x1090   :  { %v7568_v7 = vsel %vm7465_vm13, %v22256_v34, 0.0 }
0x1091   :  { %20189 = vpow2.f32 %v7544_v37  ;;  %7569 = vadd.xlane.f32.xlu1 %v7568_v7 }
0x1093   :  { %v22260_v55 = vpop.eup %20181 }
0x1094   :  { %v22262_v48 = vpop.eup %20183  ;;  %v7574_v15 = vsel %vm7465_vm13, %v22260_v55, 0.0 }
0x1095   :  { %7575 = vadd.xlane.f32.xlu1 %v7574_v15  ;;  %v7571_v5 = vsel %vm7465_vm13, %v22262_v48, 0.0 }
0x1096   :  { %7572 = vadd.xlane.f32.xlu0 %v7571_v5 }
0x1097   :  { %v22268_v20 = vpop.eup %20185 }
0x1098   :  { %v22270_v38 = vpop.eup %20187  ;;  %v7580_v0 = vsel %vm7465_vm13, %v22268_v20, 0.0 }
0x1099   :  { %7581 = vadd.xlane.f32.xlu1 %v7580_v0  ;;  %v7577_v21 = vsel %vm7465_vm13, %v22270_v38, 0.0 }
0x109a   :  { %7578 = vadd.xlane.f32.xlu0 %v7577_v21 }
0x109b   :  { %v22276_v45 = vpop.eup %20189 }
0x109c   :  { %v7583_v52 = vsel %vm7465_vm13, %v22276_v45, 0.0 }
0x109e   :  { %7584 = vadd.xlane.f32.xlu0 %v7583_v52 }
0x10b3   :  { %v7492_v59 = vpop.xlane.xlu1 %7491 }
0x10b4   :  { %v7522_v31 = vsub.f32 %v22152_v46, %v7492_v59 }
0x10b5   :  { %v7495_v9 = vpop.xlane.xlu0 %7494 }
0x10b6   :  { %v7546_v40 = vmul.f32 1.442695, %v7522_v31  ;;  %v7523_v24 = vsub.f32 %v22156_v62, %v7495_v9 }
0x10b7   :  { %v7498_v54 = vpop.xlane.xlu1 %7497 }
0x10b8   :  { %20191 = vpow2.f32 %v7546_v40  ;;  %v7548_v61 = vmul.f32 1.442695, %v7523_v24  ;;  %v7524_v37 = vsub.f32 %v22160_v17, %v7498_v54 }
0x10b9   :  { %v7501_v7 = vpop.xlane.xlu0 %7500 }
0x10ba   :  { %20193 = vpow2.f32 %v7548_v61  ;;  %v7550_v15 = vmul.f32 1.442695, %v7524_v37  ;;  %v7525_v5 = vsub.f32 %v22164_v11, %v7501_v7 }
0x10bb   :  { %v7504_v0 = vpop.xlane.xlu1 %7503 }
0x10bc   :  { %20195 = vpow2.f32 %v7550_v15  ;;  %v7552_v21 = vmul.f32 1.442695, %v7525_v5  ;;  %v7526_v52 = vsub.f32 %v22168_v13, %v7504_v0 }
0x10bd   :  { %v7507_v46 = vpop.xlane.xlu0 %7506 }
0x10be   :  { %20197 = vpow2.f32 %v7552_v21  ;;  %v7554_v59 = vmul.f32 1.442695, %v7526_v52  ;;  %v7527_v62 = vsub.f32 %v22172_v49, %v7507_v46 }
0x10bf   :  { %v7510_v31 = vpop.xlane.xlu1 %7509 }
0x10c0   :  { %20199 = vpow2.f32 %v7554_v59  ;;  %v7556_v9 = vmul.f32 1.442695, %v7527_v62  ;;  %v7528_v17 = vsub.f32 %v22176_v56, %v7510_v31 }
0x10c1   :  { %v7513_v40 = vpop.xlane.xlu0 %7512 }
0x10c2   :  { %v22287_v24 = vpop.eup %20191  ;;  %20201 = vpow2.f32 %v7556_v9  ;;  %v7558_v11 = vmul.f32 1.442695, %v7528_v17  ;;  %v7529_v54 = vsub.f32 %v22180_v18, %v7513_v40 }
0x10c3   :  { %v7586_v13 = vsel %vm7465_vm13, %v22287_v24, 0.0  ;;  %v22360_v9 = vpop.permute.xlu1 %9284 }
0x10c4   :  { %v22292_v61 = vpop.eup %20193  ;;  %20203 = vpow2.f32 %v7558_v11  ;;  %v7560_v37 = vmul.f32 1.442695, %v7529_v54  ;;  %7587 = vadd.xlane.f32.xlu1 %v7586_v13 }
0x10c5   :  { %v7589_v49 = vsel %vm7465_vm13, %v22292_v61, 0.0  ;;  %v22362_v17 = vpop.permute.xlu0 %9206 }
0x10c6   :  { %v22296_v7 = vpop.eup %20195  ;;  %20205 = vpow2.f32 %v7560_v37  ;;  %7590 = vadd.xlane.f32.xlu0 %v7589_v49 }
0x10c7   :  { %v7592_v56 = vsel %vm7465_vm13, %v22296_v7, 0.0  ;;  %v22368_v40 = vpop.permute.xlu1 %9282 }
0x10c8   :  { %v22300_v15 = vpop.eup %20197  ;;  %7593 = vadd.xlane.f32.xlu1 %v7592_v56 }
0x10c9   :  { %v7595_v18 = vsel %vm7465_vm13, %v22300_v15, 0.0  ;;  %v22374_v11 = vpop.permute.xlu0 %9204 }
0x10ca   :  { %v22304_v5 = vpop.eup %20199  ;;  %7596 = vadd.xlane.f32.xlu0 %v7595_v18 }
0x10cb   :  { %v7598_v0 = vsel %vm7465_vm13, %v22304_v5, 0.0  ;;  %v22380_v54 = vpop.permute.xlu1 %9440 }
0x10cc   :  { %v22308_v21 = vpop.eup %20201  ;;  %7599 = vadd.xlane.f32.xlu1 %v7598_v0 }
0x10cd   :  { %v7601_v52 = vsel %vm7465_vm13, %v22308_v21, 0.0  ;;  %v22382_v13 = vpop.permute.xlu0 %9362 }
0x10ce   :  { %v22312_v46 = vpop.eup %20203  ;;  %7602 = vadd.xlane.f32.xlu0 %v7601_v52 }
0x10cf   :  { %v7604_v59 = vsel %vm7465_vm13, %v22312_v46, 0.0 }
0x10d0   :  { %v22316_v62 = vpop.eup %20205  ;;  %7605 = vadd.xlane.f32.xlu1 %v7604_v59 }
0x10d1   :  { %v7607_v31 = vsel %vm7465_vm13, %v22316_v62, 0.0 }
0x10d2   :  { %7608 = vadd.xlane.f32.xlu0 %v7607_v31 }
0x10e1   :  { %9438 = vrot.lane.b32.xlu1 %v22031_v10, %s20502_s22 }
0x10e5   :  { %9596 = vrot.lane.b32.xlu1 %v21884_v2, %s20501_s21 }
0x10e8   :  { %9360 = vrot.lane.b32.xlu0 %v22018_v19, %s20502_s22 }
0x10e9   :  { %9594 = vrot.lane.b32.xlu1 %v22050_v35, %s20502_s22 }
0x10ec   :  { %9518 = vrot.lane.b32.xlu0 %v21876_v57, %s20501_s21 }
0x10ed   :  { %9752 = vrot.lane.b32.xlu1 %v21896_v33, %s20501_s21 }
0x10f0   :  { %9516 = vrot.lane.b32.xlu0 %v22041_v27, %s20502_s22 }
0x10f1   :  { %9750 = vrot.lane.b32.xlu1 %v22069_v47, %s20502_s22 }
0x10f4   :  { %9674 = vrot.lane.b32.xlu0 %v21878_v53, %s20501_s21 }
0x10f5   :  { %9908 = vrot.lane.b32.xlu1 %v21904_v44, %s20501_s21 }
0x10f8   :  { %9672 = vrot.lane.b32.xlu0 %v22054_v3, %s20502_s22 }
0x10f9   :  { %9906 = vrot.lane.b32.xlu1 %v22088_v36, %s20502_s22 }
0x10fc   :  { %9830 = vrot.lane.b32.xlu0 %v21888_v8, %s20501_s21 }
0x10fd   :  { %10064 = vrot.lane.b32.xlu1 %v21912_v42, %s20501_s21 }
0x1100   :  { %9828 = vrot.lane.b32.xlu0 %v22073_v63, %s20502_s22 }
0x1101   :  { %10062 = vrot.lane.b32.xlu1 %v22107_v28, %s20502_s22 }
0x1104   :  { %9986 = vrot.lane.b32.xlu0 %v21886_v60, %s20501_s21 }
0x1105   :  { %10333 = vrot.lane.b32.xlu1 %v21836_v43, %s20503_s23 }
0x1108   :  { %9984 = vrot.lane.b32.xlu0 %v22092_v23, %s20502_s22 }
0x1109   :  { %10487 = vrot.lane.b32.xlu1 %v21844_v32, %s20503_s23 }
0x110c   :  { %10410 = vrot.lane.b32.xlu0 %v21842_v26, %s20503_s23 }
0x110d   :  { %10641 = vrot.lane.b32.xlu1 %v21848_v58, %s20503_s23 }
0x1110   :  { %10564 = vrot.lane.b32.xlu0 %v21856_v12, %s20503_s23 }
0x1111   :  { %10718 = vrot.lane.b32.xlu1 %v21866_v29, %s20503_s23 }
0x1114   :  { %10795 = vrot.lane.b32.xlu0 %v21858_v22, %s20503_s23 }
0x1115   :  { %10872 = vrot.lane.b32.xlu1 %v21872_v1, %s20503_s23 }
0x1118   :  { %10949 = vrot.lane.b32.xlu0 %v21876_v57, %s20503_s23 }
0x1119   :  { %11026 = vrot.lane.b32.xlu1 %v21884_v2, %s20503_s23 }
0x111a   :  { %v7564_v37 = vpop.xlane.xlu1 %7563 }
0x111b   :  { %20207 = vrcp.f32 %v7564_v37 }
0x111c   :  { %11103 = vrot.lane.b32.xlu0 %v21878_v53, %s20503_s23  ;;  %v7567_v49 = vpop.xlane.xlu0 %7566 }
0x111d   :  { %11180 = vrot.lane.b32.xlu1 %v21896_v33, %s20503_s23  ;;  %20209 = vrcp.f32 %v7567_v49 }
0x111e   :  { %v7570_v56 = vpop.xlane.xlu1 %7569 }
0x111f   :  { %20211 = vrcp.f32 %v7570_v56 }
0x1120   :  { %11257 = vrot.lane.b32.xlu0 %v21888_v8, %s20503_s23 }
0x1121   :  { %11334 = vrot.lane.b32.xlu1 %v21904_v44, %s20503_s23 }
0x1122   :  { %v7576_v18 = vpop.xlane.xlu1 %7575 }
0x1123   :  { %20213 = vrcp.f32 %v7576_v18  ;;  %v7573_v0 = vpop.xlane.xlu0 %7572 }
0x1124   :  { %20215 = vrcp.f32 %v7573_v0  ;;  %11411 = vrot.lane.b32.xlu0 %v21886_v60, %s20503_s23 }
0x1125   :  { %v20208_v52 = vpop.eup %20207  ;;  %11488 = vrot.lane.b32.xlu1 %v21912_v42, %s20503_s23 }
0x1126   :  { %v7582_v59 = vpop.xlane.xlu1 %7581  ;;  %v7611_v31 = vmul.f32 %v20208_v52, %v22247_v16  ;;  %v24779_v16 = vmov 0.0  }
0x1127   :  { %v20210_v37 = vpop.eup %20209  ;;  %20217 = vrcp.f32 %v7582_v59  ;;  %v7579_v49 = vpop.xlane.xlu0 %7578 }
0x1128   :  { %20219 = vrcp.f32 %v7579_v49  ;;  %11567 = vrot.lane.b32.xlu0 %v21836_v43, %s20504_s24  ;;  %7642 = vst.msk [vmem:[%s24729_s10] sm:$0xf] %vm7465_vm13, %v7611_v31  ;;  %19332 = vmatmul.mubr.msk.f32.vlgmr.msra.gmra.mrb[90].mxu1 %vm7660_vm14, %v7611_v31  ;;  %v7613_v56 = vmul.f32 %v20210_v37, %v22251_v30  ;;  %v24783_v37 = vld [vmem:[#allocation19_spill] sm:$0xff] }
0x1129   :  { %v20212_v18 = vpop.eup %20211  ;;  %11645 = vrot.lane.b32.xlu1 %v21842_v26, %s20504_s24  ;;  %19340 = vmatpush3.msk.msra.mxu1 %vm7664_vm12, %v22184_v14 }
0x112a   :  { %7643 = vst.msk [vmem:[%s24729_s10 + $0x4] sm:$0xf] %vm7465_vm13, %v7613_v56  ;;  %19337 = vmatmul.mubr.msk.f32.vlgmr.msra.gmra.mrb[94].mxu0 %vm7660_vm14, %v7613_v56  ;;  %19341 = vmatprep.mubr.msk.f32.mxu1 %vm20498_vm1, %v24779_v16  ;;  %v7615_v0 = vmul.f32 %v20212_v18, %v22256_v34 }
0x112b   :  { %19345 = vmatpush3.msk.msra.mxu0 %vm7664_vm12, %v22188_v50  ;;  %v7585_v30 = vpop.xlane.xlu0 %7584  ;;  %19349 = vmatprep.subr.mxu1 %v24779_v16 }
0x112c   :  { %20221 = vrcp.f32 %v7585_v30  ;;  %11565 = vrot.lane.b32.xlu0 %v21949_v6, %s20505_s25  ;;  %7644 = vst.msk [vmem:[%s24729_s10 + $0x8] sm:$0xf] %vm7465_vm13, %v7615_v0  ;;  %19342 = vmatmul.mubr.msk.f32.vlgmr.msra.gmra.mrb[92].mxu1 %vm7660_vm14, %v7615_v0 }
0x112d   :  { %v20214_v14 = vpop.eup %20213  ;;  %11643 = vrot.lane.b32.xlu1 %v21959_v51, %s20505_s25  ;;  %19350 = vmatpush3.msk.msra.mxu1 %vm7664_vm12, %v22186_v4 }
0x112e   :  { %v20216_v50 = vpop.eup %20215  ;;  %19351 = vmatprep.mubr.msk.f32.mxu1 %vm20498_vm1, %v24779_v16  ;;  %19359 = vmatprep.subr.mxu1 %v24779_v16  ;;  %v7619_v34 = vmul.f32 %v20214_v14, %v22260_v55 }
0x112f   :  { %19346 = vmatprep.mubr.msk.f32.mxu0 %vm20498_vm1, %v24779_v16  ;;  %19354 = vmatprep.subr.mxu0 %v24779_v16  ;;  %v7617_v52 = vmul.f32 %v20216_v50, %v22262_v48 }
0x1130   :  { %11723 = vrot.lane.b32.xlu0 %v21844_v32, %s20504_s24  ;;  %7646 = vst.msk [vmem:[%s24729_s10 + $0x10] sm:$0xf] %vm7465_vm13, %v7619_v34  ;;  %19352 = vmatmul.mubr.msk.f32.vlgmr.msra.gmra.mrb[94].mxu1 %vm7660_vm14, %v7619_v34 }
0x1131   :  { %v20218_v4 = vpop.eup %20217  ;;  %11801 = vrot.lane.b32.xlu1 %v21856_v12, %s20504_s24  ;;  %7645 = vst.msk [vmem:[%s24729_s10 + $0xc] sm:$0xf] %vm7465_vm13, %v7617_v52  ;;  %19347 = vmatmul.mubr.msk.f32.vlgmr.msra.gmra.mrb[96].mxu0 %vm7660_vm14, %v7617_v52 }
0x1132   :  { %v20220_v55 = vpop.eup %20219  ;;  %19355 = vmatpush3.msk.msra.mxu0 %vm7664_vm12, %v22192_v41  ;;  %19360 = vmatpush3.msk.msra.mxu1 %vm7664_vm12, %v22196_v25  ;;  %v7623_v48 = vmul.f32 %v20218_v4, %v22268_v20  ;;  %v24780_v41 = vld [vmem:[#allocation14_spill] sm:$0xff]  ;;  %v24781_v20 = vld [vmem:[#allocation17_spill] sm:$0xff] }
0x1133   :  { %19361 = vmatprep.mubr.msk.f32.mxu1 %vm20498_vm1, %v24779_v16  ;;  %19369 = vmatprep.subr.mxu1 %v24779_v16  ;;  %v7621_v59 = vmul.f32 %v20220_v55, %v22270_v38  ;;  %v24782_v38 = vld [vmem:[#allocation18_spill] sm:$0xff] }
0x1134   :  { %11721 = vrot.lane.b32.xlu0 %v21964_v39, %s20505_s25  ;;  %19356 = vmatprep.mubr.msk.f32.mxu0 %vm20498_vm1, %v24779_v16  ;;  %7648 = vst.msk [vmem:[%s24729_s10 + $0x18] sm:$0xf] %vm7465_vm13, %v7623_v48 }
0x1135   :  { %19364 = vmatprep.subr.mxu0 %v24779_v16  ;;  %11799 = vrot.lane.b32.xlu1 %v24780_v41, %s20505_s25  ;;  %7647 = vst.msk [vmem:[%s24729_s10 + $0x14] sm:$0xf] %vm7465_vm13, %v7621_v59 }
0x1136   :  { %v20222_v25 = vpop.eup %20221  ;;  %19357 = vmatmul.mubr.msk.f32.vlgmr.msra.gmra.mrb[98].mxu0 %vm7660_vm14, %v7621_v59  ;;  %19362 = vmatmul.mubr.msk.f32.vlgmr.msra.gmra.mrb[96].mxu1 %vm7660_vm14, %v7623_v48  ;;  %v24784_v59 = vld [vmem:[#allocation20_spill] sm:$0xff] }
0x1137   :  { %19365 = vmatpush3.msk.msra.mxu0 %vm7664_vm12, %v24781_v20  ;;  %19370 = vmatpush3.msk.msra.mxu1 %vm7664_vm12, %v24782_v38  ;;  %v7625_v31 = vmul.f32 %v20222_v25, %v22276_v45  ;;  %v24785_v20 = vld [vmem:[#allocation21_spill] sm:$0xff] }
0x1138   :  { %19366 = vmatprep.mubr.msk.f32.mxu0 %vm20498_vm1, %v24779_v16  ;;  %19374 = vmatprep.subr.mxu0 %v24779_v16 }
0x1139   :  { %7649 = vst.msk [vmem:[%s24729_s10 + $0x1c] sm:$0xf] %vm7465_vm13, %v7625_v31  ;;  %19371 = vmatprep.mubr.msk.f32.mxu1 %vm20498_vm1, %v24779_v16  ;;  %19379 = vmatprep.subr.mxu1 %v24779_v16 }
0x113a   :  { %19367 = vmatmul.mubr.msk.f32.vlgmr.msra.gmra.mrb[100].mxu0 %vm7660_vm14, %v7625_v31 }
0x113b   :  { %19375 = vmatpush3.msk.msra.mxu0 %vm7664_vm12, %v24783_v37  ;;  %19376 = vmatprep.mubr.msk.f32.mxu0 %vm20498_vm1, %v24779_v16  ;;  %v24786_v37 = vld [vmem:[#allocation22_spill] sm:$0xff] }
0x113c   :  { %19384 = vmatprep.subr.mxu0 %v24779_v16 }
0x1151   :  { %v7588_v45 = vpop.xlane.xlu1 %7587 }
0x1152   :  { %20223 = vrcp.f32 %v7588_v45 }
0x1153   :  { %v7591_v49 = vpop.xlane.xlu0 %7590 }
0x1154   :  { %20225 = vrcp.f32 %v7591_v49 }
0x1155   :  { %v7594_v56 = vpop.xlane.xlu1 %7593 }
0x1156   :  { %20227 = vrcp.f32 %v7594_v56  ;;  %v24787_v56 = vld [vmem:[#allocation33_spill] sm:$0xff] }
0x1157   :  { %v7597_v18 = vpop.xlane.xlu0 %7596 }
0x1158   :  { %20229 = vrcp.f32 %v7597_v18 }
0x1159   :  { %v7600_v0 = vpop.xlane.xlu1 %7599 }
0x115a   :  { %20231 = vrcp.f32 %v7600_v0 }
0x115b   :  { %v7603_v30 = vpop.xlane.xlu0 %7602 }
0x115c   :  { %v20224_v14 = vpop.eup %20223  ;;  %20233 = vrcp.f32 %v7603_v30  ;;  %v24788_v30 = vld [vmem:[#allocation24_spill] sm:$0xff] }
0x115d   :  { %v7606_v50 = vpop.xlane.xlu1 %7605  ;;  %v7627_v34 = vmul.f32 %v20224_v14, %v22287_v24 }
0x115e   :  { %v20226_v52 = vpop.eup %20225  ;;  %20235 = vrcp.f32 %v7606_v50 }
0x115f   :  { %7650 = vst.msk [vmem:[%s24729_s10 + $0x20] sm:$0xf] %vm7465_vm13, %v7627_v34  ;;  %19372 = vmatmul.mubr.msk.f32.vlgmr.msra.gmra.mrb[98].mxu1 %vm7660_vm14, %v7627_v34  ;;  %v7609_v4 = vpop.xlane.xlu0 %7608  ;;  %v7629_v55 = vmul.f32 %v20226_v52, %v22292_v61  ;;  %v24789_v34 = vld [vmem:[#allocation23_spill] sm:$0xff] }
0x1160   :  { %v20228_v48 = vpop.eup %20227  ;;  %19380 = vmatpush3.msk.msra.mxu1 %vm7664_vm12, %v24784_v59  ;;  %20237 = vrcp.f32 %v7609_v4  ;;  %19381 = vmatprep.mubr.msk.f32.mxu1 %vm20498_vm1, %v24779_v16 }
0x1161   :  { %v22515_v24 = vpop.permute.xlu1 %9438  ;;  %7651 = vst.msk [vmem:[%s24729_s10 + $0x24] sm:$0xf] %vm7465_vm13, %v7629_v55  ;;  %19377 = vmatmul.mubr.msk.f32.vlgmr.msra.gmra.mrb[102].mxu0 %vm7660_vm14, %v7629_v55  ;;  %19389 = vmatprep.subr.mxu1 %v24779_v16  ;;  %v7631_v61 = vmul.f32 %v20228_v48, %v22296_v7  ;;  %v24790_v55 = vld [vmem:[#allocation26_spill] sm:$0xff]  ;;  %v24791_v48 = vld [vmem:[#allocation25_spill] sm:$0xff] }
0x1162   :  { %v20230_v25 = vpop.eup %20229  ;;  %19385 = vmatpush3.msk.msra.mxu0 %vm7664_vm12, %v24785_v20  ;;  %19386 = vmatprep.mubr.msk.f32.mxu0 %vm20498_vm1, %v24779_v16 }
0x1163   :  { %7652 = vst.msk [vmem:[%s24729_s10 + $0x28] sm:$0xf] %vm7465_vm13, %v7631_v61  ;;  %19382 = vmatmul.mubr.msk.f32.vlgmr.msra.gmra.mrb[100].mxu1 %vm7660_vm14, %v7631_v61  ;;  %v22533_v38 = vpop.permute.xlu0 %9360  ;;  %19394 = vmatprep.subr.mxu0 %v24779_v16  ;;  %v7633_v7 = vmul.f32 %v20230_v25, %v22300_v15  ;;  %v24792_v61 = vld [vmem:[#allocation28_spill] sm:$0xff]  ;;  %v24793_v25 = vld [vmem:[#allocation30_spill] sm:$0xff] }
0x1164   :  { %v20232_v31 = vpop.eup %20231  ;;  %19390 = vmatpush3.msk.msra.mxu1 %vm7664_vm12, %v24786_v37  ;;  %19391 = vmatprep.mubr.msk.f32.mxu1 %vm20498_vm1, %v24779_v16  ;;  %v24796_v37 = vld [vmem:[#allocation32_spill] sm:$0xff] }
0x1165   :  { %v22541_v45 = vpop.permute.xlu1 %9596  ;;  %7653 = vst.msk [vmem:[%s24729_s10 + $0x2c] sm:$0xf] %vm7465_vm13, %v7633_v7  ;;  %19387 = vmatmul.mubr.msk.f32.vlgmr.msra.gmra.mrb[104].mxu0 %vm7660_vm14, %v7633_v7  ;;  %19399 = vmatprep.subr.mxu1 %v24779_v16  ;;  %v7635_v15 = vmul.f32 %v20232_v31, %v22304_v5  ;;  %v24794_v7 = vld [vmem:[#allocation27_spill] sm:$0xff]  ;;  %v24795_v31 = vld [vmem:[#allocation29_spill] sm:$0xff] }
0x1166   :  { %v20234_v49 = vpop.eup %20233  ;;  %19395 = vmatpush3.msk.msra.mxu0 %vm7664_vm12, %v24787_v56  ;;  %19396 = vmatprep.mubr.msk.f32.mxu0 %vm20498_vm1, %v24779_v16 }
0x1167   :  { %7654 = vst.msk [vmem:[%s24729_s10 + $0x30] sm:$0xf] %vm7465_vm13, %v7635_v15  ;;  %19392 = vmatmul.mubr.msk.f32.vlgmr.msra.gmra.mrb[102].mxu1 %vm7660_vm14, %v7635_v15  ;;  %v9519_v18 = vpop.permute.xlu0 %9518  ;;  %19404 = vmatprep.subr.mxu0 %v24779_v16  ;;  %v7637_v0 = vmul.f32 %v20234_v49, %v22308_v21  ;;  %v24797_v49 = vld [vmem:[#allocation31_spill] sm:$0xff] }
0x1168   :  { %v20236_v5 = vpop.eup %20235  ;;  %19400 = vmatpush3.msk.msra.mxu1 %vm7664_vm12, %v24788_v30  ;;  %19401 = vmatprep.mubr.msk.f32.mxu1 %vm20498_vm1, %v24779_v16 }
0x1169   :  { %v22565_v14 = vpop.permute.xlu1 %9594  ;;  %7655 = vst.msk [vmem:[%s24729_s10 + $0x34] sm:$0xf] %vm7465_vm13, %v7637_v0  ;;  %19397 = vmatmul.mubr.msk.f32.vlgmr.msra.gmra.mrb[106].mxu0 %vm7660_vm14, %v7637_v0  ;;  %v7639_v50 = vmul.f32 %v20236_v5, %v22312_v46  ;;  %19409 = vmatprep.subr.mxu1 %v24779_v16 }
0x116a   :  { %v20238_v21 = vpop.eup %20237  ;;  %19405 = vmatpush3.msk.msra.mxu0 %vm7664_vm12, %v24789_v34  ;;  %19406 = vmatprep.mubr.msk.f32.mxu0 %vm20498_vm1, %v24779_v16 }
0x116b   :  { %7656 = vst.msk [vmem:[%s24729_s10 + $0x38] sm:$0xf] %vm7465_vm13, %v7639_v50  ;;  %19402 = vmatmul.mubr.msk.f32.vlgmr.msra.gmra.mrb[104].mxu1 %vm7660_vm14, %v7639_v50  ;;  %v9517_v52 = vpop.permute.xlu0 %9516  ;;  %v7641_v4 = vmul.f32 %v20238_v21, %v22316_v62  ;;  %19414 = vmatprep.subr.mxu0 %v24779_v16 }
0x116c   :  { %19411 = vmatprep.mubr.msk.f32.mxu1 %vm20498_vm1, %v24779_v16 }
0x116d   :  { %v9753_v46 = vpop.permute.xlu1 %9752  ;;  %7657 = vst.msk [vmem:[%s24729_s10 + $0x3c] sm:$0xf] %vm7465_vm13, %v7641_v4  ;;  %19407 = vmatmul.mubr.msk.f32.vlgmr.msra.gmra.mrb[108].mxu0 %vm7660_vm14, %v7641_v4 }
0x116e   :  { %19416 = vmatprep.mubr.msk.f32.mxu0 %vm20498_vm1, %v24779_v16 }
0x116f   :  { %19410 = vmatpush3.xpose.msk.msra.mxu1 %vm193_vm2, %v24790_v55  ;;  %v9675_v62 = vpop.permute.xlu0 %9674 }
0x1170   :  { %19419 = vmatprep.subr.mxu1 %v24779_v16 }
0x1171   :  { %19415 = vmatpush3.xpose.msk.msra.mxu0 %vm193_vm2, %v24791_v48  ;;  %v9751_v59 = vpop.permute.xlu1 %9750 }
0x1172   :  { %19412 = vmatmul.mubr.msk.f32.vlgmr.msra.gmra.mrb[106].mxu1 %vm193_vm2, %v24792_v61  ;;  %19424 = vmatprep.subr.mxu0 %v24779_v16 }
0x1173   :  { %19420 = vmatpush3.xpose.msk.msra.mxu1 %vm193_vm2, %v24793_v25  ;;  %v9673_v20 = vpop.permute.xlu0 %9672  ;;  %19421 = vmatprep.mubr.msk.f32.mxu1 %vm20498_vm1, %v24779_v16 }
0x1174   :  { %19417 = vmatmul.mubr.msk.f32.vlgmr.msra.gmra.mrb[110].mxu0 %vm193_vm2, %v24794_v7  ;;  %19429 = vmatprep.subr.mxu1 %v24779_v16 }
0x1175   :  { %19425 = vmatpush3.xpose.msk.msra.mxu0 %vm193_vm2, %v24795_v31  ;;  %19426 = vmatprep.mubr.msk.f32.mxu0 %vm20498_vm1, %v24779_v16  ;;  %v9909_v15 = vpop.permute.xlu1 %9908 }
0x1176   :  { %19422 = vmatmul.mubr.msk.f32.vlgmr.msra.gmra.mrb[108].mxu1 %vm193_vm2, %v24796_v37  ;;  %19434 = vmatprep.subr.mxu0 %v24779_v16 }
0x1177   :  { %19430 = vmatpush3.xpose.msk.msra.mxu1 %vm193_vm2, %v22362_v17  ;;  %19431 = vmatprep.mubr.msk.f32.mxu1 %vm20498_vm1, %v24779_v16  ;;  %v9831_v56 = vpop.permute.xlu0 %9830 }
0x1178   :  { %19427 = vmatmul.mubr.msk.f32.vlgmr.msra.gmra.mrb[112].mxu0 %vm193_vm2, %v24797_v49  ;;  %19439 = vmatprep.subr.mxu1 %v24779_v16 }
0x1179   :  { %19435 = vmatpush3.xpose.msk.msra.mxu0 %vm193_vm2, %v22360_v9  ;;  %19436 = vmatprep.mubr.msk.f32.mxu0 %vm20498_vm1, %v24779_v16  ;;  %v9907_v17 = vpop.permute.xlu1 %9906 }
0x117a   :  { %19432 = vmatmul.mubr.msk.f32.vlgmr.msra.gmra.mrb[110].mxu1 %vm193_vm2, %v22374_v11  ;;  %19444 = vmatprep.subr.mxu0 %v24779_v16 }
0x117b   :  { %19440 = vmatpush3.xpose.msk.msra.mxu1 %vm193_vm2, %v22382_v13  ;;  %19441 = vmatprep.mubr.msk.f32.mxu1 %vm20498_vm1, %v24779_v16  ;;  %v9829_v9 = vpop.permute.xlu0 %9828 }
0x117c   :  { %19437 = vmatmul.mubr.msk.f32.vlgmr.msra.gmra.mrb[114].mxu0 %vm193_vm2, %v22368_v40  ;;  %19449 = vmatprep.subr.mxu1 %v24779_v16 }
0x117d   :  { %19445 = vmatpush3.xpose.msk.msra.mxu0 %vm193_vm2, %v22380_v54  ;;  %19446 = vmatprep.mubr.msk.f32.mxu0 %vm20498_vm1, %v24779_v16  ;;  %v10065_v40 = vpop.permute.xlu1 %10064 }
0x117e   :  { %19442 = vmatmul.mubr.msk.f32.vlgmr.msra.gmra.mrb[112].mxu1 %vm193_vm2, %v22533_v38  ;;  %19454 = vmatprep.subr.mxu0 %v24779_v16 }
0x117f   :  { %19450 = vmatpush3.xpose.msk.msra.mxu1 %vm193_vm2, %v9519_v18  ;;  %19451 = vmatprep.mubr.msk.f32.mxu1 %vm20498_vm1, %v24779_v16  ;;  %v9987_v11 = vpop.permute.xlu0 %9986 }
0x1180   :  { %19447 = vmatmul.mubr.msk.f32.vlgmr.msra.gmra.mrb[116].mxu0 %vm193_vm2, %v22515_v24  ;;  %19459 = vmatprep.subr.mxu1 %v24779_v16 }
0x1181   :  { %19455 = vmatpush3.xpose.msk.msra.mxu0 %vm193_vm2, %v22541_v45  ;;  %19456 = vmatprep.mubr.msk.f32.mxu0 %vm20498_vm1, %v24779_v16  ;;  %v10063_v54 = vpop.permute.xlu1 %10062 }
0x1182   :  { %19452 = vmatmul.mubr.msk.f32.vlgmr.msra.gmra.mrb[114].mxu1 %vm193_vm2, %v9517_v52  ;;  %19464 = vmatprep.subr.mxu0 %v24779_v16 }
0x1183   :  { %19460 = vmatpush3.xpose.msk.msra.mxu1 %vm193_vm2, %v9675_v62  ;;  %19461 = vmatprep.mubr.msk.f32.mxu1 %vm20498_vm1, %v24779_v16  ;;  %v9985_v13 = vpop.permute.xlu0 %9984 }
0x1184   :  { %19457 = vmatmul.mubr.msk.f32.vlgmr.msra.gmra.mrb[118].mxu0 %vm193_vm2, %v22565_v14  ;;  %19469 = vmatprep.subr.mxu1 %v24779_v16 }
0x1185   :  { %19465 = vmatpush3.xpose.msk.msra.mxu0 %vm193_vm2, %v9753_v46  ;;  %19466 = vmatprep.mubr.msk.f32.mxu0 %vm20498_vm1, %v24779_v16  ;;  %v10334_v24 = vpop.permute.xlu1 %10333 }
0x1186   :  { %19462 = vmatmul.mubr.msk.f32.vlgmr.msra.gmra.mrb[116].mxu1 %vm193_vm2, %v9673_v20  ;;  %19474 = vmatprep.subr.mxu0 %v24779_v16 }
0x1187   :  { %19470 = vmatpush3.xpose.msk.msra.mxu1 %vm193_vm2, %v9831_v56  ;;  %19471 = vmatprep.mubr.msk.f32.mxu1 %vm20498_vm1, %v24779_v16  ;;  %v10411_v38 = vpop.permute.xlu0 %10410 }
0x1188   :  { %19467 = vmatmul.mubr.msk.f32.vlgmr.msra.gmra.mrb[120].mxu0 %vm193_vm2, %v9751_v59  ;;  %19479 = vmatprep.subr.mxu1 %v24779_v16 }
0x1189   :  { %19475 = vmatpush3.xpose.msk.msra.mxu0 %vm193_vm2, %v9909_v15  ;;  %19476 = vmatprep.mubr.msk.f32.mxu0 %vm20498_vm1, %v24779_v16 }
0x118a   :  { %19472 = vmatmul.mubr.msk.f32.vlgmr.msra.gmra.mrb[118].mxu1 %vm193_vm2, %v9829_v9  ;;  %19484 = vmatprep.subr.mxu0 %v24779_v16 }
0x118b   :  { %19480 = vmatpush3.xpose.msk.msra.mxu1 %vm193_vm2, %v9987_v11  ;;  %19481 = vmatprep.mubr.msk.f32.mxu1 %vm20498_vm1, %v24779_v16 }
0x118c   :  { %19477 = vmatmul.mubr.msk.f32.vlgmr.msra.gmra.mrb[122].mxu0 %vm193_vm2, %v9907_v17  ;;  %19489 = vmatprep.subr.mxu1 %v24779_v16 }
0x118d   :  { %19485 = vmatpush3.xpose.msk.msra.mxu0 %vm193_vm2, %v10065_v40  ;;  %19486 = vmatprep.mubr.msk.f32.mxu0 %vm20498_vm1, %v24779_v16 }
0x118e   :  { %19482 = vmatmul.mubr.msk.f32.vlgmr.msra.gmra.mrb[120].mxu1 %vm193_vm2, %v9985_v13  ;;  %19494 = vmatprep.subr.mxu0 %v24779_v16 }
0x118f   :  { %19490 = vmatpush3.msk.msra.mxu1 %vm7664_vm12, %v10334_v24  ;;  %19491 = vmatprep.mubr.msk.f32.mxu1 %vm20498_vm1, %v24779_v16 }
0x1190   :  { %19487 = vmatmul.mubr.msk.f32.vlgmr.msra.gmra.mrb[124].mxu0 %vm193_vm2, %v10063_v54  ;;  %19499 = vmatprep.subr.mxu1 %v24779_v16 }
0x1191   :  { %19495 = vmatpush3.msk.msra.mxu0 %vm7664_vm12, %v10411_v38  ;;  %19496 = vmatprep.mubr.msk.f32.mxu0 %vm20498_vm1, %v24779_v16 }
0x1192   :  { %19504 = vmatprep.subr.mxu0 %v24779_v16 }
0x11fb   :  { %v22696_v45 = vpop.f32.mrb[90].mxu1 }
0x11fc   :  { %24798 = vst [vmem:[#allocation14_spill] sm:$0xff] %v22696_v45  ;;  %v19333_v18 = vpop.f32.mrb[91].mxu1 }
0x11fd   :  { %v22698_v0 = vpop.f32.mrb[94].mxu0 }
0x11fe   :  { %24799 = vst [vmem:[#allocation17_spill] sm:$0xff] %v22698_v0  ;;  %v19338_v5 = vpop.f32.mrb[95].mxu0 }
0x11ff   :  { %v22700_v30 = vpop.f32.mrb[92].mxu1 }
0x1200   :  { %24800 = vst [vmem:[#allocation18_spill] sm:$0xff] %v22700_v30  ;;  %v19343_v14 = vpop.f32.mrb[93].mxu1 }
0x1203   :  { %v22702_v50 = vpop.f32.mrb[94].mxu1 }
0x1204   :  { %24801 = vst [vmem:[#allocation19_spill] sm:$0xff] %v22702_v50  ;;  %v22704_v21 = vpop.f32.mrb[96].mxu0  ;;  %v19353_v34 = vpop.f32.mrb[95].mxu1 }
0x1205   :  { %24802 = vst [vmem:[#allocation20_spill] sm:$0xff] %v22704_v21  ;;  %v19348_v52 = vpop.f32.mrb[97].mxu0 }
0x1209   :  { %v22706_v4 = vpop.f32.mrb[98].mxu0  ;;  %v22708_v46 = vpop.f32.mrb[96].mxu1 }
0x120a   :  { %24803 = vst [vmem:[#allocation21_spill] sm:$0xff] %v22706_v4  ;;  %24804 = vst [vmem:[#allocation22_spill] sm:$0xff] %v22708_v46  ;;  %v19358_v55 = vpop.f32.mrb[99].mxu0  ;;  %v19363_v62 = vpop.f32.mrb[97].mxu1 }
0x120d   :  { %v22710_v48 = vpop.f32.mrb[100].mxu0 }
0x120e   :  { %24805 = vst [vmem:[#allocation33_spill] sm:$0xff] %v22710_v48  ;;  %v19368_v59 = vpop.f32.mrb[101].mxu0 }
0x1232   :  { %v22712_v61 = vpop.f32.mrb[98].mxu1 }
0x1233   :  { %24806 = vst [vmem:[#allocation24_spill] sm:$0xff] %v22712_v61  ;;  %v19373_v25 = vpop.f32.mrb[99].mxu1 }
0x1234   :  { %v22714_v20 = vpop.f32.mrb[102].mxu0 }
0x1235   :  { %24807 = vst [vmem:[#allocation23_spill] sm:$0xff] %v22714_v20  ;;  %v19378_v7 = vpop.f32.mrb[103].mxu0 }
0x1236   :  { %v22716_v31 = vpop.f32.mrb[100].mxu1 }
0x1237   :  { %24808 = vst [vmem:[#allocation26_spill] sm:$0xff] %v22716_v31  ;;  %v19383_v37 = vpop.f32.mrb[101].mxu1 }
0x1238   :  { %v22718_v15 = vpop.f32.mrb[104].mxu0 }
0x1239   :  { %24809 = vst [vmem:[#allocation25_spill] sm:$0xff] %v22718_v15  ;;  %v19388_v49 = vpop.f32.mrb[105].mxu0 }
0x123a   :  { %v22720_v56 = vpop.f32.mrb[102].mxu1 }
0x123b   :  { %24810 = vst [vmem:[#allocation28_spill] sm:$0xff] %v22720_v56  ;;  %v19393_v17 = vpop.f32.mrb[103].mxu1 }
0x123c   :  { %v22722_v9 = vpop.f32.mrb[106].mxu0 }
0x123d   :  { %24811 = vst [vmem:[#allocation30_spill] sm:$0xff] %v22722_v9  ;;  %v19398_v40 = vpop.f32.mrb[107].mxu0 }
0x123e   :  { %v22724_v11 = vpop.f32.mrb[104].mxu1 }
0x123f   :  { %24812 = vst [vmem:[#allocation27_spill] sm:$0xff] %v22724_v11  ;;  %v19403_v54 = vpop.f32.mrb[105].mxu1 }
0x1240   :  { %v22726_v13 = vpop.f32.mrb[108].mxu0 }
0x1241   :  { %24813 = vst [vmem:[#allocation29_spill] sm:$0xff] %v22726_v13  ;;  %v19408_v24 = vpop.f32.mrb[109].mxu0 }
0x1245   :  { %v22728_v38 = vpop.f32.mrb[106].mxu1 }
0x1246   :  { %v19413_v18 = vpop.f32.mrb[107].mxu1  ;;  %v10140_v5 = vsel %vm7465_vm13, %v22728_v38, -inf }
0x1247   :  { %10141 = vmax.xlane.f32.xlu0 %v10140_v5  ;;  %v22732_v14 = vpop.f32.mrb[110].mxu0 }
0x1248   :  { %v19418_v34 = vpop.f32.mrb[111].mxu0  ;;  %v10143_v52 = vsel %vm7465_vm13, %v22732_v14, -inf }
0x1249   :  { %v22736_v55 = vpop.f32.mrb[108].mxu1  ;;  %10144 = vmax.xlane.f32.xlu1 %v10143_v52 }
0x124a   :  { %v19423_v62 = vpop.f32.mrb[109].mxu1  ;;  %v10146_v59 = vsel %vm7465_vm13, %v22736_v55, -inf }
0x124b   :  { %10147 = vmax.xlane.f32.xlu0 %v10146_v59  ;;  %v22740_v25 = vpop.f32.mrb[112].mxu0 }
0x124c   :  { %v19428_v7 = vpop.f32.mrb[113].mxu0  ;;  %v10149_v40 = vsel %vm7465_vm13, %v22740_v25, -inf }
0x124d   :  { %v22742_v37 = vpop.f32.mrb[110].mxu1 }
0x124e   :  { %v19433_v49 = vpop.f32.mrb[111].mxu1  ;;  %v10152_v17 = vsel %vm7465_vm13, %v22742_v37, -inf }
0x124f   :  { %10153 = vmax.xlane.f32.xlu1 %v10152_v17  ;;  %10150 = vmax.xlane.f32.xlu0 %v10149_v40  ;;  %v22748_v54 = vpop.f32.mrb[114].mxu0 }
0x1250   :  { %v19438_v24 = vpop.f32.mrb[115].mxu0  ;;  %v10155_v52 = vsel %vm7465_vm13, %v22748_v54, -inf }
0x1251   :  { %v22750_v18 = vpop.f32.mrb[112].mxu1 }
0x1252   :  { %v19443_v5 = vpop.f32.mrb[113].mxu1  ;;  %v10158_v34 = vsel %vm7465_vm13, %v22750_v18, -inf }
0x1253   :  { %10159 = vmax.xlane.f32.xlu1 %v10158_v34  ;;  %10156 = vmax.xlane.f32.xlu0 %v10155_v52  ;;  %v22756_v62 = vpop.f32.mrb[116].mxu0 }
0x1254   :  { %v19448_v59 = vpop.f32.mrb[117].mxu0  ;;  %v10161_v40 = vsel %vm7465_vm13, %v22756_v62, -inf }
0x1255   :  { %v22758_v7 = vpop.f32.mrb[114].mxu1 }
0x1256   :  { %v19453_v49 = vpop.f32.mrb[115].mxu1  ;;  %v10164_v17 = vsel %vm7465_vm13, %v22758_v7, -inf }
0x1257   :  { %10165 = vmax.xlane.f32.xlu1 %v10164_v17  ;;  %10162 = vmax.xlane.f32.xlu0 %v10161_v40  ;;  %v22764_v24 = vpop.f32.mrb[118].mxu0 }
0x1258   :  { %v19458_v5 = vpop.f32.mrb[119].mxu0  ;;  %v10167_v59 = vsel %vm7465_vm13, %v22764_v24, -inf }
0x1259   :  { %v22766_v11 = vpop.f32.mrb[116].mxu1 }
0x125a   :  { %v19463_v34 = vpop.f32.mrb[117].mxu1  ;;  %v10170_v52 = vsel %vm7465_vm13, %v22766_v11, -inf }
0x125b   :  { %10171 = vmax.xlane.f32.xlu1 %v10170_v52  ;;  %10168 = vmax.xlane.f32.xlu0 %v10167_v59  ;;  %v22772_v49 = vpop.f32.mrb[120].mxu0 }
0x125c   :  { %v19468_v13 = vpop.f32.mrb[121].mxu0  ;;  %v10173_v5 = vsel %vm7465_vm13, %v22772_v49, -inf }
0x125d   :  { %v22774_v56 = vpop.f32.mrb[118].mxu1 }
0x125e   :  { %v19473_v17 = vpop.f32.mrb[119].mxu1  ;;  %v10176_v40 = vsel %vm7465_vm13, %v22774_v56, -inf }
0x125f   :  { %10177 = vmax.xlane.f32.xlu1 %v10176_v40  ;;  %10174 = vmax.xlane.f32.xlu0 %v10173_v5  ;;  %v22780_v34 = vpop.f32.mrb[122].mxu0  ;;  %v24815_v5 = vld [vmem:[#allocation15_spill] sm:$0xff] }
0x1260   :  { %v19478_v9 = vpop.f32.mrb[123].mxu0  ;;  %v10179_v59 = vsel %vm7465_vm13, %v22780_v34, -inf }
0x1261   :  { %v22782_v31 = vpop.f32.mrb[120].mxu1  ;;  %v24814_v9 = vld [vmem:[#allocation16_spill] sm:$0xff] }
0x1262   :  { %v19483_v52 = vpop.f32.mrb[121].mxu1  ;;  %v10182_v13 = vsel %vm7465_vm13, %v22782_v31, -inf }
0x1263   :  { %10183 = vmax.xlane.f32.xlu1 %v10182_v13  ;;  %10180 = vmax.xlane.f32.xlu0 %v10179_v59  ;;  %v22788_v17 = vpop.f32.mrb[124].mxu0  ;;  %v22808_v13 = vpop.permute.xlu0 %10564 }
0x1264   :  { %v19488_v15 = vpop.f32.mrb[125].mxu0  ;;  %v10185_v40 = vsel %vm7465_vm13, %v22788_v17, -inf  ;;  %24817 = vst [vmem:[#allocation31_spill] sm:$0xff] %v22808_v13 }
0x1265   :  { %v22804_v15 = vpop.permute.xlu1 %10487 }
0x1267   :  { %10186 = vmax.xlane.f32.xlu0 %v10185_v40  ;;  %v22812_v40 = vpop.permute.xlu0 %10795 }
0x1268   :  { %24819 = vst [vmem:[#allocation15_spill] sm:$0xff] %v22812_v40 }
0x1269   :  { %v22806_v52 = vpop.permute.xlu1 %10641 }
0x126a   :  { %24816 = vst [vmem:[#allocation32_spill] sm:$0xff] %v22806_v52 }
0x126b   :  { %v22816_v20 = vpop.permute.xlu0 %10949 }
0x126c   :  { %24821 = vst [vmem:[#allocation35_spill] sm:$0xff] %v22816_v20 }
0x126d   :  { %v22810_v59 = vpop.permute.xlu1 %10718 }
0x126e   :  { %24818 = vst [vmem:[#allocation16_spill] sm:$0xff] %v22810_v59 }
0x126f   :  { %v22820_v48 = vpop.permute.xlu0 %11103 }
0x1270   :  { %24823 = vst [vmem:[#allocation37_spill] sm:$0xff] %v22820_v48 }
0x1271   :  { %v22814_v61 = vpop.permute.xlu1 %10872 }
0x1272   :  { %24820 = vst [vmem:[#allocation34_spill] sm:$0xff] %v22814_v61 }
0x1273   :  { %v22824_v4 = vpop.permute.xlu0 %11257 }
0x1274   :  { %11957 = vrot.lane.b32.xlu1 %v21866_v29, %s20504_s24  ;;  %24825 = vst [vmem:[#allocation39_spill] sm:$0xff] %v22824_v4 }
0x1275   :  { %v22818_v46 = vpop.permute.xlu1 %11026 }
0x1276   :  { %24822 = vst [vmem:[#allocation36_spill] sm:$0xff] %v22818_v46 }
0x1277   :  { %v22828_v21 = vpop.permute.xlu0 %11411 }
0x1278   :  { %11955 = vrot.lane.b32.xlu1 %v24814_v9, %s20505_s25  ;;  %24827 = vst [vmem:[#allocation41_spill] sm:$0xff] %v22828_v21 }
0x1279   :  { %v22822_v50 = vpop.permute.xlu1 %11180 }
0x127a   :  { %24824 = vst [vmem:[#allocation38_spill] sm:$0xff] %v22822_v50 }
0x127b   :  { %v22832_v0 = vpop.permute.xlu0 %11567 }
0x127c   :  { %12113 = vrot.lane.b32.xlu1 %v21872_v1, %s20504_s24  ;;  %24829 = vst [vmem:[#allocation43_spill] sm:$0xff] %v22832_v0 }
0x127d   :  { %11879 = vrot.lane.b32.xlu0 %v21848_v58, %s20504_s24  ;;  %v22826_v30 = vpop.permute.xlu1 %11334 }
0x127e   :  { %24826 = vst [vmem:[#allocation40_spill] sm:$0xff] %v22826_v30 }
0x127f   :  { %v22836_v61 = vpop.permute.xlu0 %11565 }
0x1280   :  { %24831 = vst [vmem:[#allocation45_spill] sm:$0xff] %v22836_v61 }
0x1281   :  { %11877 = vrot.lane.b32.xlu0 %v24815_v5, %s20505_s25  ;;  %v22830_v45 = vpop.permute.xlu1 %11488 }
0x1282   :  { %24828 = vst [vmem:[#allocation42_spill] sm:$0xff] %v22830_v45 }
0x1283   :  { %v22840_v46 = vpop.permute.xlu0 %11723 }
0x1284   :  { %24833 = vst [vmem:[#allocation47_spill] sm:$0xff] %v22840_v46 }
0x1285   :  { %12035 = vrot.lane.b32.xlu0 %v21858_v22, %s20504_s24  ;;  %v22834_v59 = vpop.permute.xlu1 %11645 }
0x1286   :  { %24830 = vst [vmem:[#allocation44_spill] sm:$0xff] %v22834_v59 }
0x1287   :  { %v22844_v50 = vpop.permute.xlu0 %11721 }
0x1288   :  { %24835 = vst [vmem:[#allocation49_spill] sm:$0xff] %v22844_v50 }
0x1289   :  { %v22838_v20 = vpop.permute.xlu1 %11643 }
0x128a   :  { %24832 = vst [vmem:[#allocation46_spill] sm:$0xff] %v22838_v20 }
0x128d   :  { %v22842_v48 = vpop.permute.xlu1 %11801 }
0x128e   :  { %24834 = vst [vmem:[#allocation48_spill] sm:$0xff] %v22842_v48 }
0x1291   :  { %v22846_v4 = vpop.permute.xlu1 %11799 }
0x1292   :  { %24836 = vst [vmem:[#allocation50_spill] sm:$0xff] %v22846_v4 }
0x12d4   :  { %v10142_v30 = vpop.xlane.xlu0 %10141 }
0x12d5   :  { %v10188_v21 = vsub.f32 %v22728_v38, %v10142_v30 }
0x12d6   :  { %v10145_v45 = vpop.xlane.xlu1 %10144 }
0x12d7   :  { %v10204_v40 = vmul.f32 1.442695, %v10188_v21  ;;  %v10189_v0 = vsub.f32 %v22732_v14, %v10145_v45 }
0x12d8   :  { %v10148_v59 = vpop.xlane.xlu0 %10147 }
0x12d9   :  { %20239 = vpow2.f32 %v10204_v40  ;;  %v10206_v61 = vmul.f32 1.442695, %v10189_v0  ;;  %v10190_v20 = vsub.f32 %v22736_v55, %v10148_v59 }
0x12db   :  { %20241 = vpow2.f32 %v10206_v61  ;;  %v10208_v46 = vmul.f32 1.442695, %v10190_v20 }
0x12dc   :  { %v10154_v52 = vpop.xlane.xlu1 %10153  ;;  %v10151_v48 = vpop.xlane.xlu0 %10150 }
0x12dd   :  { %20243 = vpow2.f32 %v10208_v46  ;;  %v10192_v50 = vsub.f32 %v22742_v37, %v10154_v52  ;;  %v10191_v4 = vsub.f32 %v22740_v25, %v10151_v48 }
0x12df   :  { %v10212_v13 = vmul.f32 1.442695, %v10192_v50  ;;  %v10210_v30 = vmul.f32 1.442695, %v10191_v4 }
0x12e0   :  { %v10160_v38 = vpop.xlane.xlu1 %10159  ;;  %v10157_v21 = vpop.xlane.xlu0 %10156 }
0x12e1   :  { %20245 = vpow2.f32 %v10212_v13  ;;  %v10194_v45 = vsub.f32 %v22750_v18, %v10160_v38  ;;  %v10193_v0 = vsub.f32 %v22748_v54, %v10157_v21 }
0x12e2   :  { %20247 = vpow2.f32 %v10210_v30 }
0x12e3   :  { %v22855_v14 = vpop.eup %20239  ;;  %v10216_v61 = vmul.f32 1.442695, %v10194_v45  ;;  %v10214_v20 = vmul.f32 1.442695, %v10193_v0 }
0x12e4   :  { %v10166_v55 = vpop.xlane.xlu1 %10165  ;;  %v10163_v46 = vpop.xlane.xlu0 %10162  ;;  %v10236_v37 = vsel %vm7465_vm13, %v22855_v14, 0.0 }
0x12e5   :  { %v22859_v48 = vpop.eup %20241  ;;  %20249 = vpow2.f32 %v10216_v61  ;;  %v10196_v50 = vsub.f32 %v22758_v7, %v10166_v55  ;;  %v10195_v4 = vsub.f32 %v22756_v62, %v10163_v46  ;;  %10237 = vadd.xlane.f32.xlu1 %v10236_v37 }
0x12e6   :  { %20251 = vpow2.f32 %v10214_v20  ;;  %v10239_v25 = vsel %vm7465_vm13, %v22859_v48, 0.0 }
0x12e7   :  { %v22865_v54 = vpop.eup %20243  ;;  %v10220_v18 = vmul.f32 1.442695, %v10196_v50  ;;  %v10218_v52 = vmul.f32 1.442695, %v10195_v4  ;;  %10240 = vadd.xlane.f32.xlu0 %v10239_v25 }
0x12e8   :  { %v10172_v13 = vpop.xlane.xlu1 %10171  ;;  %v10169_v59 = vpop.xlane.xlu0 %10168  ;;  %v10242_v40 = vsel %vm7465_vm13, %v22865_v54, 0.0 }
0x12e9   :  { %20253 = vpow2.f32 %v10220_v18  ;;  %v10198_v7 = vsub.f32 %v22766_v11, %v10172_v13  ;;  %v10197_v62 = vsub.f32 %v22764_v24, %v10169_v59  ;;  %10243 = vadd.xlane.f32.xlu1 %v10242_v40 }
0x12ea   :  { %20255 = vpow2.f32 %v10218_v52 }
0x12eb   :  { %v22871_v30 = vpop.eup %20245  ;;  %v10224_v38 = vmul.f32 1.442695, %v10198_v7  ;;  %v10222_v21 = vmul.f32 1.442695, %v10197_v62 }
0x12ec   :  { %v22873_v45 = vpop.eup %20247  ;;  %v10178_v0 = vpop.xlane.xlu1 %10177  ;;  %v10248_v20 = vsel %vm7465_vm13, %v22871_v30, 0.0 }
0x12ed   :  { %v10175_v61 = vpop.xlane.xlu0 %10174  ;;  %20257 = vpow2.f32 %v10224_v38  ;;  %v10200_v55 = vsub.f32 %v22774_v56, %v10178_v0  ;;  %10249 = vadd.xlane.f32.xlu1 %v10248_v20  ;;  %v10245_v24 = vsel %vm7465_vm13, %v22873_v45, 0.0 }
0x12ee   :  { %v10199_v11 = vsub.f32 %v22772_v49, %v10175_v61  ;;  %20259 = vpow2.f32 %v10222_v21  ;;  %10246 = vadd.xlane.f32.xlu0 %v10245_v24 }
0x12ef   :  { %v22881_v46 = vpop.eup %20249  ;;  %v10228_v37 = vmul.f32 1.442695, %v10200_v55 }
0x12f0   :  { %v10226_v50 = vmul.f32 1.442695, %v10199_v11  ;;  %v22883_v4 = vpop.eup %20251  ;;  %v10184_v25 = vpop.xlane.xlu1 %10183  ;;  %v10254_v52 = vsel %vm7465_vm13, %v22881_v46, 0.0 }
0x12f1   :  { %v10181_v18 = vpop.xlane.xlu0 %10180  ;;  %20261 = vpow2.f32 %v10228_v37  ;;  %v10202_v56 = vsub.f32 %v22782_v31, %v10184_v25  ;;  %10255 = vadd.xlane.f32.xlu1 %v10254_v52  ;;  %v10251_v13 = vsel %vm7465_vm13, %v22883_v4, 0.0 }
0x12f2   :  { %v10201_v49 = vsub.f32 %v22780_v34, %v10181_v18  ;;  %20263 = vpow2.f32 %v10226_v50  ;;  %10252 = vadd.xlane.f32.xlu0 %v10251_v13 }
0x12f3   :  { %v22891_v59 = vpop.eup %20253  ;;  %v10232_v40 = vmul.f32 1.442695, %v10202_v56 }
0x12f4   :  { %v10230_v7 = vmul.f32 1.442695, %v10201_v49  ;;  %v22893_v62 = vpop.eup %20255  ;;  %v10260_v21 = vsel %vm7465_vm13, %v22891_v59, 0.0 }
0x12f5   :  { %v10187_v38 = vpop.xlane.xlu0 %10186  ;;  %20265 = vpow2.f32 %v10232_v40  ;;  %10261 = vadd.xlane.f32.xlu1 %v10260_v21  ;;  %v10257_v34 = vsel %vm7465_vm13, %v22893_v62, 0.0  ;;  %v23004_v40 = vpop.permute.xlu1 %11957 }
0x12f6   :  { %v10203_v31 = vsub.f32 %v22788_v17, %v10187_v38  ;;  %20267 = vpow2.f32 %v10230_v7  ;;  %10258 = vadd.xlane.f32.xlu0 %v10257_v34 }
0x12f7   :  { %v22900_v0 = vpop.eup %20257 }
0x12f8   :  { %v10234_v61 = vmul.f32 1.442695, %v10203_v31  ;;  %v22902_v20 = vpop.eup %20259  ;;  %v10266_v55 = vsel %vm7465_vm13, %v22900_v0, 0.0 }
0x12f9   :  { %10267 = vadd.xlane.f32.xlu1 %v10266_v55  ;;  %v10263_v11 = vsel %vm7465_vm13, %v22902_v20, 0.0  ;;  %v23008_v7 = vpop.permute.xlu0 %11879  ;;  %v23014_v38 = vpop.permute.xlu1 %11955 }
0x12fa   :  { %20269 = vpow2.f32 %v10234_v61  ;;  %10264 = vadd.xlane.f32.xlu0 %v10263_v11 }
0x12fb   :  { %v22908_v17 = vpop.eup %20261 }
0x12fc   :  { %v22910_v24 = vpop.eup %20263  ;;  %v10272_v37 = vsel %vm7465_vm13, %v22908_v17, 0.0 }
0x12fd   :  { %10273 = vadd.xlane.f32.xlu1 %v10272_v37  ;;  %v10269_v50 = vsel %vm7465_vm13, %v22910_v24, 0.0 }
0x12fe   :  { %10270 = vadd.xlane.f32.xlu0 %v10269_v50 }
0x12ff   :  { %v22916_v25 = vpop.eup %20265 }
0x1300   :  { %v22918_v18 = vpop.eup %20267  ;;  %v10278_v52 = vsel %vm7465_vm13, %v22916_v25, 0.0 }
0x1301   :  { %10279 = vadd.xlane.f32.xlu1 %v10278_v52  ;;  %v10275_v56 = vsel %vm7465_vm13, %v22918_v18, 0.0 }
0x1302   :  { %10276 = vadd.xlane.f32.xlu0 %v10275_v56 }
0x1304   :  { %v22924_v49 = vpop.eup %20269 }
0x1305   :  { %v10281_v13 = vsel %vm7465_vm13, %v22924_v49, 0.0 }
0x1306   :  { %10282 = vadd.xlane.f32.xlu0 %v10281_v13 }
0x1312   :  { %12111 = vrot.lane.b32.xlu1 %v22031_v10, %s20505_s25 }
0x1316   :  { %12269 = vrot.lane.b32.xlu1 %v21884_v2, %s20504_s24 }
0x131a   :  { %12267 = vrot.lane.b32.xlu1 %v22050_v35, %s20505_s25 }
0x131c   :  { %12033 = vrot.lane.b32.xlu0 %v22018_v19, %s20505_s25 }
0x131e   :  { %12425 = vrot.lane.b32.xlu1 %v21896_v33, %s20504_s24 }
0x1320   :  { %12191 = vrot.lane.b32.xlu0 %v21876_v57, %s20504_s24 }
0x1322   :  { %12423 = vrot.lane.b32.xlu1 %v22069_v47, %s20505_s25 }
0x1324   :  { %12189 = vrot.lane.b32.xlu0 %v22041_v27, %s20505_s25 }
0x1326   :  { %12581 = vrot.lane.b32.xlu1 %v21904_v44, %s20504_s24 }
0x1328   :  { %12347 = vrot.lane.b32.xlu0 %v21878_v53, %s20504_s24 }
0x132a   :  { %12579 = vrot.lane.b32.xlu1 %v22088_v36, %s20505_s25 }
0x132c   :  { %12345 = vrot.lane.b32.xlu0 %v22054_v3, %s20505_s25 }
0x132e   :  { %12737 = vrot.lane.b32.xlu1 %v21912_v42, %s20504_s24 }
0x1330   :  { %12503 = vrot.lane.b32.xlu0 %v21888_v8, %s20504_s24 }
0x1332   :  { %12735 = vrot.lane.b32.xlu1 %v22107_v28, %s20505_s25 }
0x1334   :  { %12501 = vrot.lane.b32.xlu0 %v22073_v63, %s20505_s25 }
0x1336   :  { %13006 = vrot.lane.b32.xlu1 %v21836_v43, %s20506_s26 }
0x1338   :  { %12659 = vrot.lane.b32.xlu0 %v21886_v60, %s20504_s24 }
0x133a   :  { %13160 = vrot.lane.b32.xlu1 %v21844_v32, %s20506_s26 }
0x133c   :  { %12657 = vrot.lane.b32.xlu0 %v22092_v23, %s20505_s25 }
0x133e   :  { %13314 = vrot.lane.b32.xlu1 %v21848_v58, %s20506_s26 }
0x1340   :  { %13083 = vrot.lane.b32.xlu0 %v21842_v26, %s20506_s26 }
0x1342   :  { %13391 = vrot.lane.b32.xlu1 %v21866_v29, %s20506_s26 }
0x1344   :  { %13237 = vrot.lane.b32.xlu0 %v21856_v12, %s20506_s26 }
0x1346   :  { %13545 = vrot.lane.b32.xlu1 %v21872_v1, %s20506_s26 }
0x1348   :  { %13468 = vrot.lane.b32.xlu0 %v21858_v22, %s20506_s26 }
0x134a   :  { %13699 = vrot.lane.b32.xlu1 %v21884_v2, %s20506_s26 }
0x134c   :  { %13622 = vrot.lane.b32.xlu0 %v21876_v57, %s20506_s26 }
0x134e   :  { %13853 = vrot.lane.b32.xlu1 %v21896_v33, %s20506_s26 }
0x1350   :  { %13776 = vrot.lane.b32.xlu0 %v21878_v53, %s20506_s26 }
0x1352   :  { %14007 = vrot.lane.b32.xlu1 %v21904_v44, %s20506_s26 }
0x1354   :  { %13930 = vrot.lane.b32.xlu0 %v21888_v8, %s20506_s26 }
0x1356   :  { %14161 = vrot.lane.b32.xlu1 %v21912_v42, %s20506_s26 }
0x1358   :  { %14084 = vrot.lane.b32.xlu0 %v21886_v60, %s20506_s26 }
0x135a   :  { %14318 = vrot.lane.b32.xlu1 %v21842_v26, %s20507_s27 }
0x135c   :  { %14240 = vrot.lane.b32.xlu0 %v21836_v43, %s20507_s27 }
0x135e   :  { %14316 = vrot.lane.b32.xlu1 %v21959_v51, %s20508_s28  ;;  %v23018_v51 = vpop.permute.xlu0 %11877 }
0x1360   :  { %14238 = vrot.lane.b32.xlu0 %v21949_v6, %s20508_s28  ;;  %v23024_v6 = vpop.permute.xlu1 %12113 }
0x1362   :  { %14474 = vrot.lane.b32.xlu1 %v21856_v12, %s20507_s27  ;;  %v23028_v21 = vpop.permute.xlu0 %12035 }
0x1364   :  { %14396 = vrot.lane.b32.xlu0 %v21844_v32, %s20507_s27 }
0x1366   :  { %14472 = vrot.lane.b32.xlu1 %v24780_v41, %s20508_s28 }
0x1368   :  { %14394 = vrot.lane.b32.xlu0 %v21964_v39, %s20508_s28 }
0x136a   :  { %14630 = vrot.lane.b32.xlu1 %v21866_v29, %s20507_s27 }
0x136c   :  { %14552 = vrot.lane.b32.xlu0 %v21848_v58, %s20507_s27 }
0x136e   :  { %14628 = vrot.lane.b32.xlu1 %v24814_v9, %s20508_s28 }
0x1370   :  { %14550 = vrot.lane.b32.xlu0 %v24815_v5, %s20508_s28 }
0x1372   :  { %v10238_v41 = vpop.xlane.xlu1 %10237 }
0x1373   :  { %20271 = vrcp.f32 %v10238_v41 }
0x1374   :  { %v10241_v39 = vpop.xlane.xlu0 %10240 }
0x1375   :  { %20273 = vrcp.f32 %v10241_v39 }
0x1376   :  { %v10244_v31 = vpop.xlane.xlu1 %10243 }
0x1377   :  { %20275 = vrcp.f32 %v10244_v31 }
0x137a   :  { %v10250_v34 = vpop.xlane.xlu1 %10249 }
0x137b   :  { %20277 = vrcp.f32 %v10250_v34  ;;  %v10247_v61 = vpop.xlane.xlu0 %10246 }
0x137c   :  { %20279 = vrcp.f32 %v10247_v61 }
0x137d   :  { %v20272_v55 = vpop.eup %20271 }
0x137e   :  { %v10256_v11 = vpop.xlane.xlu1 %10255  ;;  %v10285_v37 = vmul.f32 %v20272_v55, %v22855_v14 }
0x137f   :  { %v20274_v9 = vpop.eup %20273  ;;  %20281 = vrcp.f32 %v10256_v11  ;;  %v10253_v50 = vpop.xlane.xlu0 %10252  ;;  %v24840_v11 = vld [vmem:[#allocation16_spill] sm:$0xff] }
0x1380   :  { %20283 = vrcp.f32 %v10253_v50  ;;  %18171 = vst.msk [vmem:[%s24729_s10 + $0x40] sm:$0xf] %vm7465_vm13, %v10285_v37  ;;  %19492 = vmatmul.mubr.msk.f32.vlgmr.msra.gmra.mrb[122].mxu1 %vm7660_vm14, %v10285_v37  ;;  %v10287_v5 = vmul.f32 %v20274_v9, %v22859_v48  ;;  %v24837_v48 = vld [vmem:[#allocation31_spill] sm:$0xff] }
0x1381   :  { %v20276_v52 = vpop.eup %20275  ;;  %19500 = vmatpush3.msk.msra.mxu1 %vm7664_vm12, %v22804_v15  ;;  %19501 = vmatprep.mubr.msk.f32.mxu1 %vm20498_vm1, %v24779_v16 }
0x1382   :  { %v10262_v14 = vpop.xlane.xlu1 %10261  ;;  %18172 = vst.msk [vmem:[%s24729_s10 + $0x44] sm:$0xf] %vm7465_vm13, %v10287_v5  ;;  %19497 = vmatmul.mubr.msk.f32.vlgmr.msra.gmra.mrb[126].mxu0 %vm7660_vm14, %v10287_v5  ;;  %19509 = vmatprep.subr.mxu1 %v24779_v16  ;;  %v10289_v56 = vmul.f32 %v20276_v52, %v22865_v54  ;;  %v24838_v54 = vld [vmem:[#allocation32_spill] sm:$0xff]  ;;  %v24841_v52 = vld [vmem:[#allocation35_spill] sm:$0xff] }
0x1383   :  { %20285 = vrcp.f32 %v10262_v14  ;;  %19505 = vmatpush3.msk.msra.mxu0 %vm7664_vm12, %v24837_v48  ;;  %v10259_v15 = vpop.xlane.xlu0 %10258  ;;  %19506 = vmatprep.mubr.msk.f32.mxu0 %vm20498_vm1, %v24779_v16  ;;  %v24842_v14 = vld [vmem:[#allocation34_spill] sm:$0xff] }
0x1384   :  { %20287 = vrcp.f32 %v10259_v15  ;;  %18173 = vst.msk [vmem:[%s24729_s10 + $0x48] sm:$0xf] %vm7465_vm13, %v10289_v56  ;;  %19502 = vmatmul.mubr.msk.f32.vlgmr.msra.gmra.mrb[124].mxu1 %vm7660_vm14, %v10289_v56  ;;  %19514 = vmatprep.subr.mxu0 %v24779_v16 }
0x1385   :  { %v20278_v13 = vpop.eup %20277  ;;  %19510 = vmatpush3.msk.msra.mxu1 %vm7664_vm12, %v24838_v54  ;;  %19511 = vmatprep.mubr.msk.f32.mxu1 %vm20498_vm1, %v24779_v16  ;;  %v24843_v54 = vld [vmem:[#allocation37_spill] sm:$0xff] }
0x1386   :  { %v20280_v41 = vpop.eup %20279  ;;  %v10268_v39 = vpop.xlane.xlu1 %10267  ;;  %19519 = vmatprep.subr.mxu1 %v24779_v16  ;;  %v10293_v31 = vmul.f32 %v20278_v13, %v22871_v30  ;;  %v24839_v30 = vld [vmem:[#allocation15_spill] sm:$0xff] }
0x1387   :  { %20289 = vrcp.f32 %v10268_v39  ;;  %v10265_v34 = vpop.xlane.xlu0 %10264  ;;  %v10291_v61 = vmul.f32 %v20280_v41, %v22873_v45  ;;  %v24844_v41 = vld [vmem:[#allocation36_spill] sm:$0xff] }
0x1388   :  { %20291 = vrcp.f32 %v10265_v34  ;;  %18175 = vst.msk [vmem:[%s24729_s10 + $0x50] sm:$0xf] %vm7465_vm13, %v10293_v31  ;;  %19512 = vmatmul.mubr.msk.f32.vlgmr.msra.gmra.mrb[126].mxu1 %vm7660_vm14, %v10293_v31 }
0x1389   :  { %v20282_v55 = vpop.eup %20281  ;;  %18174 = vst.msk [vmem:[%s24729_s10 + $0x4c] sm:$0xf] %vm7465_vm13, %v10291_v61  ;;  %19507 = vmatmul.mubr.msk.f32.vlgmr.msra.gmra.mrb[128].mxu0 %vm7660_vm14, %v10291_v61  ;;  %19520 = vmatpush3.msk.msra.mxu1 %vm7664_vm12, %v24839_v30  ;;  %v24846_v30 = vld [vmem:[#allocation38_spill] sm:$0xff] }
0x138a   :  { %v20284_v45 = vpop.eup %20283  ;;  %19515 = vmatpush3.msk.msra.mxu0 %vm7664_vm12, %v24840_v11  ;;  %v10274_v37 = vpop.xlane.xlu1 %10273  ;;  %19516 = vmatprep.mubr.msk.f32.mxu0 %vm20498_vm1, %v24779_v16  ;;  %v10297_v9 = vmul.f32 %v20282_v55, %v22881_v46 }
0x138b   :  { %20293 = vrcp.f32 %v10274_v37  ;;  %v10271_v50 = vpop.xlane.xlu0 %10270  ;;  %19521 = vmatprep.mubr.msk.f32.mxu1 %vm20498_vm1, %v24779_v16  ;;  %19524 = vmatprep.subr.mxu0 %v24779_v16  ;;  %v10295_v5 = vmul.f32 %v20284_v45, %v22883_v4 }
0x138c   :  { %20295 = vrcp.f32 %v10271_v50  ;;  %19529 = vmatprep.subr.mxu1 %v24779_v16  ;;  %18177 = vst.msk [vmem:[%s24729_s10 + $0x58] sm:$0xf] %vm7465_vm13, %v10297_v9  ;;  %19522 = vmatmul.mubr.msk.f32.vlgmr.msra.gmra.mrb[128].mxu1 %vm7660_vm14, %v10297_v9 }
0x138d   :  { %v20286_v46 = vpop.eup %20285  ;;  %18176 = vst.msk [vmem:[%s24729_s10 + $0x54] sm:$0xf] %vm7465_vm13, %v10295_v5  ;;  %19517 = vmatmul.mubr.msk.f32.vlgmr.msra.gmra.mrb[130].mxu0 %vm7660_vm14, %v10295_v5  ;;  %19530 = vmatpush3.msk.msra.mxu1 %vm7664_vm12, %v24841_v52  ;;  %v24848_v5 = vld [vmem:[#allocation40_spill] sm:$0xff] }
0x138e   :  { %v20288_v4 = vpop.eup %20287  ;;  %19525 = vmatpush3.msk.msra.mxu0 %vm7664_vm12, %v24842_v14  ;;  %v10280_v56 = vpop.xlane.xlu1 %10279  ;;  %19526 = vmatprep.mubr.msk.f32.mxu0 %vm20498_vm1, %v24779_v16  ;;  %v10301_v48 = vmul.f32 %v20286_v46, %v22891_v59 }
0x138f   :  { %20297 = vrcp.f32 %v10280_v56  ;;  %v10277_v15 = vpop.xlane.xlu0 %10276  ;;  %19531 = vmatprep.mubr.msk.f32.mxu1 %vm20498_vm1, %v24779_v16  ;;  %19534 = vmatprep.subr.mxu0 %v24779_v16  ;;  %v10299_v13 = vmul.f32 %v20288_v4, %v22893_v62 }
0x1390   :  { %20299 = vrcp.f32 %v10277_v15  ;;  %19539 = vmatprep.subr.mxu1 %v24779_v16  ;;  %18179 = vst.msk [vmem:[%s24729_s10 + $0x60] sm:$0xf] %vm7465_vm13, %v10301_v48  ;;  %19532 = vmatmul.mubr.msk.f32.vlgmr.msra.gmra.mrb[130].mxu1 %vm7660_vm14, %v10301_v48 }
0x1391   :  { %v20290_v59 = vpop.eup %20289  ;;  %18178 = vst.msk [vmem:[%s24729_s10 + $0x5c] sm:$0xf] %vm7465_vm13, %v10299_v13  ;;  %19527 = vmatmul.mubr.msk.f32.vlgmr.msra.gmra.mrb[132].mxu0 %vm7660_vm14, %v10299_v13  ;;  %19540 = vmatpush3.msk.msra.mxu1 %vm7664_vm12, %v24843_v54  ;;  %v24850_v13 = vld [vmem:[#allocation43_spill] sm:$0xff]  ;;  %v24851_v54 = vld [vmem:[#allocation45_spill] sm:$0xff] }
0x1392   :  { %v20292_v62 = vpop.eup %20291  ;;  %19535 = vmatpush3.msk.msra.mxu0 %vm7664_vm12, %v24844_v41  ;;  %v23125_v39 = vpop.permute.xlu1 %12111  ;;  %19536 = vmatprep.mubr.msk.f32.mxu0 %vm20498_vm1, %v24779_v16  ;;  %v10305_v31 = vmul.f32 %v20290_v59, %v22900_v0  ;;  %v24845_v0 = vld [vmem:[#allocation39_spill] sm:$0xff]  ;;  %v24853_v41 = vld [vmem:[#allocation44_spill] sm:$0xff] }
0x1393   :  { %v10283_v34 = vpop.xlane.xlu0 %10282  ;;  %19541 = vmatprep.mubr.msk.f32.mxu1 %vm20498_vm1, %v24779_v16  ;;  %19544 = vmatprep.subr.mxu0 %v24779_v16  ;;  %v10303_v61 = vmul.f32 %v20292_v62, %v22902_v20  ;;  %v24852_v62 = vld [vmem:[#allocation47_spill] sm:$0xff] }
0x1394   :  { %20301 = vrcp.f32 %v10283_v34  ;;  %19549 = vmatprep.subr.mxu1 %v24779_v16  ;;  %18181 = vst.msk [vmem:[%s24729_s10 + $0x68] sm:$0xf] %vm7465_vm13, %v10305_v31  ;;  %19542 = vmatmul.mubr.msk.f32.vlgmr.msra.gmra.mrb[132].mxu1 %vm7660_vm14, %v10305_v31  ;;  %v24854_v31 = vld [vmem:[#allocation49_spill] sm:$0xff] }
0x1395   :  { %v20294_v55 = vpop.eup %20293  ;;  %18180 = vst.msk [vmem:[%s24729_s10 + $0x64] sm:$0xf] %vm7465_vm13, %v10303_v61  ;;  %19537 = vmatmul.mubr.msk.f32.vlgmr.msra.gmra.mrb[134].mxu0 %vm7660_vm14, %v10303_v61  ;;  %19550 = vmatpush3.msk.msra.mxu1 %vm7664_vm12, %v24845_v0  ;;  %v24856_v0 = vld [vmem:[#allocation48_spill] sm:$0xff] }
0x1396   :  { %v20296_v20 = vpop.eup %20295  ;;  %19545 = vmatpush3.msk.msra.mxu0 %vm7664_vm12, %v24846_v30  ;;  %v23149_v45 = vpop.permute.xlu1 %12269  ;;  %19546 = vmatprep.mubr.msk.f32.mxu0 %vm20498_vm1, %v24779_v16  ;;  %v10309_v11 = vmul.f32 %v20294_v55, %v22908_v17  ;;  %v24847_v17 = vld [vmem:[#allocation41_spill] sm:$0xff]  ;;  %v24855_v55 = vld [vmem:[#allocation46_spill] sm:$0xff] }
0x1397   :  { %v23154_v37 = vpop.permute.xlu0 %12033  ;;  %19551 = vmatprep.mubr.msk.f32.mxu1 %vm20498_vm1, %v24779_v16  ;;  %19554 = vmatprep.subr.mxu0 %v24779_v16  ;;  %v10307_v9 = vmul.f32 %v20296_v20, %v22910_v24  ;;  %v24857_v20 = vld [vmem:[#allocation50_spill] sm:$0xff] }
0x1398   :  { %19559 = vmatprep.subr.mxu1 %v24779_v16  ;;  %18183 = vst.msk [vmem:[%s24729_s10 + $0x70] sm:$0xf] %vm7465_vm13, %v10309_v11  ;;  %19552 = vmatmul.mubr.msk.f32.vlgmr.msra.gmra.mrb[134].mxu1 %vm7660_vm14, %v10309_v11 }
0x1399   :  { %v20298_v50 = vpop.eup %20297  ;;  %18182 = vst.msk [vmem:[%s24729_s10 + $0x6c] sm:$0xf] %vm7465_vm13, %v10307_v9  ;;  %19547 = vmatmul.mubr.msk.f32.vlgmr.msra.gmra.mrb[136].mxu0 %vm7660_vm14, %v10307_v9  ;;  %19560 = vmatpush3.msk.msra.mxu1 %vm7664_vm12, %v24847_v17 }
0x139a   :  { %v20300_v24 = vpop.eup %20299  ;;  %19555 = vmatpush3.msk.msra.mxu0 %vm7664_vm12, %v24848_v5  ;;  %v23175_v46 = vpop.permute.xlu1 %12267  ;;  %19556 = vmatprep.mubr.msk.f32.mxu0 %vm20498_vm1, %v24779_v16  ;;  %v10313_v52 = vmul.f32 %v20298_v50, %v22916_v25 }
0x139b   :  { %v12192_v4 = vpop.permute.xlu0 %12191  ;;  %19561 = vmatprep.mubr.msk.f32.mxu1 %vm20498_vm1, %v24779_v16  ;;  %19564 = vmatprep.subr.mxu0 %v24779_v16  ;;  %v10311_v14 = vmul.f32 %v20300_v24, %v22918_v18  ;;  %v24849_v18 = vld [vmem:[#allocation42_spill] sm:$0xff] }
0x139c   :  { %18185 = vst.msk [vmem:[%s24729_s10 + $0x78] sm:$0xf] %vm7465_vm13, %v10313_v52  ;;  %19562 = vmatmul.mubr.msk.f32.vlgmr.msra.gmra.mrb[136].mxu1 %vm7660_vm14, %v10313_v52  ;;  %19569 = vmatprep.subr.mxu1 %v24779_v16 }
0x139d   :  { %18184 = vst.msk [vmem:[%s24729_s10 + $0x74] sm:$0xf] %vm7465_vm13, %v10311_v14  ;;  %19557 = vmatmul.mubr.msk.f32.vlgmr.msra.gmra.mrb[138].mxu0 %vm7660_vm14, %v10311_v14  ;;  %19571 = vmatprep.mubr.msk.f32.mxu1 %vm20498_vm1, %v24779_v16 }
0x139e   :  { %v20302_v25 = vpop.eup %20301  ;;  %19565 = vmatpush3.msk.msra.mxu0 %vm7664_vm12, %v24849_v18  ;;  %v12426_v56 = vpop.permute.xlu1 %12425  ;;  %19566 = vmatprep.mubr.msk.f32.mxu0 %vm20498_vm1, %v24779_v16 }
0x139f   :  { %v12190_v48 = vpop.permute.xlu0 %12189  ;;  %v10315_v15 = vmul.f32 %v20302_v25, %v22924_v49  ;;  %19574 = vmatprep.subr.mxu0 %v24779_v16 }
0x13a0   :  { %19570 = vmatpush3.xpose.msk.msra.mxu1 %vm193_vm2, %v24850_v13 }
0x13a1   :  { %18186 = vst.msk [vmem:[%s24729_s10 + $0x7c] sm:$0xf] %vm7465_vm13, %v10315_v15  ;;  %19567 = vmatmul.mubr.msk.f32.vlgmr.msra.gmra.mrb[140].mxu0 %vm7660_vm14, %v10315_v15  ;;  %19579 = vmatprep.subr.mxu1 %v24779_v16 }
0x13a2   :  { %v12424_v59 = vpop.permute.xlu1 %12423  ;;  %19576 = vmatprep.mubr.msk.f32.mxu0 %vm20498_vm1, %v24779_v16 }
0x13a3   :  { %19572 = vmatmul.mubr.msk.f32.vlgmr.msra.gmra.mrb[138].mxu1 %vm193_vm2, %v24851_v54  ;;  %v12348_v49 = vpop.permute.xlu0 %12347 }
0x13a4   :  { %19580 = vmatpush3.xpose.msk.msra.mxu1 %vm193_vm2, %v24852_v62  ;;  %19581 = vmatprep.mubr.msk.f32.mxu1 %vm20498_vm1, %v24779_v16 }
0x13a5   :  { %19575 = vmatpush3.xpose.msk.msra.mxu0 %vm193_vm2, %v24853_v41  ;;  %19589 = vmatprep.subr.mxu1 %v24779_v16 }
0x13a6   :  { %19584 = vmatprep.subr.mxu0 %v24779_v16  ;;  %v12582_v34 = vpop.permute.xlu1 %12581 }
0x13a7   :  { %19582 = vmatmul.mubr.msk.f32.vlgmr.msra.gmra.mrb[140].mxu1 %vm193_vm2, %v24854_v31  ;;  %v12346_v61 = vpop.permute.xlu0 %12345 }
0x13a8   :  { %19577 = vmatmul.mubr.msk.f32.vlgmr.msra.gmra.mrb[142].mxu0 %vm193_vm2, %v24855_v55  ;;  %19590 = vmatpush3.xpose.msk.msra.mxu1 %vm193_vm2, %v23008_v7 }
0x13a9   :  { %19585 = vmatpush3.xpose.msk.msra.mxu0 %vm193_vm2, %v24856_v0  ;;  %19586 = vmatprep.mubr.msk.f32.mxu0 %vm20498_vm1, %v24779_v16 }
0x13aa   :  { %19591 = vmatprep.mubr.msk.f32.mxu1 %vm20498_vm1, %v24779_v16  ;;  %19594 = vmatprep.subr.mxu0 %v24779_v16  ;;  %v12580_v30 = vpop.permute.xlu1 %12579 }
0x13ab   :  { %19592 = vmatmul.mubr.msk.f32.vlgmr.msra.gmra.mrb[142].mxu1 %vm193_vm2, %v23018_v51  ;;  %19599 = vmatprep.subr.mxu1 %v24779_v16  ;;  %v12504_v7 = vpop.permute.xlu0 %12503 }
0x13ac   :  { %19587 = vmatmul.mubr.msk.f32.vlgmr.msra.gmra.mrb[144].mxu0 %vm193_vm2, %v24857_v20  ;;  %19600 = vmatpush3.xpose.msk.msra.mxu1 %vm193_vm2, %v23028_v21 }
0x13ad   :  { %19595 = vmatpush3.xpose.msk.msra.mxu0 %vm193_vm2, %v23004_v40  ;;  %19596 = vmatprep.mubr.msk.f32.mxu0 %vm20498_vm1, %v24779_v16 }
0x13ae   :  { %19601 = vmatprep.mubr.msk.f32.mxu1 %vm20498_vm1, %v24779_v16  ;;  %19604 = vmatprep.subr.mxu0 %v24779_v16  ;;  %v12738_v51 = vpop.permute.xlu1 %12737 }
0x13af   :  { %19602 = vmatmul.mubr.msk.f32.vlgmr.msra.gmra.mrb[144].mxu1 %vm193_vm2, %v23154_v37  ;;  %19609 = vmatprep.subr.mxu1 %v24779_v16  ;;  %v12502_v40 = vpop.permute.xlu0 %12501 }
0x13b0   :  { %19597 = vmatmul.mubr.msk.f32.vlgmr.msra.gmra.mrb[146].mxu0 %vm193_vm2, %v23014_v38  ;;  %19610 = vmatpush3.xpose.msk.msra.mxu1 %vm193_vm2, %v12192_v4 }
0x13b1   :  { %19605 = vmatpush3.xpose.msk.msra.mxu0 %vm193_vm2, %v23024_v6  ;;  %19606 = vmatprep.mubr.msk.f32.mxu0 %vm20498_vm1, %v24779_v16 }
0x13b2   :  { %19611 = vmatprep.mubr.msk.f32.mxu1 %vm20498_vm1, %v24779_v16  ;;  %19614 = vmatprep.subr.mxu0 %v24779_v16  ;;  %v12736_v6 = vpop.permute.xlu1 %12735 }
0x13b3   :  { %19612 = vmatmul.mubr.msk.f32.vlgmr.msra.gmra.mrb[146].mxu1 %vm193_vm2, %v12190_v48  ;;  %19619 = vmatprep.subr.mxu1 %v24779_v16  ;;  %v12660_v38 = vpop.permute.xlu0 %12659 }
0x13b4   :  { %19607 = vmatmul.mubr.msk.f32.vlgmr.msra.gmra.mrb[148].mxu0 %vm193_vm2, %v23125_v39  ;;  %19620 = vmatpush3.xpose.msk.msra.mxu1 %vm193_vm2, %v12348_v49 }
0x13b5   :  { %19615 = vmatpush3.xpose.msk.msra.mxu0 %vm193_vm2, %v23149_v45  ;;  %19616 = vmatprep.mubr.msk.f32.mxu0 %vm20498_vm1, %v24779_v16 }
0x13b6   :  { %19621 = vmatprep.mubr.msk.f32.mxu1 %vm20498_vm1, %v24779_v16  ;;  %19624 = vmatprep.subr.mxu0 %v24779_v16  ;;  %v13007_v39 = vpop.permute.xlu1 %13006 }
0x13b7   :  { %19622 = vmatmul.mubr.msk.f32.vlgmr.msra.gmra.mrb[148].mxu1 %vm193_vm2, %v12346_v61  ;;  %19629 = vmatprep.subr.mxu1 %v24779_v16  ;;  %v12658_v21 = vpop.permute.xlu0 %12657 }
0x13b8   :  { %19617 = vmatmul.mubr.msk.f32.vlgmr.msra.gmra.mrb[150].mxu0 %vm193_vm2, %v23175_v46  ;;  %19630 = vmatpush3.xpose.msk.msra.mxu1 %vm193_vm2, %v12504_v7 }
0x13b9   :  { %19625 = vmatpush3.xpose.msk.msra.mxu0 %vm193_vm2, %v12426_v56  ;;  %19626 = vmatprep.mubr.msk.f32.mxu0 %vm20498_vm1, %v24779_v16 }
0x13ba   :  { %19631 = vmatprep.mubr.msk.f32.mxu1 %vm20498_vm1, %v24779_v16  ;;  %19634 = vmatprep.subr.mxu0 %v24779_v16 }
0x13bb   :  { %19632 = vmatmul.mubr.msk.f32.vlgmr.msra.gmra.mrb[150].mxu1 %vm193_vm2, %v12502_v40  ;;  %19639 = vmatprep.subr.mxu1 %v24779_v16  ;;  %v13084_v45 = vpop.permute.xlu0 %13083 }
0x13bc   :  { %19627 = vmatmul.mubr.msk.f32.vlgmr.msra.gmra.mrb[152].mxu0 %vm193_vm2, %v12424_v59  ;;  %19640 = vmatpush3.xpose.msk.msra.mxu1 %vm193_vm2, %v12660_v38 }
0x13bd   :  { %19635 = vmatpush3.xpose.msk.msra.mxu0 %vm193_vm2, %v12582_v34  ;;  %19636 = vmatprep.mubr.msk.f32.mxu0 %vm20498_vm1, %v24779_v16 }
0x13be   :  { %19641 = vmatprep.mubr.msk.f32.mxu1 %vm20498_vm1, %v24779_v16  ;;  %19644 = vmatprep.subr.mxu0 %v24779_v16 }
0x13bf   :  { %19642 = vmatmul.mubr.msk.f32.vlgmr.msra.gmra.mrb[152].mxu1 %vm193_vm2, %v12658_v21  ;;  %19649 = vmatprep.subr.mxu1 %v24779_v16 }
0x13c0   :  { %19637 = vmatmul.mubr.msk.f32.vlgmr.msra.gmra.mrb[154].mxu0 %vm193_vm2, %v12580_v30  ;;  %19650 = vmatpush3.msk.msra.mxu1 %vm7664_vm12, %v13007_v39 }
0x13c1   :  { %19645 = vmatpush3.xpose.msk.msra.mxu0 %vm193_vm2, %v12738_v51  ;;  %19646 = vmatprep.mubr.msk.f32.mxu0 %vm20498_vm1, %v24779_v16 }
0x13c2   :  { %19654 = vmatprep.subr.mxu0 %v24779_v16  ;;  %19651 = vmatprep.mubr.msk.f32.mxu1 %vm20498_vm1, %v24779_v16 }
0x13c3   :  { %19659 = vmatprep.subr.mxu1 %v24779_v16 }
0x13c4   :  { %19647 = vmatmul.mubr.msk.f32.vlgmr.msra.gmra.mrb[156].mxu0 %vm193_vm2, %v12736_v6 }
0x13c5   :  { %19655 = vmatpush3.msk.msra.mxu0 %vm7664_vm12, %v13084_v45  ;;  %19656 = vmatprep.mubr.msk.f32.mxu0 %vm20498_vm1, %v24779_v16 }
0x13c6   :  { %19664 = vmatprep.subr.mxu0 %v24779_v16 }
0x1453   :  { %v23312_v11 = vpop.f32.mrb[122].mxu1 }
0x1454   :  { %24858 = vst [vmem:[#allocation31_spill] sm:$0xff] %v23312_v11  ;;  %v19493_v37 = vpop.f32.mrb[123].mxu1 }
0x1455   :  { %v23314_v9 = vpop.f32.mrb[126].mxu0 }
0x1456   :  { %24859 = vst [vmem:[#allocation32_spill] sm:$0xff] %v23314_v9  ;;  %v19498_v50 = vpop.f32.mrb[127].mxu0 }
0x1457   :  { %v23316_v17 = vpop.f32.mrb[124].mxu1 }
0x1458   :  { %24860 = vst [vmem:[#allocation15_spill] sm:$0xff] %v23316_v17  ;;  %v19503_v24 = vpop.f32.mrb[125].mxu1 }
0x145b   :  { %v23318_v5 = vpop.f32.mrb[126].mxu1 }
0x145c   :  { %24861 = vst [vmem:[#allocation16_spill] sm:$0xff] %v23318_v5  ;;  %v23320_v46 = vpop.f32.mrb[128].mxu0  ;;  %v19513_v52 = vpop.f32.mrb[127].mxu1 }
0x145d   :  { %24862 = vst [vmem:[#allocation35_spill] sm:$0xff] %v23320_v46  ;;  %v19508_v4 = vpop.f32.mrb[129].mxu0 }
0x145f   :  { %v23322_v14 = vpop.f32.mrb[128].mxu1 }
0x1460   :  { %24863 = vst [vmem:[#allocation34_spill] sm:$0xff] %v23322_v14  ;;  %v23324_v25 = vpop.f32.mrb[130].mxu0  ;;  %v19523_v18 = vpop.f32.mrb[129].mxu1 }
0x1461   :  { %24864 = vst [vmem:[#allocation37_spill] sm:$0xff] %v23324_v25  ;;  %v19518_v56 = vpop.f32.mrb[131].mxu0 }
0x1463   :  { %v23326_v48 = vpop.f32.mrb[130].mxu1 }
0x1464   :  { %24865 = vst [vmem:[#allocation36_spill] sm:$0xff] %v23326_v48  ;;  %v23328_v15 = vpop.f32.mrb[132].mxu0  ;;  %v19533_v13 = vpop.f32.mrb[131].mxu1 }
0x1465   :  { %24866 = vst [vmem:[#allocation39_spill] sm:$0xff] %v23328_v15  ;;  %v19528_v59 = vpop.f32.mrb[133].mxu0 }
0x1467   :  { %v23330_v54 = vpop.f32.mrb[132].mxu1 }
0x1468   :  { %24867 = vst [vmem:[#allocation38_spill] sm:$0xff] %v23330_v54  ;;  %v23332_v49 = vpop.f32.mrb[134].mxu0  ;;  %v19543_v62 = vpop.f32.mrb[133].mxu1 }
0x1469   :  { %24868 = vst [vmem:[#allocation41_spill] sm:$0xff] %v23332_v49  ;;  %v19538_v41 = vpop.f32.mrb[135].mxu0 }
0x146b   :  { %v23334_v31 = vpop.f32.mrb[134].mxu1 }
0x146c   :  { %24869 = vst [vmem:[#allocation40_spill] sm:$0xff] %v23334_v31  ;;  %v23336_v34 = vpop.f32.mrb[136].mxu0  ;;  %v19553_v61 = vpop.f32.mrb[135].mxu1 }
0x146d   :  { %24870 = vst [vmem:[#allocation42_spill] sm:$0xff] %v23336_v34  ;;  %v19548_v55 = vpop.f32.mrb[137].mxu0 }
0x146f   :  { %v23338_v0 = vpop.f32.mrb[136].mxu1 }
0x1470   :  { %24871 = vst [vmem:[#allocation43_spill] sm:$0xff] %v23338_v0  ;;  %v23340_v20 = vpop.f32.mrb[138].mxu0  ;;  %v19563_v7 = vpop.f32.mrb[137].mxu1 }
0x1471   :  { %24872 = vst [vmem:[#allocation45_spill] sm:$0xff] %v23340_v20  ;;  %v19558_v30 = vpop.f32.mrb[139].mxu0 }
0x1474   :  { %v23342_v40 = vpop.f32.mrb[140].mxu0 }
0x1475   :  { %24873 = vst [vmem:[#allocation47_spill] sm:$0xff] %v23342_v40  ;;  %v19568_v51 = vpop.f32.mrb[141].mxu0 }
0x1476   :  { %v23344_v38 = vpop.f32.mrb[138].mxu1 }
0x1477   :  { %v19573_v6 = vpop.f32.mrb[139].mxu1  ;;  %v12813_v21 = vsel %vm7465_vm13, %v23344_v38, -inf }
0x1478   :  { %12814 = vmax.xlane.f32.xlu0 %v12813_v21 }
0x147a   :  { %v23348_v39 = vpop.f32.mrb[140].mxu1 }
0x147b   :  { %v23350_v45 = vpop.f32.mrb[142].mxu0  ;;  %v19583_v37 = vpop.f32.mrb[141].mxu1  ;;  %v12819_v50 = vsel %vm7465_vm13, %v23348_v39, -inf }
0x147c   :  { %v19578_v24 = vpop.f32.mrb[143].mxu0  ;;  %12820 = vmax.xlane.f32.xlu0 %v12819_v50  ;;  %v12816_v52 = vsel %vm7465_vm13, %v23350_v45, -inf }
0x147d   :  { %12817 = vmax.xlane.f32.xlu1 %v12816_v52 }
0x147e   :  { %v23356_v4 = vpop.f32.mrb[142].mxu1 }
0x147f   :  { %v23358_v18 = vpop.f32.mrb[144].mxu0  ;;  %v19593_v56 = vpop.f32.mrb[143].mxu1  ;;  %v12825_v13 = vsel %vm7465_vm13, %v23356_v4, -inf }
0x1480   :  { %v19588_v59 = vpop.f32.mrb[145].mxu0  ;;  %v12822_v62 = vsel %vm7465_vm13, %v23358_v18, -inf }
0x1481   :  { %12826 = vmax.xlane.f32.xlu1 %v12825_v13  ;;  %12823 = vmax.xlane.f32.xlu0 %v12822_v62 }
0x1482   :  { %v23364_v41 = vpop.f32.mrb[144].mxu1 }
0x1483   :  { %v23366_v61 = vpop.f32.mrb[146].mxu0  ;;  %v19603_v55 = vpop.f32.mrb[145].mxu1  ;;  %v12831_v7 = vsel %vm7465_vm13, %v23364_v41, -inf }
0x1484   :  { %v19598_v30 = vpop.f32.mrb[147].mxu0  ;;  %v12828_v51 = vsel %vm7465_vm13, %v23366_v61, -inf }
0x1485   :  { %12832 = vmax.xlane.f32.xlu1 %v12831_v7  ;;  %12829 = vmax.xlane.f32.xlu0 %v12828_v51 }
0x1486   :  { %v23372_v6 = vpop.f32.mrb[146].mxu1 }
0x1487   :  { %v23374_v21 = vpop.f32.mrb[148].mxu0  ;;  %v19613_v37 = vpop.f32.mrb[147].mxu1  ;;  %v12837_v50 = vsel %vm7465_vm13, %v23372_v6, -inf }
0x1488   :  { %v19608_v24 = vpop.f32.mrb[149].mxu0  ;;  %v12834_v52 = vsel %vm7465_vm13, %v23374_v21, -inf }
0x1489   :  { %12838 = vmax.xlane.f32.xlu1 %v12837_v50  ;;  %12835 = vmax.xlane.f32.xlu0 %v12834_v52 }
0x148a   :  { %v23380_v56 = vpop.f32.mrb[148].mxu1 }
0x148b   :  { %v23382_v13 = vpop.f32.mrb[150].mxu0  ;;  %v19623_v59 = vpop.f32.mrb[149].mxu1  ;;  %v12843_v62 = vsel %vm7465_vm13, %v23380_v56, -inf }
0x148c   :  { %v19618_v55 = vpop.f32.mrb[151].mxu0  ;;  %v12840_v7 = vsel %vm7465_vm13, %v23382_v13, -inf }
0x148d   :  { %12844 = vmax.xlane.f32.xlu1 %v12843_v62  ;;  %12841 = vmax.xlane.f32.xlu0 %v12840_v7 }
0x148e   :  { %v23388_v30 = vpop.f32.mrb[150].mxu1 }
0x148f   :  { %v23390_v51 = vpop.f32.mrb[152].mxu0  ;;  %v19633_v37 = vpop.f32.mrb[151].mxu1  ;;  %v12849_v50 = vsel %vm7465_vm13, %v23388_v30, -inf }
0x1490   :  { %v19628_v24 = vpop.f32.mrb[153].mxu0  ;;  %v12846_v52 = vsel %vm7465_vm13, %v23390_v51, -inf }
0x1491   :  { %12850 = vmax.xlane.f32.xlu1 %v12849_v50  ;;  %12847 = vmax.xlane.f32.xlu0 %v12846_v52  ;;  %v23412_v52 = vpop.permute.xlu1 %13160 }
0x1492   :  { %v23396_v59 = vpop.f32.mrb[152].mxu1 }
0x1493   :  { %v23398_v55 = vpop.f32.mrb[154].mxu0  ;;  %v19643_v62 = vpop.f32.mrb[153].mxu1  ;;  %v12855_v7 = vsel %vm7465_vm13, %v23396_v59, -inf }
0x1494   :  { %v19638_v0 = vpop.f32.mrb[155].mxu0  ;;  %v12852_v37 = vsel %vm7465_vm13, %v23398_v55, -inf  ;;  %v23416_v62 = vpop.permute.xlu0 %13237 }
0x1495   :  { %12856 = vmax.xlane.f32.xlu1 %v12855_v7  ;;  %12853 = vmax.xlane.f32.xlu0 %v12852_v37  ;;  %v23414_v0 = vpop.permute.xlu1 %13314 }
0x1497   :  { %v23404_v24 = vpop.f32.mrb[156].mxu0 }
0x1498   :  { %v19648_v31 = vpop.f32.mrb[157].mxu0  ;;  %v12858_v50 = vsel %vm7465_vm13, %v23404_v24, -inf  ;;  %v23420_v37 = vpop.permute.xlu0 %13468 }
0x1499   :  { %12859 = vmax.xlane.f32.xlu0 %v12858_v50  ;;  %v23418_v7 = vpop.permute.xlu1 %13391 }
0x149c   :  { %v23424_v40 = vpop.permute.xlu0 %13622 }
0x149d   :  { %v23422_v31 = vpop.permute.xlu1 %13545 }
0x14a0   :  { %v23428_v20 = vpop.permute.xlu0 %13776 }
0x14a1   :  { %v23426_v50 = vpop.permute.xlu1 %13699  ;;  %24875 = vst [vmem:[#allocation49_spill] sm:$0xff] %v23428_v20 }
0x14a2   :  { %24874 = vst [vmem:[#allocation44_spill] sm:$0xff] %v23426_v50 }
0x14a4   :  { %v23432_v48 = vpop.permute.xlu0 %13930 }
0x14a5   :  { %v23430_v54 = vpop.permute.xlu1 %13853  ;;  %24877 = vst [vmem:[#allocation48_spill] sm:$0xff] %v23432_v48 }
0x14a6   :  { %14786 = vrot.lane.b32.xlu1 %v21872_v1, %s20507_s27  ;;  %24876 = vst [vmem:[#allocation46_spill] sm:$0xff] %v23430_v54 }
0x14a8   :  { %v23436_v49 = vpop.permute.xlu0 %14084 }
0x14a9   :  { %v23434_v34 = vpop.permute.xlu1 %14007  ;;  %24879 = vst [vmem:[#allocation51_spill] sm:$0xff] %v23436_v49 }
0x14aa   :  { %24878 = vst [vmem:[#allocation50_spill] sm:$0xff] %v23434_v34 }
0x14ac   :  { %v23440_v5 = vpop.permute.xlu0 %14240 }
0x14ad   :  { %v23438_v14 = vpop.permute.xlu1 %14161  ;;  %24881 = vst [vmem:[#allocation53_spill] sm:$0xff] %v23440_v5 }
0x14ae   :  { %24880 = vst [vmem:[#allocation52_spill] sm:$0xff] %v23438_v14 }
0x14af   :  { %14708 = vrot.lane.b32.xlu0 %v21858_v22, %s20507_s27 }
0x14b0   :  { %v23444_v25 = vpop.permute.xlu0 %14238 }
0x14b1   :  { %v23442_v15 = vpop.permute.xlu1 %14318  ;;  %24883 = vst [vmem:[#allocation55_spill] sm:$0xff] %v23444_v25 }
0x14b2   :  { %24882 = vst [vmem:[#allocation54_spill] sm:$0xff] %v23442_v15 }
0x14b4   :  { %v23448_v11 = vpop.permute.xlu0 %14396 }
0x14b5   :  { %v23446_v17 = vpop.permute.xlu1 %14316  ;;  %24885 = vst [vmem:[#allocation57_spill] sm:$0xff] %v23448_v11 }
0x14b6   :  { %24884 = vst [vmem:[#allocation56_spill] sm:$0xff] %v23446_v17 }
0x14b8   :  { %v23452_v9 = vpop.permute.xlu0 %14394 }
0x14b9   :  { %v23450_v46 = vpop.permute.xlu1 %14474  ;;  %24887 = vst [vmem:[#allocation59_spill] sm:$0xff] %v23452_v9 }
0x14ba   :  { %24886 = vst [vmem:[#allocation58_spill] sm:$0xff] %v23450_v46 }
0x14bc   :  { %v23456_v34 = vpop.permute.xlu0 %14552 }
0x14bd   :  { %v23454_v54 = vpop.permute.xlu1 %14472  ;;  %24889 = vst [vmem:[#allocation61_spill] sm:$0xff] %v23456_v34 }
0x14be   :  { %24888 = vst [vmem:[#allocation60_spill] sm:$0xff] %v23454_v54 }
0x14c0   :  { %v23460_v14 = vpop.permute.xlu0 %14550 }
0x14c1   :  { %v23458_v49 = vpop.permute.xlu1 %14630  ;;  %24891 = vst [vmem:[#allocation63_spill] sm:$0xff] %v23460_v14 }
0x14c2   :  { %24890 = vst [vmem:[#allocation62_spill] sm:$0xff] %v23458_v49 }
0x14c5   :  { %v23462_v15 = vpop.permute.xlu1 %14628 }
0x14c6   :  { %24892 = vst [vmem:[#allocation64_spill] sm:$0xff] %v23462_v15 }
0x1505   :  { %v12815_v5 = vpop.xlane.xlu0 %12814 }
0x1506   :  { %v12861_v25 = vsub.f32 %v23344_v38, %v12815_v5 }
0x1508   :  { %v12877_v17 = vmul.f32 1.442695, %v12861_v25 }
0x1509   :  { %v12821_v48 = vpop.xlane.xlu0 %12820 }
0x150a   :  { %20303 = vpow2.f32 %v12877_v17  ;;  %v12863_v46 = vsub.f32 %v23348_v39, %v12821_v48  ;;  %v12818_v11 = vpop.xlane.xlu1 %12817 }
0x150b   :  { %v12862_v9 = vsub.f32 %v23350_v45, %v12818_v11 }
0x150c   :  { %v12881_v54 = vmul.f32 1.442695, %v12863_v46 }
0x150d   :  { %v12879_v50 = vmul.f32 1.442695, %v12862_v9 }
0x150e   :  { %20305 = vpow2.f32 %v12881_v54  ;;  %v12827_v34 = vpop.xlane.xlu1 %12826  ;;  %v12824_v49 = vpop.xlane.xlu0 %12823 }
0x150f   :  { %20307 = vpow2.f32 %v12879_v50  ;;  %v12865_v14 = vsub.f32 %v23356_v4, %v12827_v34  ;;  %v12864_v15 = vsub.f32 %v23358_v18, %v12824_v49 }
0x1511   :  { %v12885_v20 = vmul.f32 1.442695, %v12865_v14  ;;  %v12883_v5 = vmul.f32 1.442695, %v12864_v15 }
0x1512   :  { %v12833_v25 = vpop.xlane.xlu1 %12832  ;;  %v12830_v38 = vpop.xlane.xlu0 %12829 }
0x1513   :  { %20309 = vpow2.f32 %v12885_v20  ;;  %v12867_v17 = vsub.f32 %v23364_v41, %v12833_v25  ;;  %v12866_v48 = vsub.f32 %v23366_v61, %v12830_v38 }
0x1514   :  { %v23471_v11 = vpop.eup %20303  ;;  %20311 = vpow2.f32 %v12883_v5 }
0x1515   :  { %v12889_v9 = vmul.f32 1.442695, %v12867_v17  ;;  %v12887_v46 = vmul.f32 1.442695, %v12866_v48  ;;  %v12909_v54 = vsel %vm7465_vm13, %v23471_v11, 0.0 }
0x1516   :  { %v12839_v34 = vpop.xlane.xlu1 %12838  ;;  %v12836_v39 = vpop.xlane.xlu0 %12835  ;;  %12910 = vadd.xlane.f32.xlu1 %v12909_v54 }
0x1517   :  { %20313 = vpow2.f32 %v12889_v9  ;;  %v12869_v14 = vsub.f32 %v23372_v6, %v12839_v34  ;;  %v12868_v15 = vsub.f32 %v23374_v21, %v12836_v39 }
0x1518   :  { %v23477_v49 = vpop.eup %20305  ;;  %20315 = vpow2.f32 %v12887_v46 }
0x1519   :  { %v23479_v20 = vpop.eup %20307  ;;  %v12893_v45 = vmul.f32 1.442695, %v12869_v14  ;;  %v12891_v4 = vmul.f32 1.442695, %v12868_v15  ;;  %v12915_v18 = vsel %vm7465_vm13, %v23477_v49, 0.0 }
0x151a   :  { %v12845_v41 = vpop.xlane.xlu1 %12844  ;;  %v12842_v61 = vpop.xlane.xlu0 %12841  ;;  %12916 = vadd.xlane.f32.xlu1 %v12915_v18  ;;  %v12912_v50 = vsel %vm7465_vm13, %v23479_v20, 0.0 }
0x151b   :  { %20317 = vpow2.f32 %v12893_v45  ;;  %v12871_v6 = vsub.f32 %v23380_v56, %v12845_v41  ;;  %v12870_v21 = vsub.f32 %v23382_v13, %v12842_v61  ;;  %12913 = vadd.xlane.f32.xlu0 %v12912_v50 }
0x151c   :  { %20319 = vpow2.f32 %v12891_v4 }
0x151d   :  { %v23487_v5 = vpop.eup %20309  ;;  %v12897_v25 = vmul.f32 1.442695, %v12871_v6  ;;  %v12895_v38 = vmul.f32 1.442695, %v12870_v21 }
0x151e   :  { %v23489_v17 = vpop.eup %20311  ;;  %v12851_v48 = vpop.xlane.xlu1 %12850  ;;  %v12921_v46 = vsel %vm7465_vm13, %v23487_v5, 0.0 }
0x151f   :  { %v12848_v9 = vpop.xlane.xlu0 %12847  ;;  %20321 = vpow2.f32 %v12897_v25  ;;  %v12873_v54 = vsub.f32 %v23388_v30, %v12851_v48  ;;  %12922 = vadd.xlane.f32.xlu1 %v12921_v46  ;;  %v12918_v13 = vsel %vm7465_vm13, %v23489_v17, 0.0 }
0x1520   :  { %v12872_v56 = vsub.f32 %v23390_v51, %v12848_v9  ;;  %20323 = vpow2.f32 %v12895_v38  ;;  %12919 = vadd.xlane.f32.xlu0 %v12918_v13 }
0x1521   :  { %v23497_v34 = vpop.eup %20313  ;;  %v12901_v39 = vmul.f32 1.442695, %v12873_v54 }
0x1522   :  { %v12899_v14 = vmul.f32 1.442695, %v12872_v56  ;;  %v23499_v15 = vpop.eup %20315  ;;  %v12927_v4 = vsel %vm7465_vm13, %v23497_v34, 0.0 }
0x1523   :  { %v12854_v45 = vpop.xlane.xlu0 %12853  ;;  %20325 = vpow2.f32 %v12901_v39  ;;  %12928 = vadd.xlane.f32.xlu1 %v12927_v4  ;;  %v12924_v51 = vsel %vm7465_vm13, %v23499_v15, 0.0  ;;  %v12857_v39 = vpop.xlane.xlu1 %12856 }
0x1524   :  { %v12874_v30 = vsub.f32 %v23398_v55, %v12854_v45  ;;  %20327 = vpow2.f32 %v12899_v14  ;;  %12925 = vadd.xlane.f32.xlu0 %v12924_v51  ;;  %v12875_v14 = vsub.f32 %v23396_v59, %v12857_v39 }
0x1525   :  { %v23506_v18 = vpop.eup %20317 }
0x1526   :  { %v12903_v41 = vmul.f32 1.442695, %v12874_v30  ;;  %v23508_v61 = vpop.eup %20319  ;;  %v12933_v50 = vsel %vm7465_vm13, %v23506_v18, 0.0  ;;  %v12905_v4 = vmul.f32 1.442695, %v12875_v14 }
0x1527   :  { %12934 = vadd.xlane.f32.xlu1 %v12933_v50  ;;  %v12930_v6 = vsel %vm7465_vm13, %v23508_v61, 0.0  ;;  %v12860_v45 = vpop.xlane.xlu0 %12859 }
0x1528   :  { %20329 = vpow2.f32 %v12903_v41  ;;  %12931 = vadd.xlane.f32.xlu0 %v12930_v6  ;;  %v12876_v30 = vsub.f32 %v23404_v24, %v12860_v45  ;;  %v24899_v45 = vld [vmem:[#allocation50_spill] sm:$0xff] }
0x1529   :  { %v23514_v55 = vpop.eup %20321  ;;  %20331 = vpow2.f32 %v12905_v4 }
0x152a   :  { %v23516_v21 = vpop.eup %20323  ;;  %v12939_v25 = vsel %vm7465_vm13, %v23514_v55, 0.0  ;;  %v12907_v51 = vmul.f32 1.442695, %v12876_v30  ;;  %v24900_v30 = vld [vmem:[#allocation52_spill] sm:$0xff] }
0x152b   :  { %12940 = vadd.xlane.f32.xlu1 %v12939_v25  ;;  %v12936_v38 = vsel %vm7465_vm13, %v23516_v21, 0.0 }
0x152c   :  { %12937 = vadd.xlane.f32.xlu0 %v12936_v38  ;;  %20333 = vpow2.f32 %v12907_v51 }
0x152d   :  { %v23522_v48 = vpop.eup %20325 }
0x152e   :  { %v23524_v9 = vpop.eup %20327  ;;  %v12945_v46 = vsel %vm7465_vm13, %v23522_v48, 0.0 }
0x152f   :  { %12946 = vadd.xlane.f32.xlu1 %v12945_v46  ;;  %v12942_v54 = vsel %vm7465_vm13, %v23524_v9, 0.0 }
0x1530   :  { %12943 = vadd.xlane.f32.xlu0 %v12942_v54 }
0x1532   :  { %v23530_v56 = vpop.eup %20329 }
0x1533   :  { %v12948_v13 = vsel %vm7465_vm13, %v23530_v56, 0.0  ;;  %v23540_v41 = vpop.eup %20331 }
0x1534   :  { %12949 = vadd.xlane.f32.xlu0 %v12948_v13  ;;  %v12951_v50 = vsel %vm7465_vm13, %v23540_v41, 0.0  ;;  %v24897_v13 = vld [vmem:[#allocation46_spill] sm:$0xff] }
0x1540   :  { %14784 = vrot.lane.b32.xlu1 %v22031_v10, %s20508_s28  ;;  %v23544_v10 = vpop.eup %20333 }
0x154a   :  { %14706 = vrot.lane.b32.xlu0 %v22018_v19, %s20508_s28  ;;  %v12954_v19 = vsel %vm7465_vm13, %v23544_v10, 0.0 }
0x1564   :  { %12952 = vadd.xlane.f32.xlu1 %v12951_v50 }
0x1569   :  { %12955 = vadd.xlane.f32.xlu0 %v12954_v19 }
0x1575   :  { %14942 = vrot.lane.b32.xlu1 %v21884_v2, %s20507_s27 }
0x1579   :  { %14940 = vrot.lane.b32.xlu1 %v22050_v35, %s20508_s28  ;;  %v23594_v35 = vpop.permute.xlu0 %14708 }
0x157d   :  { %15098 = vrot.lane.b32.xlu1 %v21896_v33, %s20507_s27 }
0x157f   :  { %14864 = vrot.lane.b32.xlu0 %v21876_v57, %s20507_s27 }
0x1581   :  { %15096 = vrot.lane.b32.xlu1 %v22069_v47, %s20508_s28 }
0x1583   :  { %14862 = vrot.lane.b32.xlu0 %v22041_v27, %s20508_s28  ;;  %v23586_v27 = vpop.permute.xlu1 %14786 }
0x1585   :  { %15254 = vrot.lane.b32.xlu1 %v21904_v44, %s20507_s27 }
0x1587   :  { %15020 = vrot.lane.b32.xlu0 %v21878_v53, %s20507_s27 }
0x1589   :  { %15252 = vrot.lane.b32.xlu1 %v22088_v36, %s20508_s28 }
0x158b   :  { %15018 = vrot.lane.b32.xlu0 %v22054_v3, %s20508_s28 }
0x158d   :  { %15410 = vrot.lane.b32.xlu1 %v21912_v42, %s20507_s27 }
0x158f   :  { %15176 = vrot.lane.b32.xlu0 %v21888_v8, %s20507_s27 }
0x1591   :  { %15408 = vrot.lane.b32.xlu1 %v22107_v28, %s20508_s28 }
0x1593   :  { %15174 = vrot.lane.b32.xlu0 %v22073_v63, %s20508_s28 }
0x1595   :  { %15679 = vrot.lane.b32.xlu1 %v21836_v43, %s24893_s1 }
0x1597   :  { %15332 = vrot.lane.b32.xlu0 %v21886_v60, %s20507_s27 }
0x1599   :  { %15833 = vrot.lane.b32.xlu1 %v21844_v32, %s24893_s1 }
0x159b   :  { %15330 = vrot.lane.b32.xlu0 %v22092_v23, %s20508_s28 }
0x159d   :  { %15987 = vrot.lane.b32.xlu1 %v21848_v58, %s24893_s1 }
0x159f   :  { %15756 = vrot.lane.b32.xlu0 %v21842_v26, %s24893_s1 }
0x15a1   :  { %16064 = vrot.lane.b32.xlu1 %v21866_v29, %s24893_s1 }
0x15a3   :  { %15910 = vrot.lane.b32.xlu0 %v21856_v12, %s24893_s1  ;;  %v12911_v43 = vpop.xlane.xlu1 %12910 }
0x15a4   :  { %20335 = vrcp.f32 %v12911_v43 }
0x15a5   :  { %16218 = vrot.lane.b32.xlu1 %v21872_v1, %s24893_s1 }
0x15a7   :  { %16141 = vrot.lane.b32.xlu0 %v21858_v22, %s24893_s1  ;;  %v12917_v32 = vpop.xlane.xlu1 %12916 }
0x15a8   :  { %20337 = vrcp.f32 %v12917_v32  ;;  %v12914_v58 = vpop.xlane.xlu0 %12913 }
0x15a9   :  { %20339 = vrcp.f32 %v12914_v58  ;;  %16372 = vrot.lane.b32.xlu1 %v21884_v2, %s24893_s1 }
0x15ab   :  { %16295 = vrot.lane.b32.xlu0 %v21876_v57, %s24893_s1 }
0x15ac   :  { %v12923_v26 = vpop.xlane.xlu1 %12922 }
0x15ad   :  { %20341 = vrcp.f32 %v12923_v26  ;;  %v12920_v12 = vpop.xlane.xlu0 %12919 }
0x15ae   :  { %v20336_v29 = vpop.eup %20335  ;;  %20343 = vrcp.f32 %v12920_v12 }
0x15af   :  { %v12958_v1 = vmul.f32 %v20336_v29, %v23471_v11 }
0x15b0   :  { %v12929_v3 = vpop.xlane.xlu1 %12928 }
0x15b1   :  { %20345 = vrcp.f32 %v12929_v3  ;;  %v12926_v22 = vpop.xlane.xlu0 %12925  ;;  %18251 = vst.msk [vmem:[%s24729_s10 + $0x80] sm:$0xf] %vm7465_vm13, %v12958_v1  ;;  %19652 = vmatmul.mubr.msk.f32.vlgmr.msra.gmra.mrb[154].mxu1 %vm7660_vm14, %v12958_v1  ;;  %v24901_v3 = vld [vmem:[#allocation53_spill] sm:$0xff] }
0x15b2   :  { %v20338_v2 = vpop.eup %20337  ;;  %20347 = vrcp.f32 %v12926_v22  ;;  %19660 = vmatpush3.msk.msra.mxu1 %vm7664_vm12, %v23412_v52  ;;  %19661 = vmatprep.mubr.msk.f32.mxu1 %vm20498_vm1, %v24779_v16 }
0x15b3   :  { %v20340_v57 = vpop.eup %20339  ;;  %19669 = vmatprep.subr.mxu1 %v24779_v16  ;;  %v12962_v47 = vmul.f32 %v20338_v2, %v23477_v49 }
0x15b4   :  { %v12935_v63 = vpop.xlane.xlu1 %12934  ;;  %v12960_v36 = vmul.f32 %v20340_v57, %v23479_v20 }
0x15b5   :  { %20349 = vrcp.f32 %v12935_v63  ;;  %v12932_v23 = vpop.xlane.xlu0 %12931  ;;  %18253 = vst.msk [vmem:[%s24729_s10 + $0x88] sm:$0xf] %vm7465_vm13, %v12962_v47  ;;  %19662 = vmatmul.mubr.msk.f32.vlgmr.msra.gmra.mrb[156].mxu1 %vm7660_vm14, %v12962_v47  ;;  %v24902_v47 = vld [vmem:[#allocation55_spill] sm:$0xff]  ;;  %v24903_v63 = vld [vmem:[#allocation57_spill] sm:$0xff] }
0x15b6   :  { %20351 = vrcp.f32 %v12932_v23  ;;  %18252 = vst.msk [vmem:[%s24729_s10 + $0x84] sm:$0xf] %vm7465_vm13, %v12960_v36  ;;  %19657 = vmatmul.mubr.msk.f32.vlgmr.msra.gmra.mrb[158].mxu0 %vm7660_vm14, %v12960_v36  ;;  %19670 = vmatpush3.msk.msra.mxu1 %vm7664_vm12, %v23414_v0  ;;  %v24904_v36 = vld [vmem:[#allocation54_spill] sm:$0xff] }
0x15b7   :  { %v20342_v28 = vpop.eup %20341  ;;  %19665 = vmatpush3.msk.msra.mxu0 %vm7664_vm12, %v23416_v62  ;;  %19666 = vmatprep.mubr.msk.f32.mxu0 %vm20498_vm1, %v24779_v16 }
0x15b8   :  { %v20344_v59 = vpop.eup %20343  ;;  %v12941_v24 = vpop.xlane.xlu1 %12940  ;;  %19671 = vmatprep.mubr.msk.f32.mxu1 %vm20498_vm1, %v24779_v16  ;;  %19674 = vmatprep.subr.mxu0 %v24779_v16  ;;  %v12966_v52 = vmul.f32 %v20342_v28, %v23487_v5  ;;  %v24905_v28 = vld [vmem:[#allocation59_spill] sm:$0xff] }
0x15b9   :  { %20353 = vrcp.f32 %v12941_v24  ;;  %v12938_v11 = vpop.xlane.xlu0 %12937  ;;  %19679 = vmatprep.subr.mxu1 %v24779_v16  ;;  %v12964_v0 = vmul.f32 %v20344_v59, %v23489_v17  ;;  %v24906_v59 = vld [vmem:[#allocation56_spill] sm:$0xff]  ;;  %v24907_v24 = vld [vmem:[#allocation61_spill] sm:$0xff] }
0x15ba   :  { %20355 = vrcp.f32 %v12938_v11  ;;  %18255 = vst.msk [vmem:[%s24729_s10 + $0x90] sm:$0xf] %vm7465_vm13, %v12966_v52  ;;  %19672 = vmatmul.mubr.msk.f32.vlgmr.msra.gmra.mrb[158].mxu1 %vm7660_vm14, %v12966_v52  ;;  %v24908_v52 = vld [vmem:[#allocation58_spill] sm:$0xff]  ;;  %v24909_v11 = vld [vmem:[#allocation63_spill] sm:$0xff] }
0x15bb   :  { %v20346_v62 = vpop.eup %20345  ;;  %18254 = vst.msk [vmem:[%s24729_s10 + $0x8c] sm:$0xf] %vm7465_vm13, %v12964_v0  ;;  %19667 = vmatmul.mubr.msk.f32.vlgmr.msra.gmra.mrb[160].mxu0 %vm7660_vm14, %v12964_v0  ;;  %19680 = vmatpush3.msk.msra.mxu1 %vm7664_vm12, %v23420_v37 }
0x15bc   :  { %v20348_v49 = vpop.eup %20347  ;;  %19675 = vmatpush3.msk.msra.mxu0 %vm7664_vm12, %v23418_v7  ;;  %v12947_v20 = vpop.xlane.xlu1 %12946  ;;  %19676 = vmatprep.mubr.msk.f32.mxu0 %vm20498_vm1, %v24779_v16  ;;  %v12970_v5 = vmul.f32 %v20346_v62, %v23497_v34  ;;  %v24910_v62 = vld [vmem:[#allocation60_spill] sm:$0xff] }
0x15bd   :  { %20357 = vrcp.f32 %v12947_v20  ;;  %v12944_v17 = vpop.xlane.xlu0 %12943  ;;  %19681 = vmatprep.mubr.msk.f32.mxu1 %vm20498_vm1, %v24779_v16  ;;  %19684 = vmatprep.subr.mxu0 %v24779_v16  ;;  %v12968_v6 = vmul.f32 %v20348_v49, %v23499_v15  ;;  %v24911_v20 = vld [vmem:[#allocation62_spill] sm:$0xff] }
0x15be   :  { %20359 = vrcp.f32 %v12944_v17  ;;  %19689 = vmatprep.subr.mxu1 %v24779_v16  ;;  %18257 = vst.msk [vmem:[%s24729_s10 + $0x98] sm:$0xf] %vm7465_vm13, %v12970_v5  ;;  %19682 = vmatmul.mubr.msk.f32.vlgmr.msra.gmra.mrb[160].mxu1 %vm7660_vm14, %v12970_v5  ;;  %v24912_v5 = vld [vmem:[#allocation64_spill] sm:$0xff] }
0x15bf   :  { %v20350_v7 = vpop.eup %20349  ;;  %18256 = vst.msk [vmem:[%s24729_s10 + $0x94] sm:$0xf] %vm7465_vm13, %v12968_v6  ;;  %19677 = vmatmul.mubr.msk.f32.vlgmr.msra.gmra.mrb[162].mxu0 %vm7660_vm14, %v12968_v6  ;;  %19690 = vmatpush3.msk.msra.mxu1 %vm7664_vm12, %v23424_v40 }
0x15c0   :  { %v20352_v37 = vpop.eup %20351  ;;  %19685 = vmatpush3.msk.msra.mxu0 %vm7664_vm12, %v23422_v31  ;;  %19686 = vmatprep.mubr.msk.f32.mxu0 %vm20498_vm1, %v24779_v16  ;;  %v12974_v34 = vmul.f32 %v20350_v7, %v23506_v18  ;;  %v24894_v31 = vld [vmem:[#allocation49_spill] sm:$0xff] }
0x15c1   :  { %v12950_v15 = vpop.xlane.xlu0 %12949  ;;  %19691 = vmatprep.mubr.msk.f32.mxu1 %vm20498_vm1, %v24779_v16  ;;  %19694 = vmatprep.subr.mxu0 %v24779_v16  ;;  %v12972_v25 = vmul.f32 %v20352_v37, %v23508_v61  ;;  %v24895_v61 = vld [vmem:[#allocation44_spill] sm:$0xff] }
0x15c2   :  { %20361 = vrcp.f32 %v12950_v15  ;;  %19699 = vmatprep.subr.mxu1 %v24779_v16  ;;  %18259 = vst.msk [vmem:[%s24729_s10 + $0xa0] sm:$0xf] %vm7465_vm13, %v12974_v34  ;;  %19692 = vmatmul.mubr.msk.f32.vlgmr.msra.gmra.mrb[162].mxu1 %vm7660_vm14, %v12974_v34 }
0x15c3   :  { %v20354_v40 = vpop.eup %20353  ;;  %18258 = vst.msk [vmem:[%s24729_s10 + $0x9c] sm:$0xf] %vm7465_vm13, %v12972_v25  ;;  %19687 = vmatmul.mubr.msk.f32.vlgmr.msra.gmra.mrb[164].mxu0 %vm7660_vm14, %v12972_v25  ;;  %19700 = vmatpush3.msk.msra.mxu1 %vm7664_vm12, %v24894_v31 }
0x15c4   :  { %v20356_v18 = vpop.eup %20355  ;;  %19695 = vmatpush3.msk.msra.mxu0 %vm7664_vm12, %v24895_v61  ;;  %19696 = vmatprep.mubr.msk.f32.mxu0 %vm20498_vm1, %v24779_v16  ;;  %v12978_v38 = vmul.f32 %v20354_v40, %v23514_v55  ;;  %v24896_v55 = vld [vmem:[#allocation48_spill] sm:$0xff] }
0x15c5   :  { %19701 = vmatprep.mubr.msk.f32.mxu1 %vm20498_vm1, %v24779_v16  ;;  %19704 = vmatprep.subr.mxu0 %v24779_v16  ;;  %v12976_v46 = vmul.f32 %v20356_v18, %v23516_v21  ;;  %v14707_v50 = vpop.permute.xlu0 %14706 }
0x15c6   :  { %19709 = vmatprep.subr.mxu1 %v24779_v16  ;;  %18261 = vst.msk [vmem:[%s24729_s10 + $0xa8] sm:$0xf] %vm7465_vm13, %v12978_v38  ;;  %19702 = vmatmul.mubr.msk.f32.vlgmr.msra.gmra.mrb[164].mxu1 %vm7660_vm14, %v12978_v38 }
0x15c7   :  { %v20358_v54 = vpop.eup %20357  ;;  %18260 = vst.msk [vmem:[%s24729_s10 + $0xa4] sm:$0xf] %vm7465_vm13, %v12976_v46  ;;  %19697 = vmatmul.mubr.msk.f32.vlgmr.msra.gmra.mrb[166].mxu0 %vm7660_vm14, %v12976_v46  ;;  %19710 = vmatpush3.msk.msra.mxu1 %vm7664_vm12, %v24896_v55 }
0x15c8   :  { %v20360_v21 = vpop.eup %20359  ;;  %19705 = vmatpush3.msk.msra.mxu0 %vm7664_vm12, %v24897_v13  ;;  %19706 = vmatprep.mubr.msk.f32.mxu0 %vm20498_vm1, %v24779_v16  ;;  %v12982_v39 = vmul.f32 %v20358_v54, %v23522_v48  ;;  %v24898_v48 = vld [vmem:[#allocation51_spill] sm:$0xff] }
0x15c9   :  { %19711 = vmatprep.mubr.msk.f32.mxu1 %vm20498_vm1, %v24779_v16  ;;  %19714 = vmatprep.subr.mxu0 %v24779_v16  ;;  %v12980_v14 = vmul.f32 %v20360_v21, %v23524_v9 }
0x15ca   :  { %19719 = vmatprep.subr.mxu1 %v24779_v16  ;;  %18263 = vst.msk [vmem:[%s24729_s10 + $0xb0] sm:$0xf] %vm7465_vm13, %v12982_v39  ;;  %19712 = vmatmul.mubr.msk.f32.vlgmr.msra.gmra.mrb[166].mxu1 %vm7660_vm14, %v12982_v39 }
0x15cb   :  { %18262 = vst.msk [vmem:[%s24729_s10 + $0xac] sm:$0xf] %vm7465_vm13, %v12980_v14  ;;  %19707 = vmatmul.mubr.msk.f32.vlgmr.msra.gmra.mrb[168].mxu0 %vm7660_vm14, %v12980_v14  ;;  %19720 = vmatpush3.msk.msra.mxu1 %vm7664_vm12, %v24898_v48 }
0x15cc   :  { %v20362_v9 = vpop.eup %20361  ;;  %19715 = vmatpush3.msk.msra.mxu0 %vm7664_vm12, %v24899_v45  ;;  %19716 = vmatprep.mubr.msk.f32.mxu0 %vm20498_vm1, %v24779_v16 }
0x15cd   :  { %19724 = vmatprep.subr.mxu0 %v24779_v16  ;;  %v12984_v4 = vmul.f32 %v20362_v9, %v23530_v56  ;;  %19721 = vmatprep.mubr.msk.f32.mxu1 %vm20498_vm1, %v24779_v16  ;;  %v14785_v56 = vpop.permute.xlu1 %14784 }
0x15ce   :  { %19729 = vmatprep.subr.mxu1 %v24779_v16 }
0x15cf   :  { %18264 = vst.msk [vmem:[%s24729_s10 + $0xb4] sm:$0xf] %vm7465_vm13, %v12984_v4  ;;  %19717 = vmatmul.mubr.msk.f32.vlgmr.msra.gmra.mrb[170].mxu0 %vm7660_vm14, %v12984_v4 }
0x15d0   :  { %19725 = vmatpush3.msk.msra.mxu0 %vm7664_vm12, %v24900_v30  ;;  %19726 = vmatprep.mubr.msk.f32.mxu0 %vm20498_vm1, %v24779_v16 }
0x15d1   :  { %19734 = vmatprep.subr.mxu0 %v24779_v16 }
0x15f1   :  { %v12953_v51 = vpop.xlane.xlu1 %12952 }
0x15f2   :  { %20363 = vrcp.f32 %v12953_v51 }
0x15f5   :  { %v14943_v19 = vpop.permute.xlu1 %14942 }
0x15f6   :  { %v12956_v43 = vpop.xlane.xlu0 %12955 }
0x15f7   :  { %20365 = vrcp.f32 %v12956_v43 }
0x15f9   :  { %v23758_v32 = vpop.permute.xlu1 %14940 }
0x15fa   :  { %v14865_v58 = vpop.permute.xlu0 %14864 }
0x15fc   :  { %v20364_v26 = vpop.eup %20363 }
0x15fd   :  { %v23760_v12 = vpop.permute.xlu1 %15098  ;;  %v12986_v29 = vmul.f32 %v20364_v26, %v23540_v41 }
0x15fe   :  { %v14863_v1 = vpop.permute.xlu0 %14862 }
0x15ff   :  { %18265 = vst.msk [vmem:[%s24729_s10 + $0xb8] sm:$0xf] %vm7465_vm13, %v12986_v29  ;;  %19722 = vmatmul.mubr.msk.f32.vlgmr.msra.gmra.mrb[168].mxu1 %vm7660_vm14, %v12986_v29 }
0x1600   :  { %19730 = vmatpush3.xpose.msk.msra.mxu1 %vm193_vm2, %v24901_v3  ;;  %19731 = vmatprep.mubr.msk.f32.mxu1 %vm20498_vm1, %v24779_v16 }
0x1601   :  { %v20366_v22 = vpop.eup %20365  ;;  %v15097_v2 = vpop.permute.xlu1 %15096  ;;  %19739 = vmatprep.subr.mxu1 %v24779_v16 }
0x1602   :  { %v15021_v57 = vpop.permute.xlu0 %15020  ;;  %v12988_v41 = vmul.f32 %v20366_v22, %v23544_v10 }
0x1603   :  { %19732 = vmatmul.mubr.msk.f32.vlgmr.msra.gmra.mrb[170].mxu1 %vm193_vm2, %v24902_v47 }
0x1604   :  { %18266 = vst.msk [vmem:[%s24729_s10 + $0xbc] sm:$0xf] %vm7465_vm13, %v12988_v41  ;;  %19727 = vmatmul.mubr.msk.f32.vlgmr.msra.gmra.mrb[172].mxu0 %vm7660_vm14, %v12988_v41  ;;  %19740 = vmatpush3.xpose.msk.msra.mxu1 %vm193_vm2, %v24903_v63 }
0x1605   :  { %19735 = vmatpush3.xpose.msk.msra.mxu0 %vm193_vm2, %v24904_v36  ;;  %19736 = vmatprep.mubr.msk.f32.mxu0 %vm20498_vm1, %v24779_v16  ;;  %v15255_v23 = vpop.permute.xlu1 %15254 }
0x1606   :  { %v15019_v10 = vpop.permute.xlu0 %15018  ;;  %19741 = vmatprep.mubr.msk.f32.mxu1 %vm20498_vm1, %v24779_v16  ;;  %19744 = vmatprep.subr.mxu0 %v24779_v16 }
0x1607   :  { %19749 = vmatprep.subr.mxu1 %v24779_v16  ;;  %19742 = vmatmul.mubr.msk.f32.vlgmr.msra.gmra.mrb[172].mxu1 %vm193_vm2, %v24905_v28 }
0x1608   :  { %19737 = vmatmul.mubr.msk.f32.vlgmr.msra.gmra.mrb[174].mxu0 %vm193_vm2, %v24906_v59  ;;  %19750 = vmatpush3.xpose.msk.msra.mxu1 %vm193_vm2, %v24907_v24 }
0x1609   :  { %19745 = vmatpush3.xpose.msk.msra.mxu0 %vm193_vm2, %v24908_v52  ;;  %19746 = vmatprep.mubr.msk.f32.mxu0 %vm20498_vm1, %v24779_v16  ;;  %v15253_v49 = vpop.permute.xlu1 %15252 }
0x160a   :  { %19751 = vmatprep.mubr.msk.f32.mxu1 %vm20498_vm1, %v24779_v16  ;;  %19754 = vmatprep.subr.mxu0 %v24779_v16  ;;  %v15177_v0 = vpop.permute.xlu0 %15176 }
0x160b   :  { %19759 = vmatprep.subr.mxu1 %v24779_v16  ;;  %19752 = vmatmul.mubr.msk.f32.vlgmr.msra.gmra.mrb[174].mxu1 %vm193_vm2, %v24909_v11 }
0x160c   :  { %19747 = vmatmul.mubr.msk.f32.vlgmr.msra.gmra.mrb[176].mxu0 %vm193_vm2, %v24910_v62  ;;  %19760 = vmatpush3.xpose.msk.msra.mxu1 %vm193_vm2, %v23594_v35 }
0x160d   :  { %19755 = vmatpush3.xpose.msk.msra.mxu0 %vm193_vm2, %v24911_v20  ;;  %19756 = vmatprep.mubr.msk.f32.mxu0 %vm20498_vm1, %v24779_v16  ;;  %v15411_v17 = vpop.permute.xlu1 %15410 }
0x160e   :  { %19761 = vmatprep.mubr.msk.f32.mxu1 %vm20498_vm1, %v24779_v16  ;;  %19764 = vmatprep.subr.mxu0 %v24779_v16  ;;  %v15175_v35 = vpop.permute.xlu0 %15174 }
0x160f   :  { %19769 = vmatprep.subr.mxu1 %v24779_v16  ;;  %19762 = vmatmul.mubr.msk.f32.vlgmr.msra.gmra.mrb[176].mxu1 %vm193_vm2, %v14707_v50 }
0x1610   :  { %19757 = vmatmul.mubr.msk.f32.vlgmr.msra.gmra.mrb[178].mxu0 %vm193_vm2, %v24912_v5  ;;  %19770 = vmatpush3.xpose.msk.msra.mxu1 %vm193_vm2, %v14865_v58 }
0x1611   :  { %19765 = vmatpush3.xpose.msk.msra.mxu0 %vm193_vm2, %v23586_v27  ;;  %19766 = vmatprep.mubr.msk.f32.mxu0 %vm20498_vm1, %v24779_v16  ;;  %v15409_v6 = vpop.permute.xlu1 %15408 }
0x1612   :  { %19771 = vmatprep.mubr.msk.f32.mxu1 %vm20498_vm1, %v24779_v16  ;;  %19774 = vmatprep.subr.mxu0 %v24779_v16  ;;  %v15333_v27 = vpop.permute.xlu0 %15332 }
0x1613   :  { %19779 = vmatprep.subr.mxu1 %v24779_v16  ;;  %19772 = vmatmul.mubr.msk.f32.vlgmr.msra.gmra.mrb[178].mxu1 %vm193_vm2, %v14863_v1 }
0x1614   :  { %19767 = vmatmul.mubr.msk.f32.vlgmr.msra.gmra.mrb[180].mxu0 %vm193_vm2, %v14785_v56  ;;  %19780 = vmatpush3.xpose.msk.msra.mxu1 %vm193_vm2, %v15021_v57 }
0x1615   :  { %19775 = vmatpush3.xpose.msk.msra.mxu0 %vm193_vm2, %v14943_v19  ;;  %19776 = vmatprep.mubr.msk.f32.mxu0 %vm20498_vm1, %v24779_v16  ;;  %v15680_v37 = vpop.permute.xlu1 %15679 }
0x1616   :  { %19781 = vmatprep.mubr.msk.f32.mxu1 %vm20498_vm1, %v24779_v16  ;;  %19784 = vmatprep.subr.mxu0 %v24779_v16  ;;  %v15331_v7 = vpop.permute.xlu0 %15330 }
0x1617   :  { %19789 = vmatprep.subr.mxu1 %v24779_v16  ;;  %19782 = vmatmul.mubr.msk.f32.vlgmr.msra.gmra.mrb[180].mxu1 %vm193_vm2, %v15019_v10 }
0x1618   :  { %19777 = vmatmul.mubr.msk.f32.vlgmr.msra.gmra.mrb[182].mxu0 %vm193_vm2, %v23758_v32  ;;  %19790 = vmatpush3.xpose.msk.msra.mxu1 %vm193_vm2, %v15177_v0 }
0x1619   :  { %19785 = vmatpush3.xpose.msk.msra.mxu0 %vm193_vm2, %v23760_v12  ;;  %19786 = vmatprep.mubr.msk.f32.mxu0 %vm20498_vm1, %v24779_v16 }
0x161a   :  { %19791 = vmatprep.mubr.msk.f32.mxu1 %vm20498_vm1, %v24779_v16  ;;  %19794 = vmatprep.subr.mxu0 %v24779_v16  ;;  %v15757_v34 = vpop.permute.xlu0 %15756 }
0x161b   :  { %19799 = vmatprep.subr.mxu1 %v24779_v16  ;;  %19792 = vmatmul.mubr.msk.f32.vlgmr.msra.gmra.mrb[182].mxu1 %vm193_vm2, %v15175_v35 }
0x161c   :  { %19787 = vmatmul.mubr.msk.f32.vlgmr.msra.gmra.mrb[184].mxu0 %vm193_vm2, %v15097_v2  ;;  %19800 = vmatpush3.xpose.msk.msra.mxu1 %vm193_vm2, %v15333_v27 }
0x161d   :  { %19795 = vmatpush3.xpose.msk.msra.mxu0 %vm193_vm2, %v15255_v23  ;;  %19796 = vmatprep.mubr.msk.f32.mxu0 %vm20498_vm1, %v24779_v16 }
0x161e   :  { %19801 = vmatprep.mubr.msk.f32.mxu1 %vm20498_vm1, %v24779_v16  ;;  %19804 = vmatprep.subr.mxu0 %v24779_v16 }
0x161f   :  { %19809 = vmatprep.subr.mxu1 %v24779_v16  ;;  %19802 = vmatmul.mubr.msk.f32.vlgmr.msra.gmra.mrb[184].mxu1 %vm193_vm2, %v15331_v7 }
0x1620   :  { %19797 = vmatmul.mubr.msk.f32.vlgmr.msra.gmra.mrb[186].mxu0 %vm193_vm2, %v15253_v49  ;;  %19810 = vmatpush3.msk.msra.mxu1 %vm7664_vm12, %v15680_v37 }
0x1621   :  { %19805 = vmatpush3.xpose.msk.msra.mxu0 %vm193_vm2, %v15411_v17  ;;  %19806 = vmatprep.mubr.msk.f32.mxu0 %vm20498_vm1, %v24779_v16 }
0x1622   :  { %19814 = vmatprep.subr.mxu0 %v24779_v16  ;;  %19811 = vmatprep.mubr.msk.f32.mxu1 %vm20498_vm1, %v24779_v16 }
0x1623   :  { %19819 = vmatprep.subr.mxu1 %v24779_v16 }
0x1624   :  { %19807 = vmatmul.mubr.msk.f32.vlgmr.msra.gmra.mrb[188].mxu0 %vm193_vm2, %v15409_v6 }
0x1625   :  { %19815 = vmatpush3.msk.msra.mxu0 %vm7664_vm12, %v15757_v34  ;;  %19816 = vmatprep.mubr.msk.f32.mxu0 %vm20498_vm1, %v24779_v16 }
0x1626   :  { %19824 = vmatprep.subr.mxu0 %v24779_v16 }
0x1684   :  { %v23878_v15 = vpop.f32.mrb[154].mxu1 }
0x1685   :  { %v19653_v25 = vpop.f32.mrb[155].mxu1 }
0x1688   :  { %v23880_v40 = vpop.f32.mrb[156].mxu1 }
0x1689   :  { %v23882_v31 = vpop.f32.mrb[158].mxu0  ;;  %v19663_v18 = vpop.f32.mrb[157].mxu1 }
0x168a   :  { %v19658_v61 = vpop.f32.mrb[159].mxu0 }
0x168d   :  { %v23884_v38 = vpop.f32.mrb[158].mxu1 }
0x168e   :  { %v23886_v46 = vpop.f32.mrb[160].mxu0  ;;  %v19673_v54 = vpop.f32.mrb[159].mxu1 }
0x168f   :  { %v19668_v55 = vpop.f32.mrb[161].mxu0 }
0x1691   :  { %v23888_v21 = vpop.f32.mrb[160].mxu1 }
0x1692   :  { %v23890_v13 = vpop.f32.mrb[162].mxu0  ;;  %v19683_v39 = vpop.f32.mrb[161].mxu1 }
0x1693   :  { %v19678_v14 = vpop.f32.mrb[163].mxu0 }
0x1695   :  { %v23892_v48 = vpop.f32.mrb[162].mxu1 }
0x1696   :  { %v23894_v9 = vpop.f32.mrb[164].mxu0  ;;  %v19693_v45 = vpop.f32.mrb[163].mxu1 }
0x1697   :  { %v19688_v4 = vpop.f32.mrb[165].mxu0 }
0x1699   :  { %v23896_v30 = vpop.f32.mrb[164].mxu1 }
0x169a   :  { %v23898_v56 = vpop.f32.mrb[166].mxu0  ;;  %v19703_v51 = vpop.f32.mrb[165].mxu1 }
0x169b   :  { %v19698_v50 = vpop.f32.mrb[167].mxu0 }
0x169d   :  { %v23900_v19 = vpop.f32.mrb[166].mxu1 }
0x169e   :  { %v23902_v43 = vpop.f32.mrb[168].mxu0  ;;  %v19713_v32 = vpop.f32.mrb[167].mxu1 }
0x169f   :  { %v19708_v58 = vpop.f32.mrb[169].mxu0 }
0x16a2   :  { %v23904_v26 = vpop.f32.mrb[170].mxu0 }
0x16a3   :  { %v19718_v12 = vpop.f32.mrb[171].mxu0 }
0x16d2   :  { %v23906_v29 = vpop.f32.mrb[168].mxu1 }
0x16d3   :  { %v19723_v1 = vpop.f32.mrb[169].mxu1 }
0x16d6   :  { %v23908_v3 = vpop.f32.mrb[170].mxu1 }
0x16d7   :  { %v23910_v22 = vpop.f32.mrb[172].mxu0  ;;  %v19733_v2 = vpop.f32.mrb[171].mxu1  ;;  %v15486_v57 = vsel %vm7465_vm13, %v23908_v3, -inf }
0x16d8   :  { %v19728_v41 = vpop.f32.mrb[173].mxu0  ;;  %15487 = vmax.xlane.f32.xlu0 %v15486_v57 }
0x16da   :  { %v23914_v47 = vpop.f32.mrb[172].mxu1 }
0x16db   :  { %v23916_v63 = vpop.f32.mrb[174].mxu0  ;;  %v19743_v36 = vpop.f32.mrb[173].mxu1  ;;  %v15492_v10 = vsel %vm7465_vm13, %v23914_v47, -inf }
0x16dc   :  { %v19738_v23 = vpop.f32.mrb[175].mxu0  ;;  %15493 = vmax.xlane.f32.xlu0 %v15492_v10  ;;  %v15489_v28 = vsel %vm7465_vm13, %v23916_v63, -inf }
0x16dd   :  { %15490 = vmax.xlane.f32.xlu1 %v15489_v28 }
0x16de   :  { %v23922_v59 = vpop.f32.mrb[174].mxu1 }
0x16df   :  { %v23924_v24 = vpop.f32.mrb[176].mxu0  ;;  %v19753_v52 = vpop.f32.mrb[175].mxu1  ;;  %v15498_v11 = vsel %vm7465_vm13, %v23922_v59, -inf }
0x16e0   :  { %v19748_v0 = vpop.f32.mrb[177].mxu0  ;;  %v15495_v62 = vsel %vm7465_vm13, %v23924_v24, -inf }
0x16e1   :  { %15499 = vmax.xlane.f32.xlu1 %v15498_v11  ;;  %15496 = vmax.xlane.f32.xlu0 %v15495_v62  ;;  %v23982_v11 = vpop.permute.xlu1 %15833  ;;  %v23986_v62 = vpop.permute.xlu0 %15910 }
0x16e2   :  { %v23930_v49 = vpop.f32.mrb[176].mxu1 }
0x16e3   :  { %v23932_v20 = vpop.f32.mrb[178].mxu0  ;;  %v19763_v5 = vpop.f32.mrb[177].mxu1  ;;  %v15504_v35 = vsel %vm7465_vm13, %v23930_v49, -inf }
0x16e4   :  { %v19758_v17 = vpop.f32.mrb[179].mxu0  ;;  %v15501_v27 = vsel %vm7465_vm13, %v23932_v20, -inf }
0x16e5   :  { %15505 = vmax.xlane.f32.xlu1 %v15504_v35  ;;  %15502 = vmax.xlane.f32.xlu0 %v15501_v27  ;;  %v23984_v0 = vpop.permute.xlu1 %15987  ;;  %v23990_v35 = vpop.permute.xlu0 %16141 }
0x16e6   :  { %v23938_v6 = vpop.f32.mrb[178].mxu1 }
0x16e7   :  { %v23940_v7 = vpop.f32.mrb[180].mxu0  ;;  %v19773_v37 = vpop.f32.mrb[179].mxu1  ;;  %v15510_v34 = vsel %vm7465_vm13, %v23938_v6, -inf }
0x16e8   :  { %v19768_v25 = vpop.f32.mrb[181].mxu0  ;;  %v15507_v18 = vsel %vm7465_vm13, %v23940_v7, -inf }
0x16e9   :  { %15511 = vmax.xlane.f32.xlu1 %v15510_v34  ;;  %15508 = vmax.xlane.f32.xlu0 %v15507_v18  ;;  %v23988_v5 = vpop.permute.xlu1 %16064  ;;  %v23994_v17 = vpop.permute.xlu0 %16295 }
0x16ea   :  { %v23946_v61 = vpop.f32.mrb[180].mxu1 }
0x16eb   :  { %v23948_v54 = vpop.f32.mrb[182].mxu0  ;;  %v19783_v55 = vpop.f32.mrb[181].mxu1  ;;  %v15516_v39 = vsel %vm7465_vm13, %v23946_v61, -inf }
0x16ec   :  { %v19778_v14 = vpop.f32.mrb[183].mxu0  ;;  %v15513_v45 = vsel %vm7465_vm13, %v23948_v54, -inf }
0x16ed   :  { %15517 = vmax.xlane.f32.xlu1 %v15516_v39  ;;  %15514 = vmax.xlane.f32.xlu0 %v15513_v45 }
0x16ee   :  { %v23954_v4 = vpop.f32.mrb[182].mxu1 }
0x16ef   :  { %v23956_v51 = vpop.f32.mrb[184].mxu0  ;;  %v19793_v50 = vpop.f32.mrb[183].mxu1  ;;  %v15522_v32 = vsel %vm7465_vm13, %v23954_v4, -inf }
0x16f0   :  { %v19788_v58 = vpop.f32.mrb[185].mxu0  ;;  %v15519_v12 = vsel %vm7465_vm13, %v23956_v51, -inf }
0x16f1   :  { %15523 = vmax.xlane.f32.xlu1 %v15522_v32  ;;  %15520 = vmax.xlane.f32.xlu0 %v15519_v12 }
0x16f2   :  { %v23962_v1 = vpop.f32.mrb[184].mxu1 }
0x16f3   :  { %v23964_v2 = vpop.f32.mrb[186].mxu0  ;;  %v19803_v57 = vpop.f32.mrb[185].mxu1  ;;  %v15528_v41 = vsel %vm7465_vm13, %v23962_v1, -inf }
0x16f4   :  { %v19798_v36 = vpop.f32.mrb[187].mxu0  ;;  %v15525_v10 = vsel %vm7465_vm13, %v23964_v2, -inf }
0x16f5   :  { %15529 = vmax.xlane.f32.xlu1 %v15528_v41  ;;  %15526 = vmax.xlane.f32.xlu0 %v15525_v10 }
0x16f7   :  { %v23970_v23 = vpop.f32.mrb[188].mxu0 }
0x16f8   :  { %v19808_v28 = vpop.f32.mrb[189].mxu0  ;;  %v15531_v52 = vsel %vm7465_vm13, %v23970_v23, -inf }
0x16f9   :  { %15532 = vmax.xlane.f32.xlu0 %v15531_v52 }
0x1706   :  { %16526 = vrot.lane.b32.xlu1 %v21896_v33, %s24893_s1  ;;  %v23992_v33 = vpop.permute.xlu1 %16218 }
0x170a   :  { %16680 = vrot.lane.b32.xlu1 %v21904_v44, %s24893_s1  ;;  %v23996_v27 = vpop.permute.xlu1 %16372 }
0x170f   :  { %16449 = vrot.lane.b32.xlu0 %v21878_v53, %s24893_s1 }
0x1713   :  { %16603 = vrot.lane.b32.xlu0 %v21888_v8, %s24893_s1 }
0x1765   :  { %v15488_v44 = vpop.xlane.xlu0 %15487 }
0x1766   :  { %v15534_v53 = vsub.f32 %v23908_v3, %v15488_v44 }
0x1768   :  { %v15550_v8 = vmul.f32 1.442695, %v15534_v53 }
0x1769   :  { %v15494_v37 = vpop.xlane.xlu0 %15493 }
0x176a   :  { %20367 = vpow2.f32 %v15550_v8  ;;  %v15536_v34 = vsub.f32 %v23914_v47, %v15494_v37  ;;  %v15491_v25 = vpop.xlane.xlu1 %15490 }
0x176b   :  { %v15535_v18 = vsub.f32 %v23916_v63, %v15491_v25 }
0x176c   :  { %v15554_v55 = vmul.f32 1.442695, %v15536_v34 }
0x176d   :  { %v15552_v39 = vmul.f32 1.442695, %v15535_v18 }
0x176e   :  { %20369 = vpow2.f32 %v15554_v55  ;;  %v15500_v14 = vpop.xlane.xlu1 %15499  ;;  %v15497_v45 = vpop.xlane.xlu0 %15496 }
0x176f   :  { %20371 = vpow2.f32 %v15552_v39  ;;  %v15538_v50 = vsub.f32 %v23922_v59, %v15500_v14  ;;  %v15537_v32 = vsub.f32 %v23924_v24, %v15497_v45 }
0x1771   :  { %v15558_v58 = vmul.f32 1.442695, %v15538_v50  ;;  %v15556_v3 = vmul.f32 1.442695, %v15537_v32 }
0x1772   :  { %v15506_v12 = vpop.xlane.xlu1 %15505  ;;  %v15503_v57 = vpop.xlane.xlu0 %15502 }
0x1773   :  { %20373 = vpow2.f32 %v15558_v58  ;;  %v15540_v47 = vsub.f32 %v23930_v49, %v15506_v12  ;;  %v15539_v41 = vsub.f32 %v23932_v20, %v15503_v57 }
0x1774   :  { %v24005_v63 = vpop.eup %20367  ;;  %20375 = vpow2.f32 %v15556_v3 }
0x1775   :  { %v15562_v36 = vmul.f32 1.442695, %v15540_v47  ;;  %v15560_v10 = vmul.f32 1.442695, %v15539_v41  ;;  %v15582_v28 = vsel %vm7465_vm13, %v24005_v63, 0.0 }
0x1776   :  { %v15512_v59 = vpop.xlane.xlu1 %15511  ;;  %v15509_v52 = vpop.xlane.xlu0 %15508  ;;  %15583 = vadd.xlane.f32.xlu1 %v15582_v28 }
0x1777   :  { %20377 = vpow2.f32 %v15562_v36  ;;  %v15542_v24 = vsub.f32 %v23938_v6, %v15512_v59  ;;  %v15541_v44 = vsub.f32 %v23940_v7, %v15509_v52 }
0x1778   :  { %v24011_v53 = vpop.eup %20369  ;;  %20379 = vpow2.f32 %v15560_v10 }
0x1779   :  { %v24013_v49 = vpop.eup %20371  ;;  %v15566_v20 = vmul.f32 1.442695, %v15542_v24  ;;  %v15564_v8 = vmul.f32 1.442695, %v15541_v44  ;;  %v15588_v37 = vsel %vm7465_vm13, %v24011_v53, 0.0 }
0x177a   :  { %v15518_v34 = vpop.xlane.xlu1 %15517  ;;  %v15515_v25 = vpop.xlane.xlu0 %15514  ;;  %15589 = vadd.xlane.f32.xlu1 %v15588_v37  ;;  %v15585_v18 = vsel %vm7465_vm13, %v24013_v49, 0.0 }
0x177b   :  { %20381 = vpow2.f32 %v15566_v20  ;;  %v15544_v6 = vsub.f32 %v23946_v61, %v15518_v34  ;;  %v15543_v7 = vsub.f32 %v23948_v54, %v15515_v25  ;;  %15586 = vadd.xlane.f32.xlu0 %v15585_v18 }
0x177c   :  { %20383 = vpow2.f32 %v15564_v8 }
0x177d   :  { %v24021_v55 = vpop.eup %20373  ;;  %v15570_v39 = vmul.f32 1.442695, %v15544_v6  ;;  %v15568_v14 = vmul.f32 1.442695, %v15543_v7 }
0x177e   :  { %v24023_v45 = vpop.eup %20375  ;;  %v15524_v50 = vpop.xlane.xlu1 %15523  ;;  %v15594_v58 = vsel %vm7465_vm13, %v24021_v55, 0.0 }
0x177f   :  { %v15521_v32 = vpop.xlane.xlu0 %15520  ;;  %20385 = vpow2.f32 %v15570_v39  ;;  %v15546_v3 = vsub.f32 %v23954_v4, %v15524_v50  ;;  %15595 = vadd.xlane.f32.xlu1 %v15594_v58  ;;  %v15591_v54 = vsel %vm7465_vm13, %v24023_v45, 0.0 }
0x1780   :  { %v15545_v61 = vsub.f32 %v23956_v51, %v15521_v32  ;;  %20387 = vpow2.f32 %v15568_v14  ;;  %15592 = vadd.xlane.f32.xlu0 %v15591_v54 }
0x1781   :  { %v24031_v12 = vpop.eup %20377  ;;  %v15574_v57 = vmul.f32 1.442695, %v15546_v3 }
0x1782   :  { %v15572_v47 = vmul.f32 1.442695, %v15545_v61  ;;  %v24033_v41 = vpop.eup %20379  ;;  %v15530_v36 = vpop.xlane.xlu1 %15529  ;;  %v15600_v28 = vsel %vm7465_vm13, %v24031_v12, 0.0 }
0x1783   :  { %v15527_v10 = vpop.xlane.xlu0 %15526  ;;  %20389 = vpow2.f32 %v15574_v57  ;;  %v15548_v4 = vsub.f32 %v23962_v1, %v15530_v36  ;;  %15601 = vadd.xlane.f32.xlu1 %v15600_v28  ;;  %v15597_v59 = vsel %vm7465_vm13, %v24033_v41, 0.0  ;;  %v24914_v36 = vld [vmem:[#allocation35_spill] sm:$0xff]  ;;  %v24917_v28 = vld [vmem:[#allocation37_spill] sm:$0xff] }
0x1784   :  { %v15547_v51 = vsub.f32 %v23964_v2, %v15527_v10  ;;  %20391 = vpow2.f32 %v15572_v47  ;;  %15598 = vadd.xlane.f32.xlu0 %v15597_v59  ;;  %v24913_v47 = vld [vmem:[#allocation32_spill] sm:$0xff]  ;;  %v24915_v10 = vld [vmem:[#allocation31_spill] sm:$0xff] }
0x1785   :  { %v24041_v52 = vpop.eup %20381  ;;  %v15578_v24 = vmul.f32 1.442695, %v15548_v4 }
0x1786   :  { %v15576_v44 = vmul.f32 1.442695, %v15547_v51  ;;  %v24043_v20 = vpop.eup %20383  ;;  %v15606_v37 = vsel %vm7465_vm13, %v24041_v52, 0.0 }
0x1787   :  { %v15533_v8 = vpop.xlane.xlu0 %15532  ;;  %20393 = vpow2.f32 %v15578_v24  ;;  %15607 = vadd.xlane.f32.xlu1 %v15606_v37  ;;  %v15603_v2 = vsel %vm7465_vm13, %v24043_v20, 0.0 }
0x1788   :  { %v15549_v1 = vsub.f32 %v23970_v23, %v15533_v8  ;;  %20395 = vpow2.f32 %v15576_v44  ;;  %15604 = vadd.xlane.f32.xlu0 %v15603_v2 }
0x1789   :  { %v24050_v34 = vpop.eup %20385 }
0x178a   :  { %v15580_v25 = vmul.f32 1.442695, %v15549_v1  ;;  %v24052_v18 = vpop.eup %20387  ;;  %v15612_v6 = vsel %vm7465_vm13, %v24050_v34, 0.0 }
0x178b   :  { %15613 = vadd.xlane.f32.xlu1 %v15612_v6  ;;  %v15609_v7 = vsel %vm7465_vm13, %v24052_v18, 0.0 }
0x178c   :  { %20397 = vpow2.f32 %v15580_v25  ;;  %15610 = vadd.xlane.f32.xlu0 %v15609_v7 }
0x178d   :  { %v24058_v23 = vpop.eup %20389 }
0x178e   :  { %v24060_v39 = vpop.eup %20391  ;;  %v15618_v14 = vsel %vm7465_vm13, %v24058_v23, 0.0 }
0x178f   :  { %15619 = vadd.xlane.f32.xlu1 %v15618_v14  ;;  %v15615_v50 = vsel %vm7465_vm13, %v24060_v39, 0.0 }
0x1790   :  { %15616 = vadd.xlane.f32.xlu0 %v15615_v50 }
0x1791   :  { %v24066_v32 = vpop.eup %20393 }
0x1792   :  { %v24068_v58 = vpop.eup %20395  ;;  %v15624_v3 = vsel %vm7465_vm13, %v24066_v32, 0.0 }
0x1793   :  { %15625 = vadd.xlane.f32.xlu1 %v15624_v3  ;;  %v15621_v61 = vsel %vm7465_vm13, %v24068_v58, 0.0 }
0x1794   :  { %15622 = vadd.xlane.f32.xlu0 %v15621_v61 }
0x1796   :  { %v24074_v54 = vpop.eup %20397 }
0x1797   :  { %v15627_v57 = vsel %vm7465_vm13, %v24074_v54, 0.0 }
0x1798   :  { %15628 = vadd.xlane.f32.xlu0 %v15627_v57 }
0x17a4   :  { %16834 = vrot.lane.b32.xlu1 %v21912_v42, %s24893_s1  ;;  %v24916_v42 = vld [vmem:[#allocation15_spill] sm:$0xff] }
0x17a8   :  { %16929 = vrot.lane.b32.xlu1 %v24913_v47, %s20510_s30 }
0x17ac   :  { %16933 = vrot.lane.b32.xlu1 %v24914_v36, %s20510_s30 }
0x17ae   :  { %16757 = vrot.lane.b32.xlu0 %v21886_v60, %s24893_s1  ;;  %v24918_v60 = vld [vmem:[#allocation39_spill] sm:$0xff] }
0x17b0   :  { %16993 = vrot.lane.b32.xlu1 %v23882_v31, %s20511_s11  ;;  %v24919_v31 = vld [vmem:[#allocation16_spill] sm:$0xff] }
0x17b2   :  { %16927 = vrot.lane.b32.xlu0 %v24915_v10, %s20510_s30 }
0x17b4   :  { %16997 = vrot.lane.b32.xlu1 %v23886_v46, %s20511_s11  ;;  %v24920_v46 = vld [vmem:[#allocation34_spill] sm:$0xff] }
0x17b6   :  { %16931 = vrot.lane.b32.xlu0 %v24916_v42, %s20510_s30 }
0x17b8   :  { %16937 = vrot.lane.b32.xlu1 %v24917_v28, %s20510_s30 }
0x17ba   :  { %16991 = vrot.lane.b32.xlu0 %v23878_v15, %s20511_s11  ;;  %v24921_v15 = vld [vmem:[#allocation41_spill] sm:$0xff] }
0x17bc   :  { %16941 = vrot.lane.b32.xlu1 %v24918_v60, %s20510_s30 }
0x17be   :  { %16995 = vrot.lane.b32.xlu0 %v23880_v40, %s20511_s11  ;;  %v24922_v40 = vld [vmem:[#allocation42_spill] sm:$0xff] }
0x17c0   :  { %17001 = vrot.lane.b32.xlu1 %v23890_v13, %s20511_s11  ;;  %v24923_v13 = vld [vmem:[#allocation36_spill] sm:$0xff] }
0x17c2   :  { %16935 = vrot.lane.b32.xlu0 %v24919_v31, %s20510_s30 }
0x17c4   :  { %17005 = vrot.lane.b32.xlu1 %v23894_v9, %s20511_s11  ;;  %v24924_v9 = vld [vmem:[#allocation38_spill] sm:$0xff] }
0x17c6   :  { %16939 = vrot.lane.b32.xlu0 %v24920_v46, %s20510_s30 }
0x17c8   :  { %16945 = vrot.lane.b32.xlu1 %v24921_v15, %s20510_s30  ;;  %v18379_v15 = vld [vmem:[%s24722_s3 + $0x20] sm:$0xff] }
0x17ca   :  { %16999 = vrot.lane.b32.xlu0 %v23884_v38, %s20511_s11  ;;  %v24925_v38 = vld [vmem:[#allocation45_spill] sm:$0xff] }
0x17cc   :  { %16949 = vrot.lane.b32.xlu1 %v24922_v40, %s20510_s30  ;;  %v18380_v40 = vld [vmem:[%s24722_s3 + $0x28] sm:$0xff] }
0x17ce   :  { %17003 = vrot.lane.b32.xlu0 %v23888_v21, %s20511_s11  ;;  %v24926_v21 = vld [vmem:[#allocation47_spill] sm:$0xff] }
0x17d0   :  { %17009 = vrot.lane.b32.xlu1 %v23898_v56, %s20511_s11  ;;  %v24927_v56 = vld [vmem:[#allocation40_spill] sm:$0xff] }
0x17d2   :  { %16943 = vrot.lane.b32.xlu0 %v24923_v13, %s20510_s30  ;;  %v19981_v13 = vpack.c.bf16 %v18380_v40, %v18379_v15 }
0x17d4   :  { %17013 = vrot.lane.b32.xlu1 %v23902_v43, %s20511_s11  ;;  %v24928_v43 = vld [vmem:[#allocation43_spill] sm:$0xff] }
0x17d6   :  { %16947 = vrot.lane.b32.xlu0 %v24924_v9, %s20510_s30 }
0x17d8   :  { %16953 = vrot.lane.b32.xlu1 %v24925_v38, %s20510_s30 }
0x17da   :  { %17007 = vrot.lane.b32.xlu0 %v23892_v48, %s20511_s11  ;;  %v24146_v48 = vpop.permute.xlu1 %16526 }
0x17dc   :  { %16957 = vrot.lane.b32.xlu1 %v24926_v21, %s20510_s30 }
0x17de   :  { %17011 = vrot.lane.b32.xlu0 %v23896_v30, %s20511_s11  ;;  %v24148_v30 = vpop.permute.xlu0 %16449 }
0x17e0   :  { %17017 = vrot.lane.b32.xlu1 %v23904_v26, %s20511_s11  ;;  %v24150_v26 = vpop.permute.xlu1 %16680 }
0x17e2   :  { %16951 = vrot.lane.b32.xlu0 %v24927_v56, %s20510_s30  ;;  %v24152_v51 = vpop.permute.xlu0 %16603 }
0x17e4   :  { %17021 = vrot.lane.b32.xlu1 %v23910_v22, %s20511_s11 }
0x17e6   :  { %16955 = vrot.lane.b32.xlu0 %v24928_v43, %s20510_s30 }
0x17ea   :  { %17015 = vrot.lane.b32.xlu0 %v23900_v19, %s20511_s11 }
0x17ee   :  { %17019 = vrot.lane.b32.xlu0 %v23906_v29, %s20511_s11 }
0x1803   :  { %v15584_v4 = vpop.xlane.xlu1 %15583 }
0x1804   :  { %20399 = vrcp.f32 %v15584_v4 }
0x1807   :  { %v15590_v22 = vpop.xlane.xlu1 %15589 }
0x1808   :  { %20401 = vrcp.f32 %v15590_v22  ;;  %v15587_v59 = vpop.xlane.xlu0 %15586 }
0x1809   :  { %20403 = vrcp.f32 %v15587_v59 }
0x180c   :  { %v15596_v24 = vpop.xlane.xlu1 %15595 }
0x180d   :  { %20405 = vrcp.f32 %v15596_v24  ;;  %v15593_v19 = vpop.xlane.xlu0 %15592 }
0x180e   :  { %v20400_v44 = vpop.eup %20399  ;;  %20407 = vrcp.f32 %v15593_v19 }
0x180f   :  { %v15631_v29 = vmul.f32 %v20400_v44, %v24005_v63 }
0x1810   :  { %v15602_v8 = vpop.xlane.xlu1 %15601 }
0x1811   :  { %18331 = vst.msk [vmem:[%s24729_s10 + $0xc0] sm:$0xf] %vm7465_vm13, %v15631_v29  ;;  %20409 = vrcp.f32 %v15602_v8  ;;  %v15599_v37 = vpop.xlane.xlu0 %15598  ;;  %19812 = vmatmul.mubr.msk.f32.vlgmr.msra.gmra.mrb[186].mxu1 %vm7660_vm14, %v15631_v29 }
0x1812   :  { %v20402_v1 = vpop.eup %20401  ;;  %20411 = vrcp.f32 %v15599_v37  ;;  %19820 = vmatpush3.msk.msra.mxu1 %vm7664_vm12, %v23982_v11  ;;  %19821 = vmatprep.mubr.msk.f32.mxu1 %vm20498_vm1, %v24779_v16 }
0x1813   :  { %v20404_v2 = vpop.eup %20403  ;;  %v15635_v63 = vmul.f32 %v20402_v1, %v24011_v53  ;;  %19829 = vmatprep.subr.mxu1 %v24779_v16 }
0x1814   :  { %v15608_v25 = vpop.xlane.xlu1 %15607  ;;  %v15633_v6 = vmul.f32 %v20404_v2, %v24013_v49 }
0x1815   :  { %18333 = vst.msk [vmem:[%s24729_s10 + $0xc8] sm:$0xf] %vm7465_vm13, %v15635_v63  ;;  %20413 = vrcp.f32 %v15608_v25  ;;  %v15605_v7 = vpop.xlane.xlu0 %15604  ;;  %19822 = vmatmul.mubr.msk.f32.vlgmr.msra.gmra.mrb[188].mxu1 %vm7660_vm14, %v15635_v63 }
0x1816   :  { %20415 = vrcp.f32 %v15605_v7  ;;  %18332 = vst.msk [vmem:[%s24729_s10 + $0xc4] sm:$0xf] %vm7465_vm13, %v15633_v6  ;;  %19817 = vmatmul.mubr.msk.f32.vlgmr.msra.gmra.mrb[190].mxu0 %vm7660_vm14, %v15633_v6  ;;  %19830 = vmatpush3.msk.msra.mxu1 %vm7664_vm12, %v23984_v0 }
0x1817   :  { %v20406_v11 = vpop.eup %20405  ;;  %19825 = vmatpush3.msk.msra.mxu0 %vm7664_vm12, %v23986_v62  ;;  %19826 = vmatprep.mubr.msk.f32.mxu0 %vm20498_vm1, %v24779_v16 }
0x1818   :  { %v20408_v53 = vpop.eup %20407  ;;  %v15639_v49 = vmul.f32 %v20406_v11, %v24021_v55  ;;  %v15614_v14 = vpop.xlane.xlu1 %15613  ;;  %19831 = vmatprep.mubr.msk.f32.mxu1 %vm20498_vm1, %v24779_v16  ;;  %19834 = vmatprep.subr.mxu0 %v24779_v16 }
0x1819   :  { %v15637_v50 = vmul.f32 %v20408_v53, %v24023_v45  ;;  %20417 = vrcp.f32 %v15614_v14  ;;  %v15611_v0 = vpop.xlane.xlu0 %15610  ;;  %19839 = vmatprep.subr.mxu1 %v24779_v16 }
0x181a   :  { %18335 = vst.msk [vmem:[%s24729_s10 + $0xd0] sm:$0xf] %vm7465_vm13, %v15639_v49  ;;  %20419 = vrcp.f32 %v15611_v0  ;;  %19832 = vmatmul.mubr.msk.f32.vlgmr.msra.gmra.mrb[190].mxu1 %vm7660_vm14, %v15639_v49 }
0x181b   :  { %v20410_v62 = vpop.eup %20409  ;;  %18334 = vst.msk [vmem:[%s24729_s10 + $0xcc] sm:$0xf] %vm7465_vm13, %v15637_v50  ;;  %19827 = vmatmul.mubr.msk.f32.vlgmr.msra.gmra.mrb[192].mxu0 %vm7660_vm14, %v15637_v50  ;;  %19840 = vmatpush3.msk.msra.mxu1 %vm7664_vm12, %v23990_v35 }
0x181c   :  { %v20412_v55 = vpop.eup %20411  ;;  %v15643_v45 = vmul.f32 %v20410_v62, %v24031_v12  ;;  %19835 = vmatpush3.msk.msra.mxu0 %vm7664_vm12, %v23988_v5  ;;  %v15620_v3 = vpop.xlane.xlu1 %15619  ;;  %19836 = vmatprep.mubr.msk.f32.mxu0 %vm20498_vm1, %v24779_v16 }
0x181d   :  { %v15641_v61 = vmul.f32 %v20412_v55, %v24033_v41  ;;  %20421 = vrcp.f32 %v15620_v3  ;;  %v15617_v57 = vpop.xlane.xlu0 %15616  ;;  %19841 = vmatprep.mubr.msk.f32.mxu1 %vm20498_vm1, %v24779_v16  ;;  %19844 = vmatprep.subr.mxu0 %v24779_v16 }
0x181e   :  { %18337 = vst.msk [vmem:[%s24729_s10 + $0xd8] sm:$0xf] %vm7465_vm13, %v15643_v45  ;;  %20423 = vrcp.f32 %v15617_v57  ;;  %19849 = vmatprep.subr.mxu1 %v24779_v16  ;;  %19842 = vmatmul.mubr.msk.f32.vlgmr.msra.gmra.mrb[192].mxu1 %vm7660_vm14, %v15643_v45 }
0x181f   :  { %v20414_v5 = vpop.eup %20413  ;;  %18336 = vst.msk [vmem:[%s24729_s10 + $0xd4] sm:$0xf] %vm7465_vm13, %v15641_v61  ;;  %19837 = vmatmul.mubr.msk.f32.vlgmr.msra.gmra.mrb[194].mxu0 %vm7660_vm14, %v15641_v61  ;;  %19850 = vmatpush3.msk.msra.mxu1 %vm7664_vm12, %v23994_v17 }
0x1820   :  { %v20416_v35 = vpop.eup %20415  ;;  %v15647_v12 = vmul.f32 %v20414_v5, %v24041_v52  ;;  %19845 = vmatpush3.msk.msra.mxu0 %vm7664_vm12, %v23992_v33  ;;  %v15626_v41 = vpop.xlane.xlu1 %15625  ;;  %19846 = vmatprep.mubr.msk.f32.mxu0 %vm20498_vm1, %v24779_v16 }
0x1821   :  { %v15645_v47 = vmul.f32 %v20416_v35, %v24043_v20  ;;  %20425 = vrcp.f32 %v15626_v41  ;;  %v15623_v36 = vpop.xlane.xlu0 %15622  ;;  %19851 = vmatprep.mubr.msk.f32.mxu1 %vm20498_vm1, %v24779_v16  ;;  %19854 = vmatprep.subr.mxu0 %v24779_v16 }
0x1822   :  { %18339 = vst.msk [vmem:[%s24729_s10 + $0xe0] sm:$0xf] %vm7465_vm13, %v15647_v12  ;;  %20427 = vrcp.f32 %v15623_v36  ;;  %19859 = vmatprep.subr.mxu1 %v24779_v16  ;;  %19852 = vmatmul.mubr.msk.f32.vlgmr.msra.gmra.mrb[194].mxu1 %vm7660_vm14, %v15647_v12 }
0x1823   :  { %v20418_v33 = vpop.eup %20417  ;;  %18338 = vst.msk [vmem:[%s24729_s10 + $0xdc] sm:$0xf] %vm7465_vm13, %v15645_v47  ;;  %19847 = vmatmul.mubr.msk.f32.vlgmr.msra.gmra.mrb[196].mxu0 %vm7660_vm14, %v15645_v47  ;;  %19860 = vmatpush3.msk.msra.mxu1 %vm7664_vm12, %v24148_v30 }
0x1824   :  { %v20420_v17 = vpop.eup %20419  ;;  %v15651_v52 = vmul.f32 %v20418_v33, %v24050_v34  ;;  %19855 = vmatpush3.msk.msra.mxu0 %vm7664_vm12, %v23996_v27  ;;  %19856 = vmatprep.mubr.msk.f32.mxu0 %vm20498_vm1, %v24779_v16 }
0x1825   :  { %v15649_v20 = vmul.f32 %v20420_v17, %v24052_v18  ;;  %v15629_v10 = vpop.xlane.xlu0 %15628  ;;  %19861 = vmatprep.mubr.msk.f32.mxu1 %vm20498_vm1, %v24779_v16  ;;  %19864 = vmatprep.subr.mxu0 %v24779_v16 }
0x1826   :  { %18341 = vst.msk [vmem:[%s24729_s10 + $0xe8] sm:$0xf] %vm7465_vm13, %v15651_v52  ;;  %20429 = vrcp.f32 %v15629_v10  ;;  %19869 = vmatprep.subr.mxu1 %v24779_v16  ;;  %19862 = vmatmul.mubr.msk.f32.vlgmr.msra.gmra.mrb[196].mxu1 %vm7660_vm14, %v15651_v52 }
0x1827   :  { %v20422_v27 = vpop.eup %20421  ;;  %18340 = vst.msk [vmem:[%s24729_s10 + $0xe4] sm:$0xf] %vm7465_vm13, %v15649_v20  ;;  %19857 = vmatmul.mubr.msk.f32.vlgmr.msra.gmra.mrb[198].mxu0 %vm7660_vm14, %v15649_v20  ;;  %19870 = vmatpush3.msk.msra.mxu1 %vm7664_vm12, %v24152_v51 }
0x1828   :  { %v20424_v34 = vpop.eup %20423  ;;  %v15655_v18 = vmul.f32 %v20422_v27, %v24058_v23  ;;  %19865 = vmatpush3.msk.msra.mxu0 %vm7664_vm12, %v24146_v48  ;;  %19866 = vmatprep.mubr.msk.f32.mxu0 %vm20498_vm1, %v24779_v16 }
0x1829   :  { %v15653_v42 = vmul.f32 %v20424_v34, %v24060_v39  ;;  %v16758_v28 = vpop.permute.xlu0 %16757  ;;  %19871 = vmatprep.mubr.msk.f32.mxu1 %vm20498_vm1, %v24779_v16  ;;  %19874 = vmatprep.subr.mxu0 %v24779_v16 }
0x182a   :  { %18343 = vst.msk [vmem:[%s24729_s10 + $0xf0] sm:$0xf] %vm7465_vm13, %v15655_v18  ;;  %19879 = vmatprep.subr.mxu1 %v24779_v16  ;;  %19872 = vmatmul.mubr.msk.f32.vlgmr.msra.gmra.mrb[198].mxu1 %vm7660_vm14, %v15655_v18 }
0x182b   :  { %v20426_v23 = vpop.eup %20425  ;;  %18342 = vst.msk [vmem:[%s24729_s10 + $0xec] sm:$0xf] %vm7465_vm13, %v15653_v42  ;;  %19867 = vmatmul.mubr.msk.f32.vlgmr.msra.gmra.mrb[200].mxu0 %vm7660_vm14, %v15653_v42  ;;  %19880 = vmatpush3.msk.msra.mxu1 %vm7664_vm12, %v16758_v28 }
0x182c   :  { %v20428_v39 = vpop.eup %20427  ;;  %v15659_v60 = vmul.f32 %v20426_v23, %v24066_v32  ;;  %19875 = vmatpush3.msk.msra.mxu0 %vm7664_vm12, %v24150_v26  ;;  %19876 = vmatprep.mubr.msk.f32.mxu0 %vm20498_vm1, %v24779_v16  ;;  %v16835_v32 = vpop.permute.xlu1 %16834 }
0x182d   :  { %v15657_v31 = vmul.f32 %v20428_v39, %v24068_v58  ;;  %19881 = vmatprep.mubr.msk.f32.mxu1 %vm20498_vm1, %v24779_v16  ;;  %19884 = vmatprep.subr.mxu0 %v24779_v16  ;;  %v16928_v2 = vpop.permute.xlu0 %16927 }
0x182e   :  { %18345 = vst.msk [vmem:[%s24729_s10 + $0xf8] sm:$0xf] %vm7465_vm13, %v15659_v60  ;;  %19882 = vmatmul.mubr.msk.f32.vlgmr.msra.gmra.mrb[200].mxu1 %vm7660_vm14, %v15659_v60  ;;  %19982 = vmatprep.subr.bf16.mxu1 %v19981_v13 }
0x182f   :  { %18344 = vst.msk [vmem:[%s24729_s10 + $0xf4] sm:$0xf] %vm7465_vm13, %v15657_v31  ;;  %19877 = vmatmul.mubr.msk.f32.vlgmr.msra.gmra.mrb[202].mxu0 %vm7660_vm14, %v15657_v31  ;;  %19984 = vmatpush3.bf16.msra.mxu1 %v19981_v13 }
0x1830   :  { %v20430_v58 = vpop.eup %20429  ;;  %19885 = vmatpush3.msk.msra.mxu0 %vm7664_vm12, %v16835_v32  ;;  %19886 = vmatprep.mubr.msk.f32.mxu0 %vm20498_vm1, %v24779_v16  ;;  %v18381_v16 = vld [vmem:[%s24722_s3 + $0x30] sm:$0xff]  ;;  %v16930_v11 = vpop.permute.xlu1 %16929 }
0x1831   :  { %v15661_v46 = vmul.f32 %v20430_v58, %v24074_v54  ;;  %v18382_v54 = vld [vmem:[%s24722_s3 + $0x38] sm:$0xff]  ;;  %v16932_v50 = vpop.permute.xlu0 %16931 }
0x1832   :  { %v19985_v9 = vpack.c.bf16 %v18382_v54, %v18381_v16 }
0x1833   :  { %18346 = vst.msk [vmem:[%s24729_s10 + $0xfc] sm:$0xf] %vm7465_vm13, %v15661_v46  ;;  %19887 = vmatmul.mubr.msk.f32.vlgmr.msra.gmra.mrb[204].mxu0 %vm7660_vm14, %v15661_v46 }
0x1834   :  { %19986 = vmatprep.subr.bf16.mxu1 %v19985_v9  ;;  %v16934_v61 = vpop.permute.xlu1 %16933 }
0x1835   :  { %19988 = vmatpush3.bf16.msra.mxu1 %v19985_v9  ;;  %v16992_v57 = vpop.permute.xlu0 %16991 }
0x1838   :  { %v16994_v12 = vpop.permute.xlu1 %16993 }
0x1839   :  { %v16996_v41 = vpop.permute.xlu0 %16995 }
0x183c   :  { %v16998_v47 = vpop.permute.xlu1 %16997 }
0x183d   :  { %v16936_v36 = vpop.permute.xlu0 %16935 }
0x1840   :  { %v16938_v33 = vpop.permute.xlu1 %16937 }
0x1841   :  { %v16940_v17 = vpop.permute.xlu0 %16939 }
0x1844   :  { %v16942_v52 = vpop.permute.xlu1 %16941 }
0x1845   :  { %v17000_v20 = vpop.permute.xlu0 %16999 }
0x1848   :  { %v17002_v10 = vpop.permute.xlu1 %17001 }
0x1849   :  { %v17004_v27 = vpop.permute.xlu0 %17003 }
0x184c   :  { %v17006_v34 = vpop.permute.xlu1 %17005 }
0x184d   :  { %v16944_v18 = vpop.permute.xlu0 %16943 }
0x1850   :  { %v16946_v42 = vpop.permute.xlu1 %16945 }
0x1851   :  { %v24344_v28 = vpop.permute.xlu0 %16947 }
0x1854   :  { %v24346_v23 = vpop.permute.xlu1 %16949 }
0x1855   :  { %v17008_v39 = vpop.permute.xlu0 %17007 }
0x1858   :  { %v17010_v60 = vpop.permute.xlu1 %17009 }
0x1859   :  { %v24348_v31 = vpop.permute.xlu0 %17011 }
0x185c   :  { %v17014_v32 = vpop.permute.xlu1 %17013 }
0x185d   :  { %v24350_v58 = vpop.permute.xlu0 %16951 }
0x1860   :  { %v24352_v46 = vpop.permute.xlu1 %16953 }
0x1861   :  { %v24354_v15 = vpop.permute.xlu0 %16955 }
0x1864   :  { %v24356_v40 = vpop.permute.xlu1 %16957 }
0x1865   :  { %v24358_v13 = vpop.permute.xlu0 %17015 }
0x1868   :  { %v24360_v16 = vpop.permute.xlu1 %17017 }
0x1869   :  { %v24362_v54 = vpop.permute.xlu0 %17019 }
0x18e4   :  { %v15752_v38 = vpop.f32.mrb[186].mxu1 }
0x18e5   :  { %v19813_v21 = vpop.f32.mrb[187].mxu1  ;;  %17055 = vrot.lane.b32.xlu0 %v15752_v38, %s20512_s12  ;;  %v24364_v38 = vpop.permute.xlu1 %17021 }
0x18e6   :  { %v24929_v21 = vld [vmem:[#allocation17_spill] sm:$0xff] }
0x18e8   :  { %v15906_v56 = vpop.f32.mrb[188].mxu1 }
0x18e9   :  { %v15829_v43 = vpop.f32.mrb[190].mxu0  ;;  %v19823_v48 = vpop.f32.mrb[189].mxu1  ;;  %17059 = vrot.lane.b32.xlu0 %v15906_v56, %s20512_s12  ;;  %v17104_v56 = vsel %vm193_vm2, %v24929_v21, %v16930_v11  ;;  %v24933_v11 = vld [vmem:[#allocation21_spill] sm:$0xff]  ;;  %v24937_v21 = vld [vmem:[#allocation23_spill] sm:$0xff] }
0x18ea   :  { %17057 = vrot.lane.b32.xlu1 %v15829_v43, %s20512_s12  ;;  %v19818_v30 = vpop.f32.mrb[191].mxu0  ;;  %v24930_v43 = vld [vmem:[#allocation14_spill] sm:$0xff] }
0x18eb   :  { %v17103_v48 = vsel %vm193_vm2, %v24930_v43, %v16928_v2 }
0x18ed   :  { %v16060_v26 = vpop.f32.mrb[190].mxu1 }
0x18ee   :  { %v15983_v4 = vpop.f32.mrb[192].mxu0  ;;  %v19833_v51 = vpop.f32.mrb[191].mxu1  ;;  %17063 = vrot.lane.b32.xlu0 %v16060_v26, %s20512_s12  ;;  %v17120_v26 = vsel %vm5610_vm4, %v17104_v56, %v16994_v12  ;;  %v17112_v56 = vsel %vm193_vm2, %v24937_v21, %v16946_v42 }
0x18ef   :  { %17061 = vrot.lane.b32.xlu1 %v15983_v4, %s20512_s12  ;;  %v19828_v22 = vpop.f32.mrb[193].mxu0  ;;  %v17119_v4 = vsel %vm5610_vm4, %v17103_v48, %v16992_v57  ;;  %v24935_v57 = vld [vmem:[#allocation33_spill] sm:$0xff]  ;;  %v17128_v48 = vsel %vm5610_vm4, %v17112_v56, %v17010_v60 }
0x18f1   :  { %v16214_v59 = vpop.f32.mrb[192].mxu1 }
0x18f2   :  { %v16137_v24 = vpop.f32.mrb[194].mxu0  ;;  %v19843_v19 = vpop.f32.mrb[193].mxu1  ;;  %17067 = vrot.lane.b32.xlu0 %v16214_v59, %s20512_s12 }
0x18f3   :  { %17065 = vrot.lane.b32.xlu1 %v16137_v24, %s20512_s12  ;;  %v19838_v44 = vpop.f32.mrb[195].mxu0  ;;  %v24931_v19 = vld [vmem:[#allocation20_spill] sm:$0xff] }
0x18f4   :  { %v17106_v44 = vsel %vm193_vm2, %v24931_v19, %v16934_v61 }
0x18f5   :  { %v16368_v29 = vpop.f32.mrb[194].mxu1 }
0x18f6   :  { %v16291_v8 = vpop.f32.mrb[196].mxu0  ;;  %v19853_v37 = vpop.f32.mrb[195].mxu1  ;;  %17071 = vrot.lane.b32.xlu0 %v16368_v29, %s20512_s12  ;;  %v24932_v29 = vld [vmem:[#allocation18_spill] sm:$0xff] }
0x18f7   :  { %17069 = vrot.lane.b32.xlu1 %v16291_v8, %s20512_s12  ;;  %v19848_v1 = vpop.f32.mrb[197].mxu0  ;;  %v17105_v8 = vsel %vm193_vm2, %v24932_v29, %v16932_v50 }
0x18f8   :  { %v17122_v1 = vsel %vm5610_vm4, %v17106_v44, %v16998_v47  ;;  %v17121_v2 = vsel %vm5610_vm4, %v17105_v8, %v16996_v41 }
0x18f9   :  { %v16522_v63 = vpop.f32.mrb[196].mxu1 }
0x18fa   :  { %v16445_v25 = vpop.f32.mrb[198].mxu0  ;;  %17075 = vrot.lane.b32.xlu0 %v16522_v63, %s20512_s12  ;;  %v19863_v6 = vpop.f32.mrb[197].mxu1 }
0x18fb   :  { %17073 = vrot.lane.b32.xlu1 %v16445_v25, %s20512_s12  ;;  %v19858_v7 = vpop.f32.mrb[199].mxu0 }
0x18fd   :  { %v16676_v53 = vpop.f32.mrb[198].mxu1 }
0x18fe   :  { %v16599_v49 = vpop.f32.mrb[200].mxu0  ;;  %17079 = vrot.lane.b32.xlu0 %v16676_v53, %s20512_s12  ;;  %v19873_v14 = vpop.f32.mrb[199].mxu1  ;;  %v17108_v53 = vsel %vm193_vm2, %v24933_v11, %v16938_v33 }
0x18ff   :  { %17077 = vrot.lane.b32.xlu1 %v16599_v49, %s20512_s12  ;;  %v19868_v0 = vpop.f32.mrb[201].mxu0  ;;  %v24934_v49 = vld [vmem:[#allocation19_spill] sm:$0xff] }
0x1900   :  { %v17107_v14 = vsel %vm193_vm2, %v24934_v49, %v16936_v36  ;;  %v17124_v0 = vsel %vm5610_vm4, %v17108_v53, %v17002_v10 }
0x1901   :  { %v16830_v62 = vpop.f32.mrb[200].mxu1 }
0x1902   :  { %v16753_v55 = vpop.f32.mrb[202].mxu0  ;;  %17083 = vrot.lane.b32.xlu0 %v16830_v62, %s20512_s12  ;;  %v19883_v45 = vpop.f32.mrb[201].mxu1  ;;  %v17123_v62 = vsel %vm5610_vm4, %v17107_v14, %v17000_v20 }
0x1903   :  { %17081 = vrot.lane.b32.xlu1 %v16753_v55, %s20512_s12  ;;  %v19878_v3 = vpop.f32.mrb[203].mxu0 }
0x1906   :  { %v16907_v5 = vpop.f32.mrb[204].mxu0 }
0x1907   :  { %17085 = vrot.lane.b32.xlu1 %v16907_v5, %s20512_s12  ;;  %v19888_v35 = vpop.f32.mrb[205].mxu0  ;;  %v17110_v5 = vsel %vm193_vm2, %v24935_v57, %v16942_v52  ;;  %v24938_v52 = vld [vmem:[#allocation24_spill] sm:$0xff]  ;;  %v24947_v57 = vld [vmem:[#allocation6_spill] sm:$0xff] }
0x1908   :  { %v24936_v35 = vld [vmem:[#allocation22_spill] sm:$0xff]  ;;  %v17126_v47 = vsel %vm5610_vm4, %v17110_v5, %v17006_v34  ;;  %v17111_v43 = vsel %vm193_vm2, %v24938_v52, %v16944_v18 }
0x1909   :  { %v17109_v12 = vsel %vm193_vm2, %v24936_v35, %v16940_v17  ;;  %v17127_v34 = vsel %vm5610_vm4, %v17111_v43, %v17008_v39 }
0x190a   :  { %v17125_v36 = vsel %vm5610_vm4, %v17109_v12, %v17004_v27 }
0x1957   :  { %v17056_v9 = vpop.permute.xlu0 %17055 }
0x1958   :  { %v17135_v22 = vsel %vm5619_vm3, %v17119_v4, %v17056_v9 }
0x195b   :  { %v17060_v30 = vpop.permute.xlu0 %17059 }
0x195c   :  { %v17058_v51 = vpop.permute.xlu1 %17057  ;;  %v17137_v25 = vsel %vm5619_vm3, %v17121_v2, %v17060_v30 }
0x195d   :  { %v17136_v59 = vsel %vm5619_vm3, %v17120_v26, %v17058_v51  ;;  %v24939_v51 = vld [vmem:[#allocation25_spill] sm:$0xff] }
0x195e   :  { %v17176_v24 = vcombine.low %v17135_v22, %v17136_v59  ;;  %v17114_v42 = vsel %vm193_vm2, %v24939_v51, %v24346_v23  ;;  %v24940_v22 = vld [vmem:[#allocation26_spill] sm:$0xff] }
0x195f   :  { %v17113_v18 = vsel %vm193_vm2, %v24940_v22, %v24344_v28  ;;  %v17130_v60 = vsel %vm5610_vm4, %v17114_v42, %v17014_v32  ;;  %v24941_v23 = vld [vmem:[#allocation30_spill] sm:$0xff]  ;;  %v24942_v28 = vld [vmem:[#allocation28_spill] sm:$0xff] }
0x1960   :  { %v17064_v37 = vpop.permute.xlu0 %17063  ;;  %19897 = vmatprep.mubr.msk.f32.mxu1 %vm52_vm0, %v17176_v24  ;;  %v17129_v39 = vsel %vm5610_vm4, %v17113_v18, %v24348_v31  ;;  %v17116_v8 = vsel %vm193_vm2, %v24941_v23, %v24352_v46  ;;  %v17115_v32 = vsel %vm193_vm2, %v24942_v28, %v24350_v58  ;;  %v24943_v46 = vld [vmem:[#allocation29_spill] sm:$0xff]  ;;  %v24944_v58 = vld [vmem:[#allocation27_spill] sm:$0xff] }
0x1961   :  { %v17062_v63 = vpop.permute.xlu1 %17061  ;;  %v17139_v45 = vsel %vm5619_vm3, %v17123_v62, %v17064_v37  ;;  %v17132_v31 = vsel %vm5610_vm4, %v17116_v8, %v24360_v16  ;;  %v17131_v37 = vsel %vm5610_vm4, %v17115_v32, %v24358_v13  ;;  %v17117_v16 = vsel %vm193_vm2, %v24944_v58, %v24354_v15  ;;  %v24453_v15 = vld [vmem:[%s24723_s4] sm:$0xff] }
0x1962   :  { %v17138_v6 = vsel %vm5619_vm3, %v17122_v1, %v17062_v63  ;;  %v17133_v11 = vsel %vm5610_vm4, %v17117_v16, %v24362_v54 }
0x1963   :  { %v17177_v7 = vcombine.low %v17137_v25, %v17138_v6 }
0x1964   :  { %v17068_v50 = vpop.permute.xlu0 %17067 }
0x1965   :  { %19898 = vmatmul.mubr.msk.f32.vlgmr.msra.gmra.mrb[202].mxu1 %vm52_vm0, %v17177_v7  ;;  %v17066_v55 = vpop.permute.xlu1 %17065  ;;  %v17141_v20 = vsel %vm5619_vm3, %v17125_v36, %v17068_v50  ;;  %v17118_v7 = vsel %vm193_vm2, %v24943_v46, %v24356_v40  ;;  %v24945_v40 = vld [vmem:[#allocation5_spill] sm:$0xff] }
0x1966   :  { %v17140_v3 = vsel %vm5619_vm3, %v17124_v0, %v17066_v55  ;;  %v17134_v13 = vsel %vm5610_vm4, %v17118_v7, %v24364_v38  ;;  %v17158_v0 = vsub.s32 3, %v24945_v40 }
0x1967   :  { %v17178_v61 = vcombine.low %v17139_v45, %v17140_v3  ;;  %v24946_v3 = vld [vmem:[#allocation7_spill] sm:$0xff] }
0x1968   :  { %v17072_v41 = vpop.permute.xlu0 %17071  ;;  %v17159_v38 = vrot.slane %v24453_v15, %v17158_v0 }
0x1969   :  { %19900 = vmatprep.mubr.msk.f32.mxu1 %vm52_vm0, %v17178_v61  ;;  %v17070_v33 = vpop.permute.xlu1 %17069  ;;  %v17143_v30 = vsel %vm5619_vm3, %v17127_v34, %v17072_v41 }
0x196a   :  { %v17142_v10 = vsel %vm5619_vm3, %v17126_v47, %v17070_v33 }
0x196b   :  { %v17179_v9 = vcombine.low %v17141_v20, %v17142_v10  ;;  %v24948_v20 = vld [vmem:[#allocation8_spill] sm:$0xff] }
0x196c   :  { %v17076_v17 = vpop.permute.xlu0 %17075 }
0x196d   :  { %19901 = vmatmul.mubr.msk.f32.gmra.mrb[204].mxu1 %vm52_vm0, %v17179_v9  ;;  %v17074_v27 = vpop.permute.xlu1 %17073  ;;  %v17145_v19 = vsel %vm5619_vm3, %v17129_v39, %v17076_v17  ;;  %v24949_v9 = vld [vmem:[#allocation9_spill] sm:$0xff] }
0x196e   :  { %v17144_v26 = vsel %vm5619_vm3, %v17128_v48, %v17074_v27  ;;  %v24950_v27 = vld [vmem:[#allocation11_spill] sm:$0xff] }
0x196f   :  { %v17180_v4 = vcombine.low %v17143_v30, %v17144_v26  ;;  %v24951_v26 = vld [vmem:[#allocation10_spill] sm:$0xff] }
0x1970   :  { %v17080_v59 = vpop.permute.xlu0 %17079 }
0x1971   :  { %19903 = vmatprep.mubr.msk.f32.mxu1 %vm52_vm0, %v17180_v4  ;;  %v17078_v24 = vpop.permute.xlu1 %17077  ;;  %v17147_v2 = vsel %vm5619_vm3, %v17131_v37, %v17080_v59  ;;  %v24952_v59 = vld [vmem:[#allocation13_spill] sm:$0xff] }
0x1972   :  { %v17146_v44 = vsel %vm5619_vm3, %v17130_v60, %v17078_v24 }
0x1973   :  { %v17181_v29 = vcombine.low %v17145_v19, %v17146_v44  ;;  %v24953_v19 = vld [vmem:[#allocation12_spill] sm:$0xff] }
0x1974   :  { %v17084_v25 = vpop.permute.xlu0 %17083 }
0x1975   :  { %19904 = vmatmul.mubr.msk.f32.gmra.mrb[206].mxu1 %vm52_vm0, %v17181_v29  ;;  %v17082_v1 = vpop.permute.xlu1 %17081  ;;  %v17149_v49 = vsel %vm5619_vm3, %v17133_v11, %v17084_v25 }
0x1976   :  { %v17148_v63 = vsel %vm5619_vm3, %v17132_v31, %v17082_v1 }
0x1977   :  { %v17182_v6 = vcombine.low %v17147_v2, %v17148_v63 }
0x1979   :  { %19906 = vmatprep.mubr.msk.f32.mxu1 %vm52_vm0, %v17182_v6  ;;  %v17086_v53 = vpop.permute.xlu1 %17085 }
0x197a   :  { %v17150_v14 = vsel %vm5619_vm3, %v17134_v13, %v17086_v53 }
0x197b   :  { %v17183_v50 = vcombine.low %v17149_v49, %v17150_v14 }
0x197d   :  { %19907 = vmatmul.mubr.msk.f32.gmra.mrb[208].mxu1 %vm52_vm0, %v17183_v50 }
0x1a38   :  { %v19899_v54 = vpop.f32.mrb[202].mxu1 }
0x1a39   :  { %v17272_v62 = vadd.f32 %v19899_v54, %v17159_v38  ;;  %v17266_v55 = vpop.f32.mrb[203].mxu1 }
0x1a3a   :  { %v17267_v45 = vadd.f32 %v17266_v55, %v17159_v38 }
0x1a3b   :  { %v17314_v61 = vadd.f32 %v17272_v62, %v24946_v3 }
0x1a3c   :  { %v17313_v5 = vadd.f32 %v17267_v45, %v24947_v57 }
0x1a3d   :  { %v17324_v35 = vsel %vm52_vm0, %v17314_v61, 0.0 }
0x1a3e   :  { %17325 = vadd.xlane.f32.xlu1 %v17324_v35  ;;  %v17321_v12 = vsel %vm52_vm0, %v17313_v5, 0.0 }
0x1a3f   :  { %17322 = vadd.xlane.f32.xlu0 %v17321_v12 }
0x1a40   :  { %v19902_v41 = vpop.f32.mrb[204].mxu1 }
0x1a41   :  { %v17276_v47 = vpop.f32.mrb[205].mxu1  ;;  %v17282_v36 = vadd.f32 %v19902_v41, %v17159_v38 }
0x1a42   :  { %v17277_v33 = vadd.f32 %v17276_v47, %v17159_v38 }
0x1a43   :  { %v17316_v21 = vadd.f32 %v17282_v36, %v24949_v9 }
0x1a44   :  { %v17315_v10 = vadd.f32 %v17277_v33, %v24948_v20 }
0x1a45   :  { %v17330_v34 = vsel %vm52_vm0, %v17316_v21, 0.0 }
0x1a46   :  { %v17327_v56 = vsel %vm52_vm0, %v17315_v10, 0.0 }
0x1a47   :  { %17328 = vadd.xlane.f32.xlu0 %v17327_v56  ;;  %v17449_v56 = vld [vmem:[%s24724_s5] sm:$0xff] }
0x1a48   :  { %v19905_v52 = vpop.f32.mrb[206].mxu1 }
0x1a49   :  { %v17292_v43 = vadd.f32 %v19905_v52, %v17159_v38  ;;  %v17286_v17 = vpop.f32.mrb[207].mxu1  ;;  %v17450_v52 = vld [vmem:[%s24724_s5 + $0x8] sm:$0xff] }
0x1a4a   :  { %v17287_v48 = vadd.f32 %v17286_v17, %v17159_v38  ;;  %v17451_v17 = vld [vmem:[%s24724_s5 + $0x10] sm:$0xff] }
0x1a4b   :  { %v17318_v30 = vadd.f32 %v17292_v43, %v24950_v27  ;;  %17331 = vadd.xlane.f32.xlu0 %v17330_v34  ;;  %v19989_v43 = vpack.c.bf16 %v17450_v52, %v17449_v56  ;;  %v17597_v27 = vld [vmem:[%s24726_s7] sm:$0xff] }
0x1a4c   :  { %v17317_v4 = vadd.f32 %v17287_v48, %v24951_v26  ;;  %v17452_v48 = vld [vmem:[%s24724_s5 + $0x18] sm:$0xff]  ;;  %v17599_v26 = vld [vmem:[%s24726_s7 + $0x10] sm:$0xff] }
0x1a4d   :  { %v17336_v51 = vsel %vm52_vm0, %v17318_v30, 0.0  ;;  %19990 = vmatprep.subr.bf16.mxu0 %v19989_v43  ;;  %v19993_v34 = vpack.c.bf16 %v17452_v48, %v17451_v17 }
0x1a4e   :  { %v17333_v42 = vsel %vm52_vm0, %v17317_v4, 0.0  ;;  %19992 = vmatpush3.bf16.msra.mxu0 %v19989_v43 }
0x1a4f   :  { %17337 = vadd.xlane.f32.xlu0 %v17336_v51  ;;  %17334 = vadd.xlane.f32.xlu1 %v17333_v42  ;;  %v17600_v51 = vld [vmem:[%s24726_s7 + $0x18] sm:$0xff] }
0x1a50   :  { %v19908_v22 = vpop.f32.mrb[208].mxu1  ;;  %19994 = vmatprep.subr.bf16.mxu0 %v19993_v34  ;;  %v20001_v42 = vpack.c.bf16 %v17600_v51, %v17599_v26 }
0x1a51   :  { %v17302_v18 = vadd.f32 %v19908_v22, %v17159_v38  ;;  %v17296_v60 = vpop.f32.mrb[209].mxu1  ;;  %v17601_v22 = vld [vmem:[%s24726_s7 + $0x20] sm:$0xff] }
0x1a52   :  { %v17297_v39 = vadd.f32 %v17296_v60, %v17159_v38  ;;  %19996 = vmatpush3.bf16.msra.mxu0 %v19993_v34 }
0x1a53   :  { %v17320_v24 = vadd.f32 %v17302_v18, %v24952_v59  ;;  %v17602_v18 = vld [vmem:[%s24726_s7 + $0x28] sm:$0xff] }
0x1a54   :  { %v17319_v44 = vadd.f32 %v17297_v39, %v24953_v19  ;;  %v20005_v60 = vpack.c.bf16 %v17602_v18, %v17601_v22 }
0x1a55   :  { %v17342_v29 = vsel %vm52_vm0, %v17320_v24, 0.0 }
0x1a56   :  { %17343 = vadd.xlane.f32.xlu0 %v17342_v29  ;;  %v17339_v23 = vsel %vm52_vm0, %v17319_v44, 0.0 }
0x1a57   :  { %17340 = vadd.xlane.f32.xlu1 %v17339_v23 }
0x1acb   :  { %v17326_v8 = vpop.xlane.xlu1 %17325 }
0x1acc   :  { %v17346_v28 = vmul.f32 0.03125, %v17326_v8  ;;  %v17323_v32 = vpop.xlane.xlu0 %17322 }
0x1acd   :  { %v17345_v31 = vmul.f32 0.03125, %v17323_v32 }
0x1ace   :  { %v24472_v37 = vsub.f32 %v17314_v61, %v17346_v28  ;;  %v17427_v28 = vsub.s32 4, %v24945_v40 }
0x1acf   :  { %v24474_v1 = vsub.f32 %v17313_v5, %v17345_v31 }
0x1ad0   :  { %v17362_v2 = vmul.f32 %v24472_v37, %v24472_v37 }
0x1ad1   :  { %v17361_v63 = vmul.f32 %v24474_v1, %v24474_v1 }
0x1ad2   :  { %v17372_v25 = vsel %vm52_vm0, %v17362_v2, 0.0  ;;  %v17439_v2 = vsub.s32 5, %v24945_v40 }
0x1ad3   :  { %17373 = vadd.xlane.f32.xlu0 %v17372_v25  ;;  %v17369_v6 = vsel %vm52_vm0, %v17361_v63, 0.0  ;;  %v17428_v25 = vrot.slane %v24453_v15, %v17427_v28 }
0x1ad4   :  { %v17329_v46 = vpop.xlane.xlu0 %17328  ;;  %17370 = vadd.xlane.f32.xlu1 %v17369_v6 }
0x1ad5   :  { %v17347_v7 = vmul.f32 0.03125, %v17329_v46 }
0x1ad7   :  { %v24482_v58 = vsub.f32 %v17315_v10, %v17347_v7 }
0x1ad8   :  { %v17332_v16 = vpop.xlane.xlu0 %17331 }
0x1ad9   :  { %v17348_v13 = vmul.f32 0.03125, %v17332_v16  ;;  %v17363_v11 = vmul.f32 %v24482_v58, %v24482_v58 }
0x1adb   :  { %v24486_v53 = vsub.f32 %v17316_v21, %v17348_v13  ;;  %v17375_v49 = vsel %vm52_vm0, %v17363_v11, 0.0 }
0x1adc   :  { %v17338_v14 = vpop.xlane.xlu0 %17337  ;;  %17376 = vadd.xlane.f32.xlu1 %v17375_v49  ;;  %v17335_v50 = vpop.xlane.xlu1 %17334 }
0x1add   :  { %v17350_v0 = vmul.f32 0.03125, %v17338_v14  ;;  %v17349_v38 = vmul.f32 0.03125, %v17335_v50  ;;  %v17364_v54 = vmul.f32 %v24486_v53, %v24486_v53  ;;  %v17440_v14 = vrot.slane %v24453_v15, %v17439_v2 }
0x1adf   :  { %v24491_v62 = vsub.f32 %v17318_v30, %v17350_v0  ;;  %v24493_v55 = vsub.f32 %v17317_v4, %v17349_v38  ;;  %v17378_v45 = vsel %vm52_vm0, %v17364_v54, 0.0  ;;  %v17598_v30 = vld [vmem:[%s24726_s7 + $0x8] sm:$0xff] }
0x1ae0   :  { %17379 = vadd.xlane.f32.xlu0 %v17378_v45  ;;  %v19997_v4 = vpack.c.bf16 %v17598_v30, %v17597_v27 }
0x1ae1   :  { %v17366_v3 = vmul.f32 %v24491_v62, %v24491_v62  ;;  %v17365_v61 = vmul.f32 %v24493_v55, %v24493_v55 }
0x1ae2   :  { %19998 = vmatprep.subr.bf16.mxu1 %v19997_v4 }
0x1ae3   :  { %v17344_v57 = vpop.xlane.xlu0 %17343  ;;  %v17384_v5 = vsel %vm52_vm0, %v17366_v3, 0.0  ;;  %v17381_v35 = vsel %vm52_vm0, %v17365_v61, 0.0  ;;  %20000 = vmatpush3.bf16.msra.mxu1 %v19997_v4 }
0x1ae4   :  { %v17352_v12 = vmul.f32 0.03125, %v17344_v57  ;;  %17385 = vadd.xlane.f32.xlu0 %v17384_v5  ;;  %17382 = vadd.xlane.f32.xlu1 %v17381_v35  ;;  %v17341_v41 = vpop.xlane.xlu1 %17340 }
0x1ae5   :  { %v17351_v47 = vmul.f32 0.03125, %v17341_v41  ;;  %20002 = vmatprep.subr.bf16.mxu1 %v20001_v42 }
0x1ae6   :  { %v24502_v36 = vsub.f32 %v17320_v24, %v17352_v12 }
0x1ae7   :  { %v24504_v33 = vsub.f32 %v17319_v44, %v17351_v47  ;;  %20004 = vmatpush3.bf16.msra.mxu1 %v20001_v42 }
0x1ae8   :  { %v17368_v20 = vmul.f32 %v24502_v36, %v24502_v36  ;;  %20006 = vmatprep.subr.bf16.mxu1 %v20005_v60 }
0x1ae9   :  { %v17367_v10 = vmul.f32 %v24504_v33, %v24504_v33 }
0x1aea   :  { %v17390_v9 = vsel %vm52_vm0, %v17368_v20, 0.0 }
0x1aeb   :  { %17391 = vadd.xlane.f32.xlu0 %v17390_v9  ;;  %v17387_v21 = vsel %vm52_vm0, %v17367_v10, 0.0  ;;  %20008 = vmatpush3.bf16.msra.mxu1 %v20005_v60 }
0x1aec   :  { %17388 = vadd.xlane.f32.xlu1 %v17387_v21 }
0x1b60   :  { %v17374_v39 = vpop.xlane.xlu0 %17373 }
0x1b61   :  { %v17394_v59 = vmul.f32 0.03125, %v17374_v39  ;;  %v17371_v24 = vpop.xlane.xlu1 %17370 }
0x1b62   :  { %v17393_v19 = vmul.f32 0.03125, %v17371_v24 }
0x1b63   :  { %v17402_v44 = vadd.f32 1e-05, %v17394_v59  ;;  %v18391_v59 = vld [vmem:[%s24725_s6] ss:$0 sm:$0xff]  ;;  %s20513_s6 = smov [#allocation2]  }
0x1b64   :  { %v17401_v29 = vadd.f32 1e-05, %v17393_v19 }
0x1b65   :  { %20431 = vrsqrt.f32 %v17402_v44 }
0x1b66   :  { %20433 = vrsqrt.f32 %v17401_v29 }
0x1b69   :  { %v17377_v23 = vpop.xlane.xlu1 %17376 }
0x1b6a   :  { %v17395_v8 = vmul.f32 0.03125, %v17377_v23 }
0x1b6c   :  { %v17403_v32 = vadd.f32 1e-05, %v17395_v8 }
0x1b6d   :  { %v17380_v31 = vpop.xlane.xlu0 %17379 }
0x1b6e   :  { %20435 = vrsqrt.f32 %v17403_v32  ;;  %v17396_v63 = vmul.f32 0.03125, %v17380_v31 }
0x1b6f   :  { %v20432_v6 = vpop.eup %20431 }
0x1b70   :  { %v20434_v46 = vpop.eup %20433  ;;  %v17418_v7 = vmul.f32 %v20432_v6, %v24472_v37  ;;  %v17404_v16 = vadd.f32 1e-05, %v17396_v63 }
0x1b71   :  { %v17386_v13 = vpop.xlane.xlu0 %17385  ;;  %v17383_v11 = vpop.xlane.xlu1 %17382  ;;  %v17417_v49 = vmul.f32 %v20434_v46, %v24474_v1 }
0x1b72   :  { %20437 = vrsqrt.f32 %v17404_v16  ;;  %v17398_v50 = vmul.f32 0.03125, %v17386_v13  ;;  %v17397_v0 = vmul.f32 0.03125, %v17383_v11  ;;  %v17430_v38 = vmul.f32 %v17428_v25, %v17418_v7 }
0x1b73   :  { %v17429_v54 = vmul.f32 %v17428_v25, %v17417_v49 }
0x1b74   :  { %v17406_v45 = vadd.f32 1e-05, %v17398_v50  ;;  %v17405_v3 = vadd.f32 1e-05, %v17397_v0  ;;  %v24550_v57 = vadd.f32 %v17440_v14, %v17430_v38 }
0x1b75   :  { %v24548_v61 = vadd.f32 %v17440_v14, %v17429_v54 }
0x1b76   :  { %20439 = vrsqrt.f32 %v17406_v45  ;;  %v17607_v45 = vsub.s32 6, %v24945_v40 }
0x1b77   :  { %20441 = vrsqrt.f32 %v17405_v3  ;;  %19917 = vmatprep.mubr.msk.f32.mxu0 %vm52_vm0, %v24548_v61 }
0x1b78   :  { %v20436_v37 = vpop.eup %20435  ;;  %v17392_v1 = vpop.xlane.xlu0 %17391  ;;  %19918 = vmatmul.mubr.msk.f32.vlgmr.msra.gmra.mrb[206].mxu0 %vm52_vm0, %v24550_v57  ;;  %v17608_v3 = vrot.slane %v24453_v15, %v17607_v45 }
0x1b79   :  { %v17400_v5 = vmul.f32 0.03125, %v17392_v1  ;;  %v17389_v35 = vpop.xlane.xlu1 %17388  ;;  %v17419_v12 = vmul.f32 %v20436_v37, %v24482_v58 }
0x1b7a   :  { %v17399_v41 = vmul.f32 0.03125, %v17389_v35 }
0x1b7b   :  { %v17408_v47 = vadd.f32 1e-05, %v17400_v5  ;;  %v17431_v20 = vmul.f32 %v17428_v25, %v17419_v12 }
0x1b7c   :  { %v20438_v10 = vpop.eup %20437  ;;  %v17407_v9 = vadd.f32 1e-05, %v17399_v41 }
0x1b7d   :  { %20443 = vrsqrt.f32 %v17408_v47  ;;  %v24557_v21 = vadd.f32 %v17440_v14, %v17431_v20  ;;  %v17420_v56 = vmul.f32 %v20438_v10, %v24486_v53 }
0x1b7e   :  { %20445 = vrsqrt.f32 %v17407_v9 }
0x1b7f   :  { %19920 = vmatprep.mubr.msk.f32.mxu0 %vm52_vm0, %v24557_v21  ;;  %v17432_v52 = vmul.f32 %v17428_v25, %v17420_v56 }
0x1b80   :  { %v20440_v43 = vpop.eup %20439 }
0x1b81   :  { %v20442_v17 = vpop.eup %20441  ;;  %v24562_v48 = vadd.f32 %v17440_v14, %v17432_v52  ;;  %v17422_v58 = vmul.f32 %v20440_v43, %v24491_v62 }
0x1b82   :  { %v17421_v34 = vmul.f32 %v20442_v17, %v24493_v55 }
0x1b83   :  { %19921 = vmatmul.mubr.msk.f32.gmra.mrb[208].mxu0 %vm52_vm0, %v24562_v48  ;;  %v17434_v27 = vmul.f32 %v17428_v25, %v17422_v58 }
0x1b84   :  { %v17433_v30 = vmul.f32 %v17428_v25, %v17421_v34 }
0x1b85   :  { %v24568_v26 = vadd.f32 %v17440_v14, %v17434_v27 }
0x1b86   :  { %v24570_v53 = vadd.f32 %v17440_v14, %v17433_v30 }
0x1b87   :  { %v20444_v4 = vpop.eup %20443 }
0x1b88   :  { %v20446_v51 = vpop.eup %20445  ;;  %19923 = vmatprep.mubr.msk.f32.mxu0 %vm52_vm0, %v24570_v53  ;;  %v17424_v42 = vmul.f32 %v20444_v4, %v24502_v36  ;;  %v17603_v36 = vld [vmem:[%s24726_s7 + $0x30] sm:$0xff] }
0x1b89   :  { %19924 = vmatmul.mubr.msk.f32.gmra.mrb[210].mxu0 %vm52_vm0, %v24568_v26  ;;  %v17423_v62 = vmul.f32 %v20446_v51, %v24504_v33  ;;  %v17604_v33 = vld [vmem:[%s24726_s7 + $0x38] sm:$0xff]  ;;  %s17890_s7 = sshll.u32 %s20513_s6, 4  ;;  %s17891_s7 = int_to_ptr.vmem [resolvable:$true] %s17890_s7 }
0x1b8a   :  { %v17436_v55 = vmul.f32 %v17428_v25, %v17424_v42  ;;  %v20009_v39 = vpack.c.bf16 %v17604_v33, %v17603_v36  ;;  %s20473_s23 = scalar_lea.vmem %s17891_s7, 4096  ;;  %p20478_p1 = scmp.lt.s32.totalorder %s17891_s7, %s17891_s7 }
0x1b8b   :  { %v17435_v22 = vmul.f32 %v17428_v25, %v17423_v62  ;;  %p20474_p0 = scmp.ne.s32.totalorder %s17891_s7, %s20473_s23  ;;  %p20479_p2 = scmp.lt.s32.totalorder %s20473_s23, %s20473_s23 }
0x1b8c   :  { %v24580_v60 = vadd.f32 %v17440_v14, %v17436_v55  ;;  %20010 = vmatprep.subr.bf16.mxu1 %v20009_v39 }
0x1b8d   :  { %v24578_v18 = vadd.f32 %v17440_v14, %v17435_v22  ;;  %20012 = vmatpush3.bf16.msra.mxu1 %v20009_v39  ;;  %p20480_p3 = por %p20479_p2, %p20478_p1 }
0x1b8f   :  { %19926 = vmatprep.mubr.msk.f32.mxu0 %vm52_vm0, %v24578_v18  ;;  %p20481_p4 = pnand %p20480_p3, %p20474_p0 }
0x1b90   :  { %19927 = vmatmul.mubr.msk.f32.gmra.mrb[212].mxu0 %vm52_vm0, %v24580_v60 }
0x1c4b   :  { %v19919_v24 = vpop.f32.mrb[206].mxu0 }
0x1c4c   :  { %v17556_v19 = vadd.f32 %v19919_v24, %v18391_v59  ;;  %v17550_v44 = vpop.f32.mrb[207].mxu0 }
0x1c4d   :  { %v17551_v29 = vadd.f32 %v18391_v59, %v17550_v44 }
0x1c4e   :  { %v17590_v8 = vmax.f32 %v17556_v19, 0.0 }
0x1c4f   :  { %v17589_v23 = vmax.f32 %v17551_v29, 0.0 }
0x1c51   :  { %19945 = vmatprep.mubr.msk.f32.mxu1 %vm17609_vm15, %v17589_v23 }
0x1c52   :  { %19946 = vmatmul.mubr.msk.f32.vlgmr.msra.gmra.mrb[210].mxu1 %vm17609_vm15, %v17590_v8 }
0x1c56   :  { %v19922_v28 = vpop.f32.mrb[208].mxu0 }
0x1c57   :  { %v17566_v32 = vadd.f32 %v19922_v28, %v18391_v59  ;;  %v17560_v31 = vpop.f32.mrb[209].mxu0 }
0x1c58   :  { %v17561_v2 = vadd.f32 %v18391_v59, %v17560_v31 }
0x1c59   :  { %v17592_v25 = vmax.f32 %v17566_v32, 0.0 }
0x1c5a   :  { %v17591_v63 = vmax.f32 %v17561_v2, 0.0 }
0x1c5c   :  { %v19925_v6 = vpop.f32.mrb[210].mxu0  ;;  %19948 = vmatprep.mubr.msk.f32.mxu1 %vm17609_vm15, %v17591_v63 }
0x1c5d   :  { %v17576_v46 = vadd.f32 %v19925_v6, %v18391_v59  ;;  %v17570_v7 = vpop.f32.mrb[211].mxu0  ;;  %19949 = vmatmul.mubr.msk.f32.gmra.mrb[212].mxu1 %vm17609_vm15, %v17592_v25 }
0x1c5e   :  { %v17571_v16 = vadd.f32 %v18391_v59, %v17570_v7 }
0x1c5f   :  { %v17594_v11 = vmax.f32 %v17576_v46, 0.0 }
0x1c60   :  { %v17593_v13 = vmax.f32 %v17571_v16, 0.0 }
0x1c62   :  { %19951 = vmatprep.mubr.msk.f32.mxu1 %vm17609_vm15, %v17593_v13 }
0x1c63   :  { %19952 = vmatmul.mubr.msk.f32.gmra.mrb[214].mxu1 %vm17609_vm15, %v17594_v11  ;;  %v19928_v49 = vpop.f32.mrb[212].mxu0 }
0x1c64   :  { %v17586_v14 = vadd.f32 %v19928_v49, %v18391_v59  ;;  %v17580_v50 = vpop.f32.mrb[213].mxu0 }
0x1c65   :  { %v17581_v0 = vadd.f32 %v18391_v59, %v17580_v50 }
0x1c66   :  { %v17596_v54 = vmax.f32 %v17586_v14, 0.0 }
0x1c67   :  { %v17595_v38 = vmax.f32 %v17581_v0, 0.0 }
0x1c69   :  { %19954 = vmatprep.mubr.msk.f32.mxu1 %vm17609_vm15, %v17595_v38 }
0x1c6a   :  { %19955 = vmatmul.mubr.msk.f32.gmra.mrb[216].mxu1 %vm17609_vm15, %v17596_v54 }
0x1d25   :  { %v19947_v37 = vpop.f32.mrb[210].mxu1 }
0x1d26   :  { %v17706_v1 = vadd.f32 %v19947_v37, %v17608_v3  ;;  %v17700_v5 = vpop.f32.mrb[211].mxu1 }
0x1d27   :  { %v17701_v35 = vadd.f32 %v17700_v5, %v17608_v3 }
0x1d28   :  { %v17740_v12 = vadd.f32 %v17706_v1, %v24550_v57 }
0x1d29   :  { %v17739_v41 = vadd.f32 %v17701_v35, %v24548_v61 }
0x1d2a   :  { %v17750_v47 = vsel %vm52_vm0, %v17740_v12, 0.0 }
0x1d2b   :  { %17751 = vadd.xlane.f32.xlu0 %v17750_v47  ;;  %v17747_v20 = vsel %vm52_vm0, %v17739_v41, 0.0 }
0x1d2c   :  { %17748 = vadd.xlane.f32.xlu1 %v17747_v20 }
0x1d30   :  { %v19950_v10 = vpop.f32.mrb[212].mxu1 }
0x1d31   :  { %v17716_v9 = vadd.f32 %v19950_v10, %v17608_v3  ;;  %v17710_v56 = vpop.f32.mrb[213].mxu1 }
0x1d32   :  { %v17711_v52 = vadd.f32 %v17710_v56, %v17608_v3 }
0x1d33   :  { %v17742_v43 = vadd.f32 %v17716_v9, %v24562_v48 }
0x1d34   :  { %v17741_v17 = vadd.f32 %v17711_v52, %v24557_v21 }
0x1d35   :  { %v17756_v58 = vsel %vm52_vm0, %v17742_v43, 0.0 }
0x1d36   :  { %v19953_v34 = vpop.f32.mrb[214].mxu1  ;;  %17757 = vadd.xlane.f32.xlu0 %v17756_v58  ;;  %v17753_v61 = vsel %vm52_vm0, %v17741_v17, 0.0 }
0x1d37   :  { %v17726_v57 = vadd.f32 %v19953_v34, %v17608_v3  ;;  %v17720_v27 = vpop.f32.mrb[215].mxu1  ;;  %17754 = vadd.xlane.f32.xlu1 %v17753_v61 }
0x1d38   :  { %v17721_v30 = vadd.f32 %v17720_v27, %v17608_v3 }
0x1d39   :  { %v17744_v4 = vadd.f32 %v17726_v57, %v24568_v26 }
0x1d3a   :  { %v17743_v51 = vadd.f32 %v17721_v30, %v24570_v53 }
0x1d3b   :  { %v17762_v42 = vsel %vm52_vm0, %v17744_v4, 0.0 }
0x1d3c   :  { %17763 = vadd.xlane.f32.xlu0 %v17762_v42  ;;  %v17759_v48 = vsel %vm52_vm0, %v17743_v51, 0.0 }
0x1d3d   :  { %17760 = vadd.xlane.f32.xlu1 %v17759_v48  ;;  %v19956_v21 = vpop.f32.mrb[216].mxu1 }
0x1d3e   :  { %v17736_v62 = vadd.f32 %v19956_v21, %v17608_v3  ;;  %v17730_v55 = vpop.f32.mrb[217].mxu1 }
0x1d3f   :  { %v17731_v22 = vadd.f32 %v17730_v55, %v17608_v3 }
0x1d40   :  { %v17746_v36 = vadd.f32 %v17736_v62, %v24580_v60 }
0x1d41   :  { %v17745_v33 = vadd.f32 %v17731_v22, %v24578_v18 }
0x1d42   :  { %v17768_v39 = vsel %vm52_vm0, %v17746_v36, 0.0 }
0x1d43   :  { %17769 = vadd.xlane.f32.xlu0 %v17768_v39  ;;  %v17765_v26 = vsel %vm52_vm0, %v17745_v33, 0.0 }
0x1d44   :  { %17766 = vadd.xlane.f32.xlu1 %v17765_v26 }
0x1db8   :  { %v17752_v53 = vpop.xlane.xlu0 %17751 }
0x1db9   :  { %v17772_v59 = vmul.f32 0.03125, %v17752_v53  ;;  %v17749_v24 = vpop.xlane.xlu1 %17748 }
0x1dba   :  { %v17771_v19 = vmul.f32 0.03125, %v17749_v24 }
0x1dbb   :  { %v24621_v44 = vsub.f32 %v17740_v12, %v17772_v59 }
0x1dbc   :  { %v24623_v29 = vsub.f32 %v17739_v41, %v17771_v19 }
0x1dbd   :  { %v17788_v23 = vmul.f32 %v24621_v44, %v24621_v44 }
0x1dbe   :  { %v17787_v18 = vmul.f32 %v24623_v29, %v24623_v29 }
0x1dbf   :  { %v17798_v60 = vsel %vm52_vm0, %v17788_v23, 0.0 }
0x1dc0   :  { %17799 = vadd.xlane.f32.xlu0 %v17798_v60  ;;  %v17795_v8 = vsel %vm52_vm0, %v17787_v18, 0.0 }
0x1dc1   :  { %17796 = vadd.xlane.f32.xlu1 %v17795_v8 }
0x1dc3   :  { %v17758_v28 = vpop.xlane.xlu0 %17757 }
0x1dc4   :  { %v17774_v32 = vmul.f32 0.03125, %v17758_v28  ;;  %v17755_v31 = vpop.xlane.xlu1 %17754 }
0x1dc5   :  { %v17773_v2 = vmul.f32 0.03125, %v17755_v31 }
0x1dc6   :  { %v24631_v63 = vsub.f32 %v17742_v43, %v17774_v32 }
0x1dc7   :  { %v24633_v25 = vsub.f32 %v17741_v17, %v17773_v2 }
0x1dc8   :  { %v17790_v6 = vmul.f32 %v24631_v63, %v24631_v63 }
0x1dc9   :  { %v17764_v46 = vpop.xlane.xlu0 %17763  ;;  %v17789_v7 = vmul.f32 %v24633_v25, %v24633_v25 }
0x1dca   :  { %v17776_v16 = vmul.f32 0.03125, %v17764_v46  ;;  %v17761_v13 = vpop.xlane.xlu1 %17760  ;;  %v17804_v11 = vsel %vm52_vm0, %v17790_v6, 0.0 }
0x1dcb   :  { %v17775_v49 = vmul.f32 0.03125, %v17761_v13  ;;  %17805 = vadd.xlane.f32.xlu0 %v17804_v11  ;;  %v17801_v14 = vsel %vm52_vm0, %v17789_v7, 0.0 }
0x1dcc   :  { %v24641_v50 = vsub.f32 %v17744_v4, %v17776_v16  ;;  %17802 = vadd.xlane.f32.xlu1 %v17801_v14 }
0x1dcd   :  { %v24643_v0 = vsub.f32 %v17743_v51, %v17775_v49 }
0x1dce   :  { %v17792_v38 = vmul.f32 %v24641_v50, %v24641_v50 }
0x1dcf   :  { %v17791_v54 = vmul.f32 %v24643_v0, %v24643_v0 }
0x1dd0   :  { %v17810_v45 = vsel %vm52_vm0, %v17792_v38, 0.0  ;;  %v17770_v3 = vpop.xlane.xlu0 %17769 }
0x1dd1   :  { %17811 = vadd.xlane.f32.xlu0 %v17810_v45  ;;  %v17778_v37 = vmul.f32 0.03125, %v17770_v3  ;;  %v17807_v1 = vsel %vm52_vm0, %v17791_v54, 0.0  ;;  %v17767_v5 = vpop.xlane.xlu1 %17766 }
0x1dd2   :  { %17808 = vadd.xlane.f32.xlu1 %v17807_v1  ;;  %v17777_v35 = vmul.f32 0.03125, %v17767_v5 }
0x1dd3   :  { %v24651_v12 = vsub.f32 %v17746_v36, %v17778_v37 }
0x1dd4   :  { %v24653_v41 = vsub.f32 %v17745_v33, %v17777_v35 }
0x1dd5   :  { %v17794_v47 = vmul.f32 %v24651_v12, %v24651_v12 }
0x1dd6   :  { %v17793_v20 = vmul.f32 %v24653_v41, %v24653_v41 }
0x1dd7   :  { %v17816_v10 = vsel %vm52_vm0, %v17794_v47, 0.0 }
0x1dd8   :  { %17817 = vadd.xlane.f32.xlu0 %v17816_v10  ;;  %v17813_v9 = vsel %vm52_vm0, %v17793_v20, 0.0 }
0x1dd9   :  { %17814 = vadd.xlane.f32.xlu1 %v17813_v9 }
0x1dda   :  { %20484 = shalt.err (!%p20481_p4)
}
0x1ddb   :  { %s20485_s1 = scalar_lea.hbm %s24728_s9, 4096 }
0x1ddc   :  { %p20486_p5 = scmp.ne.s32.totalorder %s24728_s9, %s20485_s1  ;;  %p20489_p6 = scmp.lt.u32.totalorder %s20485_s1, %s24728_s9 }
0x1dde   :  { %p20491_p7 = pnand %p20489_p6, %p20486_p5 }
0x1de0   :  { %20494 = shalt.err (!%p20491_p7)
}
0x1de1   :  { %s20514_s14 = smov 128   ;;  %v17853_v61 = vsub.s32 7, %v24945_v40  ;;  %v18408_v22 = vld [vmem:[%s24723_s4 + $0x8] ss:$0 sm:$0xff] }
0x1de2   :  { %17896 = dma.vmem_to_hbm [thread:$0]  %s17891_s7, 4096, %s24728_s9, [#allocation3], %s20514_s14, %s20514_s14, %s20510_s30  }
0x1de3   :  { %v17854_v51 = vrot.slane %v24453_v15, %v17853_v61 }
0x1e4d   :  { %v17800_v56 = vpop.xlane.xlu0 %17799 }
0x1e4e   :  { %v17820_v52 = vmul.f32 0.03125, %v17800_v56  ;;  %v17797_v43 = vpop.xlane.xlu1 %17796 }
0x1e4f   :  { %v17819_v17 = vmul.f32 0.03125, %v17797_v43 }
0x1e50   :  { %v17828_v58 = vadd.f32 1e-06, %v17820_v52 }
0x1e51   :  { %v17827_v34 = vadd.f32 1e-06, %v17819_v17 }
0x1e52   :  { %20447 = vrsqrt.f32 %v17828_v58 }
0x1e53   :  { %20449 = vrsqrt.f32 %v17827_v34 }
0x1e58   :  { %v17806_v57 = vpop.xlane.xlu0 %17805 }
0x1e59   :  { %v17822_v27 = vmul.f32 0.03125, %v17806_v57  ;;  %v17803_v30 = vpop.xlane.xlu1 %17802 }
0x1e5a   :  { %v17821_v4 = vmul.f32 0.03125, %v17803_v30 }
0x1e5b   :  { %v17830_v42 = vadd.f32 1e-06, %v17822_v27 }
0x1e5c   :  { %v20448_v48 = vpop.eup %20447  ;;  %v17829_v21 = vadd.f32 1e-06, %v17821_v4 }
0x1e5d   :  { %v20450_v62 = vpop.eup %20449  ;;  %v17844_v55 = vmul.f32 %v20448_v48, %v24621_v44  ;;  %20451 = vrsqrt.f32 %v17830_v42 }
0x1e5e   :  { %v17843_v36 = vmul.f32 %v20450_v62, %v24623_v29  ;;  %20453 = vrsqrt.f32 %v17829_v21  ;;  %v17812_v40 = vpop.xlane.xlu0 %17811 }
0x1e5f   :  { %v17856_v33 = vmul.f32 %v17854_v51, %v17844_v55  ;;  %v17824_v39 = vmul.f32 0.03125, %v17812_v40  ;;  %v17809_v26 = vpop.xlane.xlu1 %17808 }
0x1e60   :  { %v17855_v53 = vmul.f32 %v17854_v51, %v17843_v36  ;;  %v17823_v15 = vmul.f32 0.03125, %v17809_v26 }
0x1e61   :  { %v17868_v59 = vadd.f32 %v18408_v22, %v17856_v33  ;;  %v17832_v24 = vadd.f32 1e-06, %v17824_v39 }
0x1e62   :  { %v17867_v19 = vadd.f32 %v18408_v22, %v17855_v53  ;;  %v17831_v23 = vadd.f32 1e-06, %v17823_v15 }
0x1e63   :  { %17876 = vst.msk [vmem:[%s24727_s8 + $0x8] sm:$0xff] %vm52_vm0, %v17868_v59  ;;  %20455 = vrsqrt.f32 %v17832_v24 }
0x1e64   :  { %17875 = vst.msk [vmem:[%s24727_s8] sm:$0xff] %vm52_vm0, %v17867_v19  ;;  %20457 = vrsqrt.f32 %v17831_v23 }
0x1e65   :  { %v17818_v44 = vpop.xlane.xlu0 %17817 }
0x1e66   :  { %v17826_v29 = vmul.f32 0.03125, %v17818_v44  ;;  %v17815_v18 = vpop.xlane.xlu1 %17814 }
0x1e67   :  { %v20452_v60 = vpop.eup %20451  ;;  %v17825_v8 = vmul.f32 0.03125, %v17815_v18 }
0x1e68   :  { %v20454_v28 = vpop.eup %20453  ;;  %v17846_v32 = vmul.f32 %v20452_v60, %v24631_v63  ;;  %v17834_v31 = vadd.f32 1e-06, %v17826_v29 }
0x1e69   :  { %v17845_v2 = vmul.f32 %v20454_v28, %v24633_v25  ;;  %v17833_v6 = vadd.f32 1e-06, %v17825_v8 }
0x1e6a   :  { %v17858_v46 = vmul.f32 %v17854_v51, %v17846_v32  ;;  %20459 = vrsqrt.f32 %v17834_v31 }
0x1e6b   :  { %v17857_v7 = vmul.f32 %v17854_v51, %v17845_v2  ;;  %20461 = vrsqrt.f32 %v17833_v6 }
0x1e6c   :  { %v17870_v16 = vadd.f32 %v18408_v22, %v17858_v46 }
0x1e6d   :  { %v20456_v13 = vpop.eup %20455  ;;  %v17869_v11 = vadd.f32 %v18408_v22, %v17857_v7 }
0x1e6e   :  { %v20458_v49 = vpop.eup %20457  ;;  %17878 = vst.msk [vmem:[%s24727_s8 + $0x18] sm:$0xff] %vm52_vm0, %v17870_v16  ;;  %v17848_v14 = vmul.f32 %v20456_v13, %v24641_v50 }
0x1e6f   :  { %17877 = vst.msk [vmem:[%s24727_s8 + $0x10] sm:$0xff] %vm52_vm0, %v17869_v11  ;;  %v17847_v63 = vmul.f32 %v20458_v49, %v24643_v0 }
0x1e70   :  { %v17860_v25 = vmul.f32 %v17854_v51, %v17848_v14 }
0x1e71   :  { %v17859_v38 = vmul.f32 %v17854_v51, %v17847_v63 }
0x1e72   :  { %v17872_v54 = vadd.f32 %v18408_v22, %v17860_v25 }
0x1e73   :  { %v17871_v45 = vadd.f32 %v18408_v22, %v17859_v38 }
0x1e74   :  { %v20460_v3 = vpop.eup %20459  ;;  %17880 = vst.msk [vmem:[%s24727_s8 + $0x28] sm:$0xff] %vm52_vm0, %v17872_v54 }
0x1e75   :  { %v20462_v37 = vpop.eup %20461  ;;  %17879 = vst.msk [vmem:[%s24727_s8 + $0x20] sm:$0xff] %vm52_vm0, %v17871_v45  ;;  %v17850_v50 = vmul.f32 %v20460_v3, %v24651_v12 }
0x1e76   :  { %v17849_v0 = vmul.f32 %v20462_v37, %v24653_v41 }
0x1e77   :  { %v17862_v1 = vmul.f32 %v17854_v51, %v17850_v50 }
0x1e78   :  { %v17861_v5 = vmul.f32 %v17854_v51, %v17849_v0 }
0x1e79   :  { %v17874_v35 = vadd.f32 %v18408_v22, %v17862_v1 }
0x1e7a   :  { %v17873_v47 = vadd.f32 %v18408_v22, %v17861_v5 }
0x1e7b   :  { %17882 = vst.msk [vmem:[%s24727_s8 + $0x38] sm:$0xff] %vm52_vm0, %v17874_v35 }
0x1e7c   :  { %17881 = vst.msk [vmem:[%s24727_s8 + $0x30] sm:$0xff] %vm52_vm0, %v17873_v47 }
0x1e7d   :  { %20495 = dma.done.wait [#allocation3], 4096  }
0x1e7e   :  { %20496 = vsyncadd [#allocation3], 4294963200 }
0x1e7f   :  { %17906 = vsyncpa [#allocation3], 1 }

</bundles_post_ra>
